<compile_context>
chip_gen: v7x
topology: tpu7x:2x2x1
jax: 0.10.0
libtpu: 0.0.40
codegen_flags: <defaults>
</compile_context>

<pallas_src>
import functools

import jax
import jax.numpy as jnp
from jax import lax
from jax.experimental import pallas as pl
from jax.experimental.pallas import tpu as pltpu

_HALO_BLK = 8  # halo block height (keeps BlockSpec second-minor dims % 8 == 0)


def _fold_bn(conv_bias, gamma, beta, running_mean, running_var, eps=1e-5):
    """Fold eval-mode BatchNorm (and the conv bias) into per-channel scale/bias."""
    inv_std = 1.0 / jnp.sqrt(running_var + eps)
    scale = gamma * inv_std
    bias = (conv_bias - running_mean) * scale + beta
    return scale.astype(jnp.float32), bias.astype(jnp.float32)


def _vmem_capacity_bytes():
    try:
        return int(pltpu.get_tpu_info().vmem_capacity_bytes)
    except Exception:
        return 64 << 20  # conservative fallback: v7x per-TensorCore VMEM


def _per_step_vmem_bytes(TH, W, Cin, C1, C2, in_sz, out_sz, cdt_sz):
    """Per-grid-step VMEM footprint: double-buffered I/O and weight blocks, both scratch
    buffers, and the in-kernel im2col / f32-accumulator temporaries."""
    S1 = (TH + 2) * (W + 2)
    S2 = TH * W
    io = (2 * Cin * (TH + 2 * _HALO_BLK) * W * in_sz       # dbl-buffered input blocks
          + 2 * C2 * S2 * out_sz)                           # dbl-buffered output block
    wts = 2 * ((9 * Cin * C1 + 9 * C1 * C2) * cdt_sz + 4 * (C1 + C2))
    scratch = (Cin * (TH + 4) * (W + 4) + C1 * S1) * cdt_sz
    temps = ((9 * Cin * S1 + 9 * C1 * S2) * cdt_sz          # im2col patches
             + (2 * C1 * S1 + 2 * C2 * S2) * 4)             # f32 accum + epilogue temps
    return io + wts + scratch + temps


def _pick_tile_h(N, H, W, Cin, C1, C2, in_sz, out_sz, cdt_sz,
                 budget_bytes, min_parallel_steps=2):
    """Largest row tile (multiple of 8, divides H) whose per-step footprint fits the
    generation-aware budget; prefers TH = H (whole image per step) while keeping at
    least `min_parallel_steps` grid steps so both v7x TensorCores get work."""
    cands = [t for t in range(_HALO_BLK, H + 1, _HALO_BLK) if H % t == 0]
    if not cands:
        raise ValueError(f"H={H} must be a multiple of {_HALO_BLK}")
    fits = [t for t in cands
            if _per_step_vmem_bytes(t, W, Cin, C1, C2, in_sz, out_sz, cdt_sz)
            <= budget_bytes]
    if not fits:
        # Nothing smaller exists given the divisibility constraint; take the smallest
        # legal tile even though it exceeds the budget.
        fits = [cands[0]]
    par = [t for t in fits if N * (H // t) >= min_parallel_steps]
    return max(par if par else fits)


def subnet2conv_forward_impl(x_nchw, params, *, tile_h=None,
                             compute_dtype=jnp.bfloat16):
    """Fused SubNet2Conv forward (eval mode). NCHW in, NCHW out (no layout transposes)."""
    N, Cin, H, W = x_nchw.shape
    C1 = params["w1"].shape[0]
    C2 = params["w2"].shape[0]
    assert params["w1"].shape == (C1, Cin, 3, 3)
    assert params["w2"].shape == (C2, C1, 3, 3)
    if H % _HALO_BLK != 0:
        raise ValueError(f"H={H} must be a multiple of {_HALO_BLK}")

    out_dtype = x_nchw.dtype
    in_sz = x_nchw.dtype.itemsize
    out_sz = jnp.dtype(out_dtype).itemsize
    cdt_sz = jnp.dtype(compute_dtype).itemsize

    vmem_cap = _vmem_capacity_bytes()
    if tile_h is None:
        tile_h = _pick_tile_h(N, H, W, Cin, C1, C2, in_sz, out_sz, cdt_sz,
                              budget_bytes=max(vmem_cap // 4, 4 << 20))
    TH = int(tile_h)
    if TH % _HALO_BLK != 0 or H % TH != 0:
        raise ValueError(f"tile_h={TH} must be a multiple of {_HALO_BLK} and divide H={H}")
    R = H // TH
    th_blk = TH // _HALO_BLK
    n_hblk = H // _HALO_BLK
    S1 = (TH + 2) * (W + 2)   # stage-1 output positions (tile + 1-row/col halo)
    S2 = TH * W               # stage-2 (final) output positions

    # Folded eval-mode BN: the scale goes straight into the conv weights (trace time),
    # only the f32 bias add + ReLU stay in the kernel epilogue.
    s1, b1 = _fold_bn(params["b1"], params["gamma1"], params["beta1"],
                      params["mean1"], params["var1"])
    s2, b2 = _fold_bn(params["b2"], params["gamma2"], params["beta2"],
                      params["mean2"], params["var2"])
    # (Cout, Cin, 3, 3) -> (Cout, ky, kx, Cin) -> (Cout, 9*Cin), scaled, matmul dtype.
    w1m = (jnp.transpose(params["w1"], (0, 2, 3, 1)).reshape(C1, 9 * Cin)
           * s1[:, None]).astype(compute_dtype)
    w2m = (jnp.transpose(params["w2"], (0, 2, 3, 1)).reshape(C2, 9 * C1)
           * s2[:, None]).astype(compute_dtype)
    b1c = b1.reshape(C1, 1)
    b2c = b2.reshape(C2, 1)

    # Lane-dense output path: write (C2, TH*W) slabs into an (N, C2, H*W) HBM view when
    # the block shape is legal (TH*W % 128 == 0, or the whole image per step); otherwise
    # fall back to the 4-D (N, C2, H, W) view.
    flat_out = (R == 1) or (S2 % 128 == 0)

    def kernel(xc_ref, xt_ref, xb_ref, w1_ref, b1_ref, w2_ref, b2_ref,
               o_ref, xpad_ref, act1_ref):
        r = pl.program_id(1)
        cdt = compute_dtype

        # ---- zero-halo'd input tile, channel-major (Cin, TH+4, W+4) ----------------
        # Border-only zeroing: the interior is always overwritten below and each
        # top/bottom strip is written by exactly one branch of its pl.when pair, so no
        # element is stale.  Kept per-iteration (NOT r==0-only) so it is safe when the
        # parallel grid is sharded across v7x's two TensorCores.
        xpad_ref[:, :, 0:2] = jnp.zeros((Cin, TH + 4, 2), cdt)
        xpad_ref[:, :, W + 2:W + 4] = jnp.zeros((Cin, TH + 4, 2), cdt)
        xpad_ref[:, 2:TH + 2, 2:W + 2] = xc_ref[0].astype(cdt)

        @pl.when(r == 0)
        def _():
            xpad_ref[:, 0:2, 2:W + 2] = jnp.zeros((Cin, 2, W), cdt)

        @pl.when(r > 0)
        def _():  # two real image rows just above the tile
            xpad_ref[:, 0:2, 2:W + 2] = (
                xt_ref[0, :, _HALO_BLK - 2:_HALO_BLK, :].astype(cdt))

        @pl.when(r == R - 1)
        def _():
            xpad_ref[:, TH + 2:TH + 4, 2:W + 2] = jnp.zeros((Cin, 2, W), cdt)

        @pl.when(r < R - 1)
        def _():  # two real image rows just below the tile
            xpad_ref[:, TH + 2:TH + 4, 2:W + 2] = xb_ref[0, :, 0:2, :].astype(cdt)

        # ---- stage 1: conv1 (BN1 scale folded into w1) + bias + ReLU ---------------
        # Single K = 9*Cin im2col dot; result lanes carry the spatial dim (S1).
        patches1 = jnp.concatenate(
            [xpad_ref[:, dy:dy + TH + 2, dx:dx + W + 2].reshape(Cin, S1)
             for dy in range(3) for dx in range(3)], axis=0)            # (9*Cin, S1)
        acc1 = lax.dot_general(w1_ref[...], patches1,
                               dimension_numbers=(((1,), (0,)), ((), ())),
                               preferred_element_type=jnp.float32)       # (C1, S1)
        y1 = jnp.maximum(acc1 + b1_ref[...], 0.0).reshape(C1, TH + 2, W + 2)
        # Zero act1 positions that fall outside the image (= conv2's zero padding).
        row_ids = lax.broadcasted_iota(jnp.int32, (1, TH + 2, W + 2), 1)
        col_ids = lax.broadcasted_iota(jnp.int32, (1, TH + 2, W + 2), 2)
        g_row = r * TH - 1 + row_ids
        valid = (g_row >= 0) & (g_row < H) & (col_ids >= 1) & (col_ids <= W)
        act1_ref[...] = jnp.where(valid, y1, 0.0).astype(cdt)
        # TODO(synk): dropout1 (p=0.2) is identity in eval mode.

        # ---- stage 2: conv2 (BN2 scale folded into w2) + bias + ReLU ---------------
        patches2 = jnp.concatenate(
            [act1_ref[:, dy:dy + TH, dx:dx + W].reshape(C1, S2)
             for dy in range(3) for dx in range(3)], axis=0)             # (9*C1, S2)
        acc2 = lax.dot_general(w2_ref[...], patches2,
                               dimension_numbers=(((1,), (0,)), ((), ())),
                               preferred_element_type=jnp.float32)        # (C2, S2)
        y2 = jnp.maximum(acc2 + b2_ref[...], 0.0)
        if flat_out:
            o_ref[0] = y2.astype(o_ref.dtype)                             # lane-dense
        else:
            o_ref[0] = y2.reshape(C2, TH, W).astype(o_ref.dtype)
        # TODO(synk): dropout2 (p=0.2) is identity in eval mode.

    in_specs = [
        # current tile rows [r*TH, r*TH + TH)
        pl.BlockSpec((1, Cin, TH, W), lambda n, r: (n, 0, r, 0)),
        # 8-row block just above the tile (its last 2 rows used when r > 0)
        pl.BlockSpec((1, Cin, _HALO_BLK, W),
                     lambda n, r: (n, 0, jnp.maximum(r * th_blk - 1, 0), 0)),
        # 8-row block just below the tile (its first 2 rows used when r < R-1)
        pl.BlockSpec((1, Cin, _HALO_BLK, W),
                     lambda n, r: (n, 0, jnp.minimum((r + 1) * th_blk, n_hblk - 1), 0)),
        pl.BlockSpec((C1, 9 * Cin), lambda n, r: (0, 0)),
        pl.BlockSpec((C1, 1), lambda n, r: (0, 0)),
        pl.BlockSpec((C2, 9 * C1), lambda n, r: (0, 0)),
        pl.BlockSpec((C2, 1), lambda n, r: (0, 0)),
    ]
    if flat_out:
        out_shape = jax.ShapeDtypeStruct((N, C2, H * W), out_dtype)
        out_spec = pl.BlockSpec((1, C2, S2), lambda n, r: (n, 0, r))
    else:
        out_shape = jax.ShapeDtypeStruct((N, C2, H, W), out_dtype)
        out_spec = pl.BlockSpec((1, C2, TH, W), lambda n, r: (n, 0, r, 0))

    # VMEM accounting includes the im2col patches, f32 accumulators and the
    # double-buffered blocks; cap at 3/4 of physical VMEM (48 MiB on v7x) with headroom
    # for Mosaic internal scratch.
    vmem_est = _per_step_vmem_bytes(TH, W, Cin, C1, C2, in_sz, out_sz, cdt_sz)
    vmem_limit = int(min(max(vmem_est * 3 // 2 + (4 << 20), 16 << 20),
                         (vmem_cap * 3) // 4))

    out = pl.pallas_call(
        kernel,
        out_shape=out_shape,
        grid=(N, R),
        in_specs=in_specs,
        out_specs=out_spec,
        scratch_shapes=[
            pltpu.VMEM((Cin, TH + 4, W + 4), compute_dtype),  # halo'd input tile
            pltpu.VMEM((C1, TH + 2, W + 2), compute_dtype),   # stage-1 activation
        ],
        compiler_params=pltpu.CompilerParams(
            dimension_semantics=("parallel", "parallel"),
            vmem_limit_bytes=vmem_limit),
    )(x_nchw, x_nchw, x_nchw, w1m, b1c, w2m, b2c)

    return out.reshape(N, C2, H, W)


@functools.partial(jax.jit, static_argnames=("tile_h", "compute_dtype"))
def subnet2conv_forward(x_nchw, params, *, tile_h=None, compute_dtype=jnp.bfloat16):
    """SubNet2Conv forward (eval mode), PyTorch-style NCHW in / NCHW out.

    The kernel consumes NCHW and produces NCHW directly (no layout transposes), and
    accepts bf16 or f32 activations as-is (no wrapper-side cast pass)."""
    return subnet2conv_forward_impl(x_nchw, params, tile_h=tile_h,
                                    compute_dtype=compute_dtype)


def make_params(key, n_in, n_out):
    """Deterministic synthetic parameters matching SubNet2Conv.__init__ shapes."""
    ks = jax.random.split(key, 8)
    p = {}
    p["w1"] = 0.1 * jax.random.normal(ks[0], (n_out, n_in, 3, 3), jnp.float32)
    p["b1"] = 0.1 * jax.random.normal(ks[1], (n_out,), jnp.float32)
    p["gamma1"] = 1.0 + 0.1 * jax.random.normal(ks[2], (n_out,), jnp.float32)
    p["beta1"] = 0.1 * jax.random.normal(ks[3], (n_out,), jnp.float32)
    p["mean1"] = jnp.zeros((n_out,), jnp.float32)
    p["var1"] = jnp.ones((n_out,), jnp.float32)

    p["w2"] = 0.1 * jax.random.normal(ks[4], (n_out, n_out, 3, 3), jnp.float32)
    p["b2"] = 0.1 * jax.random.normal(ks[5], (n_out,), jnp.float32)
    p["gamma2"] = 1.0 + 0.1 * jax.random.normal(ks[6], (n_out,), jnp.float32)
    p["beta2"] = 0.1 * jax.random.normal(ks[7], (n_out,), jnp.float32)
    p["mean2"] = jnp.zeros((n_out,), jnp.float32)
    p["var2"] = jnp.ones((n_out,), jnp.float32)
    return p


def _reference_forward(x_nchw, params, compute_dtype=jnp.bfloat16):
    """Pure-JAX reference (lax.conv) mirroring the kernel numerics: BN scale folded into
    bf16 weights, bf16 operands, f32 accumulation, f32 bias + ReLU."""
    def stage(x, w_oihw, cb, gamma, beta, mean, var):
        scale, bias = _fold_bn(cb, gamma, beta, mean, var)
        wf = (w_oihw * scale[:, None, None, None]).astype(compute_dtype)
        y = lax.conv_general_dilated(
            x.astype(compute_dtype), wf, window_strides=(1, 1), padding="SAME",
            dimension_numbers=("NCHW", "OIHW", "NCHW"),
            preferred_element_type=jnp.float32)
        return jnp.maximum(y + bias[None, :, None, None], 0.0)

    y = stage(x_nchw, params["w1"], params["b1"], params["gamma1"],
              params["beta1"], params["mean1"], params["var1"])
    y = stage(y, params["w2"], params["b2"], params["gamma2"],
              params["beta2"], params["mean2"], params["var2"])
    return y.astype(x_nchw.dtype)


if __name__ == "__main__":
    key = jax.random.PRNGKey(0)
    k_x, k_p = jax.random.split(key)

    n_in, n_out = 4, 8
    N, H, W = 2, 16, 16
    x = jax.random.normal(k_x, (N, n_in, H, W), jnp.float32)   # NCHW, like PyTorch
    params = make_params(k_p, n_in, n_out)

    ref = _reference_forward(x, params)

    # 1) auto-picked tile: TH == H here (whole image per step), grid = (N, 1) = 2 steps.
    out = jax.block_until_ready(subnet2conv_forward(x, params))
    assert out.shape == (N, n_out, H, W), out.shape
    err = float(jnp.max(jnp.abs(out - ref)))
    assert jnp.allclose(out, ref, atol=1e-2, rtol=1e-2), f"max abs err = {err}"

    # 2) forced tile_h=8: exercises the row-halo copies and the boundary-masking path.
    out8 = jax.block_until_ready(subnet2conv_forward(x, params, tile_h=8))
    err8 = float(jnp.max(jnp.abs(out8 - ref)))
    assert jnp.allclose(out8, ref, atol=1e-2, rtol=1e-2), f"max abs err = {err8}"

    print("KERNEL_OK")
</pallas_src>

<mosaic_0001>
module attributes {stable_mosaic.version = 11 : i64} {
  func.func @kernel(%arg0: i32, %arg1: i32, %arg2: memref<1x4x16x16xf32, #tpu.memory_space<vmem>>, %arg3: memref<1x4x8x16xf32, #tpu.memory_space<vmem>>, %arg4: memref<1x4x8x16xf32, #tpu.memory_space<vmem>>, %arg5: memref<8x36xbf16, #tpu.memory_space<vmem>>, %arg6: memref<8x1xf32, #tpu.memory_space<vmem>>, %arg7: memref<8x72xbf16, #tpu.memory_space<vmem>>, %arg8: memref<8x1xf32, #tpu.memory_space<vmem>>, %arg9: memref<1x8x256xf32, #tpu.memory_space<vmem>>, %arg10: memref<4x20x20xbf16, #tpu.memory_space<vmem>>, %arg11: memref<8x18x18xbf16, #tpu.memory_space<vmem>>) attributes {dimension_semantics = [#tpu.dimension_semantics<parallel>, #tpu.dimension_semantics<parallel>], iteration_bounds = array<i64: 2, 1>, scalar_prefetch = 0 : i64, scratch_operands = 2 : i64, tpu.core_type = #tpu.core_type<tc>, window_params = [{transform_indices = @transform_0, window_bounds = array<i64: 1, 4, 16, 16>}, {transform_indices = @transform_1, window_bounds = array<i64: 1, 4, 8, 16>}, {transform_indices = @transform_2, window_bounds = array<i64: 1, 4, 8, 16>}, {pipeline_mode = #tpu.pipeline_mode<synchronous>, transform_indices = @transform_3, window_bounds = array<i64: 8, 36>}, {pipeline_mode = #tpu.pipeline_mode<synchronous>, transform_indices = @transform_4, window_bounds = array<i64: 8, 1>}, {pipeline_mode = #tpu.pipeline_mode<synchronous>, transform_indices = @transform_5, window_bounds = array<i64: 8, 72>}, {pipeline_mode = #tpu.pipeline_mode<synchronous>, transform_indices = @transform_6, window_bounds = array<i64: 8, 1>}, {transform_indices = @transform_7, window_bounds = array<i64: 1, 8, 256>}]} {
    %cst = arith.constant 0.000000e+00 : bf16
    %0 = vector.broadcast %cst : bf16 to vector<4x20x2xbf16>
    %c0 = arith.constant 0 : index
    %c0_0 = arith.constant 0 : index
    %c0_1 = arith.constant 0 : index
    %1 = vector.load %arg10[%c0, %c0_0, %c0_1] : memref<4x20x20xbf16, #tpu.memory_space<vmem>>, vector<4x20x2xbf16>
    tpu.vector_store %arg10[%c0, %c0_0, %c0_1], %0 {strides = array<i32>} : memref<4x20x20xbf16, #tpu.memory_space<vmem>>, vector<4x20x2xbf16>,
    %cst_2 = arith.constant 0.000000e+00 : bf16
    %2 = vector.broadcast %cst_2 : bf16 to vector<4x20x2xbf16>
    %c0_3 = arith.constant 0 : index
    %c0_4 = arith.constant 0 : index
    %c18 = arith.constant 18 : index
    %3 = vector.load %arg10[%c0_3, %c0_4, %c18] : memref<4x20x20xbf16, #tpu.memory_space<vmem>>, vector<4x20x2xbf16>
    tpu.vector_store %arg10[%c0_3, %c0_4, %c18], %2 {strides = array<i32>} : memref<4x20x20xbf16, #tpu.memory_space<vmem>>, vector<4x20x2xbf16>,
    %c0_5 = arith.constant 0 : index
    %c0_6 = arith.constant 0 : index
    %c0_7 = arith.constant 0 : index
    %c0_8 = arith.constant 0 : index
    %4 = vector.load %arg2[%c0_5, %c0_6, %c0_7, %c0_8] : memref<1x4x16x16xf32, #tpu.memory_space<vmem>>, vector<1x4x16x16xf32>
    %5 = vector.shape_cast %4 : vector<1x4x16x16xf32> to vector<4x16x16xf32>
    %6 = arith.truncf %5 : vector<4x16x16xf32> to vector<4x16x16xbf16>
    %c0_9 = arith.constant 0 : index
    %c2 = arith.constant 2 : index
    %c2_10 = arith.constant 2 : index
    %7 = vector.load %arg10[%c0_9, %c2, %c2_10] : memref<4x20x20xbf16, #tpu.memory_space<vmem>>, vector<4x16x16xbf16>
    tpu.vector_store %arg10[%c0_9, %c2, %c2_10], %6 {strides = array<i32>} : memref<4x20x20xbf16, #tpu.memory_space<vmem>>, vector<4x16x16xbf16>,
    %c0_i32 = arith.constant 0 : i32
    %8 = arith.cmpi eq, %arg1, %c0_i32 : i32
    %9 = arith.extui %8 : i1 to i32
    %c0_i32_11 = arith.constant 0 : i32
    %10 = arith.cmpi ne, %9, %c0_i32_11 : i32
    scf.if %10 {
      %cst_94 = arith.constant 0.000000e+00 : bf16
      %99 = vector.broadcast %cst_94 : bf16 to vector<4x2x16xbf16>
      %c0_95 = arith.constant 0 : index
      %c0_96 = arith.constant 0 : index
      %c2_97 = arith.constant 2 : index
      %100 = vector.load %arg10[%c0_95, %c0_96, %c2_97] : memref<4x20x20xbf16, #tpu.memory_space<vmem>>, vector<4x2x16xbf16>
      tpu.vector_store %arg10[%c0_95, %c0_96, %c2_97], %99 {strides = array<i32>} : memref<4x20x20xbf16, #tpu.memory_space<vmem>>, vector<4x2x16xbf16>,
    } else {
    }
    %c0_i32_12 = arith.constant 0 : i32
    %11 = arith.cmpi sgt, %arg1, %c0_i32_12 : i32
    %12 = arith.extui %11 : i1 to i32
    %c0_i32_13 = arith.constant 0 : i32
    %13 = arith.cmpi ne, %12, %c0_i32_13 : i32
    scf.if %13 {
      %c0_94 = arith.constant 0 : index
      %c0_95 = arith.constant 0 : index
      %c6 = arith.constant 6 : index
      %c0_96 = arith.constant 0 : index
      %99 = vector.load %arg3[%c0_94, %c0_95, %c6, %c0_96] : memref<1x4x8x16xf32, #tpu.memory_space<vmem>>, vector<1x4x2x16xf32>
      %100 = vector.shape_cast %99 : vector<1x4x2x16xf32> to vector<4x2x16xf32>
      %101 = arith.truncf %100 : vector<4x2x16xf32> to vector<4x2x16xbf16>
      %c0_97 = arith.constant 0 : index
      %c0_98 = arith.constant 0 : index
      %c2_99 = arith.constant 2 : index
      %102 = vector.load %arg10[%c0_97, %c0_98, %c2_99] : memref<4x20x20xbf16, #tpu.memory_space<vmem>>, vector<4x2x16xbf16>
      tpu.vector_store %arg10[%c0_97, %c0_98, %c2_99], %101 {strides = array<i32>} : memref<4x20x20xbf16, #tpu.memory_space<vmem>>, vector<4x2x16xbf16>,
    } else {
    }
    %c0_i32_14 = arith.constant 0 : i32
    %14 = arith.cmpi eq, %arg1, %c0_i32_14 : i32
    %15 = arith.extui %14 : i1 to i32
    %c0_i32_15 = arith.constant 0 : i32
    %16 = arith.cmpi ne, %15, %c0_i32_15 : i32
    scf.if %16 {
      %cst_94 = arith.constant 0.000000e+00 : bf16
      %99 = vector.broadcast %cst_94 : bf16 to vector<4x2x16xbf16>
      %c0_95 = arith.constant 0 : index
      %c18_96 = arith.constant 18 : index
      %c2_97 = arith.constant 2 : index
      %100 = vector.load %arg10[%c0_95, %c18_96, %c2_97] : memref<4x20x20xbf16, #tpu.memory_space<vmem>>, vector<4x2x16xbf16>
      tpu.vector_store %arg10[%c0_95, %c18_96, %c2_97], %99 {strides = array<i32>} : memref<4x20x20xbf16, #tpu.memory_space<vmem>>, vector<4x2x16xbf16>,
    } else {
    }
    %c0_i32_16 = arith.constant 0 : i32
    %17 = arith.cmpi slt, %arg1, %c0_i32_16 : i32
    %18 = arith.extui %17 : i1 to i32
    %c0_i32_17 = arith.constant 0 : i32
    %19 = arith.cmpi ne, %18, %c0_i32_17 : i32
    scf.if %19 {
      %c0_94 = arith.constant 0 : index
      %c0_95 = arith.constant 0 : index
      %c0_96 = arith.constant 0 : index
      %c0_97 = arith.constant 0 : index
      %99 = vector.load %arg4[%c0_94, %c0_95, %c0_96, %c0_97] : memref<1x4x8x16xf32, #tpu.memory_space<vmem>>, vector<1x4x2x16xf32>
      %100 = vector.shape_cast %99 : vector<1x4x2x16xf32> to vector<4x2x16xf32>
      %101 = arith.truncf %100 : vector<4x2x16xf32> to vector<4x2x16xbf16>
      %c0_98 = arith.constant 0 : index
      %c18_99 = arith.constant 18 : index
      %c2_100 = arith.constant 2 : index
      %102 = vector.load %arg10[%c0_98, %c18_99, %c2_100] : memref<4x20x20xbf16, #tpu.memory_space<vmem>>, vector<4x2x16xbf16>
      tpu.vector_store %arg10[%c0_98, %c18_99, %c2_100], %101 {strides = array<i32>} : memref<4x20x20xbf16, #tpu.memory_space<vmem>>, vector<4x2x16xbf16>,
    } else {
    }
    %c0_18 = arith.constant 0 : index
    %c0_19 = arith.constant 0 : index
    %c0_20 = arith.constant 0 : index
    %20 = vector.load %arg10[%c0_18, %c0_19, %c0_20] : memref<4x20x20xbf16, #tpu.memory_space<vmem>>, vector<4x18x18xbf16>
    %21 = vector.shape_cast %20 : vector<4x18x18xbf16> to vector<4x324xbf16>
    %c0_21 = arith.constant 0 : index
    %c0_22 = arith.constant 0 : index
    %c1 = arith.constant 1 : index
    %22 = vector.load %arg10[%c0_21, %c0_22, %c1] : memref<4x20x20xbf16, #tpu.memory_space<vmem>>, vector<4x18x18xbf16>
    %23 = vector.shape_cast %22 : vector<4x18x18xbf16> to vector<4x324xbf16>
    %c0_23 = arith.constant 0 : index
    %c0_24 = arith.constant 0 : index
    %c2_25 = arith.constant 2 : index
    %24 = vector.load %arg10[%c0_23, %c0_24, %c2_25] : memref<4x20x20xbf16, #tpu.memory_space<vmem>>, vector<4x18x18xbf16>
    %25 = vector.shape_cast %24 : vector<4x18x18xbf16> to vector<4x324xbf16>
    %c0_26 = arith.constant 0 : index
    %c1_27 = arith.constant 1 : index
    %c0_28 = arith.constant 0 : index
    %26 = vector.load %arg10[%c0_26, %c1_27, %c0_28] : memref<4x20x20xbf16, #tpu.memory_space<vmem>>, vector<4x18x18xbf16>
    %27 = vector.shape_cast %26 : vector<4x18x18xbf16> to vector<4x324xbf16>
    %c0_29 = arith.constant 0 : index
    %c1_30 = arith.constant 1 : index
    %c1_31 = arith.constant 1 : index
    %28 = vector.load %arg10[%c0_29, %c1_30, %c1_31] : memref<4x20x20xbf16, #tpu.memory_space<vmem>>, vector<4x18x18xbf16>
    %29 = vector.shape_cast %28 : vector<4x18x18xbf16> to vector<4x324xbf16>
    %c0_32 = arith.constant 0 : index
    %c1_33 = arith.constant 1 : index
    %c2_34 = arith.constant 2 : index
    %30 = vector.load %arg10[%c0_32, %c1_33, %c2_34] : memref<4x20x20xbf16, #tpu.memory_space<vmem>>, vector<4x18x18xbf16>
    %31 = vector.shape_cast %30 : vector<4x18x18xbf16> to vector<4x324xbf16>
    %c0_35 = arith.constant 0 : index
    %c2_36 = arith.constant 2 : index
    %c0_37 = arith.constant 0 : index
    %32 = vector.load %arg10[%c0_35, %c2_36, %c0_37] : memref<4x20x20xbf16, #tpu.memory_space<vmem>>, vector<4x18x18xbf16>
    %33 = vector.shape_cast %32 : vector<4x18x18xbf16> to vector<4x324xbf16>
    %c0_38 = arith.constant 0 : index
    %c2_39 = arith.constant 2 : index
    %c1_40 = arith.constant 1 : index
    %34 = vector.load %arg10[%c0_38, %c2_39, %c1_40] : memref<4x20x20xbf16, #tpu.memory_space<vmem>>, vector<4x18x18xbf16>
    %35 = vector.shape_cast %34 : vector<4x18x18xbf16> to vector<4x324xbf16>
    %c0_41 = arith.constant 0 : index
    %c2_42 = arith.constant 2 : index
    %c2_43 = arith.constant 2 : index
    %36 = vector.load %arg10[%c0_41, %c2_42, %c2_43] : memref<4x20x20xbf16, #tpu.memory_space<vmem>>, vector<4x18x18xbf16>
    %37 = vector.shape_cast %36 : vector<4x18x18xbf16> to vector<4x324xbf16>
    %38 = tpu.concatenate %21, %23, %25, %27, %29, %31, %33, %35, %37 in 0 : vector<4x324xbf16>, vector<4x324xbf16>, vector<4x324xbf16>, vector<4x324xbf16>, vector<4x324xbf16>, vector<4x324xbf16>, vector<4x324xbf16>, vector<4x324xbf16>, vector<4x324xbf16> -> vector<36x324xbf16>
    %c0_44 = arith.constant 0 : index
    %c0_45 = arith.constant 0 : index
    %39 = vector.load %arg5[%c0_44, %c0_45] : memref<8x36xbf16, #tpu.memory_space<vmem>>, vector<8x36xbf16>
    %cst_46 = arith.constant dense<0.000000e+00> : vector<8x324xf32>
    %40 = tpu.matmul %39, %38, %cst_46 {dimension_numbers = #tpu.dot_dimension_numbers<[1], [0], [0], [1], [0, 0, 1, 1], [], []>} : vector<8x36xbf16>, vector<36x324xbf16>, vector<8x324xf32> -> vector<8x324xf32>
    %c0_47 = arith.constant 0 : index
    %c0_48 = arith.constant 0 : index
    %41 = vector.load %arg6[%c0_47, %c0_48] : memref<8x1xf32, #tpu.memory_space<vmem>>, vector<8x1xf32>
    %42 = vector.broadcast %41 : vector<8x1xf32> to vector<8x324xf32>
    %43 = arith.addf %40, %42 : vector<8x324xf32>
    %cst_49 = arith.constant 0.000000e+00 : f32
    %44 = vector.broadcast %cst_49 : f32 to vector<8x324xf32>
    %45 = arith.maximumf %43, %44 : vector<8x324xf32>
    %46 = vector.shape_cast %45 : vector<8x324xf32> to vector<8x18x18xf32>
    %47 = tpu.iota {dimensions = array<i32: 1>} : vector<1x18x18xi32>
    %48 = tpu.iota {dimensions = array<i32: 2>} : vector<1x18x18xi32>
    %c16_i32 = arith.constant 16 : i32
    %49 = arith.muli %arg1, %c16_i32 : i32
    %c1_i32 = arith.constant 1 : i32
    %50 = arith.subi %49, %c1_i32 : i32
    %51 = vector.broadcast %50 : i32 to vector<1x18x18xi32>
    %52 = arith.addi %51, %47 : vector<1x18x18xi32>
    %c0_i32_50 = arith.constant 0 : i32
    %53 = vector.broadcast %c0_i32_50 : i32 to vector<1x18x18xi32>
    %54 = arith.cmpi sge, %52, %53 : vector<1x18x18xi32>
    %c16_i32_51 = arith.constant 16 : i32
    %55 = vector.broadcast %c16_i32_51 : i32 to vector<1x18x18xi32>
    %56 = arith.cmpi slt, %52, %55 : vector<1x18x18xi32>
    %57 = arith.andi %54, %56 : vector<1x18x18xi1>
    %c1_i32_52 = arith.constant 1 : i32
    %58 = vector.broadcast %c1_i32_52 : i32 to vector<1x18x18xi32>
    %59 = arith.cmpi sge, %48, %58 : vector<1x18x18xi32>
    %60 = arith.andi %57, %59 : vector<1x18x18xi1>
    %c16_i32_53 = arith.constant 16 : i32
    %61 = vector.broadcast %c16_i32_53 : i32 to vector<1x18x18xi32>
    %62 = arith.cmpi sle, %48, %61 : vector<1x18x18xi32>
    %63 = arith.andi %60, %62 : vector<1x18x18xi1>
    %cst_54 = arith.constant 0.000000e+00 : f32
    %64 = vector.shape_cast %63 : vector<1x18x18xi1> to vector<1x18x18xi1>
    %65 = vector.broadcast %64 : vector<1x18x18xi1> to vector<8x18x18xi1>
    %66 = vector.broadcast %cst_54 : f32 to vector<8x18x18xf32>
    %67 = arith.select %65, %46, %66 : vector<8x18x18xi1>, vector<8x18x18xf32>
    %68 = arith.truncf %67 : vector<8x18x18xf32> to vector<8x18x18xbf16>
    %c0_55 = arith.constant 0 : index
    %c0_56 = arith.constant 0 : index
    %c0_57 = arith.constant 0 : index
    %69 = vector.load %arg11[%c0_55, %c0_56, %c0_57] : memref<8x18x18xbf16, #tpu.memory_space<vmem>>, vector<8x18x18xbf16>
    tpu.vector_store %arg11[%c0_55, %c0_56, %c0_57], %68 {strides = array<i32>} : memref<8x18x18xbf16, #tpu.memory_space<vmem>>, vector<8x18x18xbf16>,
    %c0_58 = arith.constant 0 : index
    %c0_59 = arith.constant 0 : index
    %c0_60 = arith.constant 0 : index
    %70 = vector.load %arg11[%c0_58, %c0_59, %c0_60] : memref<8x18x18xbf16, #tpu.memory_space<vmem>>, vector<8x16x16xbf16>
    %71 = vector.shape_cast %70 : vector<8x16x16xbf16> to vector<8x256xbf16>
    %c0_61 = arith.constant 0 : index
    %c0_62 = arith.constant 0 : index
    %c1_63 = arith.constant 1 : index
    %72 = vector.load %arg11[%c0_61, %c0_62, %c1_63] : memref<8x18x18xbf16, #tpu.memory_space<vmem>>, vector<8x16x16xbf16>
    %73 = vector.shape_cast %72 : vector<8x16x16xbf16> to vector<8x256xbf16>
    %c0_64 = arith.constant 0 : index
    %c0_65 = arith.constant 0 : index
    %c2_66 = arith.constant 2 : index
    %74 = vector.load %arg11[%c0_64, %c0_65, %c2_66] : memref<8x18x18xbf16, #tpu.memory_space<vmem>>, vector<8x16x16xbf16>
    %75 = vector.shape_cast %74 : vector<8x16x16xbf16> to vector<8x256xbf16>
    %c0_67 = arith.constant 0 : index
    %c1_68 = arith.constant 1 : index
    %c0_69 = arith.constant 0 : index
    %76 = vector.load %arg11[%c0_67, %c1_68, %c0_69] : memref<8x18x18xbf16, #tpu.memory_space<vmem>>, vector<8x16x16xbf16>
    %77 = vector.shape_cast %76 : vector<8x16x16xbf16> to vector<8x256xbf16>
    %c0_70 = arith.constant 0 : index
    %c1_71 = arith.constant 1 : index
    %c1_72 = arith.constant 1 : index
    %78 = vector.load %arg11[%c0_70, %c1_71, %c1_72] : memref<8x18x18xbf16, #tpu.memory_space<vmem>>, vector<8x16x16xbf16>
    %79 = vector.shape_cast %78 : vector<8x16x16xbf16> to vector<8x256xbf16>
    %c0_73 = arith.constant 0 : index
    %c1_74 = arith.constant 1 : index
    %c2_75 = arith.constant 2 : index
    %80 = vector.load %arg11[%c0_73, %c1_74, %c2_75] : memref<8x18x18xbf16, #tpu.memory_space<vmem>>, vector<8x16x16xbf16>
    %81 = vector.shape_cast %80 : vector<8x16x16xbf16> to vector<8x256xbf16>
    %c0_76 = arith.constant 0 : index
    %c2_77 = arith.constant 2 : index
    %c0_78 = arith.constant 0 : index
    %82 = vector.load %arg11[%c0_76, %c2_77, %c0_78] : memref<8x18x18xbf16, #tpu.memory_space<vmem>>, vector<8x16x16xbf16>
    %83 = vector.shape_cast %82 : vector<8x16x16xbf16> to vector<8x256xbf16>
    %c0_79 = arith.constant 0 : index
    %c2_80 = arith.constant 2 : index
    %c1_81 = arith.constant 1 : index
    %84 = vector.load %arg11[%c0_79, %c2_80, %c1_81] : memref<8x18x18xbf16, #tpu.memory_space<vmem>>, vector<8x16x16xbf16>
    %85 = vector.shape_cast %84 : vector<8x16x16xbf16> to vector<8x256xbf16>
    %c0_82 = arith.constant 0 : index
    %c2_83 = arith.constant 2 : index
    %c2_84 = arith.constant 2 : index
    %86 = vector.load %arg11[%c0_82, %c2_83, %c2_84] : memref<8x18x18xbf16, #tpu.memory_space<vmem>>, vector<8x16x16xbf16>
    %87 = vector.shape_cast %86 : vector<8x16x16xbf16> to vector<8x256xbf16>
    %88 = tpu.concatenate %71, %73, %75, %77, %79, %81, %83, %85, %87 in 0 : vector<8x256xbf16>, vector<8x256xbf16>, vector<8x256xbf16>, vector<8x256xbf16>, vector<8x256xbf16>, vector<8x256xbf16>, vector<8x256xbf16>, vector<8x256xbf16>, vector<8x256xbf16> -> vector<72x256xbf16>
    %c0_85 = arith.constant 0 : index
    %c0_86 = arith.constant 0 : index
    %89 = vector.load %arg7[%c0_85, %c0_86] : memref<8x72xbf16, #tpu.memory_space<vmem>>, vector<8x72xbf16>
    %cst_87 = arith.constant dense<0.000000e+00> : vector<8x256xf32>
    %90 = tpu.matmul %89, %88, %cst_87 {dimension_numbers = #tpu.dot_dimension_numbers<[1], [0], [0], [1], [0, 0, 1, 1], [], []>} : vector<8x72xbf16>, vector<72x256xbf16>, vector<8x256xf32> -> vector<8x256xf32>
    %c0_88 = arith.constant 0 : index
    %c0_89 = arith.constant 0 : index
    %91 = vector.load %arg8[%c0_88, %c0_89] : memref<8x1xf32, #tpu.memory_space<vmem>>, vector<8x1xf32>
    %92 = vector.broadcast %91 : vector<8x1xf32> to vector<8x256xf32>
    %93 = arith.addf %90, %92 : vector<8x256xf32>
    %cst_90 = arith.constant 0.000000e+00 : f32
    %94 = vector.broadcast %cst_90 : f32 to vector<8x256xf32>
    %95 = arith.maximumf %93, %94 : vector<8x256xf32>
    %c0_91 = arith.constant 0 : index
    %c0_92 = arith.constant 0 : index
    %c0_93 = arith.constant 0 : index
    %96 = vector.load %arg9[%c0_91, %c0_92, %c0_93] : memref<1x8x256xf32, #tpu.memory_space<vmem>>, vector<1x8x256xf32>
    %97 = vector.shape_cast %96 : vector<1x8x256xf32> to vector<8x256xf32>
    %98 = vector.shape_cast %95 : vector<8x256xf32> to vector<1x8x256xf32>
    tpu.vector_store %arg9[%c0_91, %c0_92, %c0_93], %98 {strides = array<i32>} : memref<1x8x256xf32, #tpu.memory_space<vmem>>, vector<1x8x256xf32>,
    return
  }
  func.func @transform_0(%arg0: i32, %arg1: i32) -> (i32, i32, i32, i32) {
    %c0_i32 = arith.constant 0 : i32
    %c0_i32_0 = arith.constant 0 : i32
    %c0_i32_1 = arith.constant 0 : i32
    return %arg0, %c0_i32, %arg1, %c0_i32_0 : i32, i32, i32, i32
  }
  func.func @transform_1(%arg0: i32, %arg1: i32) -> (i32, i32, i32, i32) {
    %c2_i32 = arith.constant 2 : i32
    %0 = arith.muli %arg1, %c2_i32 : i32
    %c1_i32 = arith.constant 1 : i32
    %1 = arith.subi %0, %c1_i32 : i32
    %c0_i32 = arith.constant 0 : i32
    %2 = arith.maxsi %1, %c0_i32 : i32
    %c0_i32_0 = arith.constant 0 : i32
    %c0_i32_1 = arith.constant 0 : i32
    %c0_i32_2 = arith.constant 0 : i32
    return %arg0, %c0_i32_0, %2, %c0_i32_1 : i32, i32, i32, i32
  }
  func.func @transform_2(%arg0: i32, %arg1: i32) -> (i32, i32, i32, i32) {
    %c1_i32 = arith.constant 1 : i32
    %0 = arith.addi %arg1, %c1_i32 : i32
    %c2_i32 = arith.constant 2 : i32
    %1 = arith.muli %0, %c2_i32 : i32
    %c1_i32_0 = arith.constant 1 : i32
    %2 = arith.minsi %1, %c1_i32_0 : i32
    %c0_i32 = arith.constant 0 : i32
    %c0_i32_1 = arith.constant 0 : i32
    %c0_i32_2 = arith.constant 0 : i32
    return %arg0, %c0_i32, %2, %c0_i32_1 : i32, i32, i32, i32
  }
  func.func @transform_3(%arg0: i32, %arg1: i32) -> (i32, i32) {
    %c0_i32 = arith.constant 0 : i32
    %c0_i32_0 = arith.constant 0 : i32
    %c0_i32_1 = arith.constant 0 : i32
    return %c0_i32, %c0_i32_0 : i32, i32
  }
  func.func @transform_4(%arg0: i32, %arg1: i32) -> (i32, i32) {
    %c0_i32 = arith.constant 0 : i32
    %c0_i32_0 = arith.constant 0 : i32
    %c0_i32_1 = arith.constant 0 : i32
    return %c0_i32, %c0_i32_0 : i32, i32
  }
  func.func @transform_5(%arg0: i32, %arg1: i32) -> (i32, i32) {
    %c0_i32 = arith.constant 0 : i32
    %c0_i32_0 = arith.constant 0 : i32
    %c0_i32_1 = arith.constant 0 : i32
    return %c0_i32, %c0_i32_0 : i32, i32
  }
  func.func @transform_6(%arg0: i32, %arg1: i32) -> (i32, i32) {
    %c0_i32 = arith.constant 0 : i32
    %c0_i32_0 = arith.constant 0 : i32
    %c0_i32_1 = arith.constant 0 : i32
    return %c0_i32, %c0_i32_0 : i32, i32
  }
  func.func @transform_7(%arg0: i32, %arg1: i32) -> (i32, i32, i32) {
    %c0_i32 = arith.constant 0 : i32
    %c0_i32_0 = arith.constant 0 : i32
    return %arg0, %c0_i32, %arg1 : i32, i32, i32
  }
}

</mosaic_0001>

<bundles_post_ra>
// kernel: subnet2conv_forward.1
= control target key start
LH: loop header
LB: loop body
LE: loop exit
PB: predicated region body
PF: predicated region fallthrough
CT: control target
= control target key end

     0   :  { %s8571_s24 = smov 0   ;;  %s8573_s1 = smov 0   ;;  %s13305_s0 = inlined_call_operand.vmem [shape: f32[2,4,16,16], index: 0, kind: input, shape index: {}, may-alias: {0,1,2}]   ;;  %s13306_s1 = inlined_call_operand.vmem [shape: f32[2,4,16,16], index: 1, kind: input, shape index: {}, may-alias: {0,1,2}]   ;;  %s13307_s2 = inlined_call_operand.vmem [shape: f32[2,4,16,16], index: 2, kind: input, shape index: {}, may-alias: {0,1,2}]   ;;  %s13308_s3 = inlined_call_operand.vmem [shape: bf16[8,36], index: 3, kind: input, shape index: {}]   ;;  %s13309_s4 = inlined_call_operand.vmem [shape: f32[8,1], index: 4, kind: input, shape index: {}]   ;;  %s13310_s5 = inlined_call_operand.vmem [shape: bf16[8,72], index: 5, kind: input, shape index: {}]   ;;  %s13311_s6 = inlined_call_operand.vmem [shape: f32[8,1], index: 6, kind: input, shape index: {}]   ;;  %s13312_s7 = inlined_call_operand.vmem [shape: f32[2,8,256], index: 7, kind: output, shape index: {}]  }
   0x1   :  { %s8575_s2 = smov 0  }
   0x2 LB: > { %s29_s25 = sadd.s32 1, %s8482_s1  ;;  %p7952_p1 = scmp.ge.s32.totalorder %s8486_s2, 2  ;;  %s8486_s2 = sphi %s8575_s2, %s17_s2   ;;  %s8482_s1 = sphi %s8573_s1, %s14048_s1   ;;  %s8478_s24 = sphi %s8571_s24, %s14047_s24  }
   0x3   : > { %p31_p0 = scmp.ge.s32.totalorder %s29_s25, 2  ;;  %p7959_p2 = scmp.ge.s32.totalorder %s8486_s2, 1 }
   0x4   : > { %p400_p3 = scmp.lt.s32.totalorder %s8486_s2, 3 }
   0x5   : > { %s14050_s25 = smov (%p31_p0, %s29_s25), 0 }
   0x6   : > { %p401_p4 = pnand %p7959_p2, %p400_p3 }
   0x8   : > { %404 = sbr.rel (%p401_p4) target bundleno = 1845 (0x735), region = 116 }
   0xf   : > { %p463_p5 = scmp.lt.s32.totalorder %s8478_s24, 1  ;;  %vm491_vm0 = vcmask 11264   ;;  %v13320_v0 = vmov 0   ;;  %vm505_vm1 = vcmask 158864   ;;  %vm614_vm2 = vcmask 139280   ;;  %s8489_s30 = smov 2  }
  0x10   : > { %496 = vst.msk [vmem:[#allocation2 + $0xc] sm:$0xf] %vm491_vm0, %v13320_v0  ;;  %492 = vst.msk [vmem:[#allocation2] sm:$0xf] %vm491_vm0, %v13320_v0  ;;  %vm494_vm3 = vcmask 9216   ;;  %4015 = vmatprep.mubr.bf16.mxu1 %v13320_v0  ;;  %8447 = vset.pattern.permute.xlu1 %v13320_v0  ;;  %vm508_vm4 = vcmask 156816   ;;  %v13313_v54 = vlaneseq }
  0x11   : > { %493 = vst.msk [vmem:[#allocation2 + $0x4] sm:$0xf] %vm491_vm0, %v13320_v0  ;;  %497 = vst.msk [vmem:[#allocation2 + $0x10] sm:$0xf] %vm491_vm0, %v13320_v0  ;;  %s14052_s24 = smov (!%p463_p5, %s8478_s24), 1  ;;  %vm676_vm5 = vcmask 140305   ;;  %7809 = vmatprep.mubr.bf16.mxu0 %v13320_v0  ;;  %8448 = vset.pattern.permute.xlu0 %v13320_v0 }
  0x12   : > { %499 = vst.msk [vmem:[#allocation2 + $0x18] sm:$0xf] %vm491_vm0, %v13320_v0  ;;  %500 = vst.msk [vmem:[#allocation2 + $0x1c] sm:$0xf] %vm491_vm0, %v13320_v0  ;;  %s8307_s26 = sshll.u32 %s14052_s24, 6  ;;  %vm551_vm6 = vcmask 1040384  }
  0x13   : > { %502 = vst.msk [vmem:[#allocation2 + $0x24] sm:$0xf] %vm491_vm0, %v13320_v0  ;;  %503 = vst.msk [vmem:[#allocation2 + $0x28] sm:$0xf] %vm491_vm0, %v13320_v0  ;;  %s8653_s29 = scalar_lea.vmem %s13305_s0, %s8307_s26  ;;  %vm552_vm7 = vcmask 1044484   ;;  %vm610_vm9 = vcmask 142353  }
  0x14   : > { %510 = vst.msk [vmem:[#allocation2 + $0xc] sm:$0xf] %vm505_vm1, %v13320_v0  ;;  %506 = vst.msk [vmem:[#allocation2] sm:$0xf] %vm505_vm1, %v13320_v0  ;;  %v521_v1 = vld [vmem:[%s8653_s29 + $0x10] sm:$0xff]  ;;  %v519_v2 = vld [vmem:[%s8653_s29] sm:$0xff] }
  0x15   : > { %507 = vst.msk [vmem:[#allocation2 + $0x4] sm:$0xf] %vm505_vm1, %v13320_v0  ;;  %511 = vst.msk [vmem:[#allocation2 + $0x10] sm:$0xf] %vm505_vm1, %v13320_v0  ;;  %v520_v3 = vld [vmem:[%s8653_s29 + $0x8] sm:$0xff]  ;;  %v8311_v4 = vpack.c.bf16 %v521_v1, %v521_v1  ;;  %v8309_v5 = vpack.c.bf16 %v519_v2, %v519_v2  ;;  %v523_v7 = vld [vmem:[%s8653_s29 + $0x20] sm:$0xff] }
  0x16   : > { %513 = vst.msk [vmem:[#allocation2 + $0x18] sm:$0xf] %vm505_vm1, %v13320_v0  ;;  %514 = vst.msk [vmem:[#allocation2 + $0x1c] sm:$0xf] %vm505_vm1, %v13320_v0  ;;  %v8310_v6 = vpack.c.bf16 %v520_v3, %v520_v3  ;;  %v522_v8 = vld [vmem:[%s8653_s29 + $0x18] sm:$0xff]  ;;  %v8313_v9 = vpack.c.bf16 %v523_v7, %v523_v7  ;;  %v524_v14 = vld [vmem:[%s8653_s29 + $0x28] sm:$0xff] }
  0x17   : > { %516 = vst.msk [vmem:[#allocation2 + $0x24] sm:$0xf] %vm505_vm1, %v13320_v0  ;;  %517 = vst.msk [vmem:[#allocation2 + $0x28] sm:$0xf] %vm505_vm1, %v13320_v0  ;;  %v8312_v10 = vpack.c.bf16 %v522_v8, %v522_v8  ;;  %v559_v11 = vrot.slane %v8311_v4, 7  ;;  %v554_v12 = vrot.slane %v8309_v5, 7  ;;  %v8314_v19 = vpack.c.bf16 %v524_v14, %v524_v14 }
  0x18   : > { %495 = vst.msk [vmem:[#allocation2 + $0x8] sm:$0x3] %vm494_vm3, %v13320_v0  ;;  %498 = vst.msk [vmem:[#allocation2 + $0x14] sm:$0x3] %vm494_vm3, %v13320_v0  ;;  %v556_v13 = vrot.slane %v8310_v6, 7  ;;  %v564_v16 = vrot.slane %v8313_v9, 7 }
  0x19   : > { %501 = vst.msk [vmem:[#allocation2 + $0x20] sm:$0x3] %vm494_vm3, %v13320_v0  ;;  %504 = vst.msk [vmem:[#allocation2 + $0x2c] sm:$0x3] %vm494_vm3, %v13320_v0  ;;  %580 = vrot.lane.b32.xlu1 %v559_v11, %s8489_s30  ;;  %574 = vrot.lane.b32.xlu0 %v554_v12, %s8489_s30  ;;  %v561_v17 = vrot.slane %v8312_v10, 7  ;;  %v555_v18 = vrot.slane %v554_v12, 4 }
  0x1a   : > { %630 = vst.msk [vmem:[#allocation2 + $0xc] sm:$0x1] %vm614_vm2, %v13320_v0  ;;  %629 = vst.msk [vmem:[#allocation2] sm:$0x1] %vm614_vm2, %v13320_v0  ;;  %v558_v15 = vrot.slane %v556_v13, 4  ;;  %v525_v20 = vld [vmem:[%s8653_s29 + $0x30] sm:$0xff] }
  0x1b   : > { %509 = vst.msk [vmem:[#allocation2 + $0x8] sm:$0x3] %vm508_vm4, %v13320_v0  ;;  %512 = vst.msk [vmem:[#allocation2 + $0x14] sm:$0x3] %vm508_vm4, %v13320_v0  ;;  %v563_v22 = vrot.slane %v561_v17, 4  ;;  %v8315_v23 = vpack.c.bf16 %v525_v20, %v525_v20  ;;  %v560_v24 = vrot.slane %v559_v11, 4 }
  0x1c   : > { %631 = vst.msk [vmem:[#allocation2 + $0x18] sm:$0x1] %vm614_vm2, %v13320_v0  ;;  %632 = vst.msk [vmem:[#allocation2 + $0x24] sm:$0x1] %vm614_vm2, %v13320_v0  ;;  %v565_v25 = vrot.slane %v564_v16, 4  ;;  %v566_v27 = vrot.slane %v8314_v19, 7 }
  0x1d   : > { %515 = vst.msk [vmem:[#allocation2 + $0x20] sm:$0x3] %vm508_vm4, %v13320_v0  ;;  %518 = vst.msk [vmem:[#allocation2 + $0x2c] sm:$0x3] %vm508_vm4, %v13320_v0  ;;  %578 = vrot.lane.b32.xlu1 %v558_v15, %s8489_s30  ;;  %586 = vrot.lane.b32.xlu0 %v564_v16, %s8489_s30  ;;  %v526_v28 = vld [vmem:[%s8653_s29 + $0x38] sm:$0xff]  ;;  %v569_v32 = vrot.slane %v8315_v23, 7 }
  0x1e   : > { %677 = vst.msk [vmem:[#allocation2 + $0x8] sm:$0x2] %vm676_vm5, %v13320_v0  ;;  %678 = vst.msk [vmem:[#allocation2 + $0x14] sm:$0x2] %vm676_vm5, %v13320_v0  ;;  %v8316_v29 = vpack.c.bf16 %v526_v28, %v526_v28  ;;  %v568_v33 = vrot.slane %v566_v27, 4  ;;  %vm612_vm10 = vcmask 142352  }
  0x1f   : > { %679 = vst.msk [vmem:[#allocation2 + $0x20] sm:$0x2] %vm676_vm5, %v13320_v0  ;;  %680 = vst.msk [vmem:[#allocation2 + $0x2c] sm:$0x2] %vm676_vm5, %v13320_v0  ;;  %v570_v35 = vrot.slane %v569_v32, 4  ;;  %s8490_s8 = smov 127  }
  0x20   : > { %vm8664_vm8 = vmor %vm551_vm6, %vm552_vm7  ;;  %v571_v34 = vrot.slane %v8316_v29, 7  ;;  %v8491_v52 = vmov 1983009808   ;;  %vm1746_vm11 = vsmask.f32 3328  ;;  %v8709_v2 = vshrl.u32 %v13313_v54, 7 }
  0x21   : > { %v557_v26 = vsel %vm8664_vm8, %v555_v18, %v556_v13  ;;  %584 = vrot.lane.b32.xlu1 %v563_v22, %s8489_s30  ;;  %v567_v30 = vsel %vm8664_vm8, %v565_v25, %v566_v27  ;;  %v562_v31 = vsel %vm8664_vm8, %v560_v24, %v561_v17  ;;  %v728_v53 = vunpack.c.l.s4 %v8491_v52  ;;  %s8492_s9 = smov 126   ;;  %s8494_s10 = smov 72  }
  0x22   : > { %576 = vrot.lane.b32.xlu0 %v557_v26, %s8489_s30  ;;  %v573_v36 = vrot.slane %v571_v34, 4  ;;  %v572_v37 = vsel %vm8664_vm8, %v570_v35, %v571_v34  ;;  %vm1747_vm12 = vsmask.f32 7440  ;;  %13473 = vst [vmem:[#allocation6_spill] sm:$0xff] %v8709_v2  ;;  %vm2864_vm13 = vcmask 1042432   ;;  %s8495_s11 = smov 32  }
  0x23   : > { %v729_v1 = vunpack.c.0.s8 %v728_v53  ;;  %vm2865_vm14 = vcmask 1046532   ;;  %vm8718_vm15 = vmor %vm1746_vm11, %vm1747_vm12  ;;  %v13474_v5 = vmov 0  ;;  %v8493_v17 = vmov 1934713408   ;;  %s8496_s12 = smov 36   ;;  %s8497_s13 = smov 108  }
  0x24   : > { %v13475_v5 = vsel %vm8718_vm15, 4294967295, %v13474_v5  ;;  %v745_v18 = vunpack.c.l.s4 %v8493_v17  ;;  %vm8741_vm0 = vmor %vm2864_vm13, %vm2865_vm14  ;;  %v13479_v19 = vmov 0  ;;  %s8498_s14 = smov 18   ;;  %s8499_s15 = smov 90   ;;  %vm1004_vm1 = vcmask 146432  }
  0x25   : > { %588 = vrot.lane.b32.xlu1 %v567_v30, %s8489_s30  ;;  %13476 = vst [vmem:[#allocation7_spill] sm:$0xff] %v13475_v5  ;;  %v8729_v13 = vsub.s32 %v729_v1, %v8709_v2  ;;  %v13480_v19 = vsel %vm8741_vm0, 4294967295, %v13479_v19  ;;  %s8500_s16 = smov 50   ;;  %s8501_s17 = smov 16   ;;  %vm1011_vm3 = vcmask 441344   ;;  %vm1014_vm4 = vcmask 588800  }
  0x26   : > { %582 = vrot.lane.b32.xlu0 %v562_v31, %s8489_s30  ;;  %13481 = vst [vmem:[#allocation10_spill] sm:$0xff] %v13480_v19  ;;  %s8502_s18 = smov 88   ;;  %s8503_s19 = smov 54   ;;  %vm1017_vm5 = vcmask 736256   ;;  %vm13397_vm6 = vcmask 883712   ;;  %vm13393_vm7 = vcmask 1031168  }
  0x27   : > { %13478 = vst [vmem:[#allocation9_spill] sm:$0xff] %v8729_v13  ;;  %s8504_s20 = smov 52   ;;  %s8505_s21 = smov 124   ;;  %vm3922_vm8 = vcmask 1041408   ;;  %vm1032_vm11 = vcmask 424960   ;;  %vm1035_vm12 = vcmask 572416  }
  0x28   : > { %s8506_s22 = smov 34   ;;  %s8507_s23 = smov 106   ;;  %vm13394_vm13 = vcmask 719872   ;;  %vm1041_vm14 = vcmask 867328  }
  0x29   : > { %592 = vrot.lane.b32.xlu1 %v569_v32, %s8489_s30  ;;  %s8508_s26 = smov 70   ;;  %s8509_s27 = smov 14  }
  0x2a   : > { %590 = vrot.lane.b32.xlu0 %v568_v33, %s8489_s30  ;;  %s8524_s28 = smov 4   ;;  %s8526_s29 = smov 78  }
  0x2d   : > { %596 = vrot.lane.b32.xlu1 %v573_v36, %s8489_s30  ;;  %v746_v36 = vunpack.c.0.s8 %v745_v18 }
  0x2e   : > { %594 = vrot.lane.b32.xlu0 %v572_v37, %s8489_s30 }
  0x8b   : > { %v581_v38 = vpop.permute.xlu1 %580  ;;  %v575_v39 = vpop.permute.xlu0 %574 }
  0x8c   : > { %616 = vst.msk [vmem:[#allocation2 + $0xc] sm:$0xe] %vm610_vm9, %v581_v38  ;;  %611 = vst.msk [vmem:[#allocation2] sm:$0xe] %vm610_vm9, %v575_v39 }
  0x8f   : > { %v579_v40 = vpop.permute.xlu1 %578  ;;  %v587_v41 = vpop.permute.xlu0 %586 }
  0x90   : > { %615 = vst.msk [vmem:[#allocation2 + $0x8] sm:$0x1] %vm614_vm2, %v579_v40 }
  0x91   : > { %619 = vst.msk [vmem:[#allocation2 + $0x18] sm:$0xe] %vm610_vm9, %v587_v41 }
  0x93   : > { %v585_v42 = vpop.permute.xlu1 %584  ;;  %v8691_v44 = vld [vmem:[#allocation2] sm:$0xf]  ;;  %v8693_v45 = vld [vmem:[#allocation2 + $0xc] sm:$0xf] }
  0x94   : > { %v577_v43 = vpop.permute.xlu0 %576  ;;  %618 = vst.msk [vmem:[#allocation2 + $0x14] sm:$0x1] %vm614_vm2, %v585_v42  ;;  %1068 = vrot.lane.b32.xlu1 %v8691_v44, %s8490_s8  ;;  %1074 = vrot.lane.b32.xlu0 %v8693_v45, %s8490_s8  ;;  %v1750_v46 = vshrl.u32 %v8691_v44, 16  ;;  %v1753_v47 = vshll.u32 %v8691_v44, 16  ;;  %v1779_v21 = vshrl.u32 %v8693_v45, 16  ;;  %v1782_v22 = vshll.u32 %v8693_v45, 16 }
  0x95   : > { %613 = vst.msk [vmem:[#allocation2 + $0x4] sm:$0xf] %vm612_vm10, %v577_v43  ;;  %v733_v27 = vrot.slane %v8691_v44, %v8729_v13 }
  0x96   : > { %v1752_v48 = vrot.slane %v1750_v46, 4  ;;  %v1755_v55 = vrot.slane %v1753_v47, 5  ;;  %v1781_v39 = vrot.slane %v1779_v21, 4  ;;  %v1784_v43 = vrot.slane %v1782_v22, 5 }
  0x97   : > { %v589_v49 = vpop.permute.xlu1 %588  ;;  %v8726_v12 = vld [vmem:[#allocation2 + $0x8] sm:$0x3] }
  0x98   : > { %v583_v50 = vpop.permute.xlu0 %582  ;;  %v734_v51 = vld [vmem:[#allocation2 + $0x18] sm:$0xf]  ;;  %620 = vst.msk [vmem:[#allocation2 + $0x1c] sm:$0xf] %vm612_vm10, %v589_v49  ;;  %v1756_v58 = vor.u32 %v1755_v55, %v1752_v48  ;;  %13477 = vst [vmem:[#allocation8_spill] sm:$0xff] %v8726_v12  ;;  %v13315_v23 = vrot.slane %v8726_v12, 5 }
  0x99   : > { %617 = vst.msk [vmem:[#allocation2 + $0x10] sm:$0xf] %vm612_vm10, %v583_v50  ;;  %1080 = vrot.lane.b32.xlu1 %v734_v51, %s8490_s8  ;;  %v1808_v56 = vshrl.u32 %v734_v51, 16  ;;  %v1811_v57 = vshll.u32 %v734_v51, 16  ;;  %v741_v28 = vrot.slane %v734_v51, %v8729_v13  ;;  %v8758_v29 = vld [vmem:[#allocation2 + $0x8] sm:$0x1] }
  0x9a   : > { %v1757_v6 = vrot.slane %v1756_v58, 4 }
  0x9b   : > { %v1810_v59 = vrot.slane %v1808_v56, 4  ;;  %v593_v60 = vpop.permute.xlu1 %592  ;;  %v1813_v63 = vrot.slane %v1811_v57, 5  ;;  %v8780_v38 = vld [vmem:[#allocation2 + $0x14] sm:$0x3]  ;;  %v743_v52 = vcombine.high %v733_v27, %v741_v28  ;;  %v742_v57 = vcombine.low %v733_v27, %v741_v28 }
  0x9c   : > { %v591_v61 = vpop.permute.xlu0 %590  ;;  %v8706_v62 = vld [vmem:[#allocation2 + $0x4] sm:$0xf]  ;;  %622 = vst.msk [vmem:[#allocation2 + $0x24] sm:$0xe] %vm610_vm9, %v593_v60  ;;  %13484 = vst [vmem:[#allocation13_spill] sm:$0xff] %v8780_v38  ;;  %v13317_v55 = vrot.slane %v8780_v38, 5 }
  0x9d   : > { %621 = vst.msk [vmem:[#allocation2 + $0x20] sm:$0x1] %vm614_vm2, %v591_v61  ;;  %1411 = vrot.lane.b32.xlu1 %v8693_v45, %s8492_s9  ;;  %v2869_v3 = vrot.slane %v8706_v62, 5  ;;  %v1759_v4 = vshll.u32 %v8706_v62, 16  ;;  %v1814_v7 = vor.u32 %v1813_v63, %v1810_v59  ;;  %v8828_v61 = vsub.s32 %v746_v36, %v8709_v2 }
  0x9e   : > { %vm13392_vm9 = vcmask 130048  }
  0x9f   : > { %v597_v8 = vpop.permute.xlu1 %596  ;;  %v8724_v11 = vld [vmem:[#allocation2 + $0x1c] sm:$0xf]  ;;  %v2871_v15 = vrot.slane %v2869_v3, 4  ;;  %v8737_v16 = vrot.slane %v1759_v4, 5  ;;  %v1815_v26 = vrot.slane %v1814_v7, 4  ;;  %v1785_v7 = vor.u32 %v1784_v43, %v1781_v39 }
  0xa0   : > { %v595_v9 = vpop.permute.xlu0 %594  ;;  %v8722_v10 = vld [vmem:[#allocation2 + $0x10] sm:$0xf]  ;;  %624 = vst.msk [vmem:[#allocation2 + $0x2c] sm:$0x1] %vm614_vm2, %v597_v8  ;;  %v13322_v14 = vrot.slane %v8724_v11, 5  ;;  %v1817_v20 = vshll.u32 %v8724_v11, 16  ;;  %v8854_v18 = vrot.slane %v742_v57, %v8828_v61 }
  0xa1   : > { %623 = vst.msk [vmem:[#allocation2 + $0x28] sm:$0xf] %vm612_vm10, %v595_v9  ;;  %1417 = vrot.lane.b32.xlu1 %v734_v51, %s8492_s9  ;;  %v13319_v24 = vrot.slane %v8722_v10, 5  ;;  %v8753_v25 = vsel %vm8718_vm15, %v1757_v6, %v8737_v16  ;;  %v8769_v32 = vsel %vm8741_vm0, %v2871_v15, %v13315_v23  ;;  %v1788_v56 = vshll.u32 %v8722_v10, 16  ;;  %v8844_v8 = vld [vmem:[#allocation2] sm:$0xe] }
  0xa2   : > { %13483 = vst [vmem:[#allocation12_spill] sm:$0xff] %v8769_v32  ;;  %v2887_v33 = vrot.slane %v13322_v14, 4  ;;  %v8774_v35 = vrot.slane %v1817_v20, 5  ;;  %v8778_v37 = vrot.slane %v8753_v25, %v8729_v13  ;;  %v8801_v48 = vrot.slane %v8769_v32, %v8729_v13  ;;  %13486 = vst [vmem:[#allocation15_spill] sm:$0xff] %v8854_v18 }
  0xa3   : > { %v768_v30 = vld [vmem:[#allocation2 + $0x24] sm:$0xf]  ;;  %v2879_v42 = vrot.slane %v13319_v24, 4  ;;  %v767_v6 = vrot.slane %v8693_v45, %v8729_v13  ;;  %v757_v15 = vrot.slane %v743_v52, %v8828_v61  ;;  %v8864_v21 = vrot.slane %v1788_v56, 5 }
  0xa4   : > { %v8760_v31 = vld [vmem:[#allocation2 + $0x20] sm:$0x3]  ;;  %1086 = vrot.lane.b32.xlu0 %v768_v30, %s8490_s8  ;;  %v8791_v41 = vsel %vm8718_vm15, %v1815_v26, %v8774_v35  ;;  %v775_v58 = vrot.slane %v768_v30, %v8729_v13  ;;  %v1837_v17 = vshrl.u32 %v768_v30, 16  ;;  %v1840_v27 = vshll.u32 %v768_v30, 16 }
  0xa5   : > { %13482 = vst [vmem:[#allocation11_spill] sm:$0xff] %v8760_v31  ;;  %1072 = vrot.lane.b32.xlu1 %v8758_v29, %s8490_s8  ;;  %v13314_v34 = vrot.slane %v8760_v31, 5  ;;  %v8795_v46 = vld [vmem:[#allocation2 + $0x20] sm:$0x1]  ;;  %v8809_v50 = vrot.slane %v8791_v41, %v8729_v13  ;;  %v8834_v63 = vsel %vm8741_vm0, %v2879_v42, %v13317_v55  ;;  %v8084_v36 = vrot.slane %v8844_v8, 9 }
  0xa6   : > { %v8858_v45 = vrot.slane %v8834_v63, %v8729_v13  ;;  %v777_v22 = vcombine.high %v767_v6, %v775_v58  ;;  %v1839_v26 = vrot.slane %v1837_v17, 4  ;;  %v1786_v42 = vrot.slane %v1785_v7, 4 }
  0xa7   : > { %v8786_v40 = vsel %vm8741_vm0, %v2887_v33, %v13314_v34  ;;  %v8811_v51 = vld [vmem:[#allocation2 + $0x2c] sm:$0x3]  ;;  %v8867_v33 = vld [vmem:[#allocation2 + $0x14] sm:$0x1]  ;;  %v1842_v52 = vrot.slane %v1840_v27, 5  ;;  %v1769_v56 = vshll.u32 %v8726_v12, 16  ;;  %v776_v7 = vcombine.low %v767_v6, %v775_v58 }
  0xa8   : > { %v8797_v47 = vld [vmem:[#allocation2 + $0x28] sm:$0xf]  ;;  %v8805_v49 = vrot.slane %v8786_v40, %v8729_v13  ;;  %13485 = vst [vmem:[#allocation14_spill] sm:$0xff] %v8811_v51  ;;  %1405 = vrot.lane.b32.xlu0 %v8691_v44, %s8492_s9  ;;  %v13316_v4 = vrot.slane %v8811_v51, 5  ;;  %v791_v43 = vrot.slane %v777_v22, %v8828_v61  ;;  %v8884_v57 = vsel %vm8718_vm15, %v1786_v42, %v8864_v21  ;;  %v8898_v34 = vld [vmem:[#allocation2 + $0x2c] sm:$0x1] }
  0xa9   : > { %1084 = vrot.lane.b32.xlu1 %v8795_v46, %s8490_s8  ;;  %v13318_v53 = vrot.slane %v8797_v47, 5  ;;  %v1846_v28 = vshll.u32 %v8797_v47, 16  ;;  %v1763_v8 = vshrl.u32 %v8706_v62, 16  ;;  %v1843_v22 = vor.u32 %v1842_v52, %v1839_v26 }
  0xaa   : > { %v8891_v17 = vpack.i.b16 %v791_v43, %v757_v15  ;;  %v8896_v54 = vcombine.high %v791_v43, %v13320_v0  ;;  %v8901_v42 = vrot.slane %v776_v7, %v8828_v61  ;;  %v898_v55 = vshrl.u32 %v791_v43, 16 }
  0xab   : > { %v2895_v1 = vrot.slane %v13318_v53, 4  ;;  %v8893_v27 = vrot.slane %v1846_v28, 5  ;;  %v1765_v23 = vrot.slane %v1763_v8, 4  ;;  %v1844_v58 = vrot.slane %v1843_v22, 4 }
  0xac   : > { %1423 = vrot.lane.b32.xlu0 %v768_v30, %s8492_s9  ;;  %v8878_v30 = vcombine.high %v757_v15, %v13320_v0  ;;  %13487 = vst [vmem:[#allocation16_spill] sm:$0xff] %v8901_v42  ;;  %v885_v26 = vshrl.u32 %v8854_v18, 16  ;;  %v1821_v28 = vshrl.u32 %v8724_v11, 16  ;;  %v792_v52 = vcombine.high %v8901_v42, %v13320_v0 }
  0xad   : > { %1076 = vrot.lane.b32.xlu1 %v8722_v10, %s8490_s8  ;;  %v8850_v9 = vsel %vm8741_vm0, %v2895_v1, %v13316_v4  ;;  %v8888_v1 = vcombine.high %v8854_v18, %v13320_v0  ;;  %v897_v4 = vshrl.u32 %v757_v15, 16  ;;  %v886_v15 = vshrl.u32 %v8901_v42, 16 }
  0xae   : > { %v8862_v20 = vrot.slane %v8850_v9, %v8729_v13  ;;  %v8909_v6 = vpack.i.b16 %v8896_v54, %v8878_v30  ;;  %v1766_v43 = vor.u32 %v1765_v23, %v8737_v16  ;;  %v8921_v8 = vrot.slane %v8884_v57, %v8729_v13 }
  0xaf   : > { %v8917_v7 = vpack.i.b16 %v898_v55, %v897_v4  ;;  %v8926_v22 = vsel %vm8718_vm15, %v1844_v58, %v8893_v27  ;;  %v1823_v59 = vrot.slane %v1821_v28, 4  ;;  %v1827_v39 = vshll.u32 %v8760_v31, 16  ;;  %v2854_v4 = vld [vmem:[#allocation2 + $0x18] sm:$0xe] }
  0xb0   : > { %1078 = vrot.lane.b32.xlu0 %v8867_v33, %s8490_s8  ;;  %v8931_v60 = vrot.slane %v8926_v22, %v8729_v13  ;;  %v8934_v16 = vpack.i.b16 %v792_v52, %v8888_v1  ;;  %v8936_v23 = vpack.i.b16 %v886_v15, %v885_v26  ;;  %v1767_v55 = vrot.slane %v1766_v43, 4 }
  0xb1   : > { %1088 = vrot.lane.b32.xlu1 %v8797_v47, %s8490_s8  ;;  %13488 = vst [vmem:[#allocation17_spill] sm:$0xff] %v8917_v7  ;;  %v8942_v58 = vrot.slane %v1769_v56, 5  ;;  %v1824_v28 = vor.u32 %v1823_v59, %v8774_v35  ;;  %v8945_v44 = vrot.slane %v1827_v39, 5  ;;  %v801_v15 = vrot.slane %v8706_v62, %v8729_v13 }
  0xb2   : > { %v809_v43 = vrot.slane %v8724_v11, %v8729_v13  ;;  %v1792_v59 = vshrl.u32 %v8722_v10, 16  ;;  %v8965_v39 = vsel %vm8741_vm0, %v8084_v36, %v2869_v3  ;;  %v8086_v53 = vrot.slane %v2854_v4, 9 }
  0xb3   : > { %v8958_v56 = vsel %vm8718_vm15, %v1767_v55, %v8942_v58  ;;  %v1825_v35 = vrot.slane %v1824_v28, 4  ;;  %v1798_v26 = vshll.u32 %v8780_v38, 16  ;;  %v1850_v24 = vshrl.u32 %v8797_v47, 16 }
  0xb4   : > { %1090 = vrot.lane.b32.xlu0 %v8898_v34, %s8490_s8  ;;  %13489 = vst [vmem:[#allocation18_spill] sm:$0xff] %v8958_v56  ;;  %v1794_v28 = vrot.slane %v1792_v59, 4  ;;  %v8980_v3 = vrot.slane %v8958_v56, %v8729_v13  ;;  %v810_v4 = vcombine.low %v801_v15, %v809_v43  ;;  %v13491_v59 = vrot.slane %v8724_v11, 5 }
  0xb5   : > { %1407 = vrot.lane.b32.xlu1 %v8706_v62, %s8492_s9  ;;  %v8975_v55 = vsel %vm8718_vm15, %v1825_v35, %v8945_v44  ;;  %v1852_v14 = vrot.slane %v1850_v24, 4  ;;  %v835_v35 = vrot.slane %v8722_v10, %v8729_v13  ;;  %vm1008_vm2 = vcmask 293888  }
  0xb6   : > { %13490 = vst [vmem:[#allocation19_spill] sm:$0xff] %v8975_v55  ;;  %v8984_v36 = vrot.slane %v8975_v55, %v8729_v13  ;;  %v1795_v0 = vor.u32 %v1794_v28, %v8864_v21  ;;  %v8994_v2 = vsel %vm8741_vm0, %v8086_v53, %v13491_v59  ;;  %v843_v53 = vrot.slane %v8797_v47, %v8729_v13 }
  0xb7   : > { %v1853_v21 = vor.u32 %v1852_v14, %v8893_v27  ;;  %v811_v28 = vcombine.high %v801_v15, %v809_v43  ;;  %v818_v38 = vrot.slane %v810_v4, %v8828_v61  ;;  %v892_v55 = vshrl.u32 %v792_v52, 16 }
  0xb8   : > { %1409 = vrot.lane.b32.xlu0 %v8758_v29, %s8492_s9  ;;  %v1796_v24 = vrot.slane %v1795_v0, 4  ;;  %v844_v0 = vcombine.low %v835_v35, %v843_v53  ;;  %v845_v27 = vcombine.high %v835_v35, %v843_v53  ;;  %v903_v15 = vshrl.u32 %v8878_v30, 16 }
  0xb9   : > { %1419 = vrot.lane.b32.xlu1 %v8724_v11, %s8492_s9  ;;  %v1854_v56 = vrot.slane %v1853_v21, 4  ;;  %v825_v14 = vrot.slane %v811_v28, %v8828_v61  ;;  %v904_v43 = vshrl.u32 %v8896_v54, 16  ;;  %v13496_v35 = vmov 0   ;;  %v2853_v21 = vld [vmem:[#allocation2 + $0xc] sm:$0xe] }
  0xba   : > { %v852_v52 = vrot.slane %v844_v0, %v8828_v61  ;;  %v859_v4 = vrot.slane %v845_v27, %v8828_v61  ;;  %vm1029_vm10 = vcmask 277504  }
  0xbb   : > { %v9042_v28 = vpack.i.b16 %v904_v43, %v903_v15  ;;  %v827_v30 = vcombine.high %v825_v14, %v13496_v35  ;;  %v8085_v15 = vrot.slane %v2853_v21, 9 }
  0xbc   : > { %1070 = vrot.lane.b32.xlu0 %v8706_v62, %s8490_s8  ;;  %v1856_v62 = vshll.u32 %v8811_v51, 16  ;;  %v9000_v51 = vrot.slane %v1798_v26, 5  ;;  %v891_v26 = vshrl.u32 %v8888_v1, 16  ;;  %v9039_v53 = vpack.i.b16 %v852_v52, %v818_v38 }
  0xbd   : > { %3212 = vrot.lane.b32.xlu1 %v8965_v39, %s8490_s8  ;;  %13498 = vst [vmem:[#allocation25_spill] sm:$0xff] %v9042_v28  ;;  %v9045_v0 = vpack.i.b16 %v859_v4, %v825_v14  ;;  %v861_v5 = vcombine.high %v859_v4, %v13496_v35  ;;  %v2855_v28 = vld [vmem:[#allocation2 + $0x24] sm:$0xe] }
  0xbe   : > { %13492 = vst [vmem:[#allocation20_spill] sm:$0xff] %v9000_v51  ;;  %v9009_v59 = vrot.slane %v1856_v62, 5  ;;  %v9019_v7 = vpack.i.b16 %v892_v55, %v891_v26  ;;  %13497 = vst [vmem:[#allocation24_spill] sm:$0xff] %v9039_v53 }
  0xbf   : > { %13499 = vst [vmem:[#allocation26_spill] sm:$0xff] %v9045_v0  ;;  %v9054_v43 = vpack.i.b16 %v861_v5, %v827_v30  ;;  %v13500_v0 = vrot.slane %v8722_v10, 5 }
  0xc0   : > { %1082 = vrot.lane.b32.xlu0 %v8724_v11, %s8490_s8  ;;  %13493 = vst [vmem:[#allocation21_spill] sm:$0xff] %v9009_v59  ;;  %v9016_v11 = vsel %vm8718_vm15, %v1796_v24, %v9000_v51  ;;  %13494 = vst [vmem:[#allocation22_spill] sm:$0xff] %v9019_v7  ;;  %v9028_v1 = vsel %vm8718_vm15, %v1854_v56, %v9009_v59  ;;  %v826_v24 = vcombine.high %v818_v38, %v13496_v35 }
  0xc1   : > { %3224 = vrot.lane.b32.xlu1 %v8994_v2, %s8490_s8  ;;  %13495 = vst [vmem:[#allocation23_spill] sm:$0xff] %v9028_v1  ;;  %v1974_v55 = vrot.slane %v9016_v11, %v8729_v13  ;;  %v1982_v62 = vrot.slane %v9028_v1, %v8729_v13  ;;  %v860_v56 = vcombine.high %v852_v52, %v13496_v35  ;;  %v909_v59 = vshrl.u32 %v818_v38, 16 }
  0xc2   : > { %v910_v51 = vshrl.u32 %v852_v52, 16  ;;  %v9062_v53 = vsel %vm8741_vm0, %v8085_v15, %v13500_v0  ;;  %v915_v1 = vshrl.u32 %v826_v24, 16 }
  0xc3   : > { %v1983_v54 = vcombine.low %v1974_v55, %v1982_v62  ;;  %v1984_v26 = vcombine.high %v1974_v55, %v1982_v62  ;;  %v9052_v27 = vpack.i.b16 %v860_v56, %v826_v24  ;;  %v921_v55 = vshrl.u32 %v825_v14, 16 }
  0xc4   : > { %1413 = vrot.lane.b32.xlu0 %v8722_v10, %s8492_s9  ;;  %v9056_v7 = vpack.i.b16 %v910_v51, %v909_v59  ;;  %v922_v62 = vshrl.u32 %v859_v4, 16  ;;  %v927_v51 = vshrl.u32 %v827_v30, 16  ;;  %v928_v59 = vshrl.u32 %v861_v5, 16 }
  0xc5   : > { %3549 = vrot.lane.b32.xlu1 %v8965_v39, %s8492_s9  ;;  %v8087_v14 = vrot.slane %v2855_v28, 9  ;;  %v1991_v52 = vrot.slane %v1983_v54, %v8828_v61  ;;  %v1773_v4 = vshrl.u32 %v8726_v12, 16  ;;  %v1831_v24 = vshrl.u32 %v8760_v31, 16 }
  0xc6   : > { %v9068_v38 = vpack.i.b16 %v922_v62, %v921_v55  ;;  %v9074_v21 = vpack.i.b16 %v928_v59, %v927_v51  ;;  %v13502_v5 = vcombine.low %v8980_v3, %v8984_v36  ;;  %v13504_v54 = vcombine.high %v8921_v8, %v8931_v60 }
  0xc7   : > { %v9087_v30 = vrot.slane %v1773_v4, 4  ;;  %v13506_v51 = vcombine.low %v8778_v37, %v8809_v50 }
  0xc8   : > { %1425 = vrot.lane.b32.xlu0 %v8797_v47, %s8492_s9  ;;  %v1957_v28 = vrot.slane %v13502_v5, %v8828_v61  ;;  %v9105_v15 = vrot.slane %v13504_v54, %v8828_v61  ;;  %v2049_v5 = vshrl.u32 %v1991_v52, 16 }
  0xc9   : > { %3214 = vrot.lane.b32.xlu1 %v8769_v32, %s8490_s8  ;;  %v916_v32 = vshrl.u32 %v860_v56, 16  ;;  %v13501_v56 = vrot.slane %v8797_v47, 5  ;;  %v13503_v47 = vcombine.high %v8778_v37, %v8809_v50  ;;  %v9115_v59 = vrot.slane %v13506_v51, %v8828_v61 }
  0xca   : > { %v9109_v62 = vpack.i.b16 %v1991_v52, %v1957_v28  ;;  %v1965_v37 = vcombine.high %v1957_v28, %v13496_v35  ;;  %v1999_v50 = vcombine.high %v1991_v52, %v13496_v35  ;;  %v1932_v54 = vcombine.high %v9105_v15, %v13496_v35 }
  0xcb   : > { %v9071_v10 = vpack.i.b16 %v916_v32, %v915_v1  ;;  %v9081_v0 = vsel %vm8741_vm0, %v8087_v14, %v13501_v56  ;;  %v9093_v32 = vrot.slane %v1831_v24, 4  ;;  %v9099_v1 = vrot.slane %v13503_v47, %v8828_v61  ;;  %13507 = vst [vmem:[#allocation28_spill] sm:$0xff] %v9115_v59 }
  0xcc   : > { %3218 = vrot.lane.b32.xlu0 %v9062_v53, %s8490_s8  ;;  %13505 = vst [vmem:[#allocation27_spill] sm:$0xff] %v9109_v62  ;;  %v13508_v14 = vcombine.low %v8921_v8, %v8931_v60  ;;  %v2048_v56 = vshrl.u32 %v1957_v28, 16  ;;  %v874_v60 = vcombine.low %v8867_v33, %v8898_v34  ;;  %v1998_v51 = vrot.slane %v1984_v26, %v8828_v61 }
  0xcd   : > { %3226 = vrot.lane.b32.xlu1 %v8786_v40, %s8490_s8  ;;  %v1898_v47 = vcombine.high %v9099_v1, %v13496_v35  ;;  %v2024_v24 = vshrl.u32 %v9115_v59, 16  ;;  %v2043_v55 = vshrl.u32 %v1932_v54, 16  ;;  %v13512_v26 = vcombine.high %v8980_v3, %v8984_v36 }
  0xce   : > { %v9121_v4 = vrot.slane %v13508_v14, %v8828_v61  ;;  %v9133_v8 = vpack.i.b16 %v2049_v5, %v2048_v56  ;;  %v9140_v14 = vpack.i.b16 %v1999_v50, %v1965_v37  ;;  %v864_v56 = vcombine.low %v8758_v29, %v8795_v46 }
  0xcf   : > { %v2042_v52 = vshrl.u32 %v1898_v47, 16  ;;  %v1964_v5 = vrot.slane %v13512_v26, %v8828_v61  ;;  %v9165_v31 = vrot.slane %v874_v60, %v8828_v61  ;;  %v2054_v62 = vshrl.u32 %v1965_v37, 16 }
  0xd0   : > { %3230 = vrot.lane.b32.xlu0 %v9081_v0, %s8490_s8  ;;  %13509 = vst [vmem:[#allocation29_spill] sm:$0xff] %v9121_v4  ;;  %13510 = vst [vmem:[#allocation30_spill] sm:$0xff] %v9133_v8  ;;  %v2025_v28 = vshrl.u32 %v9121_v4, 16  ;;  %v1897_v8 = vcombine.high %v9115_v59, %v13496_v35  ;;  %v1931_v29 = vcombine.high %v9121_v4, %v13496_v35  ;;  %v2055_v12 = vshrl.u32 %v1999_v50, 16 }
  0xd1   : > { %2515 = vrot.lane.b32.xlu1 %v8753_v25, %s8492_s9  ;;  %13511 = vst [vmem:[#allocation31_spill] sm:$0xff] %v9140_v14  ;;  %v9156_v14 = vpack.i.b16 %v2043_v55, %v2042_v52  ;;  %v9167_v3 = vpack.i.b16 %v1998_v51, %v1964_v5  ;;  %v2948_v36 = vrot.slane %v9081_v0, %v8729_v13  ;;  %v2037_v18 = vshrl.u32 %v9105_v15, 16 }
  0xd2   : > { %v9154_v19 = vpack.i.b16 %v2025_v28, %v2024_v24  ;;  %v9171_v55 = vpack.i.b16 %v1931_v29, %v1897_v8  ;;  %v2030_v24 = vshrl.u32 %v1897_v8, 16  ;;  %v2031_v28 = vshrl.u32 %v1931_v29, 16 }
  0xd3   : > { %13513 = vst [vmem:[#allocation32_spill] sm:$0xff] %v9167_v3  ;;  %v9174_v52 = vrot.slane %v864_v56, %v8828_v61  ;;  %v9180_v37 = vpack.i.b16 %v2055_v12, %v2054_v62  ;;  %v2906_v50 = vrot.slane %v8965_v39, %v8729_v13  ;;  %v2914_v60 = vrot.slane %v8994_v2, %v8729_v13 }
  0xd4   : > { %3220 = vrot.lane.b32.xlu0 %v8834_v63, %s8490_s8  ;;  %v2940_v8 = vrot.slane %v9062_v53, %v8729_v13  ;;  %v9188_v26 = vpack.i.b16 %v2031_v28, %v2030_v24  ;;  %v7985_v56 = vcombine.low %v8891_v17, %v8891_v17  ;;  %v9196_v12 = vpack.i.b16 %v9105_v15, %v9099_v1 }
  0xd5   : > { %2527 = vrot.lane.b32.xlu1 %v8791_v41, %s8492_s9  ;;  %v2060_v39 = vshrl.u32 %v1964_v5, 16  ;;  %v2061_v29 = vshrl.u32 %v1998_v51, 16  ;;  %v2916_v24 = vcombine.high %v2906_v50, %v2914_v60  ;;  %v2036_v17 = vshrl.u32 %v9099_v1, 16 }
  0xd6   : > { %13514 = vst [vmem:[#allocation33_spill] sm:$0xff] %v9196_v12  ;;  %v2950_v62 = vcombine.high %v2940_v8, %v2948_v36  ;;  %v2949_v42 = vcombine.low %v2940_v8, %v2948_v36  ;;  %v1966_v3 = vcombine.high %v1964_v5, %v13496_v35  ;;  %v13517_v1 = vcombine.high %v8858_v45, %v8862_v20 }
  0xd7   : > { %v7983_v5 = vcombine.low %v8934_v16, %v8934_v16  ;;  %v7982_v16 = vcombine.low %v8936_v23, %v8936_v23 }
  0xd8   : > { %3232 = vrot.lane.b32.xlu0 %v8850_v9, %s8490_s8  ;;  %v2964_v12 = vrot.slane %v2950_v62, %v8828_v61  ;;  %v3032_v15 = vrot.slane %v13517_v1, %v8828_v61  ;;  %v2915_v62 = vcombine.low %v2906_v50, %v2914_v60  ;;  %v933_v1 = vshrl.u32 %v9174_v52, 16 }
  0xd9   : > { %2178 = vrot.lane.b32.xlu1 %v8753_v25, %s8490_s8  ;;  %v9201_v25 = vpack.i.b16 %v2061_v29, %v2060_v39  ;;  %v2930_v39 = vrot.slane %v2916_v24, %v8828_v61  ;;  %v9231_v29 = vrot.slane %v2949_v42, %v8828_v61  ;;  %v7987_v24 = vcombine.low %v8909_v6, %v8909_v6 }
  0xda   : > { %v3034_v6 = vcombine.high %v3032_v15, %v13496_v35  ;;  %v9254_v23 = vrot.slane %v2915_v62, %v8828_v61  ;;  %v3071_v36 = vshrl.u32 %v2964_v12, 16  ;;  %v13530_v62 = vld [vmem:[#allocation17_spill] sm:$0xff] }
  0xdb   : > { %13515 = vst [vmem:[#allocation34_spill] sm:$0xff] %v9201_v25  ;;  %13521 = vst [vmem:[#allocation38_spill] sm:$0xff] %v9231_v29  ;;  %v9245_v42 = vcombine.high %v2930_v39, %v13496_v35  ;;  %v9249_v50 = vpack.i.b16 %v2964_v12, %v2930_v39 }
  0xdc   : > { %2521 = vrot.lane.b32.xlu0 %v8884_v57, %s8492_s9  ;;  %13526 = vst [vmem:[#allocation43_spill] sm:$0xff] %v9254_v23 }
  0xdd   : > { %2190 = vrot.lane.b32.xlu1 %v8791_v41, %s8490_s8  ;;  %v932_v41 = vpack.i.b16 %v9165_v31, %v9174_v52  ;;  %13523 = vst [vmem:[#allocation40_spill] sm:$0xff] %v9245_v42  ;;  %13525 = vst [vmem:[#allocation42_spill] sm:$0xff] %v9249_v50  ;;  %v2066_v52 = vshrl.u32 %v1966_v3, 16 }
  0xdf   : > { %v7997_v28 = vcombine.low %v932_v41, %v932_v41  ;;  %v2000_v41 = vcombine.high %v1998_v51, %v13496_v35  ;;  %v9228_v51 = vpack.i.b16 %v1932_v54, %v1898_v47  ;;  %v934_v47 = vshrl.u32 %v9165_v31, 16 }
  0xe0   : > { %2533 = vrot.lane.b32.xlu0 %v8926_v22, %s8492_s9 }
  0xe1   : > { %950 = vrot.lane.b32.xlu1 %v7985_v56, %s8494_s10  ;;  %v9209_v56 = vpack.i.b16 %v2037_v18, %v2036_v17  ;;  %v9226_v8 = vpack.i.b16 %v2000_v41, %v1966_v3  ;;  %13520 = vst [vmem:[#allocation37_spill] sm:$0xff] %v9228_v51  ;;  %v935_v59 = vpack.i.b16 %v934_v47, %v933_v1  ;;  %v13535_v3 = vld [vmem:[#allocation19_spill] sm:$0xff]  ;;  %v13538_v47 = vld [vmem:[#allocation26_spill] sm:$0xff] }
  0xe2   : > { %v13539_v1 = vld [vmem:[#allocation22_spill] sm:$0xff] }
  0xe3   : > { %13516 = vst [vmem:[#allocation35_spill] sm:$0xff] %v9209_v56  ;;  %13519 = vst [vmem:[#allocation36_spill] sm:$0xff] %v9226_v8 }
  0xe4   : > { %2184 = vrot.lane.b32.xlu0 %v8884_v57, %s8490_s8  ;;  %v13518_v57 = vcombine.high %v8801_v48, %v8805_v49 }
  0xe5   : > { %998 = vrot.lane.b32.xlu1 %v7997_v28, %s8495_s11  ;;  %v9241_v28 = vcombine.high %v2964_v12, %v13496_v35 }
  0xe6   : > { %v2998_v18 = vrot.slane %v13518_v57, %v8828_v61  ;;  %v3070_v57 = vshrl.u32 %v2930_v39, 16  ;;  %v2067_v39 = vshrl.u32 %v2000_v41, 16  ;;  %v13536_v41 = vld [vmem:[#allocation23_spill] sm:$0xff] }
  0xe7   : > { %13522 = vst [vmem:[#allocation39_spill] sm:$0xff] %v9241_v28 }
  0xe8   : > { %2196 = vrot.lane.b32.xlu0 %v8926_v22, %s8490_s8  ;;  %v9247_v54 = vpack.i.b16 %v3032_v15, %v2998_v18  ;;  %v3094_v60 = vshrl.u32 %v2998_v18, 16  ;;  %v3095_v22 = vshrl.u32 %v3032_v15, 16  ;;  %v3000_v17 = vcombine.high %v2998_v18, %v13496_v35 }
  0xe9   : > { %942 = vrot.lane.b32.xlu1 %v7983_v5, %s8496_s12  ;;  %v9265_v15 = vpack.i.b16 %v9241_v28, %v9245_v42  ;;  %v9271_v4 = vpack.i.b16 %v3071_v36, %v3070_v57  ;;  %v7984_v57 = vcombine.low %v13539_v1, %v13539_v1  ;;  %v13543_v1 = vld [vmem:[#allocation14_spill] sm:$0xff] }
  0xea   : > { %13524 = vst [vmem:[#allocation41_spill] sm:$0xff] %v9247_v54  ;;  %v9259_v31 = vpack.i.b16 %v3095_v22, %v3094_v60  ;;  %v9261_v5 = vpack.i.b16 %v3034_v6, %v3000_v17  ;;  %v13533_v60 = vld [vmem:[#allocation18_spill] sm:$0xff]  ;;  %v3100_v12 = vshrl.u32 %v3000_v17, 16  ;;  %v3101_v22 = vshrl.u32 %v3034_v6, 16 }
  0xeb   : > { %13529 = vst [vmem:[#allocation46_spill] sm:$0xff] %v9265_v15  ;;  %13531 = vst [vmem:[#allocation17_spill] sm:$0xff] %v9271_v4  ;;  %v7998_v15 = vcombine.low %v935_v59, %v935_v59  ;;  %v13537_v59 = vld [vmem:[#allocation24_spill] sm:$0xff]  ;;  %v7993_v17 = vcombine.low %v13538_v47, %v13538_v47  ;;  %v7996_v47 = vcombine.low %v9074_v21, %v9074_v21 }
  0xec   : > { %938 = vrot.lane.b32.xlu0 %v7982_v16, %s8498_s14  ;;  %13527 = vst [vmem:[#allocation44_spill] sm:$0xff] %v9259_v31  ;;  %13528 = vst [vmem:[#allocation45_spill] sm:$0xff] %v9261_v5  ;;  %v9273_v16 = vpack.i.b16 %v2067_v39, %v2066_v52  ;;  %v9278_v18 = vpack.i.b16 %v3101_v22, %v3100_v12  ;;  %v7989_v36 = vcombine.low %v13537_v59, %v13537_v59  ;;  %v13540_v52 = vld [vmem:[#allocation25_spill] sm:$0xff]  ;;  %v13541_v22 = vld [vmem:[#allocation12_spill] sm:$0xff] }
  0xed   : > { %958 = vrot.lane.b32.xlu1 %v7987_v24, %s8497_s13  ;;  %v7986_v24 = vcombine.low %v13530_v62, %v13530_v62  ;;  %v7988_v39 = vcombine.low %v13540_v52, %v13540_v52  ;;  %v7995_v62 = vcombine.low %v9054_v43, %v9054_v43  ;;  %v7994_v43 = vcombine.low %v9068_v38, %v9068_v38  ;;  %v13542_v59 = vld [vmem:[#allocation13_spill] sm:$0xff]  ;;  %v13544_v52 = vld [vmem:[#allocation20_spill] sm:$0xff]  ;;  %v13567_v5 = vld [vmem:[#allocation27_spill] sm:$0xff] }
  0xee   : > { %13532 = vst [vmem:[#allocation47_spill] sm:$0xff] %v9273_v16  ;;  %13534 = vst [vmem:[#allocation18_spill] sm:$0xff] %v9278_v18 }
  0xf0   : > { %954 = vrot.lane.b32.xlu0 %v7986_v24, %s8499_s15 }
  0xf1   : > { %2517 = vrot.lane.b32.xlu1 %v13533_v60, %s8492_s9 }
  0xf4   : > { %1002 = vrot.lane.b32.xlu0 %v7998_v15, %s8500_s16  ;;  %v7991_v15 = vcombine.low %v9052_v27, %v9052_v27  ;;  %v7990_v27 = vcombine.low %v9056_v7, %v9056_v7 }
  0xf5   : > { %2529 = vrot.lane.b32.xlu1 %v13535_v3, %s8492_s9 }
  0xf8   : > { %2523 = vrot.lane.b32.xlu0 %v9016_v11, %s8492_s9 }
  0xf9   : > { %2180 = vrot.lane.b32.xlu1 %v13533_v60, %s8490_s8 }
  0xfc   : > { %2535 = vrot.lane.b32.xlu0 %v13536_v41, %s8492_s9 }
  0xfd   : > { %2192 = vrot.lane.b32.xlu1 %v13535_v3, %s8490_s8 }
 0x100   : > { %2186 = vrot.lane.b32.xlu0 %v9016_v11, %s8490_s8 }
 0x101   : > { %966 = vrot.lane.b32.xlu1 %v7989_v36, %s8501_s17  ;;  %v1802_v36 = vshrl.u32 %v13542_v59, 16 }
 0x104   : > { %2198 = vrot.lane.b32.xlu0 %v13536_v41, %s8490_s8  ;;  %v7992_v41 = vcombine.low %v9071_v10, %v9071_v10 }
 0x105   : > { %982 = vrot.lane.b32.xlu1 %v7993_v17, %s8502_s18  ;;  %v1804_v17 = vrot.slane %v1802_v36, 4 }
 0x106   : > { %v1069_v6 = vpop.permute.xlu1 %1068  ;;  %v1075_v60 = vpop.permute.xlu0 %1074 }
 0x108   : > { %946 = vrot.lane.b32.xlu0 %v7984_v57, %s8503_s19  ;;  %v1860_v57 = vshrl.u32 %v13543_v1, 16 }
 0x109   : > { %974 = vrot.lane.b32.xlu1 %v7991_v15, %s8504_s20 }
 0x10b   : > { %v1081_v11 = vpop.permute.xlu1 %1080 }
 0x10c   : > { %962 = vrot.lane.b32.xlu0 %v7988_v39, %s8492_s9  ;;  %v1862_v39 = vrot.slane %v1860_v57, 4 }
 0x10d   : > { %990 = vrot.lane.b32.xlu1 %v7995_v62, %s8505_s21 }
 0x10f   : > { %v1412_v24 = vpop.permute.xlu1 %1411 }
 0x110   : > { %970 = vrot.lane.b32.xlu0 %v7990_v27, %s8506_s22 }
 0x111   : > { %3561 = vrot.lane.b32.xlu1 %v8994_v2, %s8492_s9 }
 0x113   : > { %v1418_v12 = vpop.permute.xlu1 %1417 }
 0x114   : > { %986 = vrot.lane.b32.xlu0 %v7994_v43, %s8507_s23  ;;  %v13546_v43 = vld [vmem:[#allocation21_spill] sm:$0xff] }
 0x115   : > { %3551 = vrot.lane.b32.xlu1 %v13541_v22, %s8492_s9 }
 0x116   : > { %v1087_v7 = vpop.permute.xlu0 %1086 }
 0x117   : > { %v9323_v3 = vpop.permute.xlu1 %1072  ;;  %v9358_v22 = vrot.slane %v1087_v7, %v8729_v13  ;;  %v9375_v7 = vrot.slane %v1412_v24, %v8729_v13 }
 0x118   : > { %978 = vrot.lane.b32.xlu0 %v7992_v41, %s8508_s26 }
 0x119   : > { %3563 = vrot.lane.b32.xlu1 %v8786_v40, %s8492_s9  ;;  %v1805_v40 = vor.u32 %v1804_v17, %v13544_v52  ;;  %v1133_v17 = vrot.slane %v1075_v60, %v8729_v13  ;;  %v9384_v60 = vrot.slane %v1418_v12, %v8729_v13 }
 0x11a   : > { %v1406_v38 = vpop.permute.xlu0 %1405 }
 0x11b   : > { %v9331_v2 = vpop.permute.xlu1 %1084  ;;  %v9350_v27 = vrot.slane %v1805_v40, 4  ;;  %v9378_v57 = vrot.slane %v1406_v38, %v8729_v13 }
 0x11c   : > { %994 = vrot.lane.b32.xlu0 %v7996_v47, %s8509_s27  ;;  %v1099_v47 = vrot.slane %v1069_v6, %v8729_v13 }
 0x11d   : > { %1415 = vrot.lane.b32.xlu1 %v8867_v33, %s8492_s9  ;;  %13545 = vst [vmem:[#allocation19_spill] sm:$0xff] %v9350_v27  ;;  %v1863_v33 = vor.u32 %v1862_v39, %v13546_v43  ;;  %v1445_v24 = vcombine.low %v9378_v57, %v9384_v60 }
 0x11e   : > { %v1424_v15 = vpop.permute.xlu0 %1423 }
 0x11f   : > { %v9339_v10 = vpop.permute.xlu1 %1076  ;;  %v9365_v36 = vrot.slane %v1424_v15, %v8729_v13  ;;  %v1142_v15 = vcombine.low %v1133_v17, %v9358_v22 }
 0x120   : > { %3555 = vrot.lane.b32.xlu0 %v9062_v53, %s8492_s9 }
 0x121   : > { %1427 = vrot.lane.b32.xlu1 %v8898_v34, %s8492_s9  ;;  %v9362_v34 = vrot.slane %v1863_v33, 4  ;;  %v9395_v38 = vrot.slane %v1142_v15, %v8828_v61 }
 0x122   : > { %v9348_v62 = vpop.permute.xlu0 %1078 }
 0x123   : > { %v9346_v21 = vpop.permute.xlu1 %1088  ;;  %13547 = vst [vmem:[#allocation23_spill] sm:$0xff] %v9362_v34  ;;  %13549 = vst [vmem:[#allocation26_spill] sm:$0xff] %v9395_v38 }
 0x124   : > { %3567 = vrot.lane.b32.xlu0 %v9081_v0, %s8492_s9  ;;  %v1107_v0 = vrot.slane %v1081_v11, %v8729_v13 }
 0x125   : > { %2525 = vrot.lane.b32.xlu1 %v9350_v27, %s8492_s9 }
 0x126   : > { %v9360_v41 = vpop.permute.xlu0 %1090  ;;  %v1108_v11 = vcombine.low %v1099_v47, %v1107_v0 }
 0x127   : > { %v1408_v53 = vpop.permute.xlu1 %1407  ;;  %v1240_v8 = vcombine.low %v9348_v62, %v9360_v41  ;;  %v1480_v62 = vcombine.high %v9375_v7, %v9365_v36 }
 0x128   : > { %3557 = vrot.lane.b32.xlu0 %v8834_v63, %s8492_s9  ;;  %v1479_v63 = vcombine.low %v9375_v7, %v9365_v36  ;;  %v9405_v43 = vrot.slane %v1108_v11, %v8828_v61  ;;  %v13555_v11 = vrot.slane %v13542_v59, 5  ;;  %v1201_v36 = vrot.slane %v9339_v10, %v8729_v13 }
 0x129   : > { %2537 = vrot.lane.b32.xlu1 %v9362_v34, %s8492_s9  ;;  %v1209_v7 = vrot.slane %v9346_v21, %v8729_v13  ;;  %v9573_v21 = vrot.slane %v1480_v62, %v8828_v61 }
 0x12a   : > { %v9381_v6 = vpop.permute.xlu0 %1409  ;;  %v9402_v39 = vrot.slane %v1479_v63, %v8828_v61  ;;  %13551 = vst [vmem:[#allocation25_spill] sm:$0xff] %v9405_v43  ;;  %v13553_v63 = vor.u32 %v9087_v30, %v8942_v58  ;;  %v9425_v16 = vrot.slane %v13555_v11, 4  ;;  %v13558_v30 = vor.u32 %v9093_v32, %v8945_v44 }
 0x12b   : > { %v1420_v52 = vpop.permute.xlu1 %1419  ;;  %13548 = vst [vmem:[#allocation24_spill] sm:$0xff] %v9381_v6  ;;  %v1109_v32 = vcombine.high %v1099_v47, %v1107_v0  ;;  %v1124_v54 = vcombine.high %v9405_v43, %v13496_v35  ;;  %v1251_v25 = vshrl.u32 %v9405_v43, 16  ;;  %v1211_v62 = vcombine.high %v1201_v36, %v1209_v7 }
 0x12c   : > { %3569 = vrot.lane.b32.xlu0 %v8850_v9, %s8492_s9  ;;  %13550 = vst [vmem:[#allocation22_spill] sm:$0xff] %v9402_v39  ;;  %v9412_v9 = vrot.slane %v1445_v24, %v8828_v61  ;;  %v9421_v18 = vrot.slane %v13553_v63, 4  ;;  %13556 = vst [vmem:[#allocation14_spill] sm:$0xff] %v9425_v16  ;;  %v9440_v59 = vrot.slane %v13558_v30, 4  ;;  %v13560_v63 = vrot.slane %v13543_v1, 5 }
 0x12d   : > { %2188 = vrot.lane.b32.xlu1 %v9350_v27, %s8490_s8  ;;  %v1143_v1 = vcombine.high %v1133_v17, %v9358_v22  ;;  %v9465_v30 = vrot.slane %v1408_v53, %v8729_v13  ;;  %v1123_v22 = vrot.slane %v1109_v32, %v8828_v61 }
 0x12e   : > { %v9399_v12 = vpop.permute.xlu0 %1070  ;;  %13552 = vst [vmem:[#allocation12_spill] sm:$0xff] %v9412_v9  ;;  %13554 = vst [vmem:[#allocation13_spill] sm:$0xff] %v9421_v18  ;;  %v9444_v11 = vrot.slane %v13560_v63, 4 }
 0x12f   : > { %v9397_v40 = vpop.permute.xlu1 %3212  ;;  %13559 = vst [vmem:[#allocation21_spill] sm:$0xff] %v9440_v59  ;;  %v1157_v53 = vrot.slane %v1143_v1, %v8828_v61  ;;  %v13568_v1 = vld [vmem:[#allocation11_spill] sm:$0xff] }
 0x130   : > { %1421 = vrot.lane.b32.xlu0 %v8795_v46, %s8492_s9  ;;  %13561 = vst [vmem:[#allocation48_spill] sm:$0xff] %v9444_v11  ;;  %v13569_v31 = vrot.slane %v13568_v1, 5 }
 0x131   : > { %2200 = vrot.lane.b32.xlu1 %v9362_v34, %s8490_s8  ;;  %v9451_v34 = vrot.slane %v1420_v52, %v8729_v13  ;;  %v1159_v1 = vcombine.high %v1157_v53, %v13496_v35  ;;  %v1264_v23 = vshrl.u32 %v1157_v53, 16 }
 0x132   : > { %v9416_v15 = vpop.permute.xlu0 %1082  ;;  %v9505_v47 = vrot.slane %v13569_v31, 4  ;;  %v1252_v31 = vshrl.u32 %v9395_v38, 16 }
 0x133   : > { %v9414_v33 = vpop.permute.xlu1 %3224 }
 0x134   : > { %2519 = vrot.lane.b32.xlu0 %v9421_v18, %s8492_s9  ;;  %13570 = vst [vmem:[#allocation27_spill] sm:$0xff] %v9505_v47  ;;  %v1253_v41 = vpack.i.b16 %v1252_v31, %v1251_v25 }
 0x135   : > { %3222 = vrot.lane.b32.xlu1 %v9425_v16, %s8490_s8 }
 0x136   : > { %v1414_v58 = vpop.permute.xlu0 %1413 }
 0x137   : > { %v9435_v27 = vpop.permute.xlu1 %3549  ;;  %v9457_v44 = vrot.slane %v1414_v58, %v8729_v13  ;;  %v1514_v58 = vcombine.high %v9465_v30, %v9451_v34 }
 0x138   : > { %13557 = vst [vmem:[#allocation20_spill] sm:$0xff] %v9435_v27  ;;  %2531 = vrot.lane.b32.xlu0 %v9440_v59, %s8492_s9 }
 0x139   : > { %3234 = vrot.lane.b32.xlu1 %v9444_v11, %s8490_s8  ;;  %v9501_v32 = vrot.slane %v1514_v58, %v8828_v61 }
 0x13a   : > { %v1426_v46 = vpop.permute.xlu0 %1425 }
 0x13b   : > { %v3215_v24 = vpop.permute.xlu1 %3214  ;;  %v9454_v6 = vrot.slane %v1426_v46, %v8729_v13  ;;  %v9538_v51 = vcombine.high %v9501_v32, %v13496_v35 }
 0x13c   : > { %2182 = vrot.lane.b32.xlu0 %v9421_v18, %s8490_s8  ;;  %v9474_v18 = vrot.slane %v3215_v24, %v8729_v13 }
 0x13d   : > { %3559 = vrot.lane.b32.xlu1 %v9425_v16, %s8492_s9  ;;  %v1548_v52 = vcombine.high %v9457_v44, %v9454_v6 }
 0x13e   : > { %v9469_v63 = vpop.permute.xlu0 %3218  ;;  %13562 = vst [vmem:[#allocation49_spill] sm:$0xff] %v9474_v18 }
 0x13f   : > { %v3227_v46 = vpop.permute.xlu1 %3226  ;;  %v9488_v17 = vrot.slane %v1548_v52, %v8828_v61  ;;  %v13571_v52 = vld [vmem:[#allocation30_spill] sm:$0xff] }
 0x140   : > { %v9477_v16 = vrot.slane %v3227_v46, %v8729_v13  ;;  %2194 = vrot.lane.b32.xlu0 %v9440_v59, %s8490_s8  ;;  %v13564_v46 = vld [vmem:[#allocation8_spill] sm:$0xff]  ;;  %v8041_v50 = vcombine.low %v13571_v52, %v13571_v52  ;;  %v1230_v52 = vcombine.low %v9323_v3, %v9331_v2  ;;  %v1446_v3 = vcombine.high %v9378_v57, %v9384_v60 }
 0x141   : > { %3571 = vrot.lane.b32.xlu1 %v9444_v11, %s8492_s9  ;;  %v13565_v4 = vrot.slane %v13564_v46, 5  ;;  %v8040_v11 = vcombine.low %v13567_v5, %v13567_v5  ;;  %v13572_v5 = vld [vmem:[#allocation31_spill] sm:$0xff]  ;;  %v1125_v46 = vcombine.high %v1123_v22, %v13496_v35  ;;  %v1263_v2 = vshrl.u32 %v1123_v22, 16 }
 0x142   : > { %13563 = vst [vmem:[#allocation50_spill] sm:$0xff] %v9477_v16  ;;  %v9492_v24 = vpop.permute.xlu0 %3230  ;;  %v8042_v58 = vcombine.low %v13572_v5, %v13572_v5  ;;  %v1257_v5 = vshrl.u32 %v1124_v54, 16  ;;  %v9546_v29 = vrot.slane %v1230_v52, %v8828_v61  ;;  %v1270_v60 = vshrl.u32 %v1159_v1, 16 }
 0x143   : > { %v9490_v0 = vpop.permute.xlu1 %2515  ;;  %v9496_v59 = vrot.slane %v13565_v4, 4  ;;  %v1158_v4 = vcombine.high %v9395_v38, %v13496_v35  ;;  %v9532_v38 = vcombine.high %v9488_v17, %v13496_v35  ;;  %v1269_v57 = vshrl.u32 %v1125_v46, 16 }
 0x144   : > { %v9561_v52 = vpack.i.b16 %v1157_v53, %v1123_v22  ;;  %v9564_v28 = vrot.slane %v1446_v3, %v8828_v61  ;;  %v1265_v10 = vpack.i.b16 %v1264_v23, %v1263_v2  ;;  %v1547_v53 = vcombine.low %v9457_v44, %v9454_v6 }
 0x145   : > { %13566 = vst [vmem:[#allocation8_spill] sm:$0xff] %v9496_v59  ;;  %3216 = vrot.lane.b32.xlu0 %v9496_v59, %s8490_s8  ;;  %2105 = vrot.lane.b32.xlu1 %v8040_v11, %s8501_s17  ;;  %v1258_v43 = vshrl.u32 %v1158_v4, 16  ;;  %v9550_v42 = vpack.i.b16 %v9532_v38, %v9538_v51  ;;  %v9584_v3 = vpack.i.b16 %v1270_v60, %v1269_v57 }
 0x146   : > { %v3221_v11 = vpop.permute.xlu0 %3220  ;;  %v9586_v23 = vpack.i.b16 %v1158_v4, %v1124_v54  ;;  %v1210_v2 = vcombine.low %v1201_v36, %v1209_v7  ;;  %v8003_v6 = vcombine.low %v1265_v10, %v1265_v10  ;;  %v1299_v4 = vshrl.u32 %v9546_v29, 16 }
 0x147   : > { %v2528_v56 = vpop.permute.xlu1 %2527  ;;  %13573 = vst [vmem:[#allocation11_spill] sm:$0xff] %v9550_v42  ;;  %v9567_v27 = vrot.slane %v3221_v11, %v8729_v13  ;;  %v9578_v22 = vpack.i.b16 %v1258_v43, %v1257_v5  ;;  %v1513_v5 = vcombine.low %v9465_v30, %v9451_v34  ;;  %v9610_v34 = vpack.i.b16 %v9573_v21, %v9564_v28 }
 0x148   : > { %v9613_v30 = vrot.slane %v1547_v53, %v8828_v61  ;;  %v9619_v60 = vpack.i.b16 %v1159_v1, %v1125_v46  ;;  %v9622_v36 = vrot.slane %v1210_v2, %v8828_v61  ;;  %v9625_v7 = vrot.slane %v1211_v62, %v8828_v61 }
 0x149   : > { %3228 = vrot.lane.b32.xlu0 %v9505_v47, %s8490_s8  ;;  %2109 = vrot.lane.b32.xlu1 %v8041_v50, %s8506_s22  ;;  %v9557_v50 = vrot.slane %v1240_v8, %v8828_v61  ;;  %13574 = vst [vmem:[#allocation30_spill] sm:$0xff] %v9567_v27  ;;  %v7999_v8 = vcombine.low %v1253_v41, %v1253_v41 }
 0x14a   : > { %v3233_v31 = vpop.permute.xlu0 %3232  ;;  %v9601_v41 = vrot.slane %v9490_v0, %v8729_v13  ;;  %v9632_v57 = vrot.slane %v1513_v5, %v8828_v61  ;;  %v9636_v46 = vrot.slane %v9416_v15, %v8729_v13  ;;  %v9646_v62 = vrot.slane %v9397_v40, %v8729_v13 }
 0x14b   : > { %v9559_v25 = vpop.permute.xlu1 %2178  ;;  %v9570_v42 = vrot.slane %v3233_v31, %v8729_v13  ;;  %v1300_v31 = vshrl.u32 %v9557_v50, 16  ;;  %v13577_v5 = vcombine.low %v9156_v14, %v9156_v14  ;;  %v9663_v40 = vrot.slane %v9492_v24, %v8729_v13 }
 0x14c   : > { %v1611_v14 = vpack.i.b16 %v9613_v30, %v9632_v57  ;;  %v9683_v15 = vrot.slane %v9414_v33, %v8729_v13  ;;  %v9688_v44 = vrot.slane %v9469_v63, %v8729_v13  ;;  %v1623_v33 = vpack.i.b16 %v9488_v17, %v9501_v32 }
 0x14d   : > { %13575 = vst [vmem:[#allocation31_spill] sm:$0xff] %v9570_v42  ;;  %3553 = vrot.lane.b32.xlu0 %v9496_v59, %s8492_s9  ;;  %2113 = vrot.lane.b32.xlu1 %v8042_v58, %s8504_s20  ;;  %v3355_v11 = vcombine.high %v9567_v27, %v9570_v42  ;;  %v9590_v59 = vrot.slane %v2528_v56, %v8729_v13 }
 0x14e   : > { %v2522_v43 = vpop.permute.xlu0 %2521  ;;  %v1301_v10 = vpack.i.b16 %v1300_v31, %v1299_v4  ;;  %v1167_v4 = vrot.slane %v9399_v12, %v8729_v13  ;;  %v13584_v42 = vcombine.low %v9171_v55, %v9171_v55  ;;  %v1276_v55 = vshrl.u32 %v9622_v36, 16 }
 0x14f   : > { %v2191_v58 = vpop.permute.xlu1 %2190  ;;  %v9639_v1 = vrot.slane %v2522_v43, %v8729_v13  ;;  %v9649_v31 = vrot.slane %v3355_v11, %v8828_v61 }
 0x150   : > { %v9677_v12 = vrot.slane %v2191_v58, %v8729_v13  ;;  %v8015_v43 = vcombine.low %v1301_v10, %v1301_v10  ;;  %v1176_v54 = vcombine.low %v1167_v4, %v9636_v46  ;;  %v9693_v58 = vrot.slane %v9559_v25, %v8729_v13 }
 0x151   : > { %3565 = vrot.lane.b32.xlu0 %v9505_v47, %s8492_s9  ;;  %1304 = vrot.lane.b32.xlu1 %v7999_v8, %s8498_s14  ;;  %v2556_v8 = vcombine.high %v9601_v41, %v9590_v59  ;;  %v13580_v10 = vcombine.low %v9154_v19, %v9154_v19  ;;  %v3287_v25 = vcombine.high %v9688_v44, %v9663_v40 }
 0x152   : > { %v2534_v56 = vpop.permute.xlu0 %2533  ;;  %v1177_v27 = vcombine.high %v1167_v4, %v9636_v46 }
 0x153   : > { %v9629_v53 = vpop.permute.xlu1 %950  ;;  %v9642_v2 = vrot.slane %v2534_v56, %v8729_v13 }
 0x154   : > { %13576 = vst [vmem:[#allocation51_spill] sm:$0xff] %v9629_v53 }
 0x155   : > { %2101 = vrot.lane.b32.xlu0 %v13577_v5, %s8492_s9  ;;  %1320 = vrot.lane.b32.xlu1 %v8003_v6, %s8499_s15  ;;  %v2590_v11 = vcombine.high %v9639_v1, %v9642_v2  ;;  %v13578_v6 = vcombine.high %v9474_v18, %v9477_v16  ;;  %v2570_v5 = vrot.slane %v2556_v8, %v8828_v61 }
 0x156   : > { %v2185_v24 = vpop.permute.xlu0 %2184  ;;  %v1298_v18 = vpack.i.b16 %v9557_v50, %v9546_v29  ;;  %v3253_v16 = vcombine.high %v9646_v62, %v9683_v15  ;;  %v3432_v50 = vshrl.u32 %v9649_v31, 16 }
 0x157   : > { %v9673_v56 = vrot.slane %v13578_v6, %v8828_v61  ;;  %v9679_v0 = vpop.permute.xlu1 %998  ;;  %v2604_v6 = vrot.slane %v2590_v11, %v8828_v61  ;;  %v2710_v53 = vshrl.u32 %v2570_v5, 16 }
 0x158   : > { %13579 = vst [vmem:[#allocation52_spill] sm:$0xff] %v9679_v0  ;;  %v8023_v0 = vcombine.low %v1611_v14, %v1611_v14  ;;  %v2243_v14 = vrot.slane %v2185_v24, %v8729_v13  ;;  %v9741_v24 = vrot.slane %v1176_v54, %v8828_v61  ;;  %v3267_v54 = vrot.slane %v3253_v16, %v8828_v61 }
 0x159   : > { %2077 = vrot.lane.b32.xlu0 %v13580_v10, %s8498_s14  ;;  %1368 = vrot.lane.b32.xlu1 %v8015_v43, %s8500_s16  ;;  %v9705_v63 = vpack.i.b16 %v9649_v31, %v9673_v56  ;;  %v9710_v11 = vcombine.high %v2604_v6, %v13496_v35  ;;  %v9712_v19 = vpack.i.b16 %v2604_v6, %v2570_v5  ;;  %v1630_v16 = vshrl.u32 %v9538_v51, 16 }
 0x15a   : > { %v9715_v43 = vcombine.high %v2570_v5, %v13496_v35  ;;  %v2219_v10 = vcombine.high %v9693_v58, %v9677_v12  ;;  %v2197_v47 = vpop.permute.xlu0 %2196  ;;  %v3252_v51 = vcombine.low %v9646_v62, %v9683_v15  ;;  %v13596_v62 = vcombine.low %v9578_v22, %v9578_v22 }
 0x15b   : > { %13581 = vst [vmem:[#allocation53_spill] sm:$0xff] %v9705_v63  ;;  %13582 = vst [vmem:[#allocation54_spill] sm:$0xff] %v9712_v19  ;;  %v9719_v8 = vpop.permute.xlu1 %942  ;;  %v2711_v63 = vshrl.u32 %v2604_v6, 16  ;;  %v2251_v19 = vrot.slane %v2197_v47, %v8729_v13  ;;  %v2589_v47 = vcombine.low %v9639_v1, %v9642_v2  ;;  %v8027_v6 = vcombine.low %v1623_v33, %v1623_v33 }
 0x15c   : > { %13583 = vst [vmem:[#allocation55_spill] sm:$0xff] %v9719_v8  ;;  %v9737_v29 = vpack.i.b16 %v9710_v11, %v9715_v43  ;;  %v1288_v2 = vshrl.u32 %v9625_v7, 16 }
 0x15d   : > { %2081 = vrot.lane.b32.xlu0 %v13584_v42, %s8496_s12  ;;  %1669 = vrot.lane.b32.xlu1 %v8023_v0, %s8501_s17  ;;  %v9733_v5 = vpack.i.b16 %v2711_v63, %v2710_v53  ;;  %v2253_v46 = vcombine.high %v2243_v14, %v2251_v19  ;;  %v3301_v42 = vrot.slane %v3287_v25, %v8828_v61  ;;  %v3431_v63 = vshrl.u32 %v9673_v56, 16 }
 0x15e   : > { %13586 = vst [vmem:[#allocation57_spill] sm:$0xff] %v9737_v29  ;;  %v2233_v0 = vrot.slane %v2219_v10, %v8828_v61  ;;  %v9750_v4 = vpop.permute.xlu0 %938  ;;  %v2555_v29 = vcombine.low %v9601_v41, %v9590_v59  ;;  %v9759_v25 = vrot.slane %v1177_v27, %v8828_v61  ;;  %v13589_v10 = vcombine.low %v9561_v52, %v9561_v52 }
 0x15f   : > { %13585 = vst [vmem:[#allocation56_spill] sm:$0xff] %v9733_v5  ;;  %v9748_v53 = vpop.permute.xlu1 %958  ;;  %13588 = vst [vmem:[#allocation59_spill] sm:$0xff] %v9750_v4  ;;  %v2267_v1 = vrot.slane %v2253_v46, %v8828_v61  ;;  %v8014_v5 = vcombine.low %v1298_v18, %v1298_v18  ;;  %v9766_v33 = vpack.i.b16 %v3432_v50, %v3431_v63  ;;  %v1275_v18 = vshrl.u32 %v9741_v24, 16 }
 0x160   : > { %13587 = vst [vmem:[#allocation58_spill] sm:$0xff] %v9748_v53  ;;  %v3286_v59 = vcombine.low %v9688_v44, %v9663_v40  ;;  %v9772_v41 = vrot.slane %v2589_v47, %v8828_v61  ;;  %v2252_v46 = vcombine.low %v2243_v14, %v2251_v19  ;;  %v2373_v50 = vshrl.u32 %v2233_v0, 16 }
 0x161   : > { %1316 = vrot.lane.b32.xlu0 %v13589_v10, %s8494_s10  ;;  %1685 = vrot.lane.b32.xlu1 %v8027_v6, %s8502_s18  ;;  %13590 = vst [vmem:[#allocation60_spill] sm:$0xff] %v9766_v33  ;;  %v9775_v27 = vpack.i.b16 %v2267_v1, %v2233_v0  ;;  %v9779_v10 = vpack.i.b16 %v3301_v42, %v3267_v54  ;;  %v2374_v6 = vshrl.u32 %v2267_v1, 16  ;;  %v1287_v15 = vshrl.u32 %v9759_v25, 16 }
 0x162   : > { %13591 = vst [vmem:[#allocation61_spill] sm:$0xff] %v9772_v41  ;;  %v9777_v52 = vpop.permute.xlu0 %954  ;;  %v9784_v44 = vcombine.high %v3267_v54, %v13496_v35  ;;  %v9787_v40 = vcombine.high %v3301_v42, %v13496_v35  ;;  %v9790_v47 = vrot.slane %v2555_v29, %v8828_v61  ;;  %v2218_v19 = vcombine.low %v9693_v58, %v9677_v12 }
 0x163   : > { %13592 = vst [vmem:[#allocation62_spill] sm:$0xff] %v9775_v27  ;;  %v2518_v53 = vpop.permute.xlu1 %2517  ;;  %13593 = vst [vmem:[#allocation63_spill] sm:$0xff] %v9777_v52  ;;  %v9795_v14 = vcombine.high %v2267_v1, %v13496_v35  ;;  %v9803_v63 = vpack.i.b16 %v2374_v6, %v2373_v50  ;;  %v9806_v29 = vrot.slane %v3286_v59, %v8828_v61 }
 0x164   : > { %13594 = vst [vmem:[#allocation64_spill] sm:$0xff] %v9779_v10  ;;  %13595 = vst [vmem:[#allocation65_spill] sm:$0xff] %v9790_v47  ;;  %v1277_v10 = vpack.i.b16 %v1276_v55, %v1275_v18  ;;  %v3337_v12 = vcombine.high %v9673_v56, %v13496_v35  ;;  %v3371_v58 = vcombine.high %v9649_v31, %v13496_v35  ;;  %v3407_v31 = vshrl.u32 %v3267_v54, 16 }
 0x165   : > { %1364 = vrot.lane.b32.xlu0 %v8014_v5, %s8495_s11  ;;  %1312 = vrot.lane.b32.xlu1 %v13596_v62, %s8503_s19  ;;  %13597 = vst [vmem:[#allocation66_spill] sm:$0xff] %v9803_v63  ;;  %13598 = vst [vmem:[#allocation67_spill] sm:$0xff] %v9806_v29  ;;  %v9813_v5 = vcombine.high %v2233_v0, %v13496_v35  ;;  %v9816_v22 = vrot.slane %v2252_v46, %v8828_v61  ;;  %v3408_v0 = vshrl.u32 %v3301_v42, 16 }
 0x166   : > { %v9819_v1 = vrot.slane %v2518_v53, %v8729_v13  ;;  %v9821_v6 = vpop.permute.xlu0 %1002  ;;  %v9828_v59 = vpack.i.b16 %v3371_v58, %v3337_v12  ;;  %v9831_v18 = vrot.slane %v2218_v19, %v8828_v61  ;;  %v13603_v53 = vcombine.low %v9610_v34, %v9610_v34 }
 0x167   : > { %13599 = vst [vmem:[#allocation68_spill] sm:$0xff] %v9816_v22  ;;  %v2530_v50 = vpop.permute.xlu1 %2529  ;;  %13600 = vst [vmem:[#allocation69_spill] sm:$0xff] %v9821_v6  ;;  %v13604_v46 = vcombine.low %v9584_v3, %v9584_v3  ;;  %v9843_v62 = vpack.i.b16 %v9795_v14, %v9813_v5  ;;  %v9847_v42 = vpack.i.b16 %v9787_v40, %v9784_v44  ;;  %v1631_v54 = vshrl.u32 %v9532_v38, 16 }
 0x168   : > { %v9826_v56 = vrot.slane %v2530_v50, %v8729_v13  ;;  %13601 = vst [vmem:[#allocation70_spill] sm:$0xff] %v9828_v59  ;;  %13602 = vst [vmem:[#allocation71_spill] sm:$0xff] %v9831_v18  ;;  %v9851_v19 = vrot.slane %v3252_v51, %v8828_v61  ;;  %v1289_v50 = vpack.i.b16 %v1288_v2, %v1287_v15  ;;  %v1613_v6 = vshrl.u32 %v9613_v30, 16 }
 0x169   : > { %1653 = vrot.lane.b32.xlu0 %v13603_v53, %s8494_s10  ;;  %1328 = vrot.lane.b32.xlu1 %v13604_v46, %s8492_s9  ;;  %13605 = vst [vmem:[#allocation72_spill] sm:$0xff] %v9843_v62  ;;  %13606 = vst [vmem:[#allocation73_spill] sm:$0xff] %v9847_v42  ;;  %v9855_v53 = vpack.i.b16 %v3408_v0, %v3407_v31  ;;  %v8007_v55 = vcombine.low %v1277_v10, %v1277_v10  ;;  %v13610_v51 = vshrl.u32 %v9412_v9, 16 }
 0x16a   : > { %13607 = vst [vmem:[#allocation74_spill] sm:$0xff] %v9851_v19  ;;  %v2624_v34 = vcombine.high %v9819_v1, %v9826_v56  ;;  %v2524_v46 = vpop.permute.xlu0 %2523  ;;  %v9858_v62 = vpack.i.b16 %v1631_v54, %v1630_v16  ;;  %v8004_v38 = vcombine.low %v9619_v60, %v9619_v60  ;;  %v13611_v59 = vshrl.u32 %v9402_v39, 16 }
 0x16b   : > { %13608 = vst [vmem:[#allocation75_spill] sm:$0xff] %v9855_v53  ;;  %v2181_v3 = vpop.permute.xlu1 %2180  ;;  %v9870_v15 = vcombine.high %v9412_v9, %v13496_v35  ;;  %v9874_v10 = vcombine.high %v9622_v36, %v13496_v35  ;;  %v13612_v16 = vcombine.low %v9586_v23, %v9586_v23  ;;  %v1612_v60 = vshrl.u32 %v9632_v57, 16 }
 0x16c   : > { %13609 = vst [vmem:[#allocation76_spill] sm:$0xff] %v9858_v62  ;;  %v1590_v2 = vpack.i.b16 %v13611_v59, %v13610_v51  ;;  %v9884_v59 = vcombine.high %v9402_v39, %v13496_v35  ;;  %v9890_v0 = vcombine.high %v9625_v7, %v13496_v35  ;;  %v9894_v54 = vcombine.high %v9741_v24, %v13496_v35 }
 0x16d   : > { %1308 = vrot.lane.b32.xlu0 %v13612_v16, %s8496_s12  ;;  %1336 = vrot.lane.b32.xlu1 %v8007_v55, %s8506_s22  ;;  %v9898_v23 = vcombine.high %v9632_v57, %v13496_v35  ;;  %v9902_v55 = vcombine.high %v9613_v30, %v13496_v35  ;;  %v8011_v42 = vcombine.low %v1289_v50, %v1289_v50  ;;  %v3437_v9 = vshrl.u32 %v3337_v12, 16 }
 0x16e   : > { %v2536_v16 = vpop.permute.xlu0 %2535  ;;  %v1614_v31 = vpack.i.b16 %v1613_v6, %v1612_v60  ;;  %v3438_v39 = vshrl.u32 %v3371_v58, 16  ;;  %v9905_v62 = vrot.slane %v2181_v3, %v8729_v13  ;;  %v9908_v53 = vrot.slane %v2524_v46, %v8729_v13 }
 0x16f   : > { %v2193_v51 = vpop.permute.xlu1 %2192  ;;  %v2656_v57 = vrot.slane %v2536_v16, %v8729_v13  ;;  %v9916_v30 = vcombine.high %v9759_v25, %v13496_v35  ;;  %v1593_v12 = vpack.i.b16 %v9884_v59, %v9870_v15  ;;  %v1617_v3 = vpack.i.b16 %v9902_v55, %v9898_v23 }
 0x170   : > { %v9911_v63 = vrot.slane %v2193_v51, %v8729_v13  ;;  %v9922_v58 = vpack.i.b16 %v3438_v39, %v3437_v9  ;;  %v1281_v46 = vshrl.u32 %v9894_v54, 16  ;;  %v2638_v60 = vrot.slane %v2624_v34, %v8828_v61 }
 0x171   : > { %1324 = vrot.lane.b32.xlu0 %v8004_v38, %s8497_s13  ;;  %1352 = vrot.lane.b32.xlu1 %v8011_v42, %s8507_s23  ;;  %v2658_v50 = vcombine.high %v9908_v53, %v2656_v57  ;;  %v8016_v51 = vcombine.low %v1590_v2, %v1590_v2  ;;  %v8024_v16 = vcombine.low %v1614_v31, %v1614_v31  ;;  %v1293_v34 = vshrl.u32 %v9916_v30, 16 }
 0x172   : > { %13613 = vst [vmem:[#allocation77_spill] sm:$0xff] %v9922_v58  ;;  %v2287_v6 = vcombine.high %v9905_v62, %v9911_v63  ;;  %v2187_v42 = vpop.permute.xlu0 %2186  ;;  %v9935_v39 = vcombine.high %v9573_v21, %v13496_v35  ;;  %v1282_v58 = vshrl.u32 %v9874_v10, 16  ;;  %v9941_v33 = vcombine.high %v9564_v28, %v13496_v35 }
 0x173   : > { %v9931_v38 = vpop.permute.xlu1 %966  ;;  %v2672_v9 = vrot.slane %v2658_v50, %v8828_v61  ;;  %v1294_v2 = vshrl.u32 %v9890_v0, 16  ;;  %v8017_v31 = vcombine.low %v1593_v12, %v1593_v12  ;;  %v1274_v27 = vpack.i.b16 %v9622_v36, %v9741_v24 }
 0x174   : > { %13614 = vst [vmem:[#allocation78_spill] sm:$0xff] %v9931_v38  ;;  %v8025_v38 = vcombine.low %v1617_v3, %v1617_v3  ;;  %v1283_v50 = vpack.i.b16 %v1282_v58, %v1281_v46  ;;  %v2734_v19 = vshrl.u32 %v2638_v60, 16  ;;  %v1286_v12 = vpack.i.b16 %v9625_v7, %v9759_v25 }
 0x175   : > { %1641 = vrot.lane.b32.xlu0 %v8016_v51, %s8498_s14  ;;  %1673 = vrot.lane.b32.xlu1 %v8024_v16, %s8506_s22  ;;  %v9951_v4 = vpack.i.b16 %v2672_v9, %v2638_v60  ;;  %v2735_v29 = vshrl.u32 %v2672_v9, 16  ;;  %v2674_v51 = vcombine.high %v2672_v9, %v13496_v35  ;;  %v9955_v16 = vrot.slane %v2187_v42, %v8729_v13 }
 0x176   : > { %v2199_v8 = vpop.permute.xlu0 %2198  ;;  %v1607_v36 = vshrl.u32 %v9935_v39, 16  ;;  %v1295_v24 = vpack.i.b16 %v1294_v2, %v1293_v34  ;;  %v1606_v58 = vshrl.u32 %v9941_v33, 16  ;;  %v2640_v46 = vcombine.high %v2638_v60, %v13496_v35 }
 0x177   : > { %v9949_v52 = vpop.permute.xlu1 %982  ;;  %v9958_v18 = vrot.slane %v2199_v8, %v8729_v13  ;;  %v9966_v3 = vpack.i.b16 %v2735_v29, %v2734_v19  ;;  %v2301_v42 = vrot.slane %v2287_v6, %v8828_v61  ;;  %v2657_v8 = vcombine.low %v9908_v53, %v2656_v57 }
 0x178   : > { %13615 = vst [vmem:[#allocation79_spill] sm:$0xff] %v9949_v52  ;;  %v1619_v25 = vshrl.u32 %v9902_v55, 16  ;;  %v8009_v34 = vcombine.low %v1283_v50, %v1283_v50  ;;  %v9978_v2 = vpack.i.b16 %v2674_v51, %v2640_v46  ;;  %v1608_v19 = vpack.i.b16 %v1607_v36, %v1606_v58 }
 0x179   : > { %1645 = vrot.lane.b32.xlu0 %v8017_v31, %s8496_s12  ;;  %1677 = vrot.lane.b32.xlu1 %v8025_v38, %s8504_s20  ;;  %v2321_v7 = vcombine.high %v9955_v16, %v9958_v18  ;;  %v8006_v38 = vcombine.low %v1274_v27, %v1274_v27  ;;  %v1618_v6 = vshrl.u32 %v9898_v23, 16  ;;  %v2623_v53 = vcombine.low %v9819_v1, %v9826_v56 }
 0x17a   : > { %v9976_v31 = vpop.permute.xlu0 %946  ;;  %v8010_v55 = vcombine.low %v1286_v12, %v1286_v12  ;;  %v8013_v57 = vcombine.low %v1295_v24, %v1295_v24  ;;  %v1595_v60 = vshrl.u32 %v9884_v59, 16  ;;  %v9988_v27 = vrot.slane %v2657_v8, %v8828_v61 }
 0x17b   : > { %v9974_v9 = vpop.permute.xlu1 %974  ;;  %v2335_v29 = vrot.slane %v2321_v7, %v8828_v61  ;;  %v1620_v50 = vpack.i.b16 %v1619_v25, %v1618_v6  ;;  %v2397_v52 = vshrl.u32 %v2301_v42, 16  ;;  %v2303_v36 = vcombine.high %v2301_v42, %v13496_v35 }
 0x17c   : > { %13616 = vst [vmem:[#allocation80_spill] sm:$0xff] %v9974_v9  ;;  %v2741_v12 = vshrl.u32 %v2674_v51, 16  ;;  %v9999_v24 = vrot.slane %v2623_v53, %v8828_v61  ;;  %v1594_v59 = vshrl.u32 %v9870_v15, 16  ;;  %v2740_v25 = vshrl.u32 %v2640_v46, 16 }
 0x17d   : > { %1332 = vrot.lane.b32.xlu0 %v8006_v38, %s8501_s17  ;;  %1344 = vrot.lane.b32.xlu1 %v8009_v34, %s8508_s26  ;;  %v9995_v1 = vpack.i.b16 %v2335_v29, %v2301_v42  ;;  %v2398_v56 = vshrl.u32 %v2335_v29, 16  ;;  %v2337_v7 = vcombine.high %v2335_v29, %v13496_v35  ;;  %v8022_v38 = vcombine.low %v1608_v19, %v1608_v19 }
 0x17e   : > { %v9993_v23 = vpop.permute.xlu0 %962  ;;  %v2403_v42 = vshrl.u32 %v2303_v36, 16  ;;  %v8026_v51 = vcombine.low %v1620_v50, %v1620_v50  ;;  %v1596_v53 = vpack.i.b16 %v1595_v60, %v1594_v59  ;;  %v10012_v9 = vpack.i.b16 %v2741_v12, %v2740_v25 }
 0x17f   : > { %v9991_v58 = vpop.permute.xlu1 %990  ;;  %v10004_v8 = vpack.i.b16 %v2398_v56, %v2397_v52  ;;  %v10006_v34 = vpack.i.b16 %v2337_v7, %v2303_v36  ;;  %v2404_v6 = vshrl.u32 %v2337_v7, 16  ;;  %v3017_v52 = vcombine.low %v8858_v45, %v8862_v20 }
 0x180   : > { %13617 = vst [vmem:[#allocation81_spill] sm:$0xff] %v9991_v58  ;;  %13618 = vst [vmem:[#allocation82_spill] sm:$0xff] %v10012_v9  ;;  %v8018_v19 = vcombine.low %v1596_v53, %v1596_v53  ;;  %v1280_v50 = vpack.i.b16 %v9874_v10, %v9894_v54  ;;  %v2723_v36 = vshrl.u32 %v9988_v27, 16  ;;  %v2983_v56 = vcombine.low %v8801_v48, %v8805_v49 }
 0x181   : > { %1348 = vrot.lane.b32.xlu0 %v8010_v55, %s8502_s18  ;;  %1360 = vrot.lane.b32.xlu1 %v8013_v57, %s8509_s27  ;;  %v2721_v55 = vpack.i.b16 %v9988_v27, %v9999_v24  ;;  %v10014_v57 = vpack.i.b16 %v2404_v6, %v2403_v42  ;;  %v2722_v45 = vshrl.u32 %v9999_v24, 16  ;;  %v10033_v20 = vrot.slane %v3017_v52, %v8828_v61 }
 0x182   : > { %v10008_v29 = vpop.permute.xlu0 %970  ;;  %v8008_v59 = vcombine.low %v1280_v50, %v1280_v50  ;;  %v8043_v10 = vcombine.low %v9180_v37, %v9180_v37  ;;  %v1292_v48 = vpack.i.b16 %v9890_v0, %v9916_v30  ;;  %v10044_v54 = vrot.slane %v2983_v56, %v8828_v61 }
 0x183   : > { %v3562_v58 = vpop.permute.xlu1 %3561  ;;  %13619 = vst [vmem:[#allocation83_spill] sm:$0xff] %v10014_v57  ;;  %v8074_v60 = vcombine.low %v2721_v55, %v2721_v55  ;;  %v2724_v49 = vpack.i.b16 %v2723_v36, %v2722_v45  ;;  %v1625_v0 = vshrl.u32 %v9488_v17, 16  ;;  %v2716_v30 = vshrl.u32 %v9715_v43, 16 }
 0x184   : > { %v3081_v25 = vpack.i.b16 %v10033_v20, %v10044_v54  ;;  %v8012_v6 = vcombine.low %v1292_v48, %v1292_v48  ;;  %v1624_v53 = vshrl.u32 %v9501_v32, 16  ;;  %v8035_v55 = vcombine.low %v9188_v26, %v9188_v26  ;;  %v13622_v32 = vld [vmem:[#allocation20_spill] sm:$0xff] }
 0x185   : > { %1665 = vrot.lane.b32.xlu0 %v8022_v38, %s8492_s9  ;;  %1681 = vrot.lane.b32.xlu1 %v8026_v51, %s8508_s26  ;;  %v8075_v37 = vcombine.low %v2724_v49, %v2724_v49  ;;  %v2717_v51 = vshrl.u32 %v9710_v11, 16  ;;  %v2699_v36 = vshrl.u32 %v9772_v41, 16  ;;  %v2286_v56 = vcombine.low %v9905_v62, %v9911_v63 }
 0x186   : > { %v10022_v46 = vpop.permute.xlu0 %986  ;;  %v8095_v52 = vcombine.low %v3081_v25, %v3081_v25  ;;  %v1626_v17 = vpack.i.b16 %v1625_v0, %v1624_v53  ;;  %v10070_v43 = vrot.slane %v3562_v58, %v8729_v13  ;;  %v2698_v26 = vshrl.u32 %v9790_v47, 16 }
 0x187   : > { %v10020_v15 = vpop.permute.xlu1 %3551  ;;  %13620 = vst [vmem:[#allocation84_spill] sm:$0xff] %v10022_v46  ;;  %v2718_v50 = vpack.i.b16 %v2717_v51, %v2716_v30  ;;  %v10093_v51 = vrot.slane %v2286_v56, %v8828_v61  ;;  %v10112_v56 = vcombine.high %v9988_v27, %v13496_v35  ;;  %v3083_v27 = vshrl.u32 %v10033_v20, 16 }
 0x188   : > { %v8028_v58 = vcombine.low %v1626_v17, %v1626_v17  ;;  %v2700_v48 = vpack.i.b16 %v2699_v36, %v2698_v26 }
 0x189   : > { %1649 = vrot.lane.b32.xlu0 %v8018_v19, %s8503_s19  ;;  %2779 = vrot.lane.b32.xlu1 %v8074_v60, %s8501_s17  ;;  %v2320_v19 = vcombine.low %v9955_v16, %v9958_v18  ;;  %v10077_v18 = vrot.slane %v13622_v32, %v8729_v13  ;;  %v13623_v16 = vld [vmem:[#allocation39_spill] sm:$0xff]  ;;  %v8073_v62 = vcombine.low %v2718_v50, %v2718_v50  ;;  %v13625_v50 = vld [vmem:[#allocation32_spill] sm:$0xff]  ;;  %v2729_v46 = vshrl.u32 %v10112_v56, 16 }
 0x18a   : > { %v10037_v12 = vpop.permute.xlu0 %978  ;;  %v3077_v45 = vshrl.u32 %v13623_v16, 16  ;;  %v8044_v17 = vcombine.low %v13625_v50, %v13625_v50  ;;  %v10125_v16 = vcombine.high %v9999_v24, %v13496_v35  ;;  %v3082_v24 = vshrl.u32 %v10044_v54, 16 }
 0x18b   : > { %v10035_v7 = vpop.permute.xlu1 %3563  ;;  %v3589_v0 = vcombine.low %v10077_v18, %v10070_v43 }
 0x18c   : > { %v3084_v50 = vpack.i.b16 %v3083_v27, %v3082_v24  ;;  %v13634_v27 = vld [vmem:[#allocation33_spill] sm:$0xff] }
 0x18d   : > { %1340 = vrot.lane.b32.xlu0 %v8008_v59, %s8504_s20  ;;  %2117 = vrot.lane.b32.xlu1 %v8043_v10, %s8508_s26  ;;  %v10081_v59 = vrot.slane %v2320_v19, %v8828_v61  ;;  %v10119_v32 = vrot.slane %v3589_v0, %v8828_v61  ;;  %v2727_v0 = vpack.i.b16 %v10112_v56, %v10125_v16 }
 0x18e   : > { %v10052_v42 = vpop.permute.xlu0 %994  ;;  %v2999_v56 = vcombine.high %v10044_v54, %v13496_v35  ;;  %v13647_v54 = vld [vmem:[#allocation35_spill] sm:$0xff] }
 0x18f   : > { %v10050_v38 = vpop.permute.xlu1 %1415  ;;  %13621 = vst [vmem:[#allocation85_spill] sm:$0xff] %v10052_v42  ;;  %v2384_v36 = vpack.i.b16 %v10081_v59, %v10093_v51  ;;  %13627 = vst [vmem:[#allocation39_spill] sm:$0xff] %v10119_v32 }
 0x191   : > { %1356 = vrot.lane.b32.xlu0 %v8012_v6, %s8505_s21  ;;  %2783 = vrot.lane.b32.xlu1 %v8075_v37, %s8506_s22  ;;  %v13624_v6 = vld [vmem:[#allocation40_spill] sm:$0xff] }
 0x192   : > { %v3556_v11 = vpop.permute.xlu0 %3555  ;;  %v3076_v37 = vshrl.u32 %v13624_v6, 16 }
 0x193   : > { %v10064_v60 = vpop.permute.xlu1 %1427  ;;  %v10086_v49 = vrot.slane %v3556_v11, %v8729_v13  ;;  %v8067_v11 = vcombine.low %v2700_v48, %v2700_v48 }
 0x194   : > { %v3078_v53 = vpack.i.b16 %v3077_v45, %v3076_v37  ;;  %v8057_v37 = vcombine.low %v2384_v36, %v2384_v36 }
 0x195   : > { %2085 = vrot.lane.b32.xlu0 %v8035_v55, %s8503_s19  ;;  %3139 = vrot.lane.b32.xlu1 %v8095_v52, %s8501_s17  ;;  %v1601_v55 = vshrl.u32 %v9573_v21, 16  ;;  %v1600_v21 = vshrl.u32 %v9564_v28, 16 }
 0x196   : > { %v3568_v63 = vpop.permute.xlu0 %3567  ;;  %v8094_v45 = vcombine.low %v3078_v53, %v3078_v53  ;;  %v13631_v53 = vld [vmem:[#allocation50_spill] sm:$0xff] }
 0x197   : > { %v10083_v10 = vpop.permute.xlu1 %2525  ;;  %v10089_v25 = vrot.slane %v3568_v63, %v8729_v13  ;;  %v1602_v63 = vpack.i.b16 %v1601_v55, %v1600_v21  ;;  %v13632_v55 = vld [vmem:[#allocation49_spill] sm:$0xff] }
 0x199   : > { %2775 = vrot.lane.b32.xlu0 %v8073_v62, %s8492_s9  ;;  %1689 = vrot.lane.b32.xlu1 %v8028_v58, %s8507_s23  ;;  %v3623_v30 = vcombine.low %v10086_v49, %v10089_v25  ;;  %v13628_v62 = vld [vmem:[#allocation31_spill] sm:$0xff]  ;;  %v13629_v58 = vld [vmem:[#allocation30_spill] sm:$0xff] }
 0x19a   : > { %v10104_v19 = vpop.permute.xlu0 %3557  ;;  %v3354_v48 = vcombine.low %v13629_v58, %v13628_v62  ;;  %v8020_v62 = vcombine.low %v1602_v63, %v1602_v63  ;;  %v8076_v58 = vcombine.low %v2727_v0, %v2727_v0  ;;  %v8096_v63 = vcombine.low %v3084_v50, %v3084_v50 }
 0x19b   : > { %v10102_v52 = vpop.permute.xlu1 %2537  ;;  %v10115_v26 = vrot.slane %v3623_v30, %v8828_v61  ;;  %v2380_v30 = vshrl.u32 %v9795_v14, 16 }
 0x19d   : > { %13626 = vst [vmem:[#allocation20_spill] sm:$0xff] %v10115_v26  ;;  %2751 = vrot.lane.b32.xlu0 %v8067_v11, %s8498_s14  ;;  %2121 = vrot.lane.b32.xlu1 %v8044_v17, %s8502_s18  ;;  %v3320_v11 = vcombine.low %v13632_v55, %v13631_v53  ;;  %v10144_v17 = vrot.slane %v3354_v48, %v8828_v61  ;;  %v13636_v55 = vld [vmem:[#allocation38_spill] sm:$0xff] }
 0x19e   : > { %v10132_v28 = vpop.permute.xlu0 %3569  ;;  %v8036_v48 = vcombine.low %v13634_v27, %v13634_v27  ;;  %v10167_v53 = vcombine.high %v9772_v41, %v13496_v35  ;;  %v13638_v27 = vld [vmem:[#allocation43_spill] sm:$0xff] }
 0x19f   : > { %v10130_v6 = vpop.permute.xlu1 %2188  ;;  %v10152_v42 = vrot.slane %v3320_v11, %v8828_v61  ;;  %v3059_v11 = vshrl.u32 %v13636_v55, 16  ;;  %v3058_v41 = vshrl.u32 %v13638_v27, 16 }
 0x1a0   : > { %13630 = vst [vmem:[#allocation40_spill] sm:$0xff] %v10130_v6 }
 0x1a1   : > { %3135 = vrot.lane.b32.xlu0 %v8094_v45, %s8492_s9  ;;  %2442 = vrot.lane.b32.xlu1 %v8057_v37, %s8501_s17  ;;  %v2379_v45 = vshrl.u32 %v9813_v5, 16  ;;  %v3418_v14 = vpack.i.b16 %v10144_v17, %v10152_v42  ;;  %v10173_v5 = vcombine.high %v9790_v47, %v13496_v35 }
 0x1a2   : > { %v10148_v21 = vpop.permute.xlu0 %1421 }
 0x1a3   : > { %v10146_v36 = vpop.permute.xlu1 %2200  ;;  %v2381_v0 = vpack.i.b16 %v2380_v30, %v2379_v45  ;;  %v2703_v45 = vpack.i.b16 %v10167_v53, %v10173_v5 }
 0x1a4   : > { %13633 = vst [vmem:[#allocation32_spill] sm:$0xff] %v10146_v36  ;;  %v3088_v36 = vshrl.u32 %v2999_v56, 16 }
 0x1a5   : > { %1657 = vrot.lane.b32.xlu0 %v8020_v62, %s8499_s15  ;;  %2787 = vrot.lane.b32.xlu1 %v8076_v58, %s8504_s20  ;;  %v8056_v50 = vcombine.low %v2381_v0, %v2381_v0  ;;  %v8112_v58 = vcombine.low %v3418_v14, %v3418_v14  ;;  %v8068_v9 = vcombine.low %v2703_v45, %v2703_v45  ;;  %v3414_v0 = vshrl.u32 %v9787_v40, 16  ;;  %v13643_v45 = vld [vmem:[#allocation34_spill] sm:$0xff] }
 0x1a6   : > { %v10161_v24 = vpop.permute.xlu0 %2519  ;;  %v2386_v14 = vshrl.u32 %v10081_v59, 16 }
 0x1a7   : > { %v10159_v37 = vpop.permute.xlu1 %3222 }
 0x1a8   : > { %13635 = vst [vmem:[#allocation31_spill] sm:$0xff] %v10159_v37  ;;  %v13641_v37 = vld [vmem:[#allocation11_spill] sm:$0xff] }
 0x1a9   : > { %2089 = vrot.lane.b32.xlu0 %v8036_v48, %s8494_s10  ;;  %3143 = vrot.lane.b32.xlu1 %v8096_v63, %s8506_s22  ;;  %v3060_v48 = vpack.i.b16 %v3059_v11, %v3058_v41  ;;  %v2385_v41 = vshrl.u32 %v10093_v51, 16 }
 0x1aa   : > { %v10178_v30 = vpop.permute.xlu0 %2531 }
 0x1ab   : > { %v10176_v62 = vpop.permute.xlu1 %3234  ;;  %v8088_v11 = vcombine.low %v3060_v48, %v3060_v48  ;;  %v2387_v40 = vpack.i.b16 %v2386_v14, %v2385_v41 }
 0x1ac   : > { %13637 = vst [vmem:[#allocation30_spill] sm:$0xff] %v10176_v62  ;;  %v8029_v62 = vcombine.low %v13641_v37, %v13641_v37  ;;  %v8045_v37 = vcombine.low %v13643_v45, %v13643_v45  ;;  %v3420_v45 = vshrl.u32 %v10144_v17, 16 }
 0x1ad   : > { %2438 = vrot.lane.b32.xlu0 %v8056_v50, %s8492_s9  ;;  %3476 = vrot.lane.b32.xlu1 %v8112_v58, %s8501_s17  ;;  %v3413_v50 = vshrl.u32 %v9784_v44, 16  ;;  %v2728_v44 = vshrl.u32 %v10125_v16, 16  ;;  %v8058_v6 = vcombine.low %v2387_v40, %v2387_v40 }
 0x1ae   : > { %v10187_v47 = vpop.permute.xlu0 %2182 }
 0x1af   : > { %v10185_v63 = vpop.permute.xlu1 %3559  ;;  %13640 = vst [vmem:[#allocation49_spill] sm:$0xff] %v10187_v47  ;;  %v3415_v57 = vpack.i.b16 %v3414_v0, %v3413_v50  ;;  %v1605_v0 = vpack.i.b16 %v9935_v39, %v9941_v33  ;;  %v2730_v14 = vpack.i.b16 %v2729_v46, %v2728_v44  ;;  %v13646_v33 = vld [vmem:[#allocation71_spill] sm:$0xff]  ;;  %v3419_v46 = vshrl.u32 %v10152_v42, 16 }
 0x1b0   : > { %13639 = vst [vmem:[#allocation50_spill] sm:$0xff] %v10185_v63  ;;  %v2361_v39 = vshrl.u32 %v13646_v33, 16 }
 0x1b1   : > { %2755 = vrot.lane.b32.xlu0 %v8068_v9, %s8496_s12  ;;  %1693 = vrot.lane.b32.xlu1 %v8029_v62, %s8505_s21  ;;  %v3033_v9 = vcombine.high %v10033_v20, %v13496_v35  ;;  %v8021_v41 = vcombine.low %v1605_v0, %v1605_v0  ;;  %v3421_v0 = vpack.i.b16 %v3420_v45, %v3419_v46 }
 0x1b2   : > { %v10199_v63 = vpop.permute.xlu0 %2194  ;;  %v2931_v45 = vcombine.high %v13638_v27, %v13496_v35 }
 0x1b3   : > { %v10197_v58 = vpop.permute.xlu1 %3571  ;;  %v3087_v16 = vpack.i.b16 %v3033_v9, %v2999_v56  ;;  %v10284_v56 = vcombine.high %v9816_v22, %v13496_v35 }
 0x1b4   : > { %13642 = vst [vmem:[#allocation33_spill] sm:$0xff] %v10197_v58  ;;  %v8111_v58 = vcombine.low %v3415_v57, %v3415_v57  ;;  %v2362_v57 = vshrl.u32 %v9816_v22, 16 }
 0x1b5   : > { %3111 = vrot.lane.b32.xlu0 %v8088_v11, %s8498_s14  ;;  %2125 = vrot.lane.b32.xlu1 %v8045_v37, %s8507_s23  ;;  %v8077_v11 = vcombine.low %v2730_v14, %v2730_v14  ;;  %v8097_v40 = vcombine.low %v3087_v16, %v3087_v16  ;;  %v2705_v14 = vshrl.u32 %v10167_v53, 16  ;;  %v8113_v16 = vcombine.low %v3421_v0, %v3421_v0 }
 0x1b6   : > { %v2363_v44 = vpack.i.b16 %v2362_v57, %v2361_v39  ;;  %v2336_v53 = vcombine.high %v10081_v59, %v13496_v35 }
 0x1b7   : > { %v10209_v62 = vpop.permute.xlu1 %2105  ;;  %v10211_v48 = vpop.permute.xlu0 %3216 }
 0x1b8   : > { %13644 = vst [vmem:[#allocation11_spill] sm:$0xff] %v10211_v48 }
 0x1b9   : > { %3472 = vrot.lane.b32.xlu0 %v8111_v58, %s8492_s9  ;;  %2446 = vrot.lane.b32.xlu1 %v8058_v6, %s8506_s22  ;;  %v8037_v6 = vcombine.low %v13647_v54, %v13647_v54 }
 0x1bb   : > { %v10219_v50 = vpop.permute.xlu1 %2109  ;;  %v10221_v20 = vpop.permute.xlu0 %3228 }
 0x1bc   : > { %13645 = vst [vmem:[#allocation34_spill] sm:$0xff] %v10221_v20 }
 0x1bd   : > { %1661 = vrot.lane.b32.xlu0 %v8021_v41, %s8497_s13  ;;  %2791 = vrot.lane.b32.xlu1 %v8077_v11, %s8508_s26  ;;  %v2704_v41 = vshrl.u32 %v10173_v5, 16  ;;  %v10241_v11 = vcombine.high %v13636_v55, %v13496_v35  ;;  %v2302_v5 = vcombine.high %v10093_v51, %v13496_v35  ;;  %v3089_v51 = vshrl.u32 %v3033_v9, 16 }
 0x1be   : > { %v8078_v9 = vcombine.low %v9951_v4, %v9951_v4  ;;  %v13657_v4 = vld [vmem:[#allocation37_spill] sm:$0xff] }
 0x1bf   : > { %v10231_v58 = vpop.permute.xlu1 %2113  ;;  %v10233_v37 = vpop.permute.xlu0 %3553  ;;  %v2706_v57 = vpack.i.b16 %v2705_v14, %v2704_v41  ;;  %v3063_v39 = vpack.i.b16 %v10241_v11, %v2931_v45  ;;  %v2390_v0 = vpack.i.b16 %v2336_v53, %v2302_v5  ;;  %v13652_v14 = vld [vmem:[#allocation67_spill] sm:$0xff] }
 0x1c0   : > { %13648 = vst [vmem:[#allocation35_spill] sm:$0xff] %v10231_v58  ;;  %13649 = vst [vmem:[#allocation86_spill] sm:$0xff] %v10233_v37  ;;  %v8050_v37 = vcombine.low %v2363_v44, %v2363_v44  ;;  %v3396_v41 = vshrl.u32 %v13652_v14, 16 }
 0x1c1   : > { %2093 = vrot.lane.b32.xlu0 %v8037_v6, %s8499_s15  ;;  %3147 = vrot.lane.b32.xlu1 %v8097_v40, %s8504_s20  ;;  %v13651_v40 = vld [vmem:[#allocation36_spill] sm:$0xff]  ;;  %v8069_v59 = vcombine.low %v2706_v57, %v2706_v57  ;;  %v8089_v20 = vcombine.low %v3063_v39, %v3063_v39  ;;  %v3090_v57 = vpack.i.b16 %v3089_v51, %v3088_v36  ;;  %v3065_v51 = vshrl.u32 %v10241_v11, 16 }
 0x1c2   : > { %v8046_v44 = vcombine.low %v13651_v40, %v13651_v40  ;;  %v3336_v36 = vcombine.high %v10152_v42, %v13496_v35  ;;  %v2391_v42 = vshrl.u32 %v2302_v5, 16  ;;  %v13663_v5 = vld [vmem:[#allocation55_spill] sm:$0xff] }
 0x1c3   : > { %v10243_v54 = vpop.permute.xlu1 %1304  ;;  %v10245_v48 = vpop.permute.xlu0 %3565  ;;  %v8098_v39 = vcombine.low %v3090_v57, %v3090_v57 }
 0x1c4   : > { %13650 = vst [vmem:[#allocation87_spill] sm:$0xff] %v10245_v48  ;;  %v8059_v48 = vcombine.low %v2390_v0, %v2390_v0 }
 0x1c5   : > { %2414 = vrot.lane.b32.xlu0 %v8050_v37, %s8498_s14  ;;  %3480 = vrot.lane.b32.xlu1 %v8113_v16, %s8506_s22  ;;  %v13653_v37 = vld [vmem:[#allocation74_spill] sm:$0xff] }
 0x1c6   : > { %v3395_v16 = vshrl.u32 %v13653_v37, 16 }
 0x1c7   : > { %v10256_v46 = vpop.permute.xlu1 %1320  ;;  %v10258_v6 = vpop.permute.xlu0 %2101 }
 0x1c8   : > { %v3397_v58 = vpack.i.b16 %v3396_v41, %v3395_v16  ;;  %v2392_v16 = vshrl.u32 %v2336_v53, 16 }
 0x1c9   : > { %2129 = vrot.lane.b32.xlu1 %v8046_v44, %s8505_s21  ;;  %2759 = vrot.lane.b32.xlu0 %v8069_v59, %s8503_s19 }
 0x1ca   : > { %v8105_v59 = vcombine.low %v3397_v58, %v3397_v58  ;;  %v2393_v47 = vpack.i.b16 %v2392_v16, %v2391_v42  ;;  %v3268_v42 = vcombine.high %v13653_v37, %v13496_v35 }
 0x1cb   : > { %v10266_v27 = vpop.permute.xlu1 %1368  ;;  %v10268_v55 = vpop.permute.xlu0 %2077 }
 0x1cc   : > { %13654 = vst [vmem:[#allocation36_spill] sm:$0xff] %v10266_v27  ;;  %13655 = vst [vmem:[#allocation88_spill] sm:$0xff] %v10268_v55  ;;  %v10280_v27 = vcombine.high %v10144_v17, %v13496_v35 }
 0x1cd   : > { %2450 = vrot.lane.b32.xlu1 %v8059_v48, %s8504_s20  ;;  %3115 = vrot.lane.b32.xlu0 %v8089_v20, %s8496_s12  ;;  %v2234_v48 = vcombine.high %v13646_v33, %v13496_v35  ;;  %v8038_v20 = vcombine.low %v13657_v4, %v13657_v4  ;;  %v13660_v4 = vld [vmem:[#allocation15_spill] sm:$0xff] }
 0x1ce   : > { %v3424_v0 = vpack.i.b16 %v10280_v27, %v3336_v36 }
 0x1cf   : > { %v10272_v40 = vpop.permute.xlu1 %1669  ;;  %v10274_v44 = vpop.permute.xlu0 %2081  ;;  %v2366_v41 = vpack.i.b16 %v10284_v56, %v2234_v48 }
 0x1d0   : > { %13656 = vst [vmem:[#allocation89_spill] sm:$0xff] %v10274_v44  ;;  %v8114_v55 = vcombine.low %v3424_v0, %v3424_v0 }
 0x1d1   : > { %2795 = vrot.lane.b32.xlu1 %v8078_v9, %s8502_s18  ;;  %3448 = vrot.lane.b32.xlu0 %v8105_v59, %s8498_s14  ;;  %v13658_v9 = vld [vmem:[#allocation59_spill] sm:$0xff]  ;;  %v13659_v59 = vld [vmem:[#allocation16_spill] sm:$0xff]  ;;  %v8051_v53 = vcombine.low %v2366_v41, %v2366_v41 }
 0x1d2   : > { %v13661_v33 = vpack.i.b16 %v13659_v59, %v13660_v4  ;;  %v10314_v59 = vcombine.high %v13652_v14, %v13496_v35 }
 0x1d3   : > { %v10294_v58 = vpop.permute.xlu1 %1685  ;;  %v1317_v17 = vpop.permute.xlu0 %1316 }
 0x1d4   : > { %v1007_v57 = vsel %vm1004_vm1, %v13661_v33, %v13658_v9  ;;  %v3400_v4 = vpack.i.b16 %v10314_v59, %v3268_v42 }
 0x1d5   : > { %3151 = vrot.lane.b32.xlu1 %v8098_v39, %s8508_s26  ;;  %2097 = vrot.lane.b32.xlu0 %v8038_v20, %s8497_s13  ;;  %v3064_v39 = vshrl.u32 %v2931_v45, 16  ;;  %v1010_v11 = vsel %vm1008_vm2, %v1007_v57, %v13663_v5  ;;  %v8060_v45 = vcombine.low %v2393_v47, %v2393_v47  ;;  %v13666_v57 = vld [vmem:[#allocation26_spill] sm:$0xff]  ;;  %v13667_v47 = vld [vmem:[#allocation25_spill] sm:$0xff] }
 0x1d6   : > { %v1013_v33 = vsel %vm1011_vm3, %v1010_v11, %v9976_v31 }
 0x1d7   : > { %v1313_v22 = vpop.permute.xlu1 %1312  ;;  %v10306_v44 = vpop.permute.xlu0 %1364  ;;  %v3066_v20 = vpack.i.b16 %v3065_v51, %v3064_v39  ;;  %v13665_v51 = vld [vmem:[#allocation51_spill] sm:$0xff] }
 0x1d8   : > { %13662 = vst [vmem:[#allocation37_spill] sm:$0xff] %v10306_v44  ;;  %v1016_v9 = vsel %vm1014_vm4, %v1013_v33, %v13665_v51  ;;  %v13669_v33 = vld [vmem:[#allocation63_spill] sm:$0xff] }
 0x1d9   : > { %3484 = vrot.lane.b32.xlu1 %v8114_v55, %s8504_s20  ;;  %2418 = vrot.lane.b32.xlu0 %v8051_v53, %s8496_s12  ;;  %v13664_v55 = vld [vmem:[#allocation54_spill] sm:$0xff]  ;;  %v8090_v31 = vcombine.low %v3066_v20, %v3066_v20  ;;  %v13668_v53 = vpack.i.b16 %v13666_v57, %v13667_v47  ;;  %v1019_v51 = vsel %vm1017_vm5, %v1016_v9, %v13669_v33  ;;  %v2367_v47 = vshrl.u32 %v2234_v48, 16 }
 0x1da   : > { %v8070_v16 = vcombine.low %v13664_v55, %v13664_v55  ;;  %v3426_v55 = vshrl.u32 %v10280_v27, 16  ;;  %v8106_v9 = vcombine.low %v3400_v4, %v3400_v4 }
 0x1db   : > { %v10318_v0 = vpop.permute.xlu1 %1328  ;;  %v10320_v41 = vpop.permute.xlu0 %1653  ;;  %v1372_v39 = vsel %vm1004_vm1, %v13668_v53, %v10243_v54  ;;  %v3425_v54 = vshrl.u32 %v3336_v36, 16  ;;  %v13670_v53 = vld [vmem:[#allocation41_spill] sm:$0xff] }
 0x1dc   : > { %v8099_v27 = vcombine.low %v13670_v53, %v13670_v53 }
 0x1dd   : > { %2454 = vrot.lane.b32.xlu1 %v8060_v45, %s8508_s26  ;;  %2763 = vrot.lane.b32.xlu0 %v8070_v16, %s8494_s10  ;;  %v8079_v45 = vcombine.low %v9966_v3, %v9966_v3  ;;  %v2368_v16 = vshrl.u32 %v10284_v56, 16  ;;  %v3427_v33 = vpack.i.b16 %v3426_v55, %v3425_v54 }
 0x1df   : > { %v10336_v5 = vpop.permute.xlu1 %1336  ;;  %v1309_v11 = vpop.permute.xlu0 %1308  ;;  %v8115_v55 = vcombine.low %v3427_v33, %v3427_v33  ;;  %v8080_v33 = vcombine.low %v9978_v2, %v9978_v2 }
 0x1e0   : > { %v1374_v20 = vsel %vm1008_vm2, %v1372_v39, %v1309_v11 }
 0x1e1   : > { %v1376_v57 = vsel %vm1011_vm3, %v1374_v20, %v1313_v22  ;;  %2799 = vrot.lane.b32.xlu1 %v8079_v45, %s8507_s23  ;;  %3119 = vrot.lane.b32.xlu0 %v8090_v31, %s8503_s19  ;;  %v2369_v22 = vpack.i.b16 %v2368_v16, %v2367_v47  ;;  %v13671_v20 = vld [vmem:[#allocation58_spill] sm:$0xff]  ;;  %v8061_v47 = vcombine.low %v9995_v1, %v9995_v1 }
 0x1e2   : > { %v1378_v3 = vsel %vm1014_vm4, %v1376_v57, %v1317_v17  ;;  %v1022_v45 = vsel %vm13397_vm6, %v1019_v51, %v13671_v20 }
 0x1e3   : > { %v10351_v56 = vpop.permute.xlu1 %1352  ;;  %v1380_v39 = vsel %vm1017_vm5, %v1378_v3, %v10256_v46  ;;  %v1325_v11 = vpop.permute.xlu0 %1324  ;;  %v1025_v46 = vsel %vm13393_vm7, %v1022_v45, %v9993_v23  ;;  %v8052_v16 = vcombine.low %v2369_v22, %v2369_v22  ;;  %v13672_v3 = vld [vmem:[#allocation56_spill] sm:$0xff]  ;;  %v13673_v22 = vld [vmem:[#allocation42_spill] sm:$0xff] }
 0x1e4   : > { %v1382_v36 = vsel %vm13397_vm6, %v1380_v39, %v1325_v11  ;;  %v8071_v53 = vcombine.low %v13672_v3, %v13672_v3  ;;  %v3401_v39 = vshrl.u32 %v3268_v42, 16  ;;  %v8091_v1 = vcombine.low %v13673_v22, %v13673_v22  ;;  %v13675_v42 = vld [vmem:[#allocation44_spill] sm:$0xff] }
 0x1e5   : > { %v1384_v48 = vsel %vm13393_vm7, %v1382_v36, %v10318_v0  ;;  %3155 = vrot.lane.b32.xlu1 %v8099_v27, %s8502_s18  ;;  %3452 = vrot.lane.b32.xlu0 %v8106_v9, %s8496_s12  ;;  %v3402_v27 = vshrl.u32 %v10314_v59, 16  ;;  %v8100_v36 = vcombine.low %v13675_v42, %v13675_v42  ;;  %v3624_v3 = vcombine.high %v10086_v49, %v10089_v25  ;;  %v13680_v42 = vld [vmem:[#allocation45_spill] sm:$0xff] }
 0x1e6   : > { %v3889_v17 = vrot.slane %v1384_v48, 6 }
 0x1e7   : > { %v10364_v31 = vpop.permute.xlu1 %1673  ;;  %v10366_v4 = vpop.permute.xlu0 %1641  ;;  %v3403_v20 = vpack.i.b16 %v3402_v27, %v3401_v39  ;;  %v8062_v39 = vcombine.low %v10004_v8, %v10004_v8  ;;  %v8101_v8 = vcombine.low %v13680_v42, %v13680_v42  ;;  %v8063_v42 = vcombine.low %v10006_v34, %v10006_v34 }
 0x1e8   : > { %v10369_v51 = vsel %vm3922_vm8, %v1025_v46, %v3889_v17  ;;  %v13676_v46 = vld [vmem:[#allocation53_spill] sm:$0xff] }
 0x1e9   : > { %3488 = vrot.lane.b32.xlu1 %v8115_v55, %s8508_s26  ;;  %2422 = vrot.lane.b32.xlu0 %v8052_v16, %s8503_s19  ;;  %v8107_v48 = vcombine.low %v3403_v20, %v3403_v20  ;;  %v8116_v55 = vcombine.low %v13676_v46, %v13676_v46  ;;  %v13677_v16 = vld [vmem:[#allocation62_spill] sm:$0xff]  ;;  %v10427_v20 = vrot.slane %v3624_v3, %v8828_v61  ;;  %v13684_v3 = vld [vmem:[#allocation64_spill] sm:$0xff] }
 0x1eb   : > { %v10373_v57 = vpop.permute.xlu1 %1677  ;;  %v10375_v54 = vpop.permute.xlu0 %1645 }
 0x1ed   : > { %2458 = vrot.lane.b32.xlu1 %v8061_v47, %s8502_s18  ;;  %2767 = vrot.lane.b32.xlu0 %v8071_v53, %s8499_s15  ;;  %v8053_v47 = vcombine.low %v13677_v16, %v13677_v16  ;;  %v13683_v16 = vld [vmem:[#allocation60_spill] sm:$0xff] }
 0x1ef   : > { %v10384_v11 = vpop.permute.xlu1 %1344  ;;  %v10386_v9 = vpop.permute.xlu0 %1332 }
 0x1f1   : > { %2803 = vrot.lane.b32.xlu1 %v8080_v33, %s8505_s21  ;;  %3123 = vrot.lane.b32.xlu0 %v8091_v1, %s8494_s10  ;;  %v13679_v33 = vld [vmem:[#allocation57_spill] sm:$0xff]  ;;  %v3590_v1 = vcombine.high %v10077_v18, %v10070_v43  ;;  %v10444_v43 = vcombine.high %v10427_v20, %v13496_v35 }
 0x1f2   : > { %v8072_v22 = vcombine.low %v13679_v33, %v13679_v33 }
 0x1f3   : > { %v10394_v59 = vpop.permute.xlu1 %1360  ;;  %v10396_v45 = vpop.permute.xlu0 %1348  ;;  %v10438_v46 = vrot.slane %v3590_v1, %v8828_v61 }
 0x1f4   : > { %13674 = vst [vmem:[#allocation59_spill] sm:$0xff] %v10394_v59  ;;  %v13690_v59 = vld [vmem:[#allocation46_spill] sm:$0xff] }
 0x1f5   : > { %3159 = vrot.lane.b32.xlu1 %v8100_v36, %s8507_s23  ;;  %3456 = vrot.lane.b32.xlu0 %v8107_v48, %s8503_s19  ;;  %v13681_v36 = vld [vmem:[#allocation17_spill] sm:$0xff]  ;;  %v10456_v33 = vcombine.high %v10438_v46, %v13496_v35  ;;  %v8093_v34 = vcombine.low %v13690_v59, %v13690_v59 }
 0x1f6   : > { %v8092_v48 = vcombine.low %v13681_v36, %v13681_v36 }
 0x1f7   : > { %v10402_v2 = vpop.permute.xlu1 %1681  ;;  %v10404_v17 = vpop.permute.xlu0 %1665 }
 0x1f9   : > { %3492 = vrot.lane.b32.xlu1 %v8116_v55, %s8502_s18  ;;  %2426 = vrot.lane.b32.xlu0 %v8053_v47, %s8494_s10  ;;  %v8117_v47 = vcombine.low %v13683_v16, %v13683_v16  ;;  %v3750_v16 = vshrl.u32 %v10456_v33, 16 }
 0x1fb   : > { %v10414_v53 = vpop.permute.xlu1 %2779  ;;  %v10416_v27 = vpop.permute.xlu0 %1649 }
 0x1fc   : > { %13678 = vst [vmem:[#allocation16_spill] sm:$0xff] %v10414_v53 }
 0x1fd   : > { %2462 = vrot.lane.b32.xlu1 %v8062_v39, %s8507_s23  ;;  %2771 = vrot.lane.b32.xlu0 %v8072_v22, %s8497_s13  ;;  %v8108_v39 = vcombine.low %v13684_v3, %v13684_v3 }
 0x1ff   : > { %v10429_v49 = vpop.permute.xlu1 %2117  ;;  %v10431_v25 = vpop.permute.xlu0 %1340 }
 0x201   : > { %3163 = vrot.lane.b32.xlu1 %v8101_v8, %s8505_s21  ;;  %3127 = vrot.lane.b32.xlu0 %v8092_v48, %s8499_s15  ;;  %v13687_v8 = vld [vmem:[#allocation66_spill] sm:$0xff]  ;;  %v3751_v48 = vshrl.u32 %v10444_v43, 16 }
 0x202   : > { %v8054_v36 = vcombine.low %v13687_v8, %v13687_v8  ;;  %v3639_v8 = vcombine.high %v10115_v26, %v13496_v35 }
 0x203   : > { %v10446_v18 = vpop.permute.xlu1 %2783  ;;  %v10448_v55 = vpop.permute.xlu0 %1356  ;;  %v3752_v37 = vpack.i.b16 %v3751_v48, %v3750_v16 }
 0x204   : > { %13682 = vst [vmem:[#allocation15_spill] sm:$0xff] %v10446_v18  ;;  %v3739_v18 = vshrl.u32 %v3639_v8, 16 }
 0x205   : > { %3496 = vrot.lane.b32.xlu1 %v8117_v47, %s8507_s23  ;;  %3460 = vrot.lane.b32.xlu0 %v8108_v39, %s8494_s10  ;;  %v13689_v39 = vld [vmem:[#allocation70_spill] sm:$0xff]  ;;  %v8128_v48 = vcombine.low %v3752_v37, %v3752_v37 }
 0x206   : > { %v8118_v44 = vcombine.low %v13689_v39, %v13689_v39  ;;  %v3690_v39 = vrot.slane %v10132_v28, %v8729_v13  ;;  %v3648_v28 = vrot.slane %v10020_v15, %v8729_v13  ;;  %v13697_v15 = vld [vmem:[#allocation73_spill] sm:$0xff] }
 0x207   : > { %v10460_v22 = vpop.permute.xlu1 %3139  ;;  %v10462_v1 = vpop.permute.xlu0 %2085 }
 0x208   : > { %13685 = vst [vmem:[#allocation55_spill] sm:$0xff] %v10460_v22  ;;  %13686 = vst [vmem:[#allocation54_spill] sm:$0xff] %v10462_v1 }
 0x209   : > { %2466 = vrot.lane.b32.xlu1 %v8063_v42, %s8505_s21  ;;  %2430 = vrot.lane.b32.xlu0 %v8054_v36, %s8499_s15  ;;  %v3605_v42 = vcombine.high %v10119_v32, %v13496_v35  ;;  %v13691_v36 = vld [vmem:[#allocation75_spill] sm:$0xff] }
 0x20a   : > { %v8109_v14 = vcombine.low %v13691_v36, %v13691_v36 }
 0x20b   : > { %v10472_v47 = vpop.permute.xlu1 %1689  ;;  %v10474_v3 = vpop.permute.xlu0 %2775  ;;  %v3737_v16 = vpack.i.b16 %v3639_v8, %v3605_v42  ;;  %v3738_v36 = vshrl.u32 %v3605_v42, 16  ;;  %v8110_v42 = vcombine.low %v13697_v15, %v13697_v15 }
 0x20c   : > { %13688 = vst [vmem:[#allocation51_spill] sm:$0xff] %v10474_v3  ;;  %v13694_v3 = vld [vmem:[#allocation72_spill] sm:$0xff] }
 0x20d   : > { %3500 = vrot.lane.b32.xlu1 %v8118_v44, %s8505_s21  ;;  %3131 = vrot.lane.b32.xlu0 %v8093_v34, %s8497_s13  ;;  %v3656_v44 = vrot.slane %v10035_v7, %v8729_v13  ;;  %v3682_v34 = vrot.slane %v10104_v19, %v8729_v13  ;;  %v8123_v7 = vcombine.low %v3737_v16, %v3737_v16  ;;  %v3733_v19 = vshrl.u32 %v10115_v26, 16 }
 0x20e   : > { %v3740_v1 = vpack.i.b16 %v3739_v18, %v3738_v36 }
 0x20f   : > { %v10490_v22 = vpop.permute.xlu1 %2121  ;;  %v10492_v59 = vpop.permute.xlu0 %2751  ;;  %v3691_v37 = vcombine.low %v3682_v34, %v3690_v39  ;;  %v3692_v13 = vcombine.high %v3682_v34, %v3690_v39 }
 0x210   : > { %13692 = vst [vmem:[#allocation26_spill] sm:$0xff] %v10490_v22  ;;  %13693 = vst [vmem:[#allocation25_spill] sm:$0xff] %v10492_v59  ;;  %v8055_v59 = vcombine.low %v13694_v3, %v13694_v3  ;;  %v3657_v22 = vcombine.low %v3648_v28, %v3656_v44  ;;  %v3743_v3 = vpack.i.b16 %v10427_v20, %v10438_v46 }
 0x211   : > { %3809 = vrot.lane.b32.xlu1 %v8128_v48, %s8492_s9  ;;  %3464 = vrot.lane.b32.xlu0 %v8109_v14, %s8499_s15  ;;  %v3732_v14 = vshrl.u32 %v10119_v32, 16  ;;  %v3745_v48 = vshrl.u32 %v10427_v20, 16  ;;  %v3699_v18 = vrot.slane %v3691_v37, %v8828_v61  ;;  %v3658_v32 = vcombine.high %v3648_v28, %v3656_v44  ;;  %v13700_v44 = vld [vmem:[#allocation21_spill] sm:$0xff] }
 0x212   : > { %v8125_v15 = vcombine.low %v3743_v3, %v3743_v3  ;;  %v10527_v39 = vrot.slane %v3692_v13, %v8828_v61  ;;  %v13701_v28 = vld [vmem:[#allocation13_spill] sm:$0xff]  ;;  %v13702_v13 = vld [vmem:[#allocation24_spill] sm:$0xff] }
 0x213   : > { %v10504_v53 = vpop.permute.xlu1 %2442  ;;  %v10506_v8 = vpop.permute.xlu0 %3135  ;;  %v3734_v26 = vpack.i.b16 %v3733_v19, %v3732_v14  ;;  %v3757_v14 = vshrl.u32 %v3699_v18, 16  ;;  %v1567_v3 = vcombine.low %v13702_v13, %v10148_v21 }
 0x214   : > { %13695 = vst [vmem:[#allocation63_spill] sm:$0xff] %v10504_v53  ;;  %13696 = vst [vmem:[#allocation41_spill] sm:$0xff] %v10506_v8  ;;  %v3665_v8 = vrot.slane %v3657_v22, %v8828_v61  ;;  %v13705_v53 = vld [vmem:[#allocation23_spill] sm:$0xff] }
 0x215   : > { %3789 = vrot.lane.b32.xlu1 %v8123_v7, %s8496_s12  ;;  %2434 = vrot.lane.b32.xlu0 %v8055_v59, %s8497_s13  ;;  %v8124_v7 = vcombine.low %v3740_v1, %v3740_v1  ;;  %v3744_v59 = vshrl.u32 %v10438_v46, 16  ;;  %v8122_v1 = vcombine.low %v3734_v26, %v3734_v26  ;;  %v10534_v46 = vrot.slane %v3658_v32, %v8828_v61  ;;  %s8528_s12 = smov 80  }
 0x216   : > { %v3755_v19 = vpack.i.b16 %v3699_v18, %v3665_v8  ;;  %v3756_v22 = vshrl.u32 %v3665_v8, 16  ;;  %v3769_v32 = vshrl.u32 %v10527_v39, 16 }
 0x217   : > { %v10518_v16 = vpop.permute.xlu1 %2787  ;;  %v10520_v36 = vpop.permute.xlu0 %1657  ;;  %v3746_v20 = vpack.i.b16 %v3745_v48, %v3744_v59  ;;  %v3768_v21 = vshrl.u32 %v10534_v46, 16 }
 0x218   : > { %13698 = vst [vmem:[#allocation58_spill] sm:$0xff] %v10518_v16  ;;  %v8129_v59 = vcombine.low %v3755_v19, %v3755_v19 }
 0x219   : > { %3793 = vrot.lane.b32.xlu1 %v8124_v7, %s8503_s19  ;;  %3468 = vrot.lane.b32.xlu0 %v8110_v42, %s8497_s13  ;;  %v2003_v42 = vcombine.low %v13701_v28, %v13700_v44  ;;  %v8126_v48 = vcombine.low %v3746_v20, %v3746_v20  ;;  %v1577_v44 = vcombine.low %v10050_v38, %v10064_v60  ;;  %s8517_s19 = smov 38  }
 0x21a   : > { %v3673_v20 = vcombine.high %v3665_v8, %v13496_v35  ;;  %v3770_v28 = vpack.i.b16 %v3769_v32, %v3768_v21 }
 0x21b   : > { %v10529_v34 = vpop.permute.xlu1 %3143  ;;  %v10531_v37 = vpop.permute.xlu0 %2089  ;;  %v10557_v19 = vrot.slane %v2003_v42, %v8828_v61  ;;  %v10572_v8 = vrot.slane %v1577_v44, %v8828_v61 }
 0x21c   : > { %13699 = vst [vmem:[#allocation56_spill] sm:$0xff] %v10529_v34  ;;  %v3758_v34 = vpack.i.b16 %v3757_v14, %v3756_v22  ;;  %v10560_v14 = vrot.slane %v1567_v3, %v8828_v61  ;;  %v3762_v42 = vshrl.u32 %v3673_v20, 16 }
 0x21d   : > { %3797 = vrot.lane.b32.xlu1 %v8125_v15, %s8494_s10  ;;  %3785 = vrot.lane.b32.xlu0 %v8122_v1, %s8498_s14  ;;  %v3707_v15 = vcombine.high %v3699_v18, %v13496_v35  ;;  %v13706_v1 = vld [vmem:[#allocation19_spill] sm:$0xff]  ;;  %v13707_v18 = vld [vmem:[#allocation76_spill] sm:$0xff]  ;;  %v2072_v3 = vshrl.u32 %v10557_v19, 16  ;;  %s8513_s14 = smov 110   ;;  %s8527_s10 = smov 96  }
 0x21e   : > { %v2013_v16 = vcombine.low %v13706_v1, %v13705_v53  ;;  %v8030_v53 = vcombine.low %v13707_v18, %v13707_v18  ;;  %v8130_v60 = vcombine.low %v3758_v34, %v3758_v34  ;;  %v1386_v34 = vsel %vm13392_vm9, %v10318_v0, %v10386_v9  ;;  %v13709_v18 = vld [vmem:[#allocation78_spill] sm:$0xff] }
 0x21f   : > { %v10542_v7 = vpop.permute.xlu1 %3476  ;;  %v10544_v26 = vpop.permute.xlu0 %2438  ;;  %v3761_v13 = vpack.i.b16 %v3707_v15, %v3673_v20  ;;  %v1636_v32 = vshrl.u32 %v10560_v14, 16  ;;  %v8134_v1 = vcombine.low %v3770_v28, %v3770_v28  ;;  %v1028_v20 = vsel %vm13392_vm9, %v9993_v23, %v13709_v18 }
 0x220   : > { %13703 = vst [vmem:[#allocation42_spill] sm:$0xff] %v10542_v7  ;;  %13704 = vst [vmem:[#allocation44_spill] sm:$0xff] %v10544_v26  ;;  %v1637_v9 = vshrl.u32 %v10572_v8, 16  ;;  %v13712_v7 = vld [vmem:[#allocation12_spill] sm:$0xff]  ;;  %v1388_v23 = vsel %vm1029_vm10, %v1386_v34, %v10336_v5  ;;  %v2677_v5 = vcombine.low %v10161_v24, %v10178_v30  ;;  %v3749_v30 = vpack.i.b16 %v10444_v43, %v10456_v33 }
 0x221   : > { %3801 = vrot.lane.b32.xlu1 %v8126_v48, %s8499_s15  ;;  %3813 = vrot.lane.b32.xlu0 %v8129_v59, %s8501_s17  ;;  %v3763_v48 = vshrl.u32 %v3707_v15, 16  ;;  %v10569_v59 = vrot.slane %v2013_v16, %v8828_v61  ;;  %v8131_v44 = vcombine.low %v3761_v13, %v3761_v13  ;;  %v1723_v13 = vsel %vm13392_vm9, %v10404_v17, %v10272_v40  ;;  %s8514_s15 = smov 56  }
 0x222   : > { %v1638_v40 = vpack.i.b16 %v1637_v9, %v1636_v32  ;;  %v2687_v32 = vcombine.low %v10083_v10, %v10102_v52  ;;  %v10637_v10 = vrot.slane %v2677_v5, %v8828_v61  ;;  %v13719_v5 = vld [vmem:[#allocation79_spill] sm:$0xff] }
 0x223   : > { %v10564_v22 = vpop.permute.xlu1 %1693  ;;  %v10566_v38 = vpop.permute.xlu0 %2755  ;;  %v3764_v21 = vpack.i.b16 %v3763_v48, %v3762_v42  ;;  %v2073_v0 = vshrl.u32 %v10569_v59, 16  ;;  %v1031_v48 = vsel %vm1029_vm10, %v1028_v20, %v10008_v29 }
 0x224   : > { %13708 = vst [vmem:[#allocation53_spill] sm:$0xff] %v10566_v38  ;;  %v13711_v38 = vld [vmem:[#allocation22_spill] sm:$0xff]  ;;  %v8032_v33 = vcombine.low %v1638_v40, %v1638_v40  ;;  %v10651_v9 = vrot.slane %v2687_v32, %v8828_v61  ;;  %v10693_v40 = vcombine.high %v10534_v46, %v13496_v35  ;;  %v13721_v32 = vld [vmem:[#allocation32_spill] sm:$0xff] }
 0x225   : > { %1697 = vrot.lane.b32.xlu1 %v8030_v53, %s8509_s27  ;;  %3817 = vrot.lane.b32.xlu0 %v8130_v60, %s8506_s22  ;;  %v13710_v53 = vld [vmem:[#allocation47_spill] sm:$0xff]  ;;  %v13713_v26 = vpack.i.b16 %v13711_v38, %v13712_v7  ;;  %v3767_v7 = vpack.i.b16 %v10527_v39, %v10534_v46  ;;  %v8132_v29 = vcombine.low %v3764_v21, %v3764_v21  ;;  %s8520_s22 = smov 58  }
 0x226   : > { %v8047_v60 = vcombine.low %v13710_v53, %v13710_v53  ;;  %v2074_v18 = vpack.i.b16 %v2073_v0, %v2072_v3 }
 0x227   : > { %v10581_v16 = vpop.permute.xlu1 %2125  ;;  %v10583_v15 = vpop.permute.xlu0 %3111  ;;  %v1709_v28 = vsel %vm1004_vm1, %v13713_v26, %v10366_v4  ;;  %v1390_v4 = vsel %vm1032_vm11, %v1388_v23, %v10431_v25  ;;  %v1725_v25 = vsel %vm1029_vm10, %v1723_v13, %v10364_v31  ;;  %v8133_v3 = vcombine.low %v3767_v7, %v3767_v7 }
 0x228   : > { %v1711_v42 = vsel %vm1008_vm2, %v1709_v28, %v10375_v54  ;;  %v13715_v54 = vld [vmem:[#allocation14_spill] sm:$0xff]  ;;  %v1392_v24 = vsel %vm1035_vm12, %v1390_v4, %v10384_v11  ;;  %v1727_v52 = vsel %vm1032_vm11, %v1725_v25, %v10373_v57  ;;  %v8049_v0 = vcombine.low %v2074_v18, %v2074_v18  ;;  %v13718_v4 = vld [vmem:[#allocation8_spill] sm:$0xff] }
 0x229   : > { %3833 = vrot.lane.b32.xlu1 %v8134_v1, %s8507_s23  ;;  %3821 = vrot.lane.b32.xlu0 %v8131_v44, %s8504_s20  ;;  %v1713_v26 = vsel %vm1011_vm3, %v1711_v42, %v10416_v27  ;;  %v13714_v1 = vld [vmem:[#allocation48_spill] sm:$0xff]  ;;  %v10664_v13 = vcombine.high %v10527_v39, %v13496_v35  ;;  %v2745_v23 = vpack.i.b16 %v10651_v9, %v10637_v10  ;;  %s8518_s20 = smov 94   ;;  %s8521_s23 = smov 76  }
 0x22a   : > { %v3047_v44 = vcombine.low %v13715_v54, %v13714_v1  ;;  %v13716_v27 = vld [vmem:[#allocation80_spill] sm:$0xff]  ;;  %v1715_v31 = vsel %vm1014_vm4, %v1713_v26, %v10320_v41  ;;  %v1394_v41 = vsel %vm13394_vm13, %v1392_v24, %v10396_v45  ;;  %v1729_v45 = vsel %vm1035_vm12, %v1727_v52, %v10402_v2  ;;  %v13717_v2 = vld [vmem:[#allocation27_spill] sm:$0xff] }
 0x22b   : > { %v10616_v38 = vpop.permute.xlu1 %2446  ;;  %v10618_v34 = vpop.permute.xlu0 %3472  ;;  %v1034_v21 = vsel %vm1032_vm11, %v1031_v48, %v13716_v27  ;;  %v1717_v11 = vsel %vm1017_vm5, %v1715_v31, %v10520_v36  ;;  %v8127_v36 = vcombine.low %v3749_v30, %v3749_v30  ;;  %v1396_v48 = vsel %vm1041_vm14, %v1394_v41, %v10351_v56  ;;  %v13723_v30 = vld [vmem:[#allocation35_spill] sm:$0xff] }
 0x22c   : > { %v1037_v53 = vsel %vm1035_vm12, %v1034_v21, %v10037_v12  ;;  %v2159_v12 = vsel %vm13392_vm9, %v10258_v6, %v10209_v62  ;;  %vm13395_vm9 = vcmask 1043456   ;;  %v3037_v7 = vcombine.low %v13718_v4, %v13717_v2  ;;  %v13724_v21 = vld [vmem:[#allocation84_spill] sm:$0xff]  ;;  %v13730_v4 = vld [vmem:[#allocation30_spill] sm:$0xff] }
 0x22d   : > { %2133 = vrot.lane.b32.xlu1 %v8047_v60, %s8509_s27  ;;  %3825 = vrot.lane.b32.xlu0 %v8132_v29, %s8508_s26  ;;  %v10679_v39 = vrot.slane %v3047_v44, %v8828_v61  ;;  %v1731_v56 = vsel %vm13394_vm13, %v1729_v45, %v10294_v58  ;;  %v1040_v26 = vsel %vm13394_vm13, %v1037_v53, %v13719_v5  ;;  %s8522_s26 = smov 22  }
 0x22e   : > { %v1733_v58 = vsel %vm1041_vm14, %v1731_v56, %v10472_v47  ;;  %v8082_v54 = vcombine.low %v2745_v23, %v2745_v23  ;;  %v3773_v18 = vpack.i.b16 %v10664_v13, %v10693_v40  ;;  %v10716_v47 = vrot.slane %v3037_v7, %v8828_v61 }
 0x22f   : > { %v10643_v20 = vpop.permute.xlu1 %2791  ;;  %v1662_v43 = vpop.permute.xlu0 %1661  ;;  %v1043_v31 = vsel %vm1041_vm14, %v1040_v26, %v13724_v21  ;;  %v13733_v21 = vld [vmem:[#allocation87_spill] sm:$0xff] }
 0x230   : > { %v1719_v60 = vsel %vm13397_vm6, %v1717_v11, %v1662_v43  ;;  %v2071_v11 = vpack.i.b16 %v10569_v59, %v10557_v19  ;;  %v13728_v19 = vld [vmem:[#allocation83_spill] sm:$0xff] }
 0x231   : > { %v1721_v57 = vsel %vm13393_vm7, %v1719_v60, %v10404_v17  ;;  %1705 = vrot.lane.b32.xlu1 %v8032_v33, %s8500_s16  ;;  %3829 = vrot.lane.b32.xlu0 %v8133_v3, %s8502_s18  ;;  %v1635_v17 = vpack.i.b16 %v10572_v8, %v10560_v14  ;;  %v2161_v8 = vsel %vm1029_vm10, %v2159_v12, %v10219_v50  ;;  %vm13398_vm7 = vcmask 1014784   ;;  %v13725_v33 = vld [vmem:[#allocation26_spill] sm:$0xff]  ;;  %s8516_s18 = smov 20  }
 0x232   : > { %v3895_v28 = vrot.slane %v1721_v57, 4  ;;  %v1398_v50 = vsel %vm13398_vm7, %v1396_v48, %v10448_v55  ;;  %v1735_v44 = vsel %vm13398_vm7, %v1733_v58, %v10564_v22  ;;  %v2163_v27 = vsel %vm1032_vm11, %v2161_v8, %v13723_v30  ;;  %v13729_v48 = vld [vmem:[#allocation81_spill] sm:$0xff] }
 0x233   : > { %v10672_v42 = vpop.permute.xlu1 %3147  ;;  %v10674_v62 = vpop.permute.xlu0 %2093  ;;  %v8031_v1 = vcombine.low %v1635_v17, %v1635_v17  ;;  %v2165_v3 = vsel %vm1035_vm12, %v2163_v27, %v10429_v49  ;;  %v3890_v52 = vrot.slane %v1398_v50, 6  ;;  %v3896_v41 = vrot.slane %v1735_v44, 4  ;;  %v13727_v49 = vld [vmem:[#allocation11_spill] sm:$0xff] }
 0x234   : > { %v10683_v14 = vsel %vm13395_vm9, %v10369_v51, %v3895_v28  ;;  %v13720_v51 = vld [vmem:[#allocation49_spill] sm:$0xff]  ;;  %v2167_v53 = vsel %vm13394_vm13, %v2165_v3, %v13725_v33  ;;  %v3105_v60 = vpack.i.b16 %v10679_v39, %v10716_v47  ;;  %v8064_v59 = vcombine.low %v13728_v19, %v13728_v19  ;;  %v13737_v33 = vld [vmem:[#allocation28_spill] sm:$0xff] }
 0x235   : > { %2141 = vrot.lane.b32.xlu1 %v8049_v0, %s8500_s16  ;;  %3805 = vrot.lane.b32.xlu0 %v8127_v36, %s8497_s13  ;;  %v2340_v29 = vcombine.low %v13720_v51, %v10199_v63  ;;  %v13722_v63 = vld [vmem:[#allocation40_spill] sm:$0xff]  ;;  %v13726_v0 = vld [vmem:[#allocation34_spill] sm:$0xff]  ;;  %v2169_v36 = vsel %vm1041_vm14, %v2167_v53, %v10581_v16  ;;  %v8135_v28 = vcombine.low %v3773_v18, %v3773_v18  ;;  %vm13396_vm13 = vcmask 1045504   ;;  %v13731_v16 = vld [vmem:[#allocation31_spill] sm:$0xff]  ;;  %s8512_s13 = smov 92  }
 0x236   : > { %v2350_v24 = vcombine.low %v13722_v63, %v13721_v32  ;;  %v3374_v57 = vcombine.low %v13727_v49, %v13726_v0  ;;  %v1046_v2 = vsel %vm13398_vm7, %v1043_v31, %v13729_v48  ;;  %v3384_v7 = vcombine.low %v13731_v16, %v13730_v4  ;;  %v13732_v63 = vld [vmem:[#allocation82_spill] sm:$0xff]  ;;  %v13739_v49 = vld [vmem:[#allocation89_spill] sm:$0xff] }
 0x237   : > { %v10705_v25 = vpop.permute.xlu1 %3480  ;;  %v10707_v46 = vpop.permute.xlu0 %2414  ;;  %v10727_v43 = vrot.slane %v2340_v29, %v8828_v61  ;;  %v3926_v56 = vsel %vm3922_vm8, %v1046_v2, %v3890_v52  ;;  %v2746_v18 = vshrl.u32 %v10637_v10, 16  ;;  %v13734_v31 = vld [vmem:[#allocation86_spill] sm:$0xff]  ;;  %v13735_v52 = vld [vmem:[#allocation88_spill] sm:$0xff]  ;;  %v2747_v10 = vshrl.u32 %v10651_v9, 16  ;;  %v13740_v19 = vld [vmem:[#allocation33_spill] sm:$0xff] }
 0x238   : > { %v10744_v17 = vrot.slane %v2350_v24, %v8828_v61  ;;  %v3933_v26 = vsel %vm13395_vm9, %v3926_v56, %v3896_v41  ;;  %v3381_v51 = vrot.slane %v3374_v57, %v8828_v61  ;;  %v3391_v44 = vrot.slane %v3384_v7, %v8828_v61  ;;  %v13743_v7 = vld [vmem:[#allocation18_spill] sm:$0xff] }
 0x239   : > { %2811 = vrot.lane.b32.xlu1 %v8082_v54, %s8495_s11  ;;  %1701 = vrot.lane.b32.xlu0 %v8031_v1, %s8495_s11  ;;  %v8103_v1 = vcombine.low %v3105_v60, %v3105_v60  ;;  %v8048_v54 = vcombine.low %v2071_v11, %v2071_v11  ;;  %v8081_v24 = vcombine.low %v13732_v63, %v13732_v63  ;;  %v13736_v11 = vld [vmem:[#allocation29_spill] sm:$0xff]  ;;  %vm13744_vm9 = vcmask 1031168  }
 0x23a   : > { %v2408_v5 = vpack.i.b16 %v10744_v17, %v10727_v43  ;;  %v3442_v30 = vpack.i.b16 %v3391_v44, %v3381_v51  ;;  %v3443_v27 = vshrl.u32 %v3381_v51, 16  ;;  %v3711_v3 = vcombine.low %v13734_v31, %v13733_v21 }
 0x23b   : > { %v10737_v12 = vpop.permute.xlu1 %2129  ;;  %v10739_v45 = vpop.permute.xlu0 %2759  ;;  %v13738_v53 = vpack.i.b16 %v13736_v11, %v13737_v33  ;;  %v2748_v4 = vpack.i.b16 %v2747_v10, %v2746_v18  ;;  %v8102_v9 = vcombine.low %v13743_v7, %v13743_v7  ;;  %v2409_v21 = vshrl.u32 %v10727_v43, 16  ;;  %v13745_v11 = vld [vmem:[#allocation77_spill] sm:$0xff] }
 0x23c   : > { %v2171_v23 = vsel %vm13398_vm7, %v2169_v36, %v10737_v12  ;;  %v8065_v32 = vcombine.low %v2408_v5, %v2408_v5  ;;  %v3444_v36 = vshrl.u32 %v3391_v44, 16  ;;  %v8120_v56 = vcombine.low %v3442_v30, %v3442_v30 }
 0x23d   : > { %v3902_v8 = vrot.slane %v2171_v23, 2  ;;  %2470 = vrot.lane.b32.xlu1 %v8064_v59, %s8509_s27  ;;  %3837 = vrot.lane.b32.xlu0 %v8135_v28, %s8505_s21  ;;  %v2145_v41 = vsel %vm1004_vm1, %v13738_v53, %v13735_v52  ;;  %v13741_v59 = vld [vmem:[#allocation50_spill] sm:$0xff]  ;;  %v3718_v5 = vrot.slane %v3711_v3, %v8828_v61  ;;  %v3107_v30 = vshrl.u32 %v10679_v39, 16  ;;  %s8519_s21 = smov 112  }
 0x23e   : > { %v2147_v57 = vsel %vm1008_vm2, %v2145_v41, %v13739_v49  ;;  %v3721_v28 = vcombine.low %v13741_v59, %v13740_v19  ;;  %v13742_v23 = vld [vmem:[#allocation54_spill] sm:$0xff]  ;;  %v8119_v33 = vcombine.low %v13745_v11, %v13745_v11  ;;  %v2410_v53 = vshrl.u32 %v10744_v17, 16  ;;  %v13751_v11 = vld [vmem:[#allocation63_spill] sm:$0xff] }
 0x23f   : > { %v10759_v29 = vpop.permute.xlu1 %2450  ;;  %v10761_v50 = vpop.permute.xlu0 %3115  ;;  %v3941_v58 = vsel %vm13396_vm13, %v3933_v26, %v3902_v8  ;;  %v2149_v2 = vsel %vm1011_vm3, %v2147_v57, %v13742_v23  ;;  %v3445_v8 = vpack.i.b16 %v3444_v36, %v3443_v27  ;;  %v3775_v43 = vshrl.u32 %v10664_v13, 16  ;;  %v3968_v23 = vld [vmem:[%s13309_s4] sm:$0xff] }
 0x240   : > { %3983 = vmatprep.subr.bf16.mxu1 %v3941_v58  ;;  %v2151_v16 = vsel %vm1014_vm4, %v2149_v2, %v10531_v37  ;;  %v3774_v49 = vshrl.u32 %v10693_v40, 16  ;;  %v3780_v57 = vshrl.u32 %v3718_v5, 16 }
 0x241   : > { %3171 = vrot.lane.b32.xlu1 %v8103_v1, %s8495_s11  ;;  %2137 = vrot.lane.b32.xlu0 %v8048_v54, %s8495_s11  ;;  %v2153_v26 = vsel %vm1017_vm5, %v2151_v16, %v10674_v62  ;;  %v3728_v54 = vrot.slane %v3721_v28, %v8828_v61  ;;  %v8121_v62 = vcombine.low %v3445_v8, %v3445_v8 }
 0x242   : > { %v3776_v59 = vpack.i.b16 %v3775_v43, %v3774_v49 }
 0x243   : > { %v10777_v60 = vpop.permute.xlu1 %2795  ;;  %v10779_v0 = vpop.permute.xlu0 %3448  ;;  %v3779_v18 = vpack.i.b16 %v3728_v54, %v3718_v5  ;;  %v3781_v28 = vshrl.u32 %v3728_v54, 16 }
 0x244   : > { %v8136_v16 = vcombine.low %v3776_v59, %v3776_v59  ;;  %v13757_v59 = vld [vmem:[#allocation56_spill] sm:$0xff] }
 0x245   : > { %2474 = vrot.lane.b32.xlu1 %v8065_v32, %s8495_s11  ;;  %2807 = vrot.lane.b32.xlu0 %v8081_v24, %s8509_s27  ;;  %v8083_v24 = vcombine.low %v2748_v4, %v2748_v4  ;;  %v8137_v31 = vcombine.low %v3779_v18, %v3779_v18  ;;  %v3782_v2 = vpack.i.b16 %v3781_v28, %v3780_v57  ;;  %v13747_v18 = vld [vmem:[#allocation51_spill] sm:$0xff] }
 0x247   : > { %v10797_v51 = vpop.permute.xlu1 %3151  ;;  %v2098_v58 = vpop.permute.xlu0 %2097 }
 0x248   : > { %v2155_v1 = vsel %vm13397_vm6, %v2153_v26, %v2098_v58 }
 0x249   : > { %v2157_v37 = vsel %vm13744_vm9, %v2155_v1, %v10258_v6  ;;  %3508 = vrot.lane.b32.xlu1 %v8120_v56, %s8495_s11  ;;  %3167 = vrot.lane.b32.xlu0 %v8102_v9, %s8509_s27  ;;  %v3106_v6 = vshrl.u32 %v10716_v47, 16  ;;  %v8138_v9 = vcombine.low %v3782_v2, %v3782_v2  ;;  %vm13748_vm9 = vcmask 130048  }
 0x24a   : > { %v3901_v44 = vrot.slane %v2157_v37, 2  ;;  %vm13756_vm6 = vmmov %vm13748_vm9 }
 0x24b   : > { %v10805_v32 = vpop.permute.xlu1 %3484  ;;  %v10807_v63 = vpop.permute.xlu0 %2418  ;;  %v3108_v39 = vpack.i.b16 %v3107_v30, %v3106_v6 }
 0x24c   : > { %v3938_v27 = vsel %vm13396_vm13, %v10683_v14, %v3901_v44  ;;  %v2411_v14 = vpack.i.b16 %v2410_v53, %v2409_v21  ;;  %v13746_v44 = vld [vmem:[#allocation16_spill] sm:$0xff]  ;;  %v13750_v21 = vld [vmem:[#allocation58_spill] sm:$0xff]  ;;  %vm13753_vm13 = vmmov %vm13748_vm9 }
 0x24d   : > { %3512 = vrot.lane.b32.xlu1 %v8121_v62, %s8500_s16  ;;  %2815 = vrot.lane.b32.xlu0 %v8083_v24, %s8500_s16  ;;  %v8104_v10 = vcombine.low %v3108_v39, %v3108_v39  ;;  %v2833_v62 = vsel %vm13748_vm9, %v13747_v18, %v13746_v44  ;;  %v13754_v53 = vld [vmem:[#allocation55_spill] sm:$0xff] }
 0x24e   : > { %3984 = vmatpush1.bf16.msra.mxu1 %v3938_v27  ;;  %v8066_v17 = vcombine.low %v2411_v14, %v2411_v14  ;;  %v13749_v27 = vld [vmem:[#allocation15_spill] sm:$0xff]  ;;  %v13755_v14 = vld [vmem:[#allocation41_spill] sm:$0xff] }
 0x24f   : > { %v2455_v3 = vpop.permute.xlu1 %2454  ;;  %v10816_v52 = vpop.permute.xlu0 %2763  ;;  %v2835_v6 = vsel %vm1029_vm10, %v2833_v62, %v13749_v27 }
 0x251   : > { %3845 = vrot.lane.b32.xlu1 %v8137_v31, %s8495_s11  ;;  %3504 = vrot.lane.b32.xlu0 %v8119_v33, %s8509_s27  ;;  %v2837_v31 = vsel %vm1032_vm11, %v2835_v6, %v13750_v21  ;;  %v13752_v33 = vld [vmem:[#allocation44_spill] sm:$0xff] }
 0x252   : > { %v2496_v39 = vsel %vm13753_vm13, %v13752_v33, %v13751_v11  ;;  %v2839_v49 = vsel %vm1035_vm12, %v2837_v31, %v10643_v20  ;;  %vm13758_vm13 = vcmask 719872   ;;  %v13759_v20 = vld [vmem:[#allocation42_spill] sm:$0xff]  ;;  %v13762_v31 = vld [vmem:[#allocation25_spill] sm:$0xff] }
 0x253   : > { %v2800_v41 = vpop.permute.xlu1 %2799  ;;  %v10823_v47 = vpop.permute.xlu0 %3119  ;;  %v2498_v43 = vsel %vm1029_vm10, %v2496_v39, %v10616_v38  ;;  %v2841_v2 = vsel %vm13758_vm13, %v2839_v49, %v10777_v60  ;;  %v3530_v44 = vsel %vm13756_vm6, %v10618_v34, %v13759_v20  ;;  %vm13760_vm9 = vmmov %vm13758_vm13  ;;  %v13763_v11 = vld [vmem:[#allocation61_spill] sm:$0xff]  ;;  %v13768_v49 = vld [vmem:[#allocation43_spill] sm:$0xff] }
 0x254   : > { %v3532_v60 = vsel %vm1029_vm10, %v3530_v44, %v10705_v25  ;;  %vm13761_vm13 = vmmov %vm13760_vm9  ;;  %v13764_v39 = vld [vmem:[#allocation65_spill] sm:$0xff] }
 0x255   : > { %3175 = vrot.lane.b32.xlu0 %v8104_v10, %s8500_s16  ;;  %3971 = vperm.xlu1 %8447, %v3968_v23   ;;  %v3193_v10 = vsel %vm13756_vm6, %v13755_v14, %v13754_v53  ;;  %v2500_v23 = vsel %vm1032_vm11, %v2498_v43, %v10759_v29  ;;  %v3534_v21 = vsel %vm1032_vm11, %v3532_v60, %v10805_v32  ;;  %v13766_v43 = vld [vmem:[#allocation53_spill] sm:$0xff]  ;;  %vm13770_vm6 = vmmov %vm13760_vm9 }
 0x256   : > { %v3195_v28 = vsel %vm1029_vm10, %v3193_v10, %v13757_v59  ;;  %v2502_v38 = vsel %vm1035_vm12, %v2500_v23, %v2455_v3  ;;  %v13765_v53 = vpack.i.b16 %v13763_v11, %v13764_v39  ;;  %v13780_v11 = vld [vmem:[#allocation67_spill] sm:$0xff]  ;;  %v13781_v39 = vld [vmem:[#allocation74_spill] sm:$0xff] }
 0x257   : > { %v3156_v36 = vpop.permute.xlu1 %3155  ;;  %v10828_v19 = vpop.permute.xlu0 %3452 }
 0x258   : > { %v2819_v25 = vsel %vm1004_vm1, %v13765_v53, %v13762_v31  ;;  %v13782_v53 = vpack.i.b16 %v13780_v11, %v13781_v39  ;;  %v13795_v39 = vld [vmem:[#allocation37_spill] sm:$0xff] }
 0x259   : > { %2478 = vrot.lane.b32.xlu0 %v8066_v17, %s8500_s16  ;;  %v2821_v32 = vsel %vm1008_vm2, %v2819_v25, %v13766_v43 }
 0x25a   : > { %v3516_v25 = vsel %vm1004_vm1, %v13782_v53, %v10779_v0 }
 0x25b   : > { %v3489_v13 = vpop.permute.xlu1 %3488  ;;  %v10834_v4 = vpop.permute.xlu0 %2422 }
 0x25d   : > { %3841 = vrot.lane.b32.xlu0 %v8136_v16, %s8509_s27  ;;  %v3197_v16 = vsel %vm1032_vm11, %v3195_v28, %v10672_v42  ;;  %s8523_s27 = smov 40  }
 0x25e   : > { %v3199_v62 = vsel %vm1035_vm12, %v3197_v16, %v10797_v51 }
 0x25f   : > { %v2459_v40 = vpop.permute.xlu1 %2458  ;;  %v2768_v7 = vpop.permute.xlu0 %2767  ;;  %v3201_v42 = vsel %vm13761_vm13, %v3199_v62, %v3156_v36  ;;  %v3536_v36 = vsel %vm1035_vm12, %v3534_v21, %v3489_v13  ;;  %vm13772_vm13 = vcmask 1043456  }
 0x260   : > { %v2504_v27 = vsel %vm13760_vm9, %v2502_v38, %v2459_v40  ;;  %vm13771_vm9 = vcmask 883712  }
 0x261   : > { %3849 = vrot.lane.b32.xlu0 %v8138_v9, %s8500_s16  ;;  %v2843_v9 = vsel %vm1041_vm14, %v2841_v2, %v2800_v41  ;;  %v2823_v2 = vsel %vm1011_vm3, %v2821_v32, %v10739_v45  ;;  %s8515_s16 = smov 74  }
 0x262   : > { %v2825_v44 = vsel %vm1014_vm4, %v2823_v2, %v10816_v52  ;;  %v13773_v52 = vld [vmem:[#allocation68_spill] sm:$0xff] }
 0x263   : > { %v10838_v8 = vpop.permute.xlu1 %2803  ;;  %v3124_v56 = vpop.permute.xlu0 %3123  ;;  %v2827_v62 = vsel %vm1017_vm5, %v2825_v44, %v2768_v7 }
 0x264   : > { %v2845_v29 = vsel %vm13398_vm7, %v2843_v9, %v10838_v8 }
 0x267   : > { %v3160_v5 = vpop.permute.xlu1 %3159  ;;  %v10840_v26 = vpop.permute.xlu0 %3456 }
 0x268   : > { %v3203_v51 = vsel %vm1041_vm14, %v3201_v42, %v3160_v5  ;;  %v13767_v5 = vld [vmem:[#allocation38_spill] sm:$0xff]  ;;  %v13774_v42 = vld [vmem:[#allocation71_spill] sm:$0xff] }
 0x269   : > { %v13769_v59 = vpack.i.b16 %v13767_v5, %v13768_v49 }
 0x26b   : > { %v3493_v58 = vpop.permute.xlu1 %3492  ;;  %v10842_v1 = vpop.permute.xlu0 %2426  ;;  %v3179_v28 = vsel %vm1004_vm1, %v13769_v59, %v10583_v15 }
 0x26c   : > { %v3538_v23 = vsel %vm13770_vm6, %v3536_v36, %v3493_v58  ;;  %v3181_v13 = vsel %vm1008_vm2, %v3179_v28, %v10761_v50  ;;  %vm13776_vm6 = vmmov %vm13771_vm9 }
 0x26d   : > { %v3183_v15 = vsel %vm1011_vm3, %v3181_v13, %v10823_v47 }
 0x26e   : > { %v3185_v50 = vsel %vm1014_vm4, %v3183_v15, %v3124_v56  ;;  %v13789_v15 = vld [vmem:[#allocation20_spill] sm:$0xff] }
 0x26f   : > { %v2463_v54 = vpop.permute.xlu1 %2462  ;;  %v2772_v37 = vpop.permute.xlu0 %2771 }
 0x270   : > { %v2506_v3 = vsel %vm1041_vm14, %v2504_v27, %v2463_v54  ;;  %v3908_v54 = vrot.slane %v2845_v29, 6  ;;  %v2829_v27 = vsel %vm13771_vm9, %v2827_v62, %v2772_v37  ;;  %vm13778_vm9 = vcmask 1031168  }
 0x273   : > { %v10847_v24 = vpop.permute.xlu1 %3163  ;;  %v3128_v30 = vpop.permute.xlu0 %3127 }
 0x274   : > { %v3205_v10 = vsel %vm13398_vm7, %v3203_v51, %v10847_v24  ;;  %v3187_v29 = vsel %vm1017_vm5, %v3185_v50, %v3128_v30 }
 0x275   : > { %v3914_v58 = vrot.slane %v3205_v10, 4 }
 0x277   : > { %v3497_v57 = vpop.permute.xlu1 %3496  ;;  %v10863_v17 = vpop.permute.xlu0 %3460 }
 0x278   : > { %v3540_v16 = vsel %vm1041_vm14, %v3538_v23, %v3497_v57 }
 0x27b   : > { %v10887_v41 = vpop.permute.xlu1 %2466  ;;  %v2431_v6 = vpop.permute.xlu0 %2430 }
 0x27c   : > { %v2508_v40 = vsel %vm13398_vm7, %v2506_v3, %v10887_v41  ;;  %v13775_v3 = vpack.i.b16 %v13773_v52, %v13774_v42 }
 0x27d   : > { %v3949_v38 = vsel %vm3922_vm8, %v2508_v40, %v3908_v54  ;;  %v2831_v40 = vsel %vm13778_vm9, %v2829_v27, %v13747_v18 }
 0x27e   : > { %v3955_v60 = vsel %vm13772_vm13, %v3949_v38, %v3914_v58  ;;  %v2482_v47 = vsel %vm1004_vm1, %v13775_v3, %v10707_v46  ;;  %vm13779_vm13 = vmmov %vm13778_vm9  ;;  %v3907_v18 = vrot.slane %v2831_v40, 6  ;;  %v13790_v58 = vld [vmem:[#allocation39_spill] sm:$0xff] }
 0x27f   : > { %v10916_v9 = vpop.permute.xlu1 %3500  ;;  %v3132_v20 = vpop.permute.xlu0 %3131  ;;  %v2484_v37 = vsel %vm1008_vm2, %v2482_v47, %v10807_v63 }
 0x280   : > { %v3542_v45 = vsel %vm13398_vm7, %v3540_v16, %v10916_v9  ;;  %v3189_v21 = vsel %vm13776_vm6, %v3187_v29, %v3132_v20  ;;  %vm13777_vm7 = vcmask 1045504   ;;  %v2486_v30 = vsel %vm1011_vm3, %v2484_v37, %v10834_v4 }
 0x281   : > { %v3920_v57 = vrot.slane %v3542_v45, 2  ;;  %v2488_v46 = vsel %vm1014_vm4, %v2486_v30, %v10842_v1  ;;  %v3191_v31 = vsel %vm13779_vm13, %v3189_v21, %v13755_v14  ;;  %v3518_v4 = vsel %vm1008_vm2, %v3516_v25, %v10828_v19  ;;  %v13793_v21 = vld [vmem:[#allocation59_spill] sm:$0xff] }
 0x282   : > { %v2490_v63 = vsel %vm1017_vm5, %v2488_v46, %v2431_v6  ;;  %v3520_v1 = vsel %vm1011_vm3, %v3518_v4, %v10840_v26  ;;  %v3913_v14 = vrot.slane %v3191_v31, 4  ;;  %v13791_v45 = vpack.i.b16 %v13789_v15, %v13790_v58 }
 0x283   : > { %v10935_v51 = vpop.permute.xlu1 %3809  ;;  %v3465_v7 = vpop.permute.xlu0 %3464  ;;  %v3962_v56 = vsel %vm13777_vm7, %v3955_v60, %v3920_v57  ;;  %vm13783_vm7 = vmmov %vm13776_vm6  ;;  %v3522_v0 = vsel %vm1014_vm4, %v3520_v1, %v10863_v17 }
 0x284   : > { %3985 = vmatprep.subr.bf16.mxu1 %v3962_v56  ;;  %vm13784_vm6 = vmmov %vm13778_vm9  ;;  %v3524_v32 = vsel %vm1017_vm5, %v3522_v0, %v3465_v7  ;;  %vm13785_vm9 = vcmask 1043456  }
 0x285   : > { %vm13786_vm13 = vmmov %vm13783_vm7 }
 0x287   : > { %v3790_v36 = vpop.permute.xlu1 %3789  ;;  %v2435_v54 = vpop.permute.xlu0 %2434 }
 0x288   : > { %v2492_v10 = vsel %vm13783_vm7, %v2490_v63, %v2435_v54  ;;  %vm13787_vm7 = vmmov %vm13784_vm6  ;;  %v13798_v54 = vld [vmem:[#allocation85_spill] sm:$0xff] }
 0x289   : > { %v2494_v43 = vsel %vm13784_vm6, %v2492_v10, %v13752_v33  ;;  %vm13788_vm6 = vcmask 1045504  }
 0x28a   : > { %v3947_v6 = vsel %vm3922_vm8, %v2494_v43, %v3907_v18  ;;  %v13799_v18 = vld [vmem:[#allocation36_spill] sm:$0xff] }
 0x28b   : > { %v3794_v5 = vpop.permute.xlu1 %3793  ;;  %v3469_v49 = vpop.permute.xlu0 %3468  ;;  %v3953_v19 = vsel %vm13785_vm9, %v3947_v6, %v3913_v14  ;;  %vm1047_vm9 = vcmask 113664  }
 0x28c   : > { %v3526_v59 = vsel %vm13786_vm13, %v3524_v32, %v3469_v49  ;;  %vm13792_vm13 = vcmask 130048   ;;  %v1400_v7 = vsel %vm1047_vm9, %v10448_v55, %v13793_v21  ;;  %v1049_v4 = vsel %vm1047_vm9, %v13729_v48, %v13798_v54  ;;  %v3967_v48 = vld [vmem:[%s13308_s3] sm:$0xf] }
 0x28d   : > { %v3528_v26 = vsel %vm13787_vm7, %v3526_v59, %v10618_v34  ;;  %vm13796_vm7 = vcmask 719872  }
 0x28e   : > { %v3919_v28 = vrot.slane %v3528_v26, 2  ;;  %v8510_v26 = vmov 0.0  }
 0x28f   : > { %v3798_v23 = vpop.permute.xlu1 %3797  ;;  %v3786_v2 = vpop.permute.xlu0 %3785 }
 0x290   : > { %v3959_v33 = vsel %vm13788_vm6, %v3953_v19, %v3919_v28  ;;  %v3853_v62 = vsel %vm1004_vm1, %v13791_v45, %v3786_v2  ;;  %vm1050_vm1 = vcmask 261120  }
 0x291   : > { %3986 = vmatpush1.bf16.msra.mxu1 %v3959_v33  ;;  %v3855_v34 = vsel %vm1008_vm2, %v3853_v62, %v3790_v36  ;;  %v1402_v53 = vsel %vm1050_vm1, %v1400_v7, %v13795_v39 }
 0x292   : > { %v3857_v60 = vsel %vm1011_vm3, %v3855_v34, %v3794_v5  ;;  %vm13794_vm3 = vcmask 883712  }
 0x293   : > { %v3802_v17 = vpop.permute.xlu1 %3801  ;;  %v3814_v13 = vpop.permute.xlu0 %3813  ;;  %v3859_v52 = vsel %vm1014_vm4, %v3857_v60, %v3798_v23  ;;  %v13802_v23 = vld [vmem:[#allocation69_spill] sm:$0xff] }
 0x294   : > { %v3867_v47 = vsel %vm13792_vm13, %v10935_v51, %v3814_v13  ;;  %v3861_v37 = vsel %vm1017_vm5, %v3859_v52, %v3802_v17  ;;  %vm1053_vm5 = vcmask 408576  }
 0x295   : > { %v1404_v10 = vsel %vm1053_vm5, %v1402_v53, %v13799_v18 }
 0x296   : > { %v3891_v5 = vrot.slane %v1404_v10, 6 }
 0x297   : > { %v1698_v16 = vpop.permute.xlu1 %1697  ;;  %v3818_v38 = vpop.permute.xlu0 %3817 }
 0x298   : > { %v3869_v56 = vsel %vm1029_vm10, %v3867_v47, %v3818_v38  ;;  %v1737_v25 = vsel %vm1047_vm9, %v10564_v22, %v1698_v16  ;;  %vm13797_vm10 = vcmask 1031168  }
 0x29b   : > { %v3834_v20 = vpop.permute.xlu1 %3833  ;;  %v3822_v44 = vpop.permute.xlu0 %3821 }
 0x29c   : > { %v3871_v30 = vsel %vm1032_vm11, %v3869_v56, %v3822_v44  ;;  %vm13800_vm11 = vcmask 1014784  }
 0x29f   : > { %v2134_v50 = vpop.permute.xlu1 %2133  ;;  %v3826_v57 = vpop.permute.xlu0 %3825 }
 0x2a0   : > { %v3873_v40 = vsel %vm1035_vm12, %v3871_v30, %v3826_v57  ;;  %v2173_v49 = vsel %vm1047_vm9, %v10737_v12, %v2134_v50  ;;  %vm8511_vm12 = vmmov 0  }
 0x2a3   : > { %v1706_v27 = vpop.permute.xlu1 %1705  ;;  %v3830_v29 = vpop.permute.xlu0 %3829 }
 0x2a4   : > { %v3875_v55 = vsel %vm13796_vm7, %v3873_v40, %v3830_v29 }
 0x2a5   : > { %v3877_v1 = vsel %vm1041_vm14, %v3875_v55, %v3834_v20  ;;  %vm13803_vm14 = vcmask 1043456  }
 0x2a6   : > { %vm13804_vm13 = vmmov %vm13803_vm14 }
 0x2a7   : > { %v2142_v42 = vpop.permute.xlu1 %2141  ;;  %v3806_v3 = vpop.permute.xlu0 %3805 }
 0x2a8   : > { %v3863_v46 = vsel %vm13794_vm3, %v3861_v37, %v3806_v3  ;;  %vm13805_vm3 = vmmov %vm13788_vm6 }
 0x2a9   : > { %v3865_v36 = vsel %vm13797_vm10, %v3863_v46, %v10935_v51  ;;  %v13801_v51 = vld [vmem:[#allocation52_spill] sm:$0xff] }
 0x2aa   : > { %v3977_v6 = vsel %vm3922_vm8, %v3865_v36, 0  ;;  %v1052_v32 = vsel %vm1050_vm1, %v1049_v4, %v13801_v51 }
 0x2ab   : > { %v2812_v31 = vpop.permute.xlu1 %2811  ;;  %v1702_v11 = vpop.permute.xlu0 %1701  ;;  %v1055_v2 = vsel %vm1053_vm5, %v1052_v32, %v13802_v23 }
 0x2ac   : > { %v1739_v63 = vsel %vm1050_vm1, %v1737_v25, %v1702_v11  ;;  %v3928_v13 = vsel %vm3922_vm8, %v1055_v2, %v3891_v5 }
 0x2ad   : > { %v1741_v22 = vsel %vm1053_vm5, %v1739_v63, %v1706_v27 }
 0x2ae   : > { %v3897_v19 = vrot.slane %v1741_v22, 4 }
 0x2af   : > { %v3838_v14 = vpop.permute.xlu0 %3837  ;;  %v2471_v0 = vpop.permute.xlu1 %2470 }
 0x2b0   : > { %v3879_v43 = vsel %vm13800_vm11, %v3877_v1, %v3838_v14  ;;  %v3935_v38 = vsel %vm13803_vm14, %v3928_v13, %v3897_v19 }
 0x2b1   : > { %8139 = vmatprep.subr.msk.bf16.mxu1 %vm3922_vm8, %v3879_v43 }
 0x2b2   : > { %3988 = vmatpush1.bf16.msra.mxu1 %v3977_v6 }
 0x2b3   : > { %v2138_v59 = vpop.permute.xlu0 %2137  ;;  %8354 = vmatprep.subr.bf16.mxu1 %v8510_v26  ;;  %v3172_v12 = vpop.permute.xlu1 %3171 }
 0x2b4   : > { %v2175_v28 = vsel %vm1050_vm1, %v2173_v49, %v2138_v59 }
 0x2b5   : > { %v2177_v33 = vsel %vm1053_vm5, %v2175_v28, %v2142_v42  ;;  %8140 = vmatmul.mubr.msk.bf16.vlgmr.msra.gmra.mrb[0].mxu1 %vm1008_vm2, %v3967_v48 }
 0x2b6   : > { %v3903_v17 = vrot.slane %v2177_v33, 2  ;;  %8360 = vmatprep.mubr.msk.bf16.mxu1 %vm8511_vm12, %v8510_v26  ;;  %vm4117_vm12 = vcmask 31744  }
 0x2b7   : > { %v2808_v16 = vpop.permute.xlu0 %2807  ;;  %v2475_v15 = vpop.permute.xlu1 %2474 }
 0x2b8   : > { %v3944_v20 = vsel %vm13788_vm6, %v3935_v38, %v3903_v17  ;;  %v2847_v50 = vsel %vm1047_vm9, %v10838_v8, %v2808_v16  ;;  %v2510_v8 = vsel %vm1047_vm9, %v10887_v41, %v2471_v0  ;;  %v13806_v16 = vlaneseq }
 0x2b9   : > { %8355 = vmatpush3.bf16.msra.mxu1 %v3944_v20  ;;  %v2849_v27 = vsel %vm1050_vm1, %v2847_v50, %v2812_v31  ;;  %v2512_v21 = vsel %vm1050_vm1, %v2510_v8, %v2475_v15  ;;  %v13807_v20 = vld [vmem:[#allocation6_spill] sm:$0xff]  ;;  %v13808_v15 = vld [vmem:[#allocation9_spill] sm:$0xff] }
 0x2ba   : > { %8356 = vmatprep.subr.bf16.mxu1 %v8510_v26  ;;  %v11064_v38 = vand.u32 127, %v13806_v16 }
 0x2bb   : > { %v3168_v44 = vpop.permute.xlu0 %3167  ;;  %v3509_v45 = vpop.permute.xlu1 %3508 }
 0x2bc   : > { %v3207_v34 = vsel %vm1047_vm9, %v10847_v24, %v3168_v44  ;;  %v4476_v44 = vadd.s32 4294967295, %v13807_v20  ;;  %vm4492_vm7 = vcmp.le.s32.totalorder %v11064_v38, 16 }
 0x2bd   : > { %v3209_v42 = vsel %vm1050_vm1, %v3207_v34, %v3172_v12 }
 0x2bf   : > { %v2816_v58 = vpop.permute.xlu0 %2815  ;;  %v3513_v3 = vpop.permute.xlu1 %3512 }
 0x2c0   : > { %v2851_v52 = vsel %vm1053_vm5, %v2849_v27, %v2816_v58 }
 0x2c1   : > { %v3909_v24 = vrot.slane %v2851_v52, 6 }
 0x2c3   : > { %v3505_v62 = vpop.permute.xlu0 %3504  ;;  %v3846_v41 = vpop.permute.xlu1 %3845 }
 0x2c4   : > { %v3544_v57 = vsel %vm1047_vm9, %v10916_v9, %v3505_v62 }
 0x2c5   : > { %v3546_v29 = vsel %vm1050_vm1, %v3544_v57, %v3509_v45 }
 0x2c6   : > { %v3548_v9 = vsel %vm1053_vm5, %v3546_v29, %v3513_v3 }
 0x2c7   : > { %v3176_v60 = vpop.permute.xlu0 %3175  ;;  %v3921_v30 = vrot.slane %v3548_v9, 2 }
 0x2c8   : > { %v3211_v47 = vsel %vm1053_vm5, %v3209_v42, %v3176_v60 }
 0x2c9   : > { %v3915_v56 = vrot.slane %v3211_v47, 4 }
 0x2cb   : > { %v2479_v7 = vpop.permute.xlu0 %2478 }
 0x2cc   : > { %v2514_v37 = vsel %vm1053_vm5, %v2512_v21, %v2479_v7 }
 0x2cd   : > { %v3951_v40 = vsel %vm3922_vm8, %v2514_v37, %v3909_v24 }
 0x2ce   : > { %v3957_v46 = vsel %vm13804_vm13, %v3951_v40, %v3915_v56 }
 0x2cf   : > { %v3842_v31 = vpop.permute.xlu0 %3841  ;;  %v3965_v11 = vsel %vm13805_vm3, %v3957_v46, %v3921_v30 }
 0x2d0   : > { %v3881_v39 = vsel %vm1047_vm9, %v3838_v14, %v3842_v31  ;;  %8357 = vmatpush3.bf16.msra.mxu1 %v3965_v11  ;;  %vm4488_vm9 = vcmp.ge.s32.totalorder %v11064_v38, 1 }
 0x2d1   : > { %8358 = vmatprep.subr.bf16.mxu1 %v8510_v26  ;;  %v3883_v53 = vsel %vm1050_vm1, %v3881_v39, %v3846_v41  ;;  %vm11169_vm6 = vmand %vm4488_vm9, %vm4492_vm7 }
 0x2d3   : > { %v3850_v25 = vpop.permute.xlu0 %3849 }
 0x2d4   : > { %v3885_v55 = vsel %vm1053_vm5, %v3883_v53, %v3850_v25  ;;  %v3972_v36 = vpop.permute.xlu1 %3971  ;;  %vm4630_vm5 = vcmask 142336  }
 0x2d5   : > { %v3981_v63 = vsel %vm3922_vm8, %v3885_v55, 0  ;;  %vm4479_vm8 = vcmp.ge.s32.totalorder %v4476_v44, 0 }
 0x2d6   : > { %8359 = vmatpush3.bf16.msra.mxu1 %v3981_v63  ;;  %vm11080_vm10 = vmand %vm4479_vm8, %vm4488_vm9 }
 0x2d7   : > { %vm11096_vm11 = vmand %vm11080_vm10, %vm4492_vm7  ;;  %vm4929_vm10 = vcmask 916480  }
 0x2d9   : > { %8361 = vmatmul.mubr.msk.bf16.vlgmr.msra.gmra.mrb[4].mxu1 %vm1008_vm2, %v3967_v48  ;;  %vm4091_vm2 = vcmask 15360  }
 0x388   : > { %v4017_v54 = vpop.f32.mrb[0].mxu1 }
 0x389   : > { %v4018_v4 = vadd.f32 %v4017_v54, %v3972_v36  ;;  %v4019_v18 = vpop.f32.mrb[1].mxu1 }
 0x38a   : > { %v4021_v10 = vpop.f32.mrb[2].mxu1  ;;  %v4020_v22 = vadd.f32 %v4019_v18, %v3972_v36 }
 0x38b   : > { %v11048_v1 = vmax.f32 %v4018_v4, 0.0  ;;  %v4022_v14 = vpop.f32.mrb[3].mxu1 }
 0x38c   : > { %v4065_v43 = vmax.f32 %v4020_v22, 0.0 }
 0x38d   : > { %4071 = vrot.lane.b32.xlu1 %v11048_v1, %s8512_s13  ;;  %4068 = vrot.lane.b32.xlu0 %v11048_v1, %s8513_s14  ;;  %s8529_s13 = smov 64   ;;  %s8530_s14 = smov 48  }
 0x391   : > { %4077 = vrot.lane.b32.xlu1 %v11048_v1, %s8514_s15  ;;  %4074 = vrot.lane.b32.xlu0 %v11048_v1, %s8515_s16  ;;  %s8308_s15 = sshll.u32 %s14052_s24, 4 }
 0x395   : > { %4083 = vrot.lane.b32.xlu1 %v11048_v1, %s8516_s18  ;;  %4080 = vrot.lane.b32.xlu0 %v11048_v1, %s8517_s19  ;;  %s488_s19 = scalar_lea.vmem %s13312_s7, %s8308_s15 }
 0x399   : > { %4089 = vrot.lane.b32.xlu1 %v4065_v43, %s8489_s30  ;;  %4087 = vrot.lane.b32.xlu0 %v11048_v1, %s8489_s30  ;;  %s8525_s30 = smov 114  }
 0x39d   : > { %4097 = vrot.lane.b32.xlu1 %v4065_v43, %s8518_s20  ;;  %4094 = vrot.lane.b32.xlu0 %v4065_v43, %s8519_s21 }
 0x3a1   : > { %4103 = vrot.lane.b32.xlu1 %v4065_v43, %s8520_s22  ;;  %4100 = vrot.lane.b32.xlu0 %v4065_v43, %s8521_s23 }
 0x3a5   : > { %4109 = vrot.lane.b32.xlu1 %v4065_v43, %s8522_s26  ;;  %4106 = vrot.lane.b32.xlu0 %v4065_v43, %s8523_s27 }
 0x3a9   : > { %4113 = vrot.lane.b32.xlu0 %v4065_v43, %s8524_s28 }
 0x3ac   : > { %v4058_v0 = vpop.f32.mrb[4].mxu1 }
 0x3ad   : > { %v4059_v6 = vadd.f32 %v4058_v0, %v3972_v36  ;;  %v8362_v51 = vpop.f32.mrb[5].mxu1 }
 0x3ae   : > { %v4061_v32 = vpop.f32.mrb[6].mxu1 }
 0x3af   : > { %v4066_v5 = vmax.f32 %v4059_v6, 0.0  ;;  %v8363_v48 = vpop.f32.mrb[7].mxu1 }
 0x3b1   : > { %4120 = vrot.lane.b32.xlu0 %v4066_v5, %s8525_s30  ;;  %4115 = vrot.lane.b32.xlu1 %v4066_v5, %s8524_s28 }
 0x3b5   : > { %4126 = vrot.lane.b32.xlu0 %v4066_v5, %s8526_s29  ;;  %4123 = vrot.lane.b32.xlu1 %v4066_v5, %s8527_s10 }
 0x3ff   : > { %v4072_v49 = vpop.permute.xlu1 %4071  ;;  %v4069_v19 = vpop.permute.xlu0 %4068 }
 0x400   : > { %v4129_v13 = vcombine.low %v11048_v1, %v4072_v49  ;;  %v4130_v12 = vcombine.high %v11048_v1, %v4072_v49 }
 0x402   : > { %v4137_v27 = vrot.slane %v4129_v13, %v13808_v15  ;;  %v4144_v29 = vrot.slane %v4130_v12, %v13808_v15 }
 0x403   : > { %v4078_v59 = vpop.permute.xlu1 %4077  ;;  %v4075_v28 = vpop.permute.xlu0 %4074 }
 0x404   : > { %v4145_v23 = vcombine.low %v4069_v19, %v4075_v28  ;;  %v4146_v2 = vcombine.high %v4069_v19, %v4075_v28 }
 0x406   : > { %v4153_v58 = vrot.slane %v4145_v23, %v13808_v15  ;;  %v4160_v45 = vrot.slane %v4146_v2, %v13808_v15 }
 0x407   : > { %v4084_v33 = vpop.permute.xlu1 %4083  ;;  %v4081_v17 = vpop.permute.xlu0 %4080 }
 0x408   : > { %v4161_v62 = vcombine.low %v4078_v59, %v4084_v33  ;;  %v4162_v50 = vcombine.high %v4078_v59, %v4084_v33  ;;  %v4193_v3 = vcombine.low %v4137_v27, %v4153_v58  ;;  %v4194_v47 = vcombine.high %v4137_v27, %v4153_v58 }
 0x409   : > { %v4209_v8 = vcombine.low %v4144_v29, %v4160_v45  ;;  %v4210_v9 = vcombine.high %v4144_v29, %v4160_v45 }
 0x40a   : > { %v4169_v21 = vrot.slane %v4161_v62, %v13808_v15  ;;  %v4176_v24 = vrot.slane %v4162_v50, %v13808_v15  ;;  %v4201_v41 = vrot.slane %v4193_v3, %v8828_v61  ;;  %v4208_v53 = vrot.slane %v4194_v47, %v8828_v61 }
 0x40b   : > { %v4090_v57 = vpop.permute.xlu1 %4089  ;;  %v4088_v34 = vpop.permute.xlu0 %4087  ;;  %v4217_v25 = vrot.slane %v4209_v8, %v8828_v61  ;;  %v4224_v55 = vrot.slane %v4210_v9, %v8828_v61  ;;  %v4470_v9 = vadd.s32 16, %v13807_v20 }
 0x40c   : > { %v4092_v60 = vsel %vm4091_vm2, %v4088_v34, %v4090_v57  ;;  %vm4633_vm2 = vcmask 139264  }
 0x40d   : > { %v4177_v52 = vcombine.low %v4081_v17, %v4092_v60  ;;  %v4178_v42 = vcombine.high %v4081_v17, %v4092_v60 }
 0x40f   : > { %v4185_v7 = vrot.slane %v4177_v52, %v13808_v15  ;;  %v4192_v56 = vrot.slane %v4178_v42, %v13808_v15  ;;  %v4098_v37 = vpop.permute.xlu1 %4097  ;;  %v4095_v30 = vpop.permute.xlu0 %4094 }
 0x411   : > { %v4225_v46 = vcombine.low %v4169_v21, %v4185_v7  ;;  %v4226_v31 = vcombine.high %v4169_v21, %v4185_v7  ;;  %v4241_v11 = vcombine.low %v4176_v24, %v4192_v56  ;;  %v4242_v39 = vcombine.high %v4176_v24, %v4192_v56 }
 0x413   : > { %v4233_v63 = vrot.slane %v4225_v46, %v8828_v61  ;;  %v4240_v36 = vrot.slane %v4226_v31, %v8828_v61  ;;  %v4249_v54 = vrot.slane %v4241_v11, %v8828_v61  ;;  %v4256_v4 = vrot.slane %v4242_v39, %v8828_v61  ;;  %v4104_v18 = vpop.permute.xlu1 %4103  ;;  %v4101_v10 = vpop.permute.xlu0 %4100 }
 0x414   : > { %v4281_v14 = vcombine.low %v4098_v37, %v4104_v18  ;;  %v4282_v22 = vcombine.high %v4098_v37, %v4104_v18  ;;  %v4265_v43 = vcombine.low %v4095_v30, %v4101_v10  ;;  %v4266_v0 = vcombine.high %v4095_v30, %v4101_v10 }
 0x415   : > { %v4257_v6 = vcombine.low %v4201_v41, %v4233_v63  ;;  %v4258_v51 = vcombine.high %v4201_v41, %v4233_v63  ;;  %v4259_v32 = vcombine.low %v4208_v53, %v4240_v36  ;;  %v4260_v5 = vcombine.high %v4208_v53, %v4240_v36 }
 0x416   : > { %v4261_v48 = vcombine.low %v4217_v25, %v4249_v54  ;;  %v4262_v49 = vcombine.high %v4217_v25, %v4249_v54  ;;  %v4263_v19 = vcombine.low %v4224_v55, %v4256_v4  ;;  %v4264_v59 = vcombine.high %v4224_v55, %v4256_v4 }
 0x417   : > { %v4502_v28 = vsel %vm11096_vm11, %v4257_v6, 0.0  ;;  %v4505_v23 = vsel %vm11096_vm11, %v4258_v51, 0.0  ;;  %v4508_v2 = vsel %vm11096_vm11, %v4259_v32, 0.0  ;;  %v4511_v33 = vsel %vm11096_vm11, %v4260_v5, 0.0  ;;  %v4107_v50 = vpop.permute.xlu0 %4106  ;;  %v4110_v47 = vpop.permute.xlu1 %4109 }
 0x418   : > { %v4514_v17 = vsel %vm11096_vm11, %v4261_v48, 0.0  ;;  %v4517_v13 = vsel %vm11096_vm11, %v4262_v49, 0.0  ;;  %v4520_v12 = vsel %vm11096_vm11, %v4263_v19, 0.0  ;;  %v4523_v16 = vsel %vm11096_vm11, %v4264_v59, 0.0 }
 0x419   : > { %v8325_v44 = vpack.c.bf16 %v4502_v28, %v4502_v28  ;;  %v8328_v58 = vpack.c.bf16 %v4505_v23, %v4505_v23  ;;  %v8331_v45 = vpack.c.bf16 %v4508_v2, %v4508_v2  ;;  %v8334_v62 = vpack.c.bf16 %v4511_v33, %v4511_v33 }
 0x41a   : > { %v8337_v57 = vpack.c.bf16 %v4514_v17, %v4514_v17  ;;  %v8340_v34 = vpack.c.bf16 %v4517_v13, %v4517_v13  ;;  %v8343_v27 = vpack.c.bf16 %v4520_v12, %v4520_v12  ;;  %v8346_v29 = vpack.c.bf16 %v4523_v16, %v4523_v16 }
 0x41b   : > { %4631 = vst.msk [vmem:[#allocation3] sm:$0xf] %vm4630_vm5, %v8325_v44  ;;  %4635 = vst.msk [vmem:[#allocation3 + $0xc] sm:$0xf] %vm4630_vm5, %v8328_v58  ;;  %v4289_v60 = vrot.slane %v4281_v14, %v13808_v15  ;;  %v4273_v52 = vrot.slane %v4265_v43, %v13808_v15  ;;  %v4296_v42 = vrot.slane %v4282_v22, %v13808_v15  ;;  %v4114_v8 = vpop.permute.xlu0 %4113  ;;  %v4478_v46 = vadd.s32 4294967295, %v4470_v9 }
 0x41c   : > { %4638 = vst.msk [vmem:[#allocation3 + $0x18] sm:$0xf] %vm4630_vm5, %v8331_v45  ;;  %4641 = vst.msk [vmem:[#allocation3 + $0x24] sm:$0xf] %vm4630_vm5, %v8334_v62  ;;  %v4280_v3 = vrot.slane %v4266_v0, %v13808_v15 }
 0x41d   : > { %4644 = vst.msk [vmem:[#allocation3 + $0x30] sm:$0xf] %vm4630_vm5, %v8337_v57  ;;  %4647 = vst.msk [vmem:[#allocation3 + $0x3c] sm:$0xf] %vm4630_vm5, %v8340_v34  ;;  %v4329_v21 = vcombine.low %v4273_v52, %v4289_v60  ;;  %v4330_v24 = vcombine.high %v4273_v52, %v4289_v60  ;;  %vm4484_vm14 = vcmp.lt.s32.totalorder %v4478_v46, 16 }
 0x41e   : > { %4650 = vst.msk [vmem:[#allocation3 + $0x48] sm:$0xf] %vm4630_vm5, %v8343_v27  ;;  %4653 = vst.msk [vmem:[#allocation3 + $0x54] sm:$0xf] %vm4630_vm5, %v8346_v29  ;;  %v4345_v7 = vcombine.low %v4280_v3, %v4296_v42  ;;  %v4346_v37 = vcombine.high %v4280_v3, %v4296_v42 }
 0x41f   : > { %v4337_v20 = vrot.slane %v4329_v21, %v8828_v61  ;;  %v4344_v25 = vrot.slane %v4330_v24, %v8828_v61  ;;  %vm11180_vm13 = vmand %vm4484_vm14, %vm4488_vm9  ;;  %vm4920_vm9 = vcmask 523264  }
 0x420   : > { %v4353_v55 = vrot.slane %v4345_v7, %v8828_v61  ;;  %v4360_v18 = vrot.slane %v4346_v37, %v8828_v61  ;;  %vm11212_vm3 = vmand %vm11180_vm13, %vm4492_vm7  ;;  %vm4923_vm7 = vcmask 654336   ;;  %vm13978_vm13 = vcmask 1043456  }
 0x422   : > { %v11129_v56 = vld [vmem:[#allocation3] sm:$0xf]  ;;  %v11142_v4 = vld [vmem:[#allocation3 + $0xc] sm:$0xf] }
 0x423   : > { %5281 = vrot.lane.b32.xlu0 %v11129_v56, %s8492_s9  ;;  %4963 = vrot.lane.b32.xlu1 %v11129_v56, %s8490_s8  ;;  %v4116_v30 = vpop.permute.xlu1 %4115  ;;  %v4121_v40 = vpop.permute.xlu0 %4120  ;;  %v11140_v54 = vld [vmem:[#allocation3 + $0x18] sm:$0xf]  ;;  %v11196_v7 = vld [vmem:[#allocation3 + $0x24] sm:$0xf] }
 0x424   : > { %v4118_v31 = vsel %vm4117_vm12, %v4114_v8, %v4116_v30  ;;  %v4313_v11 = vcombine.low %v4110_v47, %v4121_v40  ;;  %v4314_v39 = vcombine.high %v4110_v47, %v4121_v40  ;;  %v11157_v2 = vld [vmem:[#allocation3 + $0x30] sm:$0xf] }
 0x425   : > { %v4297_v41 = vcombine.low %v4107_v50, %v4118_v31  ;;  %v4298_v53 = vcombine.high %v4107_v50, %v4118_v31  ;;  %v11184_v47 = vld [vmem:[#allocation3 + $0x48] sm:$0xf]  ;;  %v11292_v3 = vld [vmem:[#allocation3 + $0x54] sm:$0xf] }
 0x426   : > { %v4321_v63 = vrot.slane %v4313_v11, %v13808_v15  ;;  %v4328_v36 = vrot.slane %v4314_v39, %v13808_v15 }
 0x427   : > { %v4305_v10 = vrot.slane %v4297_v41, %v13808_v15  ;;  %v4312_v1 = vrot.slane %v4298_v53, %v13808_v15  ;;  %5289 = vrot.lane.b32.xlu0 %v11140_v54, %s8492_s9  ;;  %4967 = vrot.lane.b32.xlu1 %v11142_v4, %s8490_s8  ;;  %v4124_v14 = vpop.permute.xlu1 %4123  ;;  %v4127_v22 = vpop.permute.xlu0 %4126 }
 0x428   : > { %v4401_v43 = vcombine.high %v4124_v14, %v8510_v26  ;;  %v4408_v0 = vrot.slane %v4124_v14, %v13808_v15  ;;  %v4416_v6 = vcombine.high %v4127_v22, %v8510_v26  ;;  %v4423_v51 = vrot.slane %v4127_v22, %v13808_v15 }
 0x429   : > { %v4361_v32 = vcombine.low %v4305_v10, %v4321_v63  ;;  %v4362_v5 = vcombine.high %v4305_v10, %v4321_v63  ;;  %v4377_v48 = vcombine.low %v4312_v1, %v4328_v36  ;;  %v4378_v49 = vcombine.high %v4312_v1, %v4328_v36 }
 0x42a   : > { %v4415_v19 = vrot.slane %v4401_v43, %v13808_v15  ;;  %v4430_v59 = vrot.slane %v4416_v6, %v13808_v15  ;;  %v4431_v28 = vcombine.low %v4408_v0, %v4423_v51  ;;  %v4432_v23 = vcombine.high %v4408_v0, %v4423_v51 }
 0x42b   : > { %v4369_v33 = vrot.slane %v4361_v32, %v8828_v61  ;;  %v4376_v17 = vrot.slane %v4362_v5, %v8828_v61  ;;  %v4385_v13 = vrot.slane %v4377_v48, %v8828_v61  ;;  %v4392_v12 = vrot.slane %v4378_v49, %v8828_v61  ;;  %5297 = vrot.lane.b32.xlu0 %v11157_v2, %s8492_s9 }
 0x42c   : > { %v4439_v44 = vrot.slane %v4431_v28, %v8828_v61  ;;  %v4446_v58 = vrot.slane %v4432_v23, %v8828_v61  ;;  %v4447_v45 = vcombine.low %v4415_v19, %v4430_v59  ;;  %v4448_v62 = vcombine.high %v4415_v19, %v4430_v59  ;;  %4971 = vrot.lane.b32.xlu1 %v11140_v54, %s8490_s8  ;;  %v11248_v28 = vld [vmem:[#allocation3 + $0x3c] sm:$0xf] }
 0x42d   : > { %v4393_v50 = vcombine.low %v4337_v20, %v4369_v33  ;;  %v4394_v57 = vcombine.high %v4337_v20, %v4369_v33  ;;  %v4395_v34 = vcombine.low %v4344_v25, %v4376_v17  ;;  %v4396_v27 = vcombine.high %v4344_v25, %v4376_v17 }
 0x42e   : > { %v4397_v29 = vcombine.low %v4353_v55, %v4385_v13  ;;  %v4398_v60 = vcombine.high %v4353_v55, %v4385_v13  ;;  %v4399_v52 = vcombine.low %v4360_v18, %v4392_v12  ;;  %v4400_v42 = vcombine.high %v4360_v18, %v4392_v12 }
 0x42f   : > { %v4503_v8 = vsel %vm11169_vm6, %v4393_v50, 0.0  ;;  %v4506_v9 = vsel %vm11169_vm6, %v4394_v57, 0.0  ;;  %v4509_v21 = vsel %vm11169_vm6, %v4395_v34, 0.0  ;;  %v4512_v24 = vsel %vm11169_vm6, %v4396_v27, 0.0  ;;  %5305 = vrot.lane.b32.xlu0 %v11184_v47, %s8492_s9 }
 0x430   : > { %v4515_v37 = vsel %vm11169_vm6, %v4397_v29, 0.0  ;;  %v4518_v30 = vsel %vm11169_vm6, %v4398_v60, 0.0  ;;  %v4521_v40 = vsel %vm11169_vm6, %v4399_v52, 0.0  ;;  %v4524_v46 = vsel %vm11169_vm6, %v4400_v42, 0.0  ;;  %4975 = vrot.lane.b32.xlu1 %v11196_v7, %s8490_s8 }
 0x431   : > { %v8326_v31 = vpack.c.bf16 %v4503_v8, %v4503_v8  ;;  %v8329_v11 = vpack.c.bf16 %v4506_v9, %v4506_v9  ;;  %v8332_v39 = vpack.c.bf16 %v4509_v21, %v4509_v21  ;;  %v8335_v20 = vpack.c.bf16 %v4512_v24, %v4512_v24  ;;  %v6721_v21 = vld [vmem:[#allocation3] sm:$0xe] }
 0x432   : > { %v8338_v53 = vpack.c.bf16 %v4515_v37, %v4515_v37  ;;  %v8341_v25 = vpack.c.bf16 %v4518_v30, %v4518_v30  ;;  %v8344_v55 = vpack.c.bf16 %v4521_v40, %v4521_v40  ;;  %v8347_v63 = vpack.c.bf16 %v4524_v46, %v4524_v46 }
 0x433   : > { %4632 = vst.msk [vmem:[#allocation3 + $0x4] sm:$0xf] %vm4630_vm5, %v8326_v31  ;;  %4636 = vst.msk [vmem:[#allocation3 + $0x10] sm:$0xf] %vm4630_vm5, %v8329_v11  ;;  %v4455_v38 = vrot.slane %v4447_v45, %v8828_v61  ;;  %v4462_v36 = vrot.slane %v4448_v62, %v8828_v61  ;;  %v4463_v18 = vcombine.high %v4439_v44, %v8510_v26  ;;  %v4504_v1 = vsel %vm11212_vm3, %v4439_v44, 0.0 }
 0x434   : > { %4639 = vst.msk [vmem:[#allocation3 + $0x1c] sm:$0xf] %vm4630_vm5, %v8332_v39  ;;  %4642 = vst.msk [vmem:[#allocation3 + $0x28] sm:$0xf] %vm4630_vm5, %v8335_v20  ;;  %v4464_v10 = vcombine.high %v4446_v58, %v8510_v26  ;;  %v4510_v14 = vsel %vm11212_vm3, %v4446_v58, 0.0  ;;  %4979 = vrot.lane.b32.xlu1 %v11157_v2, %s8490_s8  ;;  %v8327_v5 = vpack.c.bf16 %v4504_v1, %v4504_v1  ;;  %v8250_v31 = vrot.slane %v6721_v21, 9 }
 0x435   : > { %4645 = vst.msk [vmem:[#allocation3 + $0x34] sm:$0xf] %vm4630_vm5, %v8338_v53  ;;  %4648 = vst.msk [vmem:[#allocation3 + $0x40] sm:$0xf] %vm4630_vm5, %v8341_v25  ;;  %v4465_v22 = vcombine.high %v4455_v38, %v8510_v26  ;;  %v4466_v43 = vcombine.high %v4462_v36, %v8510_v26  ;;  %v4507_v0 = vsel %vm11212_vm3, %v4463_v18, 0.0  ;;  %v4516_v51 = vsel %vm11212_vm3, %v4455_v38, 0.0 }
 0x436   : > { %4651 = vst.msk [vmem:[#allocation3 + $0x4c] sm:$0xf] %vm4630_vm5, %v8344_v55  ;;  %4654 = vst.msk [vmem:[#allocation3 + $0x58] sm:$0xf] %vm4630_vm5, %v8347_v63  ;;  %v4513_v6 = vsel %vm11212_vm3, %v4464_v10, 0.0  ;;  %v4522_v32 = vsel %vm11212_vm3, %v4462_v36, 0.0  ;;  %v8330_v48 = vpack.c.bf16 %v4507_v0, %v4507_v0  ;;  %v8333_v19 = vpack.c.bf16 %v4510_v14, %v4510_v14 }
 0x437   : > { %v4519_v49 = vsel %vm11212_vm3, %v4465_v22, 0.0  ;;  %v4525_v26 = vsel %vm11212_vm3, %v4466_v43, 0.0  ;;  %v8336_v59 = vpack.c.bf16 %v4513_v6, %v4513_v6  ;;  %v8339_v23 = vpack.c.bf16 %v4516_v51, %v4516_v51  ;;  %4634 = vst.msk [vmem:[#allocation3 + $0x8] sm:$0x1] %vm4633_vm2, %v8327_v5  ;;  %v6725_v11 = vld [vmem:[#allocation3 + $0x30] sm:$0xe]  ;;  %vm13979_vm3 = vmmov %vm13978_vm13 }
 0x438   : > { %v8342_v33 = vpack.c.bf16 %v4519_v49, %v4519_v49  ;;  %v8345_v17 = vpack.c.bf16 %v4522_v32, %v4522_v32  ;;  %v8348_v13 = vpack.c.bf16 %v4525_v26, %v4525_v26  ;;  %4637 = vst.msk [vmem:[#allocation3 + $0x14] sm:$0x1] %vm4633_vm2, %v8330_v48  ;;  %4983 = vrot.lane.b32.xlu1 %v11248_v28, %s8490_s8  ;;  %4640 = vst.msk [vmem:[#allocation3 + $0x20] sm:$0x1] %vm4633_vm2, %v8333_v19  ;;  %v11309_v39 = vld [vmem:[#allocation3 + $0xc] sm:$0xe] }
 0x439   : > { %4643 = vst.msk [vmem:[#allocation3 + $0x2c] sm:$0x1] %vm4633_vm2, %v8336_v59  ;;  %4646 = vst.msk [vmem:[#allocation3 + $0x38] sm:$0x1] %vm4633_vm2, %v8339_v23  ;;  %v4672_v29 = vcombine.low %v11129_v56, %v11157_v2  ;;  %v4680_v60 = vcombine.low %v11140_v54, %v11184_v47  ;;  %v4706_v24 = vcombine.low %v11142_v4, %v11248_v28  ;;  %v6723_v20 = vld [vmem:[#allocation3 + $0x18] sm:$0xe] }
 0x43a   : > { %4649 = vst.msk [vmem:[#allocation3 + $0x44] sm:$0x1] %vm4633_vm2, %v8342_v33  ;;  %4652 = vst.msk [vmem:[#allocation3 + $0x50] sm:$0x1] %vm4633_vm2, %v8345_v17  ;;  %v11260_v12 = vld [vmem:[#allocation3 + $0x4] sm:$0xf]  ;;  %v4714_v37 = vcombine.low %v11196_v7, %v11292_v3 }
 0x43b   : > { %4655 = vst.msk [vmem:[#allocation3 + $0x5c] sm:$0x1] %vm4633_vm2, %v8348_v13  ;;  %v11262_v16 = vld [vmem:[#allocation3 + $0x10] sm:$0xf]  ;;  %v11264_v44 = vld [vmem:[#allocation3 + $0x1c] sm:$0xf]  ;;  %4965 = vrot.lane.b32.xlu0 %v11260_v12, %s8490_s8  ;;  %v4679_v8 = vrot.slane %v4672_v29, %v13808_v15  ;;  %v4687_v9 = vrot.slane %v4680_v60, %v13808_v15  ;;  %v11312_v41 = vrot.slane %v4706_v24, %v13808_v15 }
 0x43c   : > { %v11268_v58 = vld [vmem:[#allocation3 + $0x28] sm:$0xf]  ;;  %v11270_v45 = vld [vmem:[#allocation3 + $0x34] sm:$0xf]  ;;  %v11272_v62 = vld [vmem:[#allocation3 + $0x40] sm:$0xf]  ;;  %4987 = vrot.lane.b32.xlu1 %v11184_v47, %s8490_s8  ;;  %v11315_v53 = vrot.slane %v4714_v37, %v13808_v15 }
 0x43d   : > { %v11280_v34 = vld [vmem:[#allocation3 + $0x4c] sm:$0xf]  ;;  %v11282_v27 = vld [vmem:[#allocation3 + $0x58] sm:$0xf]  ;;  %v6747_v30 = vrot.slane %v11260_v12, 5  ;;  %v4688_v40 = vcombine.low %v4679_v8, %v4687_v9  ;;  %v4689_v46 = vcombine.high %v4679_v8, %v4687_v9  ;;  %v6761_v63 = vrot.slane %v11264_v44, 5 }
 0x43e   : > { %v8254_v38 = vrot.slane %v6725_v11, 9  ;;  %v13400_v36 = vrot.slane %v11270_v45, 5  ;;  %v5632_v18 = vshrl.u32 %v11142_v4, 16  ;;  %v5635_v10 = vshll.u32 %v11142_v4, 16  ;;  %v6727_v0 = vld [vmem:[#allocation3 + $0x48] sm:$0xe] }
 0x43f   : > { %4969 = vrot.lane.b32.xlu0 %v11262_v16, %s8490_s8  ;;  %v11323_v55 = vsel %vm8741_vm0, %v8250_v31, %v6747_v30  ;;  %v11332_v1 = vrot.slane %v4688_v40, %v8828_v61  ;;  %v11335_v14 = vrot.slane %v4689_v46, %v8828_v61  ;;  %v8251_v22 = vrot.slane %v11309_v39, 9  ;;  %v11518_v39 = vld [vmem:[#allocation3 + $0x20] sm:$0x1] }
 0x440   : > { %4991 = vrot.lane.b32.xlu1 %v11292_v3, %s8490_s8  ;;  %v8252_v43 = vrot.slane %v6723_v20, 9  ;;  %v11342_v6 = vsel %vm8741_vm0, %v8254_v38, %v13400_v36  ;;  %v5634_v51 = vrot.slane %v5632_v18, 4  ;;  %v5637_v32 = vrot.slane %v5635_v10, 5 }
 0x441   : > { %13820 = vst [vmem:[#allocation62_spill] sm:$0xff] %v11332_v1  ;;  %v4722_v5 = vcombine.low %v11312_v41, %v11315_v53  ;;  %v4723_v48 = vcombine.high %v11312_v41, %v11315_v53  ;;  %v6817_v26 = vcombine.low %v11323_v55, %v11342_v6  ;;  %v8256_v23 = vrot.slane %v6727_v0, 9 }
 0x442   : > { %v11355_v49 = vsel %vm8741_vm0, %v8252_v43, %v6761_v63  ;;  %v5638_v19 = vor.u32 %v5637_v32, %v5634_v51  ;;  %v13399_v33 = vrot.slane %v11280_v34, 5  ;;  %v11366_v17 = vcombine.high %v11332_v1, %v13496_v35 }
 0x443   : > { %4973 = vrot.lane.b32.xlu0 %v11264_v44, %s8490_s8  ;;  %v11369_v13 = vrot.slane %v6817_v26, %v13808_v15  ;;  %v5680_v29 = vshrl.u32 %v11196_v7, 16  ;;  %v5683_v60 = vshll.u32 %v11196_v7, 16  ;;  %v5728_v21 = vshrl.u32 %v11248_v28, 16 }
 0x444   : > { %5285 = vrot.lane.b32.xlu1 %v11142_v4, %s8492_s9  ;;  %v5641_v4 = vshll.u32 %v11262_v16, 16  ;;  %v5639_v8 = vrot.slane %v5638_v19, 4  ;;  %v11377_v9 = vsel %vm8741_vm0, %v8256_v23, %v13399_v33  ;;  %v5731_v24 = vshll.u32 %v11248_v28, 16 }
 0x445   : > { %13821 = vst [vmem:[#allocation57_spill] sm:$0xff] %v11369_v13  ;;  %v6825_v37 = vcombine.low %v11355_v49, %v11377_v9  ;;  %v5682_v40 = vrot.slane %v5680_v29, 4  ;;  %v5685_v46 = vrot.slane %v5683_v60, 5  ;;  %v5730_v20 = vrot.slane %v5728_v21, 4 }
 0x446   : > { %v11361_v59 = vrot.slane %v5641_v4, 5  ;;  %v5737_v41 = vshll.u32 %v11272_v62, 16  ;;  %v5776_v18 = vshrl.u32 %v11292_v3, 16  ;;  %v5779_v10 = vshll.u32 %v11292_v3, 16 }
 0x447   : > { %4977 = vrot.lane.b32.xlu0 %v11268_v58, %s8490_s8  ;;  %v11395_v53 = vrot.slane %v6825_v37, %v13808_v15  ;;  %v5686_v38 = vor.u32 %v5685_v46, %v5682_v40  ;;  %v11401_v43 = vcombine.high %v11335_v14, %v13496_v35  ;;  %v5785_v32 = vshll.u32 %v11282_v27, 16  ;;  %v11425_v46 = vld [vmem:[#allocation3 + $0x24] sm:$0xe] }
 0x448   : > { %5293 = vrot.lane.b32.xlu1 %v11196_v7, %s8492_s9  ;;  %v5689_v7 = vshll.u32 %v11268_v58, 16  ;;  %v11391_v11 = vsel %vm8718_vm15, %v5639_v8, %v11361_v59  ;;  %v11403_v51 = vrot.slane %v5737_v41, 5  ;;  %v4811_v4 = vshrl.u32 %v11332_v1, 16 }
 0x449   : > { %13823 = vst [vmem:[#allocation45_spill] sm:$0xff] %v11395_v53  ;;  %v5778_v19 = vrot.slane %v5776_v18, 4  ;;  %v4823_v23 = vshrl.u32 %v11335_v14, 16  ;;  %v5781_v8 = vrot.slane %v5779_v10, 5  ;;  %v11419_v21 = vrot.slane %v4722_v5, %v8828_v61  ;;  %v11580_v53 = vld [vmem:[#allocation3 + $0x14] sm:$0x1] }
 0x44a   : > { %v11416_v29 = vrot.slane %v5689_v7, 5  ;;  %v5687_v37 = vrot.slane %v5686_v38, 4  ;;  %v5608_v40 = vshrl.u32 %v11129_v56, 16  ;;  %v5611_v41 = vshll.u32 %v11129_v56, 16 }
 0x44b   : > { %4981 = vrot.lane.b32.xlu0 %v11270_v45, %s8490_s8  ;;  %13824 = vst [vmem:[#allocation17_spill] sm:$0xff] %v11419_v21  ;;  %v5782_v7 = vor.u32 %v5781_v8, %v5778_v19  ;;  %v13402_v5 = vrot.slane %v11262_v16, 5  ;;  %v5617_v18 = vshll.u32 %v11260_v12, 16  ;;  %v4812_v19 = vshrl.u32 %v11419_v21, 16 }
 0x44c   : > { %5301 = vrot.lane.b32.xlu1 %v11248_v28, %s8492_s9  ;;  %v5733_v28 = vrot.slane %v5731_v24, 5  ;;  %v11422_v24 = vrot.slane %v4723_v48, %v8828_v61  ;;  %v5610_v38 = vrot.slane %v5608_v40, 4  ;;  %v11446_v10 = vsel %vm8718_vm15, %v5687_v37, %v11416_v29 }
 0x44d   : > { %v5783_v56 = vrot.slane %v5782_v7, 4  ;;  %v5659_v8 = vshll.u32 %v11140_v54, 16  ;;  %v5665_v40 = vshll.u32 %v11264_v44, 16  ;;  %v11458_v37 = vrot.slane %v5617_v18, 5  ;;  %v11471_v18 = vld [vmem:[#allocation3 + $0x3c] sm:$0xe] }
 0x44e   : > { %v5734_v0 = vor.u32 %v5733_v28, %v5730_v20  ;;  %v11432_v28 = vrot.slane %v5785_v32, 5  ;;  %v5656_v32 = vshrl.u32 %v11140_v54, 16  ;;  %v4813_v50 = vpack.i.b16 %v4812_v19, %v4811_v4 }
 0x44f   : > { %4985 = vrot.lane.b32.xlu0 %v11272_v62, %s8490_s8  ;;  %v5661_v42 = vrot.slane %v5659_v8, 5  ;;  %v11478_v52 = vrot.slane %v5665_v40, 5  ;;  %v5713_v8 = vshll.u32 %v11270_v45, 16  ;;  %v4822_v4 = vpack.i.b16 %v11422_v24, %v11335_v14  ;;  %v11515_v14 = vld [vmem:[#allocation3 + $0x8] sm:$0x1] }
 0x450   : > { %5309 = vrot.lane.b32.xlu1 %v11292_v3, %s8492_s9  ;;  %v5735_v60 = vrot.slane %v5734_v0, 4  ;;  %v5613_v0 = vrot.slane %v5611_v41, 5  ;;  %v11456_v3 = vsel %vm8718_vm15, %v5783_v56, %v11432_v28  ;;  %v5658_v7 = vrot.slane %v5656_v32, 4 }
 0x451   : > { %v13401_v41 = vrot.slane %v11268_v58, 5  ;;  %v5857_v54 = vcombine.low %v11446_v10, %v11456_v3  ;;  %v5707_v32 = vshll.u32 %v11157_v2, 16  ;;  %v5761_v40 = vshll.u32 %v11280_v34, 16 }
 0x452   : > { %v11430_v20 = vsel %vm8718_vm15, %v5735_v60, %v11403_v51  ;;  %v8253_v60 = vrot.slane %v11425_v46, 9  ;;  %v5614_v26 = vor.u32 %v5613_v0, %v5610_v38  ;;  %v4824_v38 = vshrl.u32 %v11422_v24, 16 }
 0x453   : > { %4989 = vrot.lane.b32.xlu0 %v11280_v34, %s8490_s8  ;;  %v5849_v48 = vcombine.low %v11391_v11, %v11430_v20  ;;  %v5704_v0 = vshrl.u32 %v11157_v2, 16  ;;  %v11476_v57 = vrot.slane %v5857_v54, %v13808_v15  ;;  %v11497_v54 = vrot.slane %v5713_v8, 5  ;;  %v11550_v2 = vld [vmem:[#allocation3 + $0x50] sm:$0x1] }
 0x454   : > { %5287 = vrot.lane.b32.xlu1 %v11262_v16, %s8492_s9  ;;  %v5615_v56 = vrot.slane %v5614_v26, 4  ;;  %v5709_v26 = vrot.slane %v5707_v32, 5  ;;  %v11506_v32 = vsel %vm8741_vm0, %v8251_v22, %v13402_v5  ;;  %v8166_v8 = vcombine.low %v4813_v50, %v4813_v50 }
 0x455   : > { %v11464_v46 = vrot.slane %v5849_v48, %v13808_v15  ;;  %13826 = vst [vmem:[#allocation64_spill] sm:$0xff] %v11476_v57  ;;  %v5662_v48 = vor.u32 %v5661_v42, %v5658_v7  ;;  %v5706_v36 = vrot.slane %v5704_v0, 4  ;;  %v4825_v0 = vpack.i.b16 %v4824_v38, %v4823_v23 }
 0x456   : > { %v11484_v33 = vsel %vm8718_vm15, %v5615_v56, %v11458_v37  ;;  %v5752_v56 = vshrl.u32 %v11184_v47, 16  ;;  %v11526_v22 = vsel %vm8741_vm0, %v8253_v60, %v13401_v41  ;;  %v6749_v50 = vrot.slane %v6747_v30, 4 }
 0x457   : > { %4993 = vrot.lane.b32.xlu0 %v11282_v27, %s8490_s8  ;;  %13825 = vst [vmem:[#allocation60_spill] sm:$0xff] %v11464_v46  ;;  %v5663_v7 = vrot.slane %v5662_v48, 4  ;;  %v5710_v19 = vor.u32 %v5709_v26, %v5706_v36  ;;  %v4738_v48 = vcombine.high %v11419_v21, %v13496_v35  ;;  %v5755_v26 = vshll.u32 %v11184_v47, 16 }
 0x458   : > { %5295 = vrot.lane.b32.xlu1 %v11268_v58, %s8492_s9  ;;  %v5754_v38 = vrot.slane %v5752_v56, 4  ;;  %v6750_v60 = vrot.slane %v11515_v14, 5  ;;  %v6763_v42 = vrot.slane %v6761_v63, 4  ;;  %v8170_v41 = vcombine.low %v4825_v0, %v4825_v0 }
 0x459   : > { %v11513_v36 = vsel %vm8718_vm15, %v5663_v7, %v11478_v52  ;;  %v5711_v23 = vrot.slane %v5710_v19, 4  ;;  %v11532_v19 = vld [vmem:[#allocation3 + $0x38] sm:$0x1]  ;;  %v5757_v56 = vrot.slane %v5755_v26, 5  ;;  %v11545_v5 = vcombine.high %v11422_v24, %v13496_v35 }
 0x45a   : > { %v11547_v30 = vrot.slane %v5761_v40, 5  ;;  %v13828_v26 = vrot.slane %v11270_v45, 5  ;;  %v6778_v63 = vrot.slane %v11532_v19, 5  ;;  %v8169_v24 = vcombine.low %v4822_v4, %v4822_v4 }
 0x45b   : > { %5283 = vrot.lane.b32.xlu0 %v11260_v12, %s8492_s9  ;;  %v11538_v47 = vsel %vm8718_vm15, %v5711_v23, %v11497_v54  ;;  %v5758_v7 = vor.u32 %v5757_v56, %v5754_v38  ;;  %v11554_v23 = vsel %vm8741_vm0, %v6749_v50, %v6750_v60  ;;  %v4816_v40 = vpack.i.b16 %v4738_v48, %v11366_v17 }
 0x45c   : > { %5303 = vrot.lane.b32.xlu1 %v11272_v62, %s8492_s9  ;;  %13827 = vst [vmem:[#allocation66_spill] sm:$0xff] %v11554_v23  ;;  %v6777_v57 = vrot.slane %v13828_v26, 4  ;;  %v13830_v38 = vrot.slane %v11280_v34, 5  ;;  %v6792_v26 = vrot.slane %v11550_v2, 5  ;;  %v5645_v4 = vshrl.u32 %v11262_v16, 16 }
 0x45d   : > { %v5759_v50 = vrot.slane %v5758_v7, 4  ;;  %v4828_v46 = vpack.i.b16 %v11545_v5, %v11401_v43  ;;  %v5651_v21 = vshll.u32 %v11580_v53, 16  ;;  %v5765_v13 = vshrl.u32 %v11280_v34, 16 }
 0x45e   : > { %v6791_v56 = vrot.slane %v13830_v38, 4  ;;  %v11571_v60 = vsel %vm8741_vm0, %v6777_v57, %v6778_v63  ;;  %v5647_v7 = vrot.slane %v5645_v4, 4  ;;  %v5621_v63 = vshrl.u32 %v11260_v12, 16 }
 0x45f   : > { %5291 = vrot.lane.b32.xlu0 %v11264_v44, %s8492_s9  ;;  %13831 = vst [vmem:[#allocation46_spill] sm:$0xff] %v11571_v60  ;;  %v6885_v38 = vcombine.low %v11554_v23, %v11571_v60  ;;  %v11585_v57 = vsel %vm8718_vm15, %v5759_v50, %v11547_v30  ;;  %vm4926_vm5 = vcmask 785408  }
 0x460   : > { %5311 = vrot.lane.b32.xlu1 %v11282_v27, %s8492_s9  ;;  %v5648_v4 = vor.u32 %v5647_v7, %v11361_v59  ;;  %v5669_v59 = vshrl.u32 %v11264_v44, 16 }
 0x461   : > { %v11596_v60 = vrot.slane %v6885_v38, %v13808_v15  ;;  %v4830_v38 = vshrl.u32 %v11545_v5, 16  ;;  %v13837_v5 = vrot.slane %v11282_v27, 5 }
 0x463   : > { %5299 = vrot.lane.b32.xlu0 %v11270_v45, %s8492_s9  ;;  %13833 = vst [vmem:[#allocation72_spill] sm:$0xff] %v11596_v60 }
 0x464   : > { %4858 = vrot.lane.b32.xlu1 %v8166_v8, %s8501_s17  ;;  %v6764_v8 = vrot.slane %v11518_v39, 5 }
 0x466   : > { %v11564_v0 = vsel %vm8741_vm0, %v6763_v42, %v6764_v8  ;;  %v4817_v42 = vshrl.u32 %v11366_v17, 16  ;;  %v4818_v8 = vshrl.u32 %v4738_v48, 16  ;;  %v8167_v17 = vcombine.low %v4816_v40, %v4816_v40  ;;  %v11609_v48 = vld [vmem:[#allocation3 + $0x2c] sm:$0x1] }
 0x467   : > { %5307 = vrot.lane.b32.xlu0 %v11280_v34, %s8492_s9  ;;  %13829 = vst [vmem:[#allocation70_spill] sm:$0xff] %v11564_v0 }
 0x468   : > { %4874 = vrot.lane.b32.xlu1 %v8170_v41, %s8528_s12  ;;  %v11589_v41 = vsel %vm8741_vm0, %v6791_v56, %v6792_v26  ;;  %v6728_v56 = vld [vmem:[#allocation3 + $0x54] sm:$0xe]  ;;  %v4829_v26 = vshrl.u32 %v11401_v43, 16  ;;  %v11606_v40 = vpack.i.b16 %v4818_v8, %v4817_v42  ;;  %v5627_v43 = vshll.u32 %v11515_v14, 16 }
 0x469   : > { %13832 = vst [vmem:[#allocation75_spill] sm:$0xff] %v11589_v41  ;;  %v6893_v50 = vcombine.low %v11564_v0, %v11589_v41  ;;  %v5623_v41 = vrot.slane %v5621_v63, 4  ;;  %v8257_v7 = vrot.slane %v6728_v56, 9  ;;  %v5649_v8 = vrot.slane %v5648_v4, 4 }
 0x46a   : > { %v13836_v56 = vrot.slane %v11471_v18, 9  ;;  %v8171_v4 = vcombine.low %v4828_v46, %v4828_v46  ;;  %v11648_v18 = vld [vmem:[#allocation3 + $0x5c] sm:$0x1] }
 0x46b   : > { %4870 = vrot.lane.b32.xlu0 %v8169_v24, %s8529_s13  ;;  %v5693_v24 = vshrl.u32 %v11268_v58, 16  ;;  %v11612_v1 = vrot.slane %v6893_v50, %v13808_v15  ;;  %v11624_v50 = vld [vmem:[#allocation3 + $0x44] sm:$0x1]  ;;  %v5624_v14 = vor.u32 %v5623_v41, %v11458_v37  ;;  %v11641_v23 = vsel %vm8741_vm0, %v8257_v7, %v13837_v5 }
 0x46c   : > { %7091 = vrot.lane.b32.xlu1 %v11506_v32, %s8490_s8  ;;  %v5653_v37 = vrot.slane %v5651_v21, 5  ;;  %v5629_v41 = vrot.slane %v5627_v43, 5  ;;  %v5747_v7 = vshll.u32 %v11624_v50, 16  ;;  %v5717_v21 = vshrl.u32 %v11270_v45, 16 }
 0x46d   : > { %13834 = vst [vmem:[#allocation73_spill] sm:$0xff] %v11612_v1  ;;  %v5695_v0 = vrot.slane %v5693_v24, 4  ;;  %v5699_v24 = vshll.u32 %v11609_v48, 16  ;;  %v5671_v1 = vrot.slane %v5669_v59, 4  ;;  %v5675_v43 = vshll.u32 %v11518_v39, 16 }
 0x46e   : > { %v11652_v46 = vsel %vm8718_vm15, %v5649_v8, %v5653_v37  ;;  %v5723_v8 = vshll.u32 %v11532_v19, 16  ;;  %v5789_v37 = vshrl.u32 %v11282_v27, 16  ;;  %v5795_v60 = vshll.u32 %v11648_v18, 16 }
 0x46f   : > { %4862 = vrot.lane.b32.xlu0 %v8167_v17, %s8495_s11  ;;  %v5696_v63 = vor.u32 %v5695_v0, %v11416_v29  ;;  %v13835_v17 = vrot.slane %v11272_v62, 5  ;;  %v8168_v29 = vcombine.low %v11606_v40, %v11606_v40  ;;  %v11645_v0 = vpack.i.b16 %v4830_v38, %v4829_v26 }
 0x470   : > { %7099 = vrot.lane.b32.xlu1 %v11526_v22, %s8490_s8  ;;  %v5625_v26 = vrot.slane %v5624_v14, 4  ;;  %v5701_v40 = vrot.slane %v5699_v24, 5  ;;  %v5672_v38 = vor.u32 %v5671_v1, %v11478_v52  ;;  %v5749_v52 = vrot.slane %v5747_v7, 5 }
 0x471   : > { %v11635_v42 = vsel %vm8741_vm0, %v13836_v56, %v13835_v17  ;;  %v5741_v17 = vshrl.u32 %v11272_v62, 16  ;;  %v5697_v59 = vrot.slane %v5696_v63, 4  ;;  %v5719_v56 = vrot.slane %v5717_v21, 4 }
 0x472   : > { %v5771_v39 = vshll.u32 %v11550_v2, 16  ;;  %v11674_v19 = vsel %vm8718_vm15, %v5625_v26, %v5629_v41  ;;  %v5677_v63 = vrot.slane %v5675_v43, 5  ;;  %v5791_v24 = vrot.slane %v5789_v37, 4 }
 0x473   : > { %4878 = vrot.lane.b32.xlu0 %v8171_v4, %s8527_s10  ;;  %v5743_v5 = vrot.slane %v5741_v17, 4  ;;  %v5673_v4 = vrot.slane %v5672_v38, 4  ;;  %v5720_v1 = vor.u32 %v5719_v56, %v11497_v54  ;;  %v5767_v17 = vrot.slane %v5765_v13, 4 }
 0x474   : > { %7107 = vrot.lane.b32.xlu1 %v11635_v42, %s8490_s8  ;;  %v11678_v21 = vsel %vm8718_vm15, %v5697_v59, %v5701_v40  ;;  %v5725_v38 = vrot.slane %v5723_v8, 5  ;;  %v5792_v54 = vor.u32 %v5791_v24, %v11432_v28  ;;  %v5773_v40 = vrot.slane %v5771_v39, 5 }
 0x475   : > { %v5744_v14 = vor.u32 %v5743_v5, %v11403_v51  ;;  %v5721_v7 = vrot.slane %v5720_v1, 4  ;;  %v11682_v2 = vsel %vm8718_vm15, %v5673_v4, %v5677_v63  ;;  %v5797_v5 = vrot.slane %v5795_v60, 5 }
 0x476   : > { %v5768_v41 = vor.u32 %v5767_v17, %v11547_v30  ;;  %v13838_v43 = vcombine.low %v11260_v12, %v11270_v45  ;;  %v5793_v59 = vrot.slane %v5792_v54, 4  ;;  %v8172_v8 = vcombine.low %v11645_v0, %v11645_v0 }
 0x477   : > { %7087 = vrot.lane.b32.xlu0 %v11323_v55, %s8490_s8  ;;  %v5745_v51 = vrot.slane %v5744_v14, 4  ;;  %v11694_v26 = vsel %vm8718_vm15, %v5721_v7, %v5725_v38  ;;  %v13839_v4 = vcombine.low %v11264_v44, %v11280_v34  ;;  %v13840_v45 = vcombine.low %v11262_v16, %v11272_v62 }
 0x478   : > { %7115 = vrot.lane.b32.xlu1 %v11641_v23, %s8490_s8  ;;  %v4747_v28 = vrot.slane %v13838_v43, %v13808_v15  ;;  %v5883_v60 = vcombine.low %v11674_v19, %v11694_v26  ;;  %v5769_v56 = vrot.slane %v5768_v41, 4  ;;  %v13841_v37 = vcombine.low %v11268_v58, %v11282_v27 }
 0x479   : > { %v11690_v13 = vsel %vm8718_vm15, %v5745_v51, %v5749_v52  ;;  %v4755_v12 = vrot.slane %v13839_v4, %v13808_v15  ;;  %v11727_v44 = vsel %vm8718_vm15, %v5793_v59, %v5797_v5  ;;  %v13842_v17 = vrot.slane %v11262_v16, 5 }
 0x47a   : > { %v5917_v30 = vcombine.low %v11652_v46, %v11690_v13  ;;  %v4789_v14 = vrot.slane %v13841_v37, %v13808_v15  ;;  %v11723_v0 = vrot.slane %v5883_v60, %v13808_v15  ;;  %v11731_v34 = vsel %vm8718_vm15, %v5769_v56, %v5773_v40 }
 0x47b   : > { %7095 = vrot.lane.b32.xlu0 %v11355_v49, %s8490_s8  ;;  %v5925_v1 = vcombine.low %v11678_v21, %v11727_v44  ;;  %v5891_v39 = vcombine.low %v11682_v2, %v11731_v34  ;;  %v4757_v63 = vcombine.high %v4747_v28, %v4755_v12  ;;  %v6756_v51 = vrot.slane %v13842_v17, 4 }
 0x47c   : > { %4866 = vrot.lane.b32.xlu1 %v8168_v29, %s8530_s14  ;;  %v4781_v29 = vrot.slane %v13840_v45, %v13808_v15  ;;  %v11720_v52 = vrot.slane %v5917_v30, %v13808_v15  ;;  %v4756_v7 = vcombine.low %v4747_v28, %v4755_v12  ;;  %v6757_v40 = vrot.slane %v11580_v53, 5 }
 0x47d   : > { %v11743_v38 = vrot.slane %v5925_v1, %v13808_v15  ;;  %v11746_v54 = vrot.slane %v5891_v39, %v13808_v15  ;;  %v4771_v5 = vrot.slane %v4757_v63, %v8828_v61  ;;  %v13843_v43 = vrot.slane %v11268_v58, 5 }
 0x47e   : > { %v4791_v24 = vcombine.high %v4781_v29, %v4789_v14  ;;  %v4790_v31 = vcombine.low %v4781_v29, %v4789_v14  ;;  %v11754_v16 = vrot.slane %v4756_v7, %v8828_v61  ;;  %v6771_v45 = vrot.slane %v11609_v48, 5 }
 0x47f   : > { %7103 = vrot.lane.b32.xlu0 %v11342_v6, %s8490_s8  ;;  %v6770_v30 = vrot.slane %v13843_v43, 4  ;;  %v5933_v60 = vcombine.low %v11720_v52, %v11743_v38  ;;  %v5934_v59 = vcombine.high %v11720_v52, %v11743_v38  ;;  %v5899_v53 = vcombine.low %v11723_v0, %v11746_v54 }
 0x480   : > { %4882 = vrot.lane.b32.xlu1 %v8172_v8, %s8519_s21  ;;  %v4805_v41 = vrot.slane %v4791_v24, %v8828_v61  ;;  %13844 = vst [vmem:[#allocation21_spill] sm:$0xff] %v11754_v16  ;;  %v11757_v28 = vrot.slane %v4790_v31, %v8828_v61  ;;  %v5900_v58 = vcombine.high %v11723_v0, %v11746_v54  ;;  %v4835_v12 = vshrl.u32 %v11754_v16, 16 }
 0x481   : > { %v4772_v8 = vcombine.high %v11754_v16, %v13496_v35  ;;  %v13846_v29 = vrot.slane %v11272_v62, 5  ;;  %v6785_v14 = vrot.slane %v11624_v50, 5  ;;  %v13847_v52 = vrot.slane %v11282_v27, 5 }
 0x482   : > { %13845 = vst [vmem:[#allocation13_spill] sm:$0xff] %v11757_v28  ;;  %v11771_v56 = vpack.i.b16 %v4805_v41, %v4771_v5  ;;  %v4806_v4 = vcombine.high %v11757_v28, %v13496_v35  ;;  %v6799_v1 = vrot.slane %v11648_v18, 5  ;;  %v4836_v63 = vshrl.u32 %v11757_v28, 16 }
 0x483   : > { %7111 = vrot.lane.b32.xlu0 %v11377_v9, %s8490_s8  ;;  %v6784_v37 = vrot.slane %v13846_v29, 4  ;;  %v6798_v0 = vrot.slane %v13847_v52, 4  ;;  %v4773_v24 = vcombine.high %v4771_v5, %v13496_v35  ;;  %v4807_v48 = vcombine.high %v4805_v41, %v13496_v35 }
 0x484   : > { %6407 = vrot.lane.b32.xlu1 %v11391_v11, %s8492_s9  ;;  %v11785_v39 = vpack.i.b16 %v4806_v4, %v4772_v8  ;;  %v4847_v62 = vshrl.u32 %v4771_v5, 16  ;;  %v4848_v17 = vshrl.u32 %v4805_v41, 16  ;;  %v4841_v7 = vshrl.u32 %v4772_v8, 16 }
 0x485   : > { %v11794_v27 = vpack.i.b16 %v4836_v63, %v4835_v12  ;;  %v4842_v50 = vshrl.u32 %v4806_v4, 16  ;;  %v4853_v18 = vshrl.u32 %v4773_v24, 16  ;;  %v11798_v31 = vsel %vm8741_vm0, %v6756_v51, %v6757_v40 }
 0x486   : > { %v11800_v38 = vpack.i.b16 %v4807_v48, %v4773_v24  ;;  %v11802_v54 = vpack.i.b16 %v4848_v17, %v4847_v62  ;;  %v11806_v5 = vsel %vm8741_vm0, %v6770_v30, %v6771_v45  ;;  %v11810_v41 = vsel %vm8741_vm0, %v6784_v37, %v6785_v14 }
 0x487   : > { %7405 = vrot.lane.b32.xlu0 %v11323_v55, %s8492_s9  ;;  %v4854_v55 = vshrl.u32 %v4807_v48, 16  ;;  %v11814_v43 = vsel %vm8741_vm0, %v6798_v0, %v6799_v1  ;;  %v11816_v8 = vpack.i.b16 %v4842_v50, %v4841_v7  ;;  %v6851_v51 = vcombine.low %v11506_v32, %v11635_v42 }
 0x488   : > { %6415 = vrot.lane.b32.xlu1 %v11446_v10, %s8492_s9  ;;  %13848 = vst [vmem:[#allocation24_spill] sm:$0xff] %v11800_v38  ;;  %13849 = vst [vmem:[#allocation23_spill] sm:$0xff] %v11802_v54  ;;  %v6859_v40 = vcombine.low %v11526_v22, %v11641_v23  ;;  %v6919_v25 = vcombine.low %v11798_v31, %v11810_v41  ;;  %v6927_v4 = vcombine.low %v11806_v5, %v11814_v43  ;;  %vm13949_vm15 = vcmask 130048  }
 0x489   : > { %13850 = vst [vmem:[#allocation19_spill] sm:$0xff] %v11816_v8  ;;  %v11824_v30 = vpack.i.b16 %v4854_v55, %v4853_v18  ;;  %v5815_v12 = vcombine.low %v11484_v33, %v11538_v47  ;;  %v5823_v45 = vcombine.low %v11513_v36, %v11585_v57  ;;  %v6858_v29 = vrot.slane %v6851_v51, %v13808_v15  ;;  %v13856_v18 = vld [vmem:[#allocation45_spill] sm:$0xff]  ;;  %vm13955_vm8 = vmmov %vm13949_vm15 }
 0x48a   : > { %v6926_v37 = vrot.slane %v6919_v25, %v13808_v15  ;;  %v6934_v14 = vrot.slane %v6927_v4, %v13808_v15  ;;  %v11851_v1 = vrot.slane %v5899_v53, %v8828_v61  ;;  %v5948_v48 = vrot.slane %v5934_v59, %v8828_v61  ;;  %vm13960_vm11 = vmmov %vm13955_vm8 }
 0x48b   : > { %7409 = vrot.lane.b32.xlu0 %v11506_v32, %s8492_s9  ;;  %13851 = vst [vmem:[#allocation76_spill] sm:$0xff] %v11824_v30  ;;  %v6866_v32 = vrot.slane %v6859_v40, %v13808_v15  ;;  %v11845_v52 = vrot.slane %v5815_v12, %v13808_v15  ;;  %v11848_v0 = vrot.slane %v5823_v45, %v13808_v15  ;;  %vm4917_vm0 = vcmask 392192   ;;  %vm13965_vm12 = vmmov %vm13955_vm8 }
 0x48c   : > { %6423 = vrot.lane.b32.xlu1 %v11430_v20, %s8492_s9  ;;  %13852 = vst [vmem:[#allocation78_spill] sm:$0xff] %v11851_v1  ;;  %v5914_v62 = vrot.slane %v5900_v58, %v8828_v61  ;;  %v6935_v7 = vcombine.low %v6926_v37, %v6934_v14  ;;  %v5978_v50 = vshrl.u32 %v11851_v1, 16  ;;  %v6936_v25 = vcombine.high %v6926_v37, %v6934_v14  ;;  %vm13970_vm14 = vmmov %vm13955_vm8 }
 0x48d   : > { %v6867_v63 = vcombine.low %v6858_v29, %v6866_v32  ;;  %v6868_v24 = vcombine.high %v6858_v29, %v6866_v32  ;;  %v5831_v53 = vcombine.low %v11845_v52, %v11848_v0  ;;  %v13861_v29 = vld [vmem:[#allocation60_spill] sm:$0xff]  ;;  %v5915_v37 = vcombine.high %v11851_v1, %v13496_v35  ;;  %vm13974_vm6 = vmmov %vm13955_vm8 }
 0x48e   : > { %v11892_v12 = vpack.i.b16 %v5948_v48, %v5914_v62  ;;  %v5916_v45 = vcombine.high %v5914_v62, %v13496_v35  ;;  %v13862_v32 = vld [vmem:[#allocation64_spill] sm:$0xff]  ;;  %v11929_v54 = vrot.slane %v6936_v25, %v8828_v61  ;;  %vm13992_vm2 = vmmov %vm13974_vm6 }
 0x48f   : > { %7413 = vrot.lane.b32.xlu0 %v11355_v49, %s8492_s9  ;;  %v11858_v49 = vrot.slane %v5933_v60, %v8828_v61  ;;  %v13855_v60 = vld [vmem:[#allocation57_spill] sm:$0xff]  ;;  %v11910_v14 = vrot.slane %v5831_v53, %v8828_v61  ;;  %v5990_v53 = vshrl.u32 %v5914_v62, 16 }
 0x490   : > { %6431 = vrot.lane.b32.xlu1 %v11456_v3, %s8492_s9  ;;  %v13857_v59 = vcombine.low %v13855_v60, %v13856_v18  ;;  %v13859_v58 = vcombine.high %v13855_v60, %v13856_v18  ;;  %13860 = vst [vmem:[#allocation48_spill] sm:$0xff] %v11892_v12  ;;  %v13867_v18 = vld [vmem:[#allocation72_spill] sm:$0xff]  ;;  %v5996_v8 = vshrl.u32 %v5916_v45, 16 }
 0x491   : > { %13853 = vst [vmem:[#allocation47_spill] sm:$0xff] %v11858_v49  ;;  %v5979_v4 = vshrl.u32 %v11858_v49, 16  ;;  %13866 = vst [vmem:[#allocation27_spill] sm:$0xff] %v11910_v14 }
 0x492   : > { %v11877_v55 = vrot.slane %v13857_v59, %v8828_v61  ;;  %v11883_v51 = vrot.slane %v13859_v58, %v8828_v61  ;;  %v13868_v59 = vld [vmem:[#allocation73_spill] sm:$0xff] }
 0x493   : > { %7417 = vrot.lane.b32.xlu0 %v11526_v22, %s8492_s9  ;;  %v11868_v22 = vrot.slane %v6867_v63, %v8828_v61  ;;  %v13863_v63 = vcombine.low %v13861_v29, %v13862_v32  ;;  %v13869_v58 = vcombine.low %v13867_v18, %v13868_v59 }
 0x494   : > { %6089 = vrot.lane.b32.xlu1 %v11391_v11, %s8490_s8  ;;  %v11871_v11 = vrot.slane %v6868_v24, %v8828_v61  ;;  %13858 = vst [vmem:[#allocation12_spill] sm:$0xff] %v11877_v55 }
 0x495   : > { %v11862_v17 = vpop.permute.xlu1 %4963  ;;  %13854 = vst [vmem:[#allocation22_spill] sm:$0xff] %v11868_v22  ;;  %v11885_v40 = vpop.permute.xlu0 %5281  ;;  %v11899_v24 = vrot.slane %v13863_v63, %v8828_v61  ;;  %v11916_v12 = vrot.slane %v13869_v58, %v8828_v61  ;;  %v11918_v63 = vpack.i.b16 %v5979_v4, %v5978_v50  ;;  %v5991_v50 = vshrl.u32 %v5948_v48, 16 }
 0x496   : > { %v5984_v4 = vshrl.u32 %v5915_v37, 16 }
 0x497   : > { %7421 = vrot.lane.b32.xlu0 %v11342_v6, %s8492_s9  ;;  %13864 = vst [vmem:[#allocation14_spill] sm:$0xff] %v11899_v24  ;;  %v11904_v6 = vrot.slane %v6935_v7, %v8828_v61  ;;  %13870 = vst [vmem:[#allocation8_spill] sm:$0xff] %v11916_v12  ;;  %v5949_v7 = vcombine.high %v11858_v49, %v13496_v35 }
 0x498   : > { %6097 = vrot.lane.b32.xlu1 %v11446_v10, %s8490_s8  ;;  %v5950_v10 = vcombine.high %v5948_v48, %v13496_v35  ;;  %13871 = vst [vmem:[#allocation79_spill] sm:$0xff] %v11918_v63 }
 0x499   : > { %v11901_v60 = vpop.permute.xlu1 %4967  ;;  %13865 = vst [vmem:[#allocation80_spill] sm:$0xff] %v11904_v6  ;;  %v11931_v58 = vpack.i.b16 %v5949_v7, %v5915_v37  ;;  %v11933_v63 = vpop.permute.xlu0 %5289  ;;  %v5985_v62 = vshrl.u32 %v5949_v7, 16  ;;  %v6969_v7 = vshrl.u32 %v11871_v11, 16 }
 0x49a   : > { %v11924_v30 = vpack.i.b16 %v5950_v10, %v5916_v45  ;;  %v5997_v38 = vshrl.u32 %v5950_v10, 16  ;;  %v11945_v10 = vpack.i.b16 %v5991_v50, %v5990_v53  ;;  %v6952_v53 = vcombine.high %v11929_v54, %v13496_v35 }
 0x49b   : > { %7425 = vrot.lane.b32.xlu0 %v11635_v42, %s8492_s9  ;;  %v13873_v42 = vcombine.high %v13867_v18, %v13868_v59  ;;  %v11951_v37 = vpack.i.b16 %v5985_v62, %v5984_v4  ;;  %v6968_v59 = vshrl.u32 %v11883_v51, 16  ;;  %v6850_v4 = vcombine.high %v11883_v51, %v13496_v35 }
 0x49c   : > { %13872 = vst [vmem:[#allocation49_spill] sm:$0xff] %v11924_v30  ;;  %6105 = vrot.lane.b32.xlu1 %v11430_v20, %s8490_s8  ;;  %v11941_v45 = vpack.i.b16 %v5997_v38, %v5996_v8  ;;  %13875 = vst [vmem:[#allocation40_spill] sm:$0xff] %v11945_v10  ;;  %v6999_v48 = vshrl.u32 %v6952_v53, 16 }
 0x49d   : > { %v11939_v30 = vrot.slane %v13873_v42, %v8828_v61  ;;  %13876 = vst [vmem:[#allocation35_spill] sm:$0xff] %v11951_v37  ;;  %v11971_v42 = vpop.permute.xlu0 %5297  ;;  %v11975_v62 = vpack.i.b16 %v6969_v7, %v6968_v59  ;;  %v6974_v38 = vshrl.u32 %v6850_v4, 16 }
 0x49e   : > { %13874 = vst [vmem:[#allocation32_spill] sm:$0xff] %v11941_v45  ;;  %v4972_v25 = vpop.permute.xlu1 %4971 }
 0x49f   : > { %7429 = vrot.lane.b32.xlu0 %v11377_v9, %s8492_s9  ;;  %v6918_v9 = vcombine.high %v11939_v30, %v13496_v35  ;;  %13877 = vst [vmem:[#allocation84_spill] sm:$0xff] %v11975_v62 }
 0x4a0   : > { %6113 = vrot.lane.b32.xlu1 %v11456_v3, %s8490_s8  ;;  %v6884_v3 = vcombine.high %v11871_v11, %v13496_v35 }
 0x4a1   : > { %v11977_v18 = vpack.i.b16 %v6952_v53, %v6918_v9  ;;  %v6998_v20 = vshrl.u32 %v6918_v9, 16 }
 0x4a2   : > { %v4976_v50 = vpop.permute.xlu1 %4975  ;;  %v11981_v8 = vpack.i.b16 %v6884_v3, %v6850_v4  ;;  %v6975_v16 = vshrl.u32 %v6884_v3, 16 }
 0x4a3   : > { %7433 = vrot.lane.b32.xlu0 %v11641_v23, %s8492_s9  ;;  %13878 = vst [vmem:[#allocation26_spill] sm:$0xff] %v11977_v18  ;;  %v11983_v28 = vpack.i.b16 %v6999_v48, %v6998_v20  ;;  %v5306_v23 = vpop.permute.xlu0 %5305 }
 0x4a4   : > { %7093 = vrot.lane.b32.xlu1 %v11798_v31, %s8490_s8  ;;  %13879 = vst [vmem:[#allocation34_spill] sm:$0xff] %v11981_v8  ;;  %v11985_v49 = vpack.i.b16 %v6975_v16, %v6974_v38  ;;  %v5337_v37 = vcombine.low %v11933_v63, %v5306_v23 }
 0x4a5   : > { %13880 = vst [vmem:[#allocation11_spill] sm:$0xff] %v11983_v28 }
 0x4a6   : > { %v4980_v1 = vpop.permute.xlu1 %4979  ;;  %13881 = vst [vmem:[#allocation83_spill] sm:$0xff] %v11985_v49  ;;  %v13884_v49 = vld [vmem:[#allocation70_spill] sm:$0xff] }
 0x4a7   : > { %6403 = vrot.lane.b32.xlu0 %v11484_v33, %s8492_s9  ;;  %v5011_v16 = vcombine.low %v11862_v17, %v4980_v1 }
 0x4a8   : > { %7101 = vrot.lane.b32.xlu1 %v11806_v5, %s8490_s8 }
 0x4aa   : > { %v4984_v59 = vpop.permute.xlu1 %4983 }
 0x4ab   : > { %6411 = vrot.lane.b32.xlu0 %v11513_v36, %s8492_s9  ;;  %v5045_v38 = vcombine.low %v11901_v60, %v4984_v59 }
 0x4ac   : > { %7109 = vrot.lane.b32.xlu1 %v11810_v41, %s8490_s8 }
 0x4ad   : > { %v11995_v7 = vpop.permute.xlu0 %4965  ;;  %v12014_v1 = vrot.slane %v5045_v38, %v13808_v15 }
 0x4ae   : > { %v4988_v20 = vpop.permute.xlu1 %4987 }
 0x4af   : > { %v5019_v48 = vcombine.low %v4972_v25, %v4988_v20  ;;  %6419 = vrot.lane.b32.xlu0 %v11538_v47, %s8492_s9  ;;  %v12009_v25 = vrot.slane %v5011_v16, %v13808_v15  ;;  %v13882_v20 = vld [vmem:[#allocation66_spill] sm:$0xff] }
 0x4b0   : > { %7117 = vrot.lane.b32.xlu1 %v11814_v43, %s8490_s8 }
 0x4b1   : > { %v4970_v9 = vpop.permute.xlu0 %4969  ;;  %v12004_v53 = vrot.slane %v5019_v48, %v13808_v15 }
 0x4b2   : > { %v4992_v4 = vpop.permute.xlu1 %4991 }
 0x4b3   : > { %v5053_v3 = vcombine.low %v4976_v50, %v4992_v4  ;;  %6427 = vrot.lane.b32.xlu0 %v11585_v57, %s8492_s9  ;;  %v5027_v59 = vcombine.low %v12009_v25, %v12004_v53 }
 0x4b4   : > { %7407 = vrot.lane.b32.xlu1 %v13882_v20, %s8492_s9 }
 0x4b5   : > { %v12017_v17 = vrot.slane %v5053_v3, %v13808_v15  ;;  %v4974_v60 = vpop.permute.xlu0 %4973  ;;  %v12031_v4 = vrot.slane %v5027_v59, %v8828_v61 }
 0x4b6   : > { %v5286_v50 = vpop.permute.xlu1 %5285 }
 0x4b7   : > { %v5061_v48 = vcombine.low %v12014_v1, %v12017_v17  ;;  %6085 = vrot.lane.b32.xlu0 %v11484_v33, %s8490_s8  ;;  %13883 = vst [vmem:[#allocation81_spill] sm:$0xff] %v12031_v4  ;;  %v13886_v4 = vld [vmem:[#allocation75_spill] sm:$0xff] }
 0x4b8   : > { %7411 = vrot.lane.b32.xlu1 %v11798_v31, %s8492_s9 }
 0x4b9   : > { %v12028_v16 = vrot.slane %v5061_v48, %v8828_v61  ;;  %v4978_v38 = vpop.permute.xlu0 %4977 }
 0x4ba   : > { %v5294_v3 = vpop.permute.xlu1 %5293 }
 0x4bb   : > { %6093 = vrot.lane.b32.xlu0 %v11513_v36, %s8490_s8  ;;  %v13885_v36 = vld [vmem:[#allocation46_spill] sm:$0xff] }
 0x4bc   : > { %7415 = vrot.lane.b32.xlu1 %v13884_v49, %s8492_s9 }
 0x4bd   : > { %v4982_v8 = vpop.permute.xlu0 %4981 }
 0x4be   : > { %v5302_v28 = vpop.permute.xlu1 %5301 }
 0x4bf   : > { %6101 = vrot.lane.b32.xlu0 %v11538_v47, %s8490_s8  ;;  %v5363_v45 = vcombine.low %v5286_v50, %v5302_v28 }
 0x4c0   : > { %7419 = vrot.lane.b32.xlu1 %v11806_v5, %s8492_s9 }
 0x4c1   : > { %v4986_v31 = vpop.permute.xlu0 %4985  ;;  %v12069_v23 = vrot.slane %v5363_v45, %v13808_v15 }
 0x4c2   : > { %v5310_v59 = vpop.permute.xlu1 %5309 }
 0x4c3   : > { %6109 = vrot.lane.b32.xlu0 %v11585_v57, %s8490_s8  ;;  %v5371_v47 = vcombine.low %v5294_v3, %v5310_v59  ;;  %v5113_v57 = vcombine.low %v4970_v9, %v4986_v31 }
 0x4c4   : > { %7423 = vrot.lane.b32.xlu1 %v13885_v36, %s8492_s9 }
 0x4c5   : > { %v4990_v48 = vpop.permute.xlu0 %4989 }
 0x4c6   : > { %v5288_v18 = vpop.permute.xlu1 %5287  ;;  %v5087_v10 = vcombine.low %v4974_v60, %v4990_v48 }
 0x4c7   : > { %7089 = vrot.lane.b32.xlu0 %v13882_v20, %s8490_s8  ;;  %v5329_v20 = vcombine.low %v11885_v40, %v11971_v42  ;;  %v12074_v40 = vrot.slane %v5113_v57, %v13808_v15 }
 0x4c8   : > { %7427 = vrot.lane.b32.xlu1 %v11810_v41, %s8492_s9  ;;  %v12059_v41 = vrot.slane %v5371_v47, %v13808_v15  ;;  %v12077_v42 = vrot.slane %v5087_v10, %v13808_v15 }
 0x4c9   : > { %v4994_v33 = vpop.permute.xlu0 %4993 }
 0x4ca   : > { %v5296_v62 = vpop.permute.xlu1 %5295  ;;  %v5121_v5 = vcombine.low %v4978_v38, %v4994_v33  ;;  %v5079_v38 = vcombine.low %v11995_v7, %v4982_v8  ;;  %v12082_v8 = vrot.slane %v5329_v20, %v13808_v15 }
 0x4cb   : > { %7097 = vrot.lane.b32.xlu0 %v13884_v49, %s8490_s8  ;;  %v12066_v49 = vrot.slane %v5337_v37, %v13808_v15  ;;  %v5379_v37 = vcombine.low %v12069_v23, %v12059_v41 }
 0x4cc   : > { %7431 = vrot.lane.b32.xlu1 %v13886_v4, %s8492_s9  ;;  %v12063_v63 = vrot.slane %v5121_v5, %v13808_v15  ;;  %v12087_v7 = vrot.slane %v5079_v38, %v13808_v15 }
 0x4cd   : > { %v5284_v3 = vpop.permute.xlu0 %5283  ;;  %v5345_v10 = vcombine.low %v12082_v8, %v12066_v49  ;;  %v12100_v50 = vrot.slane %v5379_v37, %v8828_v61 }
 0x4ce   : > { %v5304_v28 = vpop.permute.xlu1 %5303  ;;  %v5129_v9 = vcombine.low %v12074_v40, %v12063_v63 }
 0x4cf   : > { %7105 = vrot.lane.b32.xlu0 %v13885_v36, %s8490_s8  ;;  %v12108_v48 = vrot.slane %v5345_v10, %v8828_v61 }
 0x4d0   : > { %7435 = vrot.lane.b32.xlu1 %v11814_v43, %s8492_s9  ;;  %v5095_v43 = vcombine.low %v12087_v7, %v12077_v42  ;;  %v12103_v59 = vrot.slane %v5129_v9, %v8828_v61 }
 0x4d1   : > { %v5292_v45 = vpop.permute.xlu0 %5291 }
 0x4d2   : > { %v5312_v60 = vpop.permute.xlu1 %5311  ;;  %13887 = vst [vmem:[#allocation30_spill] sm:$0xff] %v12103_v59  ;;  %v12113_v47 = vrot.slane %v5095_v43, %v8828_v61 }
 0x4d3   : > { %7113 = vrot.lane.b32.xlu0 %v13886_v4, %s8490_s8  ;;  %v5439_v33 = vcombine.low %v5296_v62, %v5312_v60  ;;  %v5431_v4 = vcombine.low %v5288_v18, %v5304_v28 }
 0x4d4   : > { %6409 = vrot.lane.b32.xlu1 %v11652_v46, %s8492_s9  ;;  %13889 = vst [vmem:[#allocation82_spill] sm:$0xff] %v12113_v47 }
 0x4d5   : > { %v5300_v31 = vpop.permute.xlu0 %5299  ;;  %v12118_v62 = vrot.slane %v5439_v33, %v13808_v15  ;;  %v12127_v37 = vrot.slane %v5431_v4, %v13808_v15 }
 0x4d6   : > { %v12105_v36 = vpop.permute.xlu1 %4858  ;;  %v5397_v5 = vcombine.low %v5284_v3, %v5300_v31 }
 0x4d7   : > { %13888 = vst [vmem:[#allocation31_spill] sm:$0xff] %v12105_v36  ;;  %6405 = vrot.lane.b32.xlu0 %v11674_v19, %s8492_s9 }
 0x4d8   : > { %6417 = vrot.lane.b32.xlu1 %v11678_v21, %s8492_s9  ;;  %v12132_v3 = vrot.slane %v5397_v5, %v13808_v15 }
 0x4d9   : > { %v5308_v57 = vpop.permute.xlu0 %5307 }
 0x4da   : > { %v12122_v38 = vpop.permute.xlu1 %4874  ;;  %v5405_v18 = vcombine.low %v5292_v45, %v5308_v57  ;;  %v5447_v45 = vcombine.low %v12127_v37, %v12118_v62 }
 0x4db   : > { %13890 = vst [vmem:[#allocation87_spill] sm:$0xff] %v12122_v38  ;;  %6413 = vrot.lane.b32.xlu0 %v11682_v2, %s8492_s9 }
 0x4dc   : > { %v12135_v9 = vrot.slane %v5405_v18, %v13808_v15  ;;  %6425 = vrot.lane.b32.xlu1 %v11690_v13, %s8492_s9  ;;  %v12153_v31 = vrot.slane %v5447_v45, %v8828_v61 }
 0x4dd   : > { %v12141_v60 = vpop.permute.xlu0 %4870 }
 0x4de   : > { %13891 = vst [vmem:[#allocation86_spill] sm:$0xff] %v12141_v60  ;;  %v5413_v10 = vcombine.low %v12132_v3, %v12135_v9  ;;  %v7092_v43 = vpop.permute.xlu1 %7091  ;;  %13893 = vst [vmem:[#allocation29_spill] sm:$0xff] %v12153_v31  ;;  %v6849_v60 = vcombine.high %v11877_v55, %v13496_v35 }
 0x4df   : > { %6421 = vrot.lane.b32.xlu0 %v11694_v26, %s8492_s9 }
 0x4e0   : > { %v12148_v33 = vrot.slane %v5413_v10, %v8828_v61  ;;  %6433 = vrot.lane.b32.xlu1 %v11727_v44, %s8492_s9 }
 0x4e1   : > { %v12155_v4 = vpop.permute.xlu0 %4862 }
 0x4e2   : > { %13892 = vst [vmem:[#allocation88_spill] sm:$0xff] %v12148_v33  ;;  %13894 = vst [vmem:[#allocation28_spill] sm:$0xff] %v12155_v4  ;;  %v7100_v5 = vpop.permute.xlu1 %7099 }
 0x4e3   : > { %6429 = vrot.lane.b32.xlu0 %v11731_v34, %s8492_s9 }
 0x4e4   : > { %6091 = vrot.lane.b32.xlu1 %v11652_v46, %s8490_s8 }
 0x4e5   : > { %v12163_v18 = vpop.permute.xlu0 %4878 }
 0x4e6   : > { %13895 = vst [vmem:[#allocation89_spill] sm:$0xff] %v12163_v18  ;;  %v7108_v10 = vpop.permute.xlu1 %7107 }
 0x4e7   : > { %6087 = vrot.lane.b32.xlu0 %v11674_v19, %s8490_s8  ;;  %v7169_v18 = vcombine.low %v7092_v43, %v7108_v10 }
 0x4e8   : > { %6099 = vrot.lane.b32.xlu1 %v11678_v21, %s8490_s8 }
 0x4e9   : > { %v7088_v45 = vpop.permute.xlu0 %7087 }
 0x4ea   : > { %v7116_v28 = vpop.permute.xlu1 %7115 }
 0x4eb   : > { %6095 = vrot.lane.b32.xlu0 %v11682_v2, %s8490_s8  ;;  %v7177_v57 = vcombine.low %v7100_v5, %v7116_v28  ;;  %v8176_v2 = vcombine.low %v11771_v56, %v11771_v56  ;;  %v8173_v5 = vcombine.low %v11794_v27, %v11794_v27  ;;  %v8174_v56 = vcombine.low %v11785_v39, %v11785_v39 }
 0x4ec   : > { %6107 = vrot.lane.b32.xlu1 %v11690_v13, %s8490_s8  ;;  %v7176_v13 = vrot.slane %v7169_v18, %v13808_v15 }
 0x4ed   : > { %v7096_v20 = vpop.permute.xlu0 %7095  ;;  %v7184_v19 = vrot.slane %v7177_v57, %v13808_v15 }
 0x4ee   : > { %v12173_v46 = vpop.permute.xlu1 %4866 }
 0x4ef   : > { %13896 = vst [vmem:[#allocation33_spill] sm:$0xff] %v12173_v46  ;;  %6103 = vrot.lane.b32.xlu0 %v11694_v26, %s8490_s8  ;;  %v5832_v26 = vcombine.high %v11845_v52, %v11848_v0 }
 0x4f0   : > { %6115 = vrot.lane.b32.xlu1 %v11727_v44, %s8490_s8  ;;  %v7186_v44 = vcombine.high %v7176_v13, %v7184_v19 }
 0x4f1   : > { %v7104_v21 = vpop.permute.xlu0 %7103  ;;  %v12207_v27 = vrot.slane %v5832_v26, %v8828_v61  ;;  %v6967_v26 = vpack.i.b16 %v11871_v11, %v11883_v51  ;;  %v13905_v11 = vld [vmem:[#allocation19_spill] sm:$0xff] }
 0x4f2   : > { %v12180_v38 = vpop.permute.xlu1 %4882  ;;  %v7135_v28 = vcombine.low %v7088_v45, %v7104_v21  ;;  %v12210_v39 = vrot.slane %v7186_v44, %v8828_v61  ;;  %v13900_v21 = vld [vmem:[#allocation23_spill] sm:$0xff]  ;;  %v6956_v44 = vshrl.u32 %v11877_v55, 16  ;;  %v8175_v51 = vcombine.low %v13905_v11, %v13905_v11 }
 0x4f3   : > { %13897 = vst [vmem:[#allocation50_spill] sm:$0xff] %v12180_v38  ;;  %6111 = vrot.lane.b32.xlu0 %v11731_v34, %s8490_s8  ;;  %v13898_v34 = vcombine.high %v13861_v29, %v13862_v32  ;;  %v8177_v29 = vcombine.low %v13900_v21, %v13900_v21  ;;  %v8261_v21 = vcombine.low %v6967_v26, %v6967_v26 }
 0x4f4   : > { %4898 = vrot.lane.b32.xlu1 %v8176_v2, %s8529_s13  ;;  %v7142_v52 = vrot.slane %v7135_v28, %v13808_v15  ;;  %13899 = vst [vmem:[#allocation54_spill] sm:$0xff] %v12210_v39  ;;  %v13901_v28 = vld [vmem:[#allocation24_spill] sm:$0xff] }
 0x4f5   : > { %v7112_v43 = vpop.permute.xlu0 %7111  ;;  %v12201_v18 = vrot.slane %v13898_v34, %v8828_v61 }
 0x4f6   : > { %v12192_v57 = vpop.permute.xlu1 %6407  ;;  %v7143_v10 = vcombine.low %v7096_v20, %v7112_v43  ;;  %v7185_v20 = vcombine.low %v7176_v13, %v7184_v19 }
 0x4f7   : > { %4886 = vrot.lane.b32.xlu0 %v8173_v5, %s8501_s17  ;;  %v8178_v5 = vcombine.low %v13901_v28, %v13901_v28 }
 0x4f8   : > { %v7150_v0 = vrot.slane %v7143_v10, %v13808_v15  ;;  %4890 = vrot.lane.b32.xlu1 %v8174_v56, %s8495_s11  ;;  %v6957_v10 = vshrl.u32 %v11868_v22, 16  ;;  %v12233_v56 = vrot.slane %v7185_v20, %v8828_v61  ;;  %v5955_v20 = vshrl.u32 %v11899_v24, 16 }
 0x4f9   : > { %v12212_v45 = vpop.permute.xlu0 %7405 }
 0x4fa   : > { %v7151_v32 = vcombine.low %v7142_v52, %v7150_v0  ;;  %v7152_v2 = vcombine.high %v7142_v52, %v7150_v0  ;;  %v12216_v43 = vpop.permute.xlu1 %6415  ;;  %13904 = vst [vmem:[#allocation16_spill] sm:$0xff] %v12233_v56  ;;  %v12241_v52 = vcombine.high %v12210_v39, %v13496_v35  ;;  %v6958_v11 = vpack.i.b16 %v6957_v10, %v6956_v44 }
 0x4fb   : > { %4902 = vrot.lane.b32.xlu0 %v8177_v29, %s8528_s12  ;;  %v5965_v29 = vpack.i.b16 %v12201_v18, %v12207_v27  ;;  %v5881_v44 = vcombine.high %v11899_v24, %v13496_v35 }
 0x4fc   : > { %v12224_v19 = vrot.slane %v7151_v32, %v8828_v61  ;;  %v12227_v13 = vrot.slane %v7152_v2, %v8828_v61  ;;  %4906 = vrot.lane.b32.xlu1 %v8178_v5, %s8527_s10  ;;  %13906 = vst [vmem:[#allocation51_spill] sm:$0xff] %v12241_v52  ;;  %v5954_v32 = vshrl.u32 %v11910_v14, 16  ;;  %v13908_v5 = vld [vmem:[#allocation76_spill] sm:$0xff]  ;;  %v7293_v4 = vshrl.u32 %v12241_v52, 16 }
 0x4fd   : > { %v12235_v34 = vpop.permute.xlu0 %7409  ;;  %v8179_v26 = vcombine.low %v13908_v5, %v13908_v5  ;;  %v8211_v28 = vcombine.low %v5965_v29, %v5965_v29  ;;  %v5847_v5 = vcombine.high %v11910_v14, %v13496_v35  ;;  %v12287_v14 = vcombine.high %v11904_v6, %v13496_v35 }
 0x4fe   : > { %13902 = vst [vmem:[#allocation18_spill] sm:$0xff] %v12224_v19  ;;  %13903 = vst [vmem:[#allocation77_spill] sm:$0xff] %v12227_v13  ;;  %v12243_v0 = vpop.permute.xlu1 %6423  ;;  %v12252_v2 = vcombine.high %v12227_v13, %v13496_v35  ;;  %v5961_v33 = vshrl.u32 %v5881_v44, 16 }
 0x4ff   : > { %4894 = vrot.lane.b32.xlu0 %v8175_v51, %s8530_s14  ;;  %v6883_v51 = vcombine.high %v11868_v22, %v13496_v35  ;;  %v8258_v22 = vcombine.low %v6958_v11, %v6958_v11  ;;  %v5960_v31 = vshrl.u32 %v5847_v5, 16 }
 0x500   : > { %13907 = vst [vmem:[#allocation15_spill] sm:$0xff] %v12252_v2  ;;  %7015 = vrot.lane.b32.xlu1 %v8261_v21, %s8529_s13  ;;  %v7292_v46 = vshrl.u32 %v12252_v2, 16  ;;  %v5956_v21 = vpack.i.b16 %v5955_v20, %v5954_v32  ;;  %v5959_v32 = vpack.i.b16 %v5881_v44, %v5847_v5  ;;  %v12283_v20 = vcombine.high %v11916_v12, %v13496_v35 }
 0x501   : > { %v12259_v38 = vpop.permute.xlu0 %7413  ;;  %v6961_v52 = vpack.i.b16 %v6883_v51, %v6849_v60  ;;  %v6963_v11 = vshrl.u32 %v6883_v51, 16  ;;  %v5882_v51 = vcombine.high %v12201_v18, %v13496_v35 }
 0x502   : > { %v12267_v36 = vpop.permute.xlu1 %6431  ;;  %v12274_v10 = vpack.i.b16 %v7293_v4, %v7292_v46  ;;  %v8208_v29 = vcombine.low %v5956_v21, %v5956_v21  ;;  %v6991_v4 = vpack.i.b16 %v11929_v54, %v11939_v30  ;;  %v6962_v46 = vshrl.u32 %v6849_v60, 16 }
 0x503   : > { %4910 = vrot.lane.b32.xlu0 %v8179_v26, %s8519_s21  ;;  %v8259_v26 = vcombine.low %v6961_v52, %v6961_v52  ;;  %v5966_v21 = vshrl.u32 %v12207_v27, 16  ;;  %v8209_v56 = vcombine.low %v5959_v32, %v5959_v32  ;;  %v6985_v19 = vpack.i.b16 %v12287_v14, %v12283_v20 }
 0x504   : > { %13909 = vst [vmem:[#allocation58_spill] sm:$0xff] %v12274_v10  ;;  %6013 = vrot.lane.b32.xlu1 %v8211_v28, %s8529_s13  ;;  %v5967_v10 = vshrl.u32 %v12201_v18, 16  ;;  %v6964_v60 = vpack.i.b16 %v6963_v11, %v6962_v46  ;;  %v5848_v52 = vcombine.high %v12207_v27, %v13496_v35  ;;  %v5973_v5 = vshrl.u32 %v5882_v51, 16 }
 0x505   : > { %v12277_v55 = vpop.permute.xlu0 %7417  ;;  %v8266_v32 = vcombine.low %v6985_v19, %v6985_v19 }
 0x506   : > { %v12279_v2 = vpop.permute.xlu1 %6089  ;;  %v5968_v39 = vpack.i.b16 %v5967_v10, %v5966_v21  ;;  %v8260_v46 = vcombine.low %v6964_v60, %v6964_v60  ;;  %v5971_v27 = vpack.i.b16 %v5882_v51, %v5848_v52  ;;  %v5962_v21 = vpack.i.b16 %v5961_v33, %v5960_v31 }
 0x507   : > { %7003 = vrot.lane.b32.xlu0 %v8258_v22, %s8501_s17  ;;  %v8268_v22 = vcombine.low %v6991_v4, %v6991_v4  ;;  %v6981_v4 = vshrl.u32 %v11904_v6, 16  ;;  %v5972_v19 = vshrl.u32 %v5848_v52, 16  ;;  %v6986_v60 = vshrl.u32 %v12283_v20, 16 }
 0x508   : > { %6001 = vrot.lane.b32.xlu1 %v8208_v29, %s8501_s17  ;;  %v8213_v6 = vcombine.low %v5971_v27, %v5971_v27  ;;  %v6993_v33 = vshrl.u32 %v11929_v54, 16 }
 0x509   : > { %v7422_v28 = vpop.permute.xlu0 %7421 }
 0x50a   : > { %v12295_v24 = vpop.permute.xlu1 %6097  ;;  %v7453_v44 = vcombine.low %v12212_v45, %v7422_v28  ;;  %v8210_v28 = vcombine.low %v5962_v21, %v5962_v21 }
 0x50b   : > { %7007 = vrot.lane.b32.xlu0 %v8259_v26, %s8495_s11  ;;  %v8212_v26 = vcombine.low %v5968_v39, %v5968_v39 }
 0x50c   : > { %6005 = vrot.lane.b32.xlu1 %v8209_v56, %s8495_s11  ;;  %v6980_v56 = vshrl.u32 %v11916_v12, 16  ;;  %v12329_v52 = vrot.slane %v7453_v44, %v13808_v15 }
 0x50d   : > { %v7426_v29 = vpop.permute.xlu0 %7425 }
 0x50e   : > { %v12305_v13 = vpop.permute.xlu1 %6105  ;;  %13911 = vst [vmem:[#allocation44_spill] sm:$0xff] %v12329_v52 }
 0x50f   : > { %7043 = vrot.lane.b32.xlu0 %v8268_v22, %s8529_s13  ;;  %v7487_v22 = vcombine.low %v12235_v34, %v7426_v29  ;;  %v5974_v34 = vpack.i.b16 %v5973_v5, %v5972_v19  ;;  %v6987_v29 = vshrl.u32 %v12287_v14, 16  ;;  %v6493_v5 = vcombine.low %v12216_v43, %v12267_v36 }
 0x510   : > { %7035 = vrot.lane.b32.xlu1 %v8266_v32, %s8495_s11  ;;  %v6982_v32 = vpack.i.b16 %v6981_v4, %v6980_v56  ;;  %v5028_v36 = vcombine.high %v12009_v25, %v12004_v53  ;;  %v5151_v53 = vshrl.u32 %v12028_v16, 16 }
 0x511   : > { %v7430_v10 = vpop.permute.xlu0 %7429  ;;  %v12333_v20 = vrot.slane %v7487_v22, %v13808_v15  ;;  %v6988_v4 = vpack.i.b16 %v6987_v29, %v6986_v60  ;;  %v13914_v22 = vld [vmem:[#allocation48_spill] sm:$0xff]  ;;  %v5062_v60 = vcombine.high %v12014_v1, %v12017_v17  ;;  %v8216_v17 = vcombine.low %v11931_v58, %v11931_v58 }
 0x512   : > { %v12311_v11 = vpop.permute.xlu1 %6113  ;;  %v7461_v18 = vcombine.low %v12259_v38, %v7430_v10  ;;  %v6992_v38 = vshrl.u32 %v11939_v30, 16 }
 0x513   : > { %6017 = vrot.lane.b32.xlu0 %v8212_v26, %s8528_s12  ;;  %13912 = vst [vmem:[#allocation55_spill] sm:$0xff] %v12333_v20  ;;  %v8267_v21 = vcombine.low %v6988_v4, %v6988_v4  ;;  %v5076_v29 = vrot.slane %v5062_v60, %v8828_v61  ;;  %v5380_v4 = vcombine.high %v12069_v23, %v12059_v41 }
 0x514   : > { %7011 = vrot.lane.b32.xlu1 %v8260_v46, %s8530_s14  ;;  %v12320_v39 = vrot.slane %v7461_v18, %v13808_v15  ;;  %v6994_v51 = vpack.i.b16 %v6993_v33, %v6992_v38  ;;  %v13915_v33 = vld [vmem:[#allocation79_spill] sm:$0xff]  ;;  %v5346_v41 = vcombine.high %v12082_v8, %v12066_v49 }
 0x515   : > { %v7434_v12 = vpop.permute.xlu0 %7433 }
 0x516   : > { %13910 = vst [vmem:[#allocation63_spill] sm:$0xff] %v12320_v39  ;;  %v12324_v31 = vpop.permute.xlu1 %7093  ;;  %v7495_v45 = vcombine.low %v12277_v55, %v7434_v12  ;;  %v7469_v54 = vcombine.low %v12329_v52, %v12320_v39  ;;  %v8265_v12 = vcombine.low %v6982_v32, %v6982_v32  ;;  %v8269_v27 = vcombine.low %v6994_v51, %v6994_v51 }
 0x517   : > { %6021 = vrot.lane.b32.xlu0 %v8213_v6, %s8527_s10  ;;  %v8214_v6 = vcombine.low %v5974_v34, %v5974_v34  ;;  %v8218_v32 = vcombine.low %v13914_v22, %v13914_v22  ;;  %v12376_v34 = vrot.slane %v6493_v5, %v13808_v15  ;;  %v5130_v39 = vcombine.high %v12074_v40, %v12063_v63 }
 0x518   : > { %v12336_v30 = vrot.slane %v7495_v45, %v13808_v15  ;;  %6009 = vrot.lane.b32.xlu1 %v8210_v28, %s8530_s14  ;;  %v12351_v46 = vrot.slane %v7469_v54, %v8828_v61  ;;  %v8215_v45 = vcombine.low %v13915_v33, %v13915_v33  ;;  %v6485_v28 = vcombine.low %v12192_v57, %v12243_v0  ;;  %v13916_v0 = vld [vmem:[#allocation49_spill] sm:$0xff] }
 0x519   : > { %v6404_v55 = vpop.permute.xlu0 %6403 }
 0x51a   : > { %13913 = vst [vmem:[#allocation41_spill] sm:$0xff] %v12336_v30  ;;  %v7503_v14 = vcombine.low %v12333_v20, %v12336_v30  ;;  %v12343_v56 = vpop.permute.xlu1 %7101  ;;  %v12387_v25 = vrot.slane %v6485_v28, %v13808_v15 }
 0x51b   : > { %7031 = vrot.lane.b32.xlu0 %v8265_v12, %s8501_s17  ;;  %v8220_v12 = vcombine.low %v13916_v0, %v13916_v0 }
 0x51c   : > { %v12347_v10 = vrot.slane %v7503_v14, %v8828_v61  ;;  %6025 = vrot.lane.b32.xlu1 %v8214_v6, %s8519_s21  ;;  %v13917_v14 = vld [vmem:[#allocation81_spill] sm:$0xff] }
 0x51d   : > { %v6412_v26 = vpop.permute.xlu0 %6411  ;;  %v5150_v6 = vshrl.u32 %v13917_v14, 16 }
 0x51e   : > { %v12353_v18 = vpop.permute.xlu1 %7109 }
 0x51f   : > { %7047 = vrot.lane.b32.xlu0 %v8269_v27, %s8528_s12  ;;  %v5152_v33 = vpack.i.b16 %v5151_v53, %v5150_v6  ;;  %v5469_v53 = vshrl.u32 %v12100_v50, 16  ;;  %v5360_v6 = vrot.slane %v5346_v41, %v8828_v61 }
 0x520   : > { %7039 = vrot.lane.b32.xlu1 %v8267_v21, %s8530_s14  ;;  %v13918_v21 = vld [vmem:[#allocation40_spill] sm:$0xff] }
 0x521   : > { %v6420_v44 = vpop.permute.xlu0 %6419  ;;  %v8219_v5 = vcombine.low %v13918_v21, %v13918_v21  ;;  %v8180_v49 = vcombine.low %v5152_v33, %v5152_v33  ;;  %v6175_v21 = vcombine.low %v12295_v24, %v12311_v11  ;;  %v5043_v24 = vcombine.high %v13917_v14, %v13496_v35 }
 0x522   : > { %v12365_v38 = vpop.permute.xlu1 %7117  ;;  %v6451_v43 = vcombine.low %v6404_v55, %v6420_v44  ;;  %v5042_v55 = vrot.slane %v5028_v36, %v8828_v61  ;;  %v5394_v36 = vrot.slane %v5380_v4, %v8828_v61 }
 0x523   : > { %6041 = vrot.lane.b32.xlu0 %v8218_v32, %s8529_s13  ;;  %v13919_v32 = vld [vmem:[#allocation32_spill] sm:$0xff] }
 0x524   : > { %6029 = vrot.lane.b32.xlu1 %v8215_v45, %s8501_s17  ;;  %v12392_v51 = vrot.slane %v6451_v43, %v13808_v15  ;;  %v8221_v60 = vcombine.low %v13919_v32, %v13919_v32  ;;  %v5163_v45 = vshrl.u32 %v5076_v29, 16  ;;  %v5162_v28 = vshrl.u32 %v5042_v55, 16 }
 0x525   : > { %v6428_v1 = vpop.permute.xlu0 %6427  ;;  %v5161_v0 = vpack.i.b16 %v5076_v29, %v5042_v55  ;;  %v5479_v32 = vpack.i.b16 %v5394_v36, %v5360_v6  ;;  %v5481_v4 = vshrl.u32 %v5394_v36, 16 }
 0x526   : > { %v12381_v54 = vpop.permute.xlu1 %7407  ;;  %v6459_v57 = vcombine.low %v6412_v26, %v6428_v1  ;;  %v6501_v26 = vcombine.low %v12387_v25, %v12376_v34  ;;  %v5164_v8 = vpack.i.b16 %v5163_v45, %v5162_v28  ;;  %v12441_v28 = vcombine.high %v12100_v50, %v13496_v35 }
 0x527   : > { %6033 = vrot.lane.b32.xlu0 %v8216_v17, %s8495_s11  ;;  %v13922_v17 = vld [vmem:[#allocation35_spill] sm:$0xff] }
 0x528   : > { %v12395_v58 = vrot.slane %v6459_v57, %v13808_v15  ;;  %6049 = vrot.lane.b32.xlu1 %v8220_v12, %s8527_s10  ;;  %v12420_v43 = vrot.slane %v6501_v26, %v8828_v61  ;;  %v8217_v57 = vcombine.low %v13922_v17, %v13922_v17  ;;  %v5468_v26 = vshrl.u32 %v12108_v48, 16 }
 0x529   : > { %v6086_v27 = vpop.permute.xlu0 %6085  ;;  %v8184_v45 = vcombine.low %v5164_v8, %v5164_v8  ;;  %v6167_v17 = vcombine.low %v12279_v2, %v12305_v13  ;;  %v8197_v8 = vcombine.low %v5479_v32, %v5479_v32 }
 0x52a   : > { %v6467_v44 = vcombine.low %v12392_v51, %v12395_v58  ;;  %v12407_v22 = vpop.permute.xlu1 %7411  ;;  %13921 = vst [vmem:[#allocation42_spill] sm:$0xff] %v12420_v43  ;;  %v5470_v41 = vpack.i.b16 %v5469_v53, %v5468_v26  ;;  %v5078_v26 = vcombine.high %v5076_v29, %v13496_v35  ;;  %v5480_v29 = vshrl.u32 %v5360_v6, 16 }
 0x52b   : > { %6045 = vrot.lane.b32.xlu0 %v8219_v5, %s8528_s12 }
 0x52c   : > { %v12415_v23 = vrot.slane %v6467_v44, %v8828_v61  ;;  %6053 = vrot.lane.b32.xlu1 %v8221_v60, %s8519_s21  ;;  %v8183_v44 = vcombine.low %v5161_v0, %v5161_v0  ;;  %v5077_v60 = vcombine.high %v12028_v16, %v13496_v35  ;;  %v12452_v0 = vrot.slane %v6175_v21, %v13808_v15 }
 0x52d   : > { %v6094_v1 = vpop.permute.xlu0 %6093  ;;  %v5482_v52 = vpack.i.b16 %v5481_v4, %v5480_v29  ;;  %v5475_v29 = vshrl.u32 %v12441_v28, 16 }
 0x52e   : > { %13920 = vst [vmem:[#allocation56_spill] sm:$0xff] %v12415_v23  ;;  %v12424_v12 = vpop.permute.xlu1 %7415  ;;  %v5155_v53 = vpack.i.b16 %v5077_v60, %v5043_v24 }
 0x52f   : > { %6037 = vrot.lane.b32.xlu0 %v8217_v57, %s8530_s14  ;;  %v5361_v57 = vcombine.high %v12108_v48, %v13496_v35  ;;  %v8198_v40 = vcombine.low %v5482_v52, %v5482_v52 }
 0x530   : > { %5197 = vrot.lane.b32.xlu1 %v8180_v49, %s8501_s17 }
 0x531   : > { %v6102_v5 = vpop.permute.xlu0 %6101  ;;  %v5473_v19 = vpack.i.b16 %v12441_v28, %v5361_v57 }
 0x532   : > { %v12437_v33 = vpop.permute.xlu1 %7419  ;;  %v6133_v11 = vcombine.low %v6086_v27, %v6102_v5  ;;  %v12457_v27 = vrot.slane %v6167_v17, %v13808_v15  ;;  %v5044_v5 = vcombine.high %v5042_v55, %v13496_v35 }
 0x533   : > { %5209 = vrot.lane.b32.xlu0 %v8183_v44, %s8529_s13  ;;  %v8194_v44 = vcombine.low %v5470_v41, %v5470_v41  ;;  %v8181_v41 = vcombine.low %v5155_v53, %v5155_v53  ;;  %v5169_v53 = vshrl.u32 %v5078_v26, 16 }
 0x534   : > { %5213 = vrot.lane.b32.xlu1 %v8184_v45, %s8528_s12  ;;  %v12462_v21 = vrot.slane %v6133_v11, %v13808_v15  ;;  %v5167_v17 = vpack.i.b16 %v5078_v26, %v5044_v5 }
 0x535   : > { %v6110_v49 = vpop.permute.xlu0 %6109 }
 0x536   : > { %v7424_v13 = vpop.permute.xlu1 %7423  ;;  %v6141_v2 = vcombine.low %v6094_v1, %v6110_v49  ;;  %v6183_v1 = vcombine.low %v12457_v27, %v12452_v0  ;;  %v5396_v49 = vcombine.high %v5394_v36, %v13496_v35  ;;  %v5156_v36 = vshrl.u32 %v5043_v24, 16 }
 0x537   : > { %5527 = vrot.lane.b32.xlu0 %v8197_v8, %s8529_s13  ;;  %v8195_v8 = vcombine.low %v5473_v19, %v5473_v19  ;;  %v8185_v4 = vcombine.low %v5167_v17, %v5167_v17  ;;  %v5474_v24 = vshrl.u32 %v5361_v57, 16  ;;  %v7521_v17 = vcombine.low %v12381_v54, %v7424_v13 }
 0x538   : > { %v12465_v32 = vrot.slane %v6141_v2, %v13808_v15  ;;  %5515 = vrot.lane.b32.xlu1 %v8194_v44, %s8501_s17  ;;  %v5157_v2 = vshrl.u32 %v5077_v60, 16  ;;  %v5362_v44 = vcombine.high %v5360_v6, %v13496_v35  ;;  %v12484_v30 = vrot.slane %v6183_v1, %v8828_v61 }
 0x539   : > { %v12470_v45 = vpop.permute.xlu0 %7089  ;;  %v5096_v6 = vcombine.high %v12087_v7, %v12077_v42  ;;  %v5144_v1 = vrot.slane %v5130_v39, %v8828_v61  ;;  %v5487_v39 = vshrl.u32 %v5396_v49, 16  ;;  %v5174_v13 = vshrl.u32 %v12113_v47, 16 }
 0x53a   : > { %v6149_v55 = vcombine.low %v12462_v21, %v12465_v32  ;;  %v7428_v11 = vpop.permute.xlu1 %7427  ;;  %13924 = vst [vmem:[#allocation61_spill] sm:$0xff] %v12484_v30  ;;  %v5485_v60 = vpack.i.b16 %v5396_v49, %v5362_v44 }
 0x53b   : > { %5201 = vrot.lane.b32.xlu0 %v8181_v41, %s8495_s11  ;;  %v5158_v41 = vpack.i.b16 %v5157_v2, %v5156_v36  ;;  %v7555_v42 = vcombine.low %v12407_v22, %v7428_v11  ;;  %v5110_v2 = vrot.slane %v5096_v6, %v8828_v61  ;;  %v12508_v22 = vrot.slane %v7521_v17, %v13808_v15 }
 0x53c   : > { %v12480_v20 = vrot.slane %v6149_v55, %v8828_v61  ;;  %5519 = vrot.lane.b32.xlu1 %v8195_v8, %s8495_s11  ;;  %v5168_v55 = vshrl.u32 %v5044_v5, 16  ;;  %v8199_v52 = vcombine.low %v5485_v60, %v5485_v60  ;;  %v5476_v5 = vpack.i.b16 %v5475_v29, %v5474_v24 }
 0x53d   : > { %v12486_v19 = vpop.permute.xlu0 %7097  ;;  %13926 = vst [vmem:[#allocation53_spill] sm:$0xff] %v12508_v22  ;;  %v5187_v60 = vshrl.u32 %v5144_v1, 16  ;;  %v12512_v29 = vrot.slane %v7555_v42, %v13808_v15  ;;  %v12531_v42 = vcombine.high %v5144_v1, %v13496_v35 }
 0x53e   : > { %13923 = vst [vmem:[#allocation25_spill] sm:$0xff] %v12480_v20  ;;  %v7432_v63 = vpop.permute.xlu1 %7431  ;;  %v5170_v28 = vpack.i.b16 %v5169_v53, %v5168_v55  ;;  %v5486_v53 = vshrl.u32 %v5362_v44, 16  ;;  %v5186_v44 = vshrl.u32 %v5110_v2, 16 }
 0x53f   : > { %v7529_v8 = vcombine.low %v12424_v12, %v7432_v63  ;;  %5217 = vrot.lane.b32.xlu0 %v8185_v4, %s8527_s10  ;;  %v5175_v12 = vshrl.u32 %v12103_v59, 16  ;;  %v8182_v4 = vcombine.low %v5158_v41, %v5158_v41 }
 0x540   : > { %5531 = vrot.lane.b32.xlu1 %v8198_v40, %s8528_s12  ;;  %v8186_v11 = vcombine.low %v5170_v28, %v5170_v28  ;;  %v5414_v40 = vcombine.high %v12132_v3, %v12135_v9  ;;  %v5448_v28 = vcombine.high %v12127_v37, %v12118_v62  ;;  %v5185_v3 = vpack.i.b16 %v5144_v1, %v5110_v2 }
 0x541   : > { %v7106_v7 = vpop.permute.xlu0 %7105  ;;  %v12502_v57 = vrot.slane %v7529_v8, %v13808_v15  ;;  %v5176_v63 = vpack.i.b16 %v5175_v12, %v5174_v13  ;;  %v5488_v8 = vpack.i.b16 %v5487_v39, %v5486_v53  ;;  %v5188_v9 = vpack.i.b16 %v5187_v60, %v5186_v44 }
 0x542   : > { %v7436_v36 = vpop.permute.xlu1 %7435  ;;  %v12544_v1 = vcombine.high %v5110_v2, %v13496_v35 }
 0x543   : > { %13925 = vst [vmem:[#allocation65_spill] sm:$0xff] %v12502_v57  ;;  %v7563_v54 = vcombine.low %v12437_v33, %v7436_v36  ;;  %5535 = vrot.lane.b32.xlu0 %v8199_v52, %s8527_s10  ;;  %v8196_v33 = vcombine.low %v5476_v5, %v5476_v5  ;;  %v7537_v41 = vcombine.low %v12508_v22, %v12502_v57 }
 0x544   : > { %5205 = vrot.lane.b32.xlu1 %v8182_v4, %s8530_s14  ;;  %v7245_v52 = vcombine.low %v12343_v56, %v12365_v38  ;;  %v8187_v36 = vcombine.low %v5176_v63, %v5176_v63  ;;  %v5428_v4 = vrot.slane %v5414_v40, %v8828_v61  ;;  %v8200_v39 = vcombine.low %v5488_v8, %v5488_v8  ;;  %v13928_v8 = vld [vmem:[#allocation29_spill] sm:$0xff] }
 0x545   : > { %v12515_v6 = vrot.slane %v7563_v54, %v13808_v15  ;;  %v7114_v49 = vpop.permute.xlu0 %7113  ;;  %v12541_v62 = vrot.slane %v7537_v41, %v8828_v61  ;;  %v7237_v56 = vcombine.low %v12324_v31, %v12353_v18  ;;  %v8191_v13 = vcombine.low %v5188_v9, %v5188_v9 }
 0x546   : > { %v12521_v55 = vpop.permute.xlu1 %6409  ;;  %v7211_v17 = vcombine.low %v12486_v19, %v7114_v49  ;;  %v7203_v19 = vcombine.low %v12470_v45, %v7106_v7  ;;  %v5462_v45 = vrot.slane %v5448_v28, %v8828_v61  ;;  %v5191_v7 = vpack.i.b16 %v12531_v42, %v12544_v1 }
 0x547   : > { %v7571_v24 = vcombine.low %v12512_v29, %v12515_v6  ;;  %5523 = vrot.lane.b32.xlu0 %v8196_v33, %s8530_s14  ;;  %v12559_v2 = vrot.slane %v7245_v52, %v13808_v15  ;;  %v8190_v49 = vcombine.low %v5185_v3, %v5185_v3  ;;  %v12567_v63 = vcombine.high %v12103_v59, %v13496_v35 }
 0x548   : > { %5221 = vrot.lane.b32.xlu1 %v8186_v11, %s8519_s21  ;;  %v12549_v38 = vrot.slane %v7211_v17, %v13808_v15  ;;  %v12562_v31 = vrot.slane %v7203_v19, %v13808_v15  ;;  %v13927_v11 = vld [vmem:[#allocation88_spill] sm:$0xff]  ;;  %v5503_v33 = vpack.i.b16 %v5462_v45, %v5428_v4  ;;  %v12570_v40 = vrot.slane %v7237_v56, %v13808_v15 }
 0x549   : > { %v12536_v5 = vrot.slane %v7571_v24, %v8828_v61  ;;  %v6406_v12 = vpop.permute.xlu0 %6405  ;;  %v5492_v53 = vshrl.u32 %v13927_v11, 16  ;;  %v5493_v44 = vshrl.u32 %v13928_v8, 16  ;;  %v12579_v24 = vcombine.high %v12113_v47, %v13496_v35  ;;  %v13934_v47 = vld [vmem:[#allocation54_spill] sm:$0xff] }
 0x54a   : > { %v6418_v37 = vpop.permute.xlu1 %6417  ;;  %v7219_v41 = vcombine.low %v12562_v31, %v12549_v38  ;;  %v7253_v17 = vcombine.low %v12570_v40, %v12559_v2  ;;  %v8192_v3 = vcombine.low %v5191_v7, %v5191_v7  ;;  %v12585_v52 = vcombine.high %v13927_v11, %v13496_v35 }
 0x54b   : > { %5225 = vrot.lane.b32.xlu0 %v8187_v36, %s8501_s17  ;;  %v5494_v9 = vpack.i.b16 %v5493_v44, %v5492_v53  ;;  %v8204_v36 = vcombine.low %v5503_v33, %v5503_v33  ;;  %v5504_v56 = vshrl.u32 %v5428_v4, 16  ;;  %v12596_v7 = vcombine.high %v13928_v8, %v13496_v35  ;;  %v13933_v8 = vld [vmem:[#allocation77_spill] sm:$0xff] }
 0x54c   : > { %5539 = vrot.lane.b32.xlu1 %v8200_v39, %s8519_s21  ;;  %v5179_v39 = vpack.i.b16 %v12567_v63, %v12579_v24  ;;  %v5505_v33 = vshrl.u32 %v5462_v45, 16  ;;  %v5430_v44 = vcombine.high %v5428_v4, %v13496_v35  ;;  %v12601_v26 = vrot.slane %v7253_v17, %v8828_v61 }
 0x54d   : > { %v6414_v18 = vpop.permute.xlu0 %6413  ;;  %v7285_v59 = vpack.i.b16 %v13934_v47, %v13933_v8 }
 0x54e   : > { %v6426_v60 = vpop.permute.xlu1 %6425  ;;  %13930 = vst [vmem:[#allocation43_spill] sm:$0xff] %v12601_v26 }
 0x54f   : > { %5241 = vrot.lane.b32.xlu0 %v8191_v13, %s8528_s12  ;;  %v12590_v13 = vrot.slane %v7219_v41, %v8828_v61 }
 0x550   : > { %5237 = vrot.lane.b32.xlu1 %v8190_v49, %s8529_s13  ;;  %v6553_v49 = vcombine.low %v12521_v55, %v6426_v60  ;;  %v5497_v60 = vpack.i.b16 %v12596_v7, %v12585_v52 }
 0x551   : > { %v6422_v28 = vpop.permute.xlu0 %6421  ;;  %13929 = vst [vmem:[#allocation38_spill] sm:$0xff] %v12590_v13 }
 0x552   : > { %v6434_v19 = vpop.permute.xlu1 %6433  ;;  %v6519_v53 = vcombine.low %v6406_v12, %v6422_v28  ;;  %v8188_v12 = vcombine.low %v5179_v39, %v5179_v39  ;;  %v5506_v28 = vpack.i.b16 %v5505_v33, %v5504_v56  ;;  %v12612_v4 = vrot.slane %v6553_v49, %v13808_v15 }
 0x553   : > { %v6561_v54 = vcombine.low %v6418_v37, %v6434_v19  ;;  %5245 = vrot.lane.b32.xlu0 %v8192_v3, %s8527_s10  ;;  %v8201_v37 = vcombine.low %v5494_v9, %v5494_v9  ;;  %v8202_v56 = vcombine.low %v5497_v60, %v5497_v60 }
 0x554   : > { %5555 = vrot.lane.b32.xlu1 %v8204_v36, %s8529_s13  ;;  %v5193_v36 = vshrl.u32 %v12531_v42, 16  ;;  %v12619_v9 = vrot.slane %v6519_v53, %v13808_v15  ;;  %v5192_v42 = vshrl.u32 %v12544_v1, 16 }
 0x555   : > { %v12604_v41 = vrot.slane %v6561_v54, %v13808_v15  ;;  %v6430_v55 = vpop.permute.xlu0 %6429  ;;  %v5464_v54 = vcombine.high %v5462_v45, %v13496_v35 }
 0x556   : > { %v12608_v3 = vpop.permute.xlu1 %6091  ;;  %v6527_v19 = vcombine.low %v6414_v18, %v6430_v55  ;;  %v8205_v55 = vcombine.low %v5506_v28, %v5506_v28  ;;  %v5194_v53 = vpack.i.b16 %v5193_v36, %v5192_v42  ;;  %v5181_v28 = vshrl.u32 %v12567_v63, 16 }
 0x557   : > { %5543 = vrot.lane.b32.xlu0 %v8201_v37, %s8501_s17  ;;  %v6569_v18 = vcombine.low %v12612_v4, %v12604_v41  ;;  %v5509_v49 = vpack.i.b16 %v5464_v54, %v5430_v44  ;;  %v5510_v37 = vshrl.u32 %v5430_v44, 16  ;;  %v5511_v1 = vshrl.u32 %v5464_v54, 16 }
 0x558   : > { %v12622_v11 = vrot.slane %v6527_v19, %v13808_v15  ;;  %5229 = vrot.lane.b32.xlu1 %v8188_v12, %s8495_s11  ;;  %v7220_v44 = vcombine.high %v12562_v31, %v12549_v38  ;;  %v8193_v42 = vcombine.low %v5194_v53, %v5194_v53  ;;  %v5180_v54 = vshrl.u32 %v12579_v24, 16  ;;  %v13936_v38 = vld [vmem:[#allocation16_spill] sm:$0xff] }
 0x559   : > { %v6088_v39 = vpop.permute.xlu0 %6087  ;;  %v12636_v12 = vrot.slane %v6569_v18, %v8828_v61  ;;  %v8206_v17 = vcombine.low %v5509_v49, %v5509_v49  ;;  %v7254_v63 = vcombine.high %v12570_v40, %v12559_v2  ;;  %v12656_v31 = vcombine.high %v13936_v38, %v13496_v35 }
 0x55a   : > { %v6535_v45 = vcombine.low %v12619_v9, %v12622_v11  ;;  %v6100_v33 = vpop.permute.xlu1 %6099  ;;  %v5498_v49 = vshrl.u32 %v12585_v52, 16  ;;  %v6468_v53 = vcombine.high %v12392_v51, %v12395_v58  ;;  %v5182_v24 = vpack.i.b16 %v5181_v28, %v5180_v54 }
 0x55b   : > { %5547 = vrot.lane.b32.xlu0 %v8202_v56, %s8495_s11  ;;  %13932 = vst [vmem:[#allocation71_spill] sm:$0xff] %v12636_v12  ;;  %v5512_v56 = vpack.i.b16 %v5511_v1, %v5510_v37  ;;  %v8275_v37 = vcombine.low %v7285_v59, %v7285_v59  ;;  %v12662_v1 = vrot.slane %v7220_v44, %v8828_v61  ;;  %v5499_v40 = vshrl.u32 %v12596_v7, 16 }
 0x55c   : > { %v12632_v19 = vrot.slane %v6535_v45, %v8828_v61  ;;  %5559 = vrot.lane.b32.xlu1 %v8205_v55, %s8528_s12  ;;  %v13935_v45 = vld [vmem:[#allocation18_spill] sm:$0xff]  ;;  %v12672_v59 = vrot.slane %v7254_v63, %v8828_v61  ;;  %v12676_v28 = vrot.slane %v6468_v53, %v8828_v61 }
 0x55d   : > { %v6096_v60 = vpop.permute.xlu0 %6095  ;;  %v12645_v55 = vcombine.high %v13935_v45, %v13496_v35  ;;  %v8207_v22 = vcombine.low %v5512_v56, %v5512_v56  ;;  %v5500_v58 = vpack.i.b16 %v5499_v40, %v5498_v49 }
 0x55e   : > { %13931 = vst [vmem:[#allocation68_spill] sm:$0xff] %v12632_v19  ;;  %v6108_v36 = vpop.permute.xlu1 %6107 }
 0x55f   : > { %5563 = vrot.lane.b32.xlu0 %v8206_v17, %s8527_s10  ;;  %v7279_v2 = vpack.i.b16 %v12656_v31, %v12645_v55  ;;  %v6235_v52 = vcombine.low %v12608_v3, %v6108_v36  ;;  %v7309_v36 = vpack.i.b16 %v12672_v59, %v12662_v1 }
 0x560   : > { %5249 = vrot.lane.b32.xlu1 %v8193_v42, %s8519_s21  ;;  %v6502_v42 = vcombine.high %v12387_v25, %v12376_v34  ;;  %v8189_v34 = vcombine.low %v5182_v24, %v5182_v24 }
 0x561   : > { %v6104_v17 = vpop.permute.xlu0 %6103  ;;  %v12690_v56 = vrot.slane %v6235_v52, %v13808_v15  ;;  %v8282_v24 = vcombine.low %v7309_v36, %v7309_v36 }
 0x562   : > { %v6116_v18 = vpop.permute.xlu1 %6115  ;;  %v6201_v51 = vcombine.low %v6088_v39, %v6104_v17  ;;  %v7286_v39 = vshrl.u32 %v13933_v8, 16  ;;  %v6150_v8 = vcombine.high %v12462_v21, %v12465_v32  ;;  %v7274_v17 = vshrl.u32 %v13935_v45, 16 }
 0x563   : > { %v6243_v57 = vcombine.low %v6100_v33, %v6116_v18  ;;  %7333 = vrot.lane.b32.xlu0 %v8275_v37, %s8529_s13  ;;  %v8273_v33 = vcombine.low %v7279_v2, %v7279_v2  ;;  %v7287_v18 = vshrl.u32 %v13934_v47, 16  ;;  %v6184_v21 = vcombine.high %v12457_v27, %v12452_v0 }
 0x564   : > { %5567 = vrot.lane.b32.xlu1 %v8207_v22, %s8519_s21  ;;  %v12687_v22 = vrot.slane %v6502_v42, %v8828_v61  ;;  %v7275_v32 = vshrl.u32 %v13936_v38, 16  ;;  %v12723_v40 = vrot.slane %v6150_v8, %v8828_v61  ;;  %v7310_v38 = vshrl.u32 %v12662_v1, 16 }
 0x565   : > { %v12679_v7 = vrot.slane %v6243_v57, %v13808_v15  ;;  %v6112_v44 = vpop.permute.xlu0 %6111  ;;  %v12694_v57 = vrot.slane %v6201_v51, %v13808_v15  ;;  %v7288_v47 = vpack.i.b16 %v7287_v18, %v7286_v39  ;;  %v12739_v36 = vrot.slane %v6184_v21, %v8828_v61 }
 0x566   : > { %v12681_v25 = vpop.permute.xlu1 %4898  ;;  %v6209_v3 = vcombine.low %v6096_v60, %v6112_v44  ;;  %v8203_v60 = vcombine.low %v5500_v58, %v5500_v58  ;;  %v6601_v53 = vpack.i.b16 %v12687_v22, %v12676_v28  ;;  %v7276_v58 = vpack.i.b16 %v7275_v32, %v7274_v17  ;;  %v13938_v44 = vld [vmem:[#allocation15_spill] sm:$0xff] }
 0x567   : > { %5233 = vrot.lane.b32.xlu0 %v8189_v34, %s8530_s14  ;;  %v6251_v63 = vcombine.low %v12690_v56, %v12679_v7  ;;  %v8276_v27 = vcombine.low %v7288_v47, %v7288_v47  ;;  %v13939_v34 = vld [vmem:[#allocation51_spill] sm:$0xff]  ;;  %v12760_v47 = vcombine.high %v12590_v13, %v13496_v35  ;;  %v6591_v21 = vshrl.u32 %v12420_v43, 16 }
 0x568   : > { %v12697_v54 = vrot.slane %v6209_v3, %v13808_v15  ;;  %7325 = vrot.lane.b32.xlu1 %v8273_v33, %s8495_s11  ;;  %v8239_v51 = vcombine.low %v6601_v53, %v6601_v53  ;;  %v7291_v3 = vpack.i.b16 %v13939_v34, %v13938_v44  ;;  %v12736_v33 = vcombine.high %v12415_v23, %v13496_v35 }
 0x569   : > { %v12705_v49 = vpop.permute.xlu0 %4886  ;;  %v12726_v42 = vrot.slane %v6251_v63, %v8828_v61  ;;  %v8272_v8 = vcombine.low %v7276_v58, %v7276_v58  ;;  %v6283_v63 = vpack.i.b16 %v12739_v36, %v12723_v40  ;;  %v6590_v53 = vshrl.u32 %v12415_v23, 16 }
 0x56a   : > { %v6217_v15 = vcombine.low %v12694_v57, %v12697_v54  ;;  %v12712_v37 = vpop.permute.xlu1 %4890  ;;  %v12767_v32 = vcombine.high %v12601_v26, %v13496_v35  ;;  %v6272_v44 = vshrl.u32 %v12480_v20, 16  ;;  %v6284_v39 = vshrl.u32 %v12723_v40, 16 }
 0x56b   : > { %5551 = vrot.lane.b32.xlu0 %v8203_v60, %s8530_s14  ;;  %v12747_v60 = vcombine.high %v12420_v43, %v13496_v35  ;;  %v8225_v58 = vcombine.low %v6283_v63, %v6283_v63  ;;  %v6536_v23 = vcombine.high %v12619_v9, %v12622_v11 }
 0x56c   : > { %v12719_v2 = vrot.slane %v6217_v15, %v8828_v61  ;;  %7361 = vrot.lane.b32.xlu1 %v8282_v24, %s8529_s13  ;;  %v8277_v15 = vcombine.low %v7291_v3, %v7291_v3 }
 0x56d   : > { %v12728_v52 = vpop.permute.xlu0 %4902  ;;  %v6595_v24 = vpack.i.b16 %v12747_v60, %v12736_v33 }
 0x56e   : > { %v12730_v0 = vpop.permute.xlu1 %4906 }
 0x56f   : > { %13937 = vst [vmem:[#allocation67_spill] sm:$0xff] %v12730_v0  ;;  %6649 = vrot.lane.b32.xlu0 %v8239_v51, %s8529_s13  ;;  %v8237_v3 = vcombine.low %v6595_v24, %v6595_v24  ;;  %v12785_v24 = vcombine.high %v12480_v20, %v13496_v35  ;;  %v7280_v20 = vshrl.u32 %v12645_v55, 16  ;;  %v12859_v55 = vcombine.high %v12723_v40, %v13496_v35 }
 0x570   : > { %7337 = vrot.lane.b32.xlu1 %v8276_v27, %s8528_s12  ;;  %v6592_v27 = vpack.i.b16 %v6591_v21, %v6590_v53  ;;  %v12879_v40 = vcombine.high %v12636_v12, %v13496_v35 }
 0x571   : > { %v12749_v18 = vpop.permute.xlu0 %4894 }
 0x572   : > { %v12754_v17 = vpop.permute.xlu1 %7015  ;;  %v8236_v53 = vcombine.low %v6592_v27, %v6592_v27  ;;  %v6570_v27 = vcombine.high %v12612_v4, %v12604_v41 }
 0x573   : > { %13940 = vst [vmem:[#allocation74_spill] sm:$0xff] %v12754_v17  ;;  %7321 = vrot.lane.b32.xlu0 %v8272_v8, %s8501_s17  ;;  %v7303_v8 = vpack.i.b16 %v12767_v32, %v12760_v47  ;;  %v6285_v17 = vshrl.u32 %v12739_v36, 16 }
 0x574   : > { %7341 = vrot.lane.b32.xlu1 %v8277_v15, %s8527_s10  ;;  %v6273_v15 = vshrl.u32 %v12484_v30, 16 }
 0x575   : > { %v12769_v51 = vpop.permute.xlu0 %4910  ;;  %v6286_v45 = vpack.i.b16 %v6285_v17, %v6284_v39  ;;  %v7298_v17 = vshrl.u32 %v12590_v13, 16  ;;  %v6278_v13 = vshrl.u32 %v12785_v24, 16 }
 0x576   : > { %13941 = vst [vmem:[#allocation20_spill] sm:$0xff] %v12769_v51  ;;  %v12772_v34 = vpop.permute.xlu1 %6013  ;;  %v6274_v21 = vpack.i.b16 %v6273_v15, %v6272_v44  ;;  %v7311_v44 = vshrl.u32 %v12672_v59, 16  ;;  %v6218_v15 = vcombine.high %v12694_v57, %v12697_v54  ;;  %v6602_v54 = vshrl.u32 %v12676_v28, 16 }
 0x577   : > { %6331 = vrot.lane.b32.xlu0 %v8225_v58, %s8529_s13  ;;  %v8280_v58 = vcombine.low %v7303_v8, %v7303_v8  ;;  %v12807_v8 = vrot.slane %v6536_v23, %v8828_v61  ;;  %v8226_v41 = vcombine.low %v6286_v45, %v6286_v45 }
 0x578   : > { %6641 = vrot.lane.b32.xlu1 %v8237_v3, %s8495_s11  ;;  %v12795_v3 = vcombine.high %v12484_v30, %v13496_v35  ;;  %v8222_v9 = vcombine.low %v6274_v21, %v6274_v21  ;;  %v7312_v4 = vpack.i.b16 %v7311_v44, %v7310_v38  ;;  %v12816_v21 = vrot.slane %v6570_v27, %v8828_v61 }
 0x579   : > { %v12781_v63 = vpop.permute.xlu0 %7003  ;;  %v12825_v45 = vrot.slane %v6218_v15, %v8828_v61 }
 0x57a   : > { %13942 = vst [vmem:[#allocation39_spill] sm:$0xff] %v12781_v63  ;;  %v12789_v43 = vpop.permute.xlu1 %6001  ;;  %v6277_v39 = vpack.i.b16 %v12795_v3, %v12785_v24  ;;  %v8283_v44 = vcombine.low %v7312_v4, %v7312_v4  ;;  %v6625_v27 = vpack.i.b16 %v12816_v21, %v12807_v8 }
 0x57b   : > { %6637 = vrot.lane.b32.xlu0 %v8236_v53, %s8501_s17 }
 0x57c   : > { %7353 = vrot.lane.b32.xlu1 %v8280_v58, %s8495_s11  ;;  %v7299_v58 = vshrl.u32 %v12601_v26, 16  ;;  %v8223_v63 = vcombine.low %v6277_v39, %v6277_v39  ;;  %v6518_v39 = vcombine.high %v12687_v22, %v13496_v35 }
 0x57d   : > { %v12801_v11 = vpop.permute.xlu0 %7007 }
 0x57e   : > { %13943 = vst [vmem:[#allocation59_spill] sm:$0xff] %v12801_v11  ;;  %v12811_v53 = vpop.permute.xlu1 %6005  ;;  %v6252_v11 = vcombine.high %v12690_v56, %v12679_v7  ;;  %v7300_v57 = vpack.i.b16 %v7299_v58, %v7298_v17  ;;  %v6603_v7 = vshrl.u32 %v12687_v22, 16  ;;  %v8246_v58 = vcombine.low %v6625_v27, %v6625_v27 }
 0x57f   : > { %6319 = vrot.lane.b32.xlu0 %v8222_v9, %s8501_s17  ;;  %v6484_v9 = vcombine.high %v12676_v28, %v13496_v35  ;;  %v6614_v27 = vshrl.u32 %v12632_v19, 16 }
 0x580   : > { %6335 = vrot.lane.b32.xlu1 %v8226_v41, %s8528_s12  ;;  %v12834_v56 = vrot.slane %v6252_v11, %v8828_v61  ;;  %v8279_v15 = vcombine.low %v7300_v57, %v7300_v57  ;;  %v6604_v41 = vpack.i.b16 %v6603_v7, %v6602_v54  ;;  %v6609_v11 = vshrl.u32 %v6518_v39, 16 }
 0x581   : > { %v12821_v23 = vpop.permute.xlu0 %7043  ;;  %v6607_v22 = vpack.i.b16 %v6518_v39, %v6484_v9 }
 0x582   : > { %13944 = vst [vmem:[#allocation37_spill] sm:$0xff] %v12821_v23  ;;  %v7036_v38 = vpop.permute.xlu1 %7035  ;;  %v6307_v28 = vpack.i.b16 %v12834_v56, %v12825_v45  ;;  %v8240_v23 = vcombine.low %v6604_v41, %v6604_v41 }
 0x583   : > { %6323 = vrot.lane.b32.xlu0 %v8223_v63, %s8495_s11  ;;  %v6608_v63 = vshrl.u32 %v6484_v9, 16  ;;  %v8241_v30 = vcombine.low %v6607_v22, %v6607_v22 }
 0x584   : > { %7365 = vrot.lane.b32.xlu1 %v8283_v44, %s8528_s12  ;;  %v8232_v54 = vcombine.low %v6307_v28, %v6307_v28 }
 0x585   : > { %v12839_v17 = vpop.permute.xlu0 %6017  ;;  %v6610_v7 = vpack.i.b16 %v6609_v11, %v6608_v63  ;;  %v13947_v63 = vld [vmem:[#allocation8_spill] sm:$0xff] }
 0x586   : > { %v12841_v4 = vpop.permute.xlu1 %7011 }
 0x587   : > { %13945 = vst [vmem:[#allocation85_spill] sm:$0xff] %v12841_v4  ;;  %7349 = vrot.lane.b32.xlu0 %v8279_v15, %s8501_s17  ;;  %v7281_v4 = vshrl.u32 %v12656_v31, 16  ;;  %v6615_v15 = vshrl.u32 %v12636_v12, 16  ;;  %v8242_v39 = vcombine.low %v6610_v7, %v6610_v7  ;;  %v13946_v31 = vld [vmem:[#allocation80_spill] sm:$0xff] }
 0x588   : > { %6677 = vrot.lane.b32.xlu1 %v8246_v58, %s8529_s13  ;;  %v13948_v11 = vpack.i.b16 %v13946_v31, %v13947_v63 }
 0x589   : > { %v12847_v44 = vpop.permute.xlu0 %6021  ;;  %v7282_v41 = vpack.i.b16 %v7281_v4, %v7280_v20  ;;  %v6616_v28 = vpack.i.b16 %v6615_v15, %v6614_v27  ;;  %v12874_v20 = vcombine.high %v12739_v36, %v13496_v35 }
 0x58a   : > { %v12850_v57 = vpop.permute.xlu1 %6009 }
 0x58b   : > { %6653 = vrot.lane.b32.xlu0 %v8240_v23, %s8528_s12  ;;  %v12865_v23 = vcombine.high %v12632_v19, %v13496_v35  ;;  %v8274_v22 = vcombine.low %v7282_v41, %v7282_v41  ;;  %v6289_v7 = vpack.i.b16 %v12874_v20, %v12859_v55  ;;  %v8243_v15 = vcombine.low %v6616_v28, %v6616_v28 }
 0x58c   : > { %6359 = vrot.lane.b32.xlu1 %v8232_v54, %s8529_s13 }
 0x58d   : > { %v7032_v58 = vpop.permute.xlu0 %7031  ;;  %v8227_v31 = vcombine.low %v6289_v7, %v6289_v7  ;;  %v6597_v7 = vshrl.u32 %v12747_v60, 16  ;;  %v6279_v60 = vshrl.u32 %v12795_v3, 16  ;;  %v6290_v3 = vshrl.u32 %v12859_v55, 16 }
 0x58e   : > { %v12861_v9 = vpop.permute.xlu1 %6025  ;;  %v7074_v54 = vsel %vm13949_vm15, %v13948_v11, %v7032_v58  ;;  %v6619_v58 = vpack.i.b16 %v12879_v40, %v12865_v23  ;;  %v6596_v11 = vshrl.u32 %v12736_v33, 16  ;;  %v6627_v33 = vshrl.u32 %v12816_v21, 16  ;;  %vm13996_vm15 = vmmov %vm13992_vm2 }
 0x58f   : > { %6657 = vrot.lane.b32.xlu0 %v8241_v30, %s8527_s10  ;;  %v12887_v30 = vcombine.high %v12662_v1, %v13496_v35  ;;  %v7076_v36 = vsel %vm1050_vm1, %v7074_v54, %v7036_v38  ;;  %v12902_v1 = vcombine.high %v12672_v59, %v13496_v35  ;;  %v12907_v38 = vcombine.high %v12726_v42, %v13496_v35 }
 0x590   : > { %6661 = vrot.lane.b32.xlu1 %v8242_v39, %s8519_s21  ;;  %v12894_v39 = vcombine.high %v12719_v2, %v13496_v35  ;;  %v6626_v59 = vshrl.u32 %v12807_v8, 16  ;;  %v6598_v12 = vpack.i.b16 %v6597_v7, %v6596_v11  ;;  %v6280_v24 = vpack.i.b16 %v6279_v60, %v6278_v13 }
 0x591   : > { %v12881_v4 = vpop.permute.xlu0 %7047  ;;  %v7315_v63 = vpack.i.b16 %v12902_v1, %v12887_v30 }
 0x592   : > { %13950 = vst [vmem:[#allocation36_spill] sm:$0xff] %v12881_v4  ;;  %v7040_v27 = vpop.permute.xlu1 %7039  ;;  %v8238_v11 = vcombine.low %v6598_v12, %v6598_v12  ;;  %v8224_v13 = vcombine.low %v6280_v24, %v6280_v24 }
 0x593   : > { %v12897_v41 = vsel %vm4917_vm0, %v7076_v36, %v7040_v27  ;;  %7329 = vrot.lane.b32.xlu0 %v8274_v22, %s8530_s14  ;;  %v8244_v27 = vcombine.low %v6619_v58, %v6619_v58  ;;  %v6301_v22 = vpack.i.b16 %v12907_v38, %v12894_v39  ;;  %v13952_v36 = vld [vmem:[#allocation47_spill] sm:$0xff]  ;;  %v8284_v58 = vcombine.low %v7315_v63, %v7315_v63 }
 0x594   : > { %13951 = vst [vmem:[#allocation52_spill] sm:$0xff] %v12897_v41  ;;  %6665 = vrot.lane.b32.xlu1 %v8243_v15, %s8501_s17  ;;  %v13953_v15 = vld [vmem:[#allocation78_spill] sm:$0xff] }
 0x595   : > { %v6042_v28 = vpop.permute.xlu0 %6041  ;;  %v13954_v4 = vpack.i.b16 %v13952_v36, %v13953_v15  ;;  %v8230_v0 = vcombine.low %v6301_v22, %v6301_v22  ;;  %v6628_v36 = vpack.i.b16 %v6627_v33, %v6626_v59  ;;  %v6308_v22 = vshrl.u32 %v12825_v45, 16 }
 0x596   : > { %v6030_v54 = vpop.permute.xlu1 %6029 }
 0x597   : > { %v6072_v41 = vsel %vm13955_vm8, %v13954_v4, %v6030_v54  ;;  %6339 = vrot.lane.b32.xlu0 %v8227_v31, %s8527_s10  ;;  %v6552_v4 = vcombine.high %v12807_v8, %v13496_v35  ;;  %v6586_v31 = vcombine.high %v12816_v21, %v13496_v35  ;;  %v7304_v54 = vshrl.u32 %v12760_v47, 16  ;;  %vm14000_vm8 = vmmov %vm13992_vm2 }
 0x598   : > { %6669 = vrot.lane.b32.xlu1 %v8244_v27, %s8495_s11  ;;  %v7305_v8 = vshrl.u32 %v12767_v32, 16  ;;  %v6291_v47 = vshrl.u32 %v12874_v20, 16  ;;  %v6302_v32 = vshrl.u32 %v12894_v39, 16  ;;  %v6296_v39 = vshrl.u32 %v12719_v2, 16 }
 0x599   : > { %v6034_v19 = vpop.permute.xlu0 %6033  ;;  %v6631_v27 = vpack.i.b16 %v6586_v31, %v6552_v4  ;;  %v6632_v24 = vshrl.u32 %v6552_v4, 16  ;;  %v6268_v4 = vcombine.high %v12834_v56, %v13496_v35 }
 0x59a   : > { %v6050_v26 = vpop.permute.xlu1 %6049  ;;  %v6074_v51 = vsel %vm1050_vm1, %v6072_v41, %v6034_v19  ;;  %v8247_v41 = vcombine.low %v6628_v36, %v6628_v36  ;;  %v7306_v21 = vpack.i.b16 %v7305_v8, %v7304_v54  ;;  %v6292_v20 = vpack.i.b16 %v6291_v47, %v6290_v3  ;;  %v13958_v47 = vld [vmem:[#allocation62_spill] sm:$0xff] }
 0x59b   : > { %7369 = vrot.lane.b32.xlu0 %v8284_v58, %s8527_s10  ;;  %v8248_v7 = vcombine.low %v6631_v27, %v6631_v27  ;;  %v6303_v36 = vshrl.u32 %v12907_v38, 16  ;;  %v6633_v38 = vshrl.u32 %v6586_v31, 16  ;;  %v13961_v31 = vld [vmem:[#allocation28_spill] sm:$0xff] }
 0x59c   : > { %6351 = vrot.lane.b32.xlu1 %v8230_v0, %s8495_s11  ;;  %v6309_v0 = vshrl.u32 %v12834_v56, 16  ;;  %v8228_v8 = vcombine.low %v6292_v20, %v6292_v20  ;;  %v6315_v56 = vshrl.u32 %v6268_v4, 16 }
 0x59d   : > { %v6046_v63 = vpop.permute.xlu0 %6045 }
 0x59e   : > { %v6054_v19 = vpop.permute.xlu1 %6053  ;;  %v6310_v33 = vpack.i.b16 %v6309_v0, %v6308_v22 }
 0x59f   : > { %6645 = vrot.lane.b32.xlu0 %v8238_v11, %s8530_s14  ;;  %v8281_v11 = vcombine.low %v7306_v21, %v7306_v21  ;;  %v13957_v21 = vld [vmem:[#allocation17_spill] sm:$0xff] }
 0x5a0   : > { %6681 = vrot.lane.b32.xlu1 %v8247_v41, %s8528_s12  ;;  %v6304_v41 = vpack.i.b16 %v6303_v36, %v6302_v32  ;;  %v13962_v32 = vld [vmem:[#allocation14_spill] sm:$0xff] }
 0x5a1   : > { %v6038_v12 = vpop.permute.xlu0 %6037 }
 0x5a2   : > { %v12940_v59 = vpop.permute.xlu1 %5197  ;;  %v6076_v15 = vsel %vm4917_vm0, %v6074_v51, %v6038_v12  ;;  %v8231_v12 = vcombine.low %v6304_v41, %v6304_v41 }
 0x5a3   : > { %v6078_v58 = vsel %vm4920_vm9, %v6076_v15, %v6042_v28  ;;  %6327 = vrot.lane.b32.xlu0 %v8224_v13, %s8530_s14  ;;  %v8233_v28 = vcombine.low %v6310_v33, %v6310_v33  ;;  %v13959_v15 = vpack.i.b16 %v13957_v21, %v13958_v47 }
 0x5a4   : > { %v6080_v55 = vsel %vm4923_vm7, %v6078_v58, %v6046_v63  ;;  %6685 = vrot.lane.b32.xlu1 %v8248_v7, %s8527_s10  ;;  %v6234_v63 = vcombine.high %v12825_v45, %v13496_v35  ;;  %v6634_v45 = vpack.i.b16 %v6633_v38, %v6632_v24  ;;  %v13963_v58 = vld [vmem:[#allocation27_spill] sm:$0xff]  ;;  %v13966_v24 = vld [vmem:[#allocation33_spill] sm:$0xff] }
 0x5a5   : > { %v6082_v51 = vsel %vm4926_vm5, %v6080_v55, %v6050_v26  ;;  %v12950_v60 = vpop.permute.xlu0 %5209  ;;  %v6297_v26 = vshrl.u32 %v12726_v42, 16  ;;  %v13964_v55 = vpack.i.b16 %v13962_v32, %v13963_v58  ;;  %v13971_v32 = vld [vmem:[#allocation84_spill] sm:$0xff] }
 0x5a6   : > { %v12953_v54 = vpop.permute.xlu1 %5213  ;;  %v12958_v27 = vsel %vm4929_vm10, %v6082_v51, %v6054_v19  ;;  %v6314_v13 = vshrl.u32 %v6234_v63, 16  ;;  %v13956_v19 = vld [vmem:[#allocation31_spill] sm:$0xff]  ;;  %v8249_v38 = vcombine.low %v6634_v45, %v6634_v45  ;;  %v8262_v58 = vcombine.low %v13971_v32, %v13971_v32 }
 0x5a7   : > { %7357 = vrot.lane.b32.xlu0 %v8281_v11, %s8530_s14  ;;  %v6298_v0 = vpack.i.b16 %v6297_v26, %v6296_v39  ;;  %v4914_v7 = vsel %vm13960_vm11, %v13959_v15, %v13956_v19  ;;  %v6057_v20 = vsel %vm13965_vm12, %v13964_v55, %v12789_v43  ;;  %v6313_v11 = vpack.i.b16 %v6268_v4, %v6234_v63  ;;  %v13967_v63 = vld [vmem:[#allocation86_spill] sm:$0xff]  ;;  %v13981_v32 = vld [vmem:[#allocation55_spill] sm:$0xff]  ;;  %vm14003_vm11 = vmmov %vm13979_vm3 }
 0x5a8   : > { %6363 = vrot.lane.b32.xlu1 %v8233_v28, %s8528_s12  ;;  %v4916_v33 = vsel %vm1050_vm1, %v4914_v7, %v13961_v31  ;;  %v6620_v39 = vshrl.u32 %v12865_v23, 16  ;;  %v6059_v41 = vsel %vm1050_vm1, %v6057_v20, %v12811_v53  ;;  %v6621_v43 = vshrl.u32 %v12879_v40, 16  ;;  %v13968_v40 = vld [vmem:[#allocation87_spill] sm:$0xff]  ;;  %v13972_v20 = vld [vmem:[#allocation89_spill] sm:$0xff]  ;;  %vm14004_vm12 = vmmov %vm13979_vm3 }
 0x5a9   : > { %v12965_v22 = vpop.permute.xlu0 %5527  ;;  %v8229_v51 = vcombine.low %v6298_v0, %v6298_v0  ;;  %v4919_v28 = vsel %vm4917_vm0, %v4916_v33, %v13966_v24  ;;  %v8234_v0 = vcombine.low %v6313_v11, %v6313_v11  ;;  %v7316_v53 = vshrl.u32 %v12887_v30, 16 }
 0x5aa   : > { %v5516_v3 = vpop.permute.xlu1 %5515  ;;  %v4922_v23 = vsel %vm4920_vm9, %v4919_v28, %v13967_v63  ;;  %v6622_v19 = vpack.i.b16 %v6621_v43, %v6620_v39  ;;  %v13969_v30 = vpack.i.b16 %v12028_v16, %v13917_v14  ;;  %v7617_v55 = vshrl.u32 %v12536_v5, 16 }
 0x5ab   : > { %6343 = vrot.lane.b32.xlu0 %v8228_v8, %s8519_s21  ;;  %v6316_v8 = vpack.i.b16 %v6315_v56, %v6314_v13  ;;  %v4925_v47 = vsel %vm4923_vm7, %v4922_v23, %v13968_v40  ;;  %v13973_v14 = vpack.i.b16 %v12100_v50, %v12108_v48  ;;  %v7616_v11 = vshrl.u32 %v12541_v62, 16 }
 0x5ac   : > { %6355 = vrot.lane.b32.xlu1 %v8231_v12, %s8530_s14  ;;  %v6061_v12 = vsel %vm4917_vm0, %v6059_v41, %v12850_v57  ;;  %v7317_v57 = vshrl.u32 %v12902_v1, 16  ;;  %v8245_v31 = vcombine.low %v6622_v19, %v6622_v19  ;;  %v7592_v43 = vshrl.u32 %v12351_v46, 16  ;;  %v13977_v19 = vld [vmem:[#allocation50_spill] sm:$0xff] }
 0x5ad   : > { %v5202_v36 = vpop.permute.xlu0 %5201  ;;  %v6063_v45 = vsel %vm4920_vm9, %v6061_v12, %v12772_v34  ;;  %v8235_v21 = vcombine.low %v6316_v8, %v6316_v8  ;;  %v5253_v34 = vsel %vm13970_vm14, %v13969_v30, %v12940_v59  ;;  %v5571_v59 = vsel %vm13974_vm6, %v13973_v14, %v5516_v3  ;;  %v13975_v3 = vld [vmem:[#allocation58_spill] sm:$0xff]  ;;  %v13983_v14 = vld [vmem:[#allocation63_spill] sm:$0xff]  ;;  %vm14008_vm14 = vmmov %vm13992_vm2 }
 0x5ae   : > { %v5520_v26 = vpop.permute.xlu1 %5519  ;;  %v6065_v15 = vsel %vm4923_vm7, %v6063_v45, %v12839_v17  ;;  %v7318_v33 = vpack.i.b16 %v7317_v57, %v7316_v53  ;;  %v5255_v56 = vsel %vm1050_vm1, %v5253_v34, %v5202_v36  ;;  %v4928_v17 = vsel %vm4926_vm5, %v4925_v47, %v13972_v20  ;;  %v13982_v20 = vld [vmem:[#allocation11_spill] sm:$0xff]  ;;  %vm14012_vm6 = vmmov %vm13992_vm2 }
 0x5af   : > { %6347 = vrot.lane.b32.xlu0 %v8229_v51, %s8501_s17  ;;  %v6067_v16 = vsel %vm4926_vm5, %v6065_v15, %v12847_v44  ;;  %v5573_v39 = vsel %vm1050_vm1, %v5571_v59, %v5520_v26  ;;  %v7593_v44 = vshrl.u32 %v12347_v10, 16  ;;  %v7618_v8 = vpack.i.b16 %v7617_v55, %v7616_v11  ;;  %v13984_v59 = vld [vmem:[#allocation44_spill] sm:$0xff] }
 0x5b0   : > { %6689 = vrot.lane.b32.xlu1 %v8249_v38, %s8519_s21  ;;  %v8285_v41 = vcombine.low %v7318_v33, %v7318_v33  ;;  %v6069_v12 = vsel %vm4929_vm10, %v6067_v16, %v12861_v9  ;;  %v4931_v9 = vsel %vm4929_vm10, %v4928_v17, %v13977_v19  ;;  %v7553_v34 = vcombine.high %v12541_v62, %v13496_v35 }
 0x5b1   : > { %v5218_v4 = vpop.permute.xlu0 %5217  ;;  %v7729_v57 = vrot.slane %v6069_v12, 4  ;;  %v8293_v47 = vcombine.low %v7618_v8, %v7618_v8  ;;  %v8271_v17 = vcombine.low %v13982_v20, %v13982_v20 }
 0x5b2   : > { %v5532_v13 = vpop.permute.xlu1 %5531 }
 0x5b3   : > { %6367 = vrot.lane.b32.xlu0 %v8234_v0, %s8527_s10 }
 0x5b4   : > { %6371 = vrot.lane.b32.xlu1 %v8235_v21, %s8519_s21  ;;  %v7519_v21 = vcombine.high %v12347_v10, %v13496_v35 }
 0x5b5   : > { %v5536_v7 = vpop.permute.xlu0 %5535 }
 0x5b6   : > { %v5206_v1 = vpop.permute.xlu1 %5205  ;;  %v7599_v16 = vshrl.u32 %v7519_v21, 16 }
 0x5b7   : > { %v5257_v51 = vsel %vm4917_vm0, %v5255_v56, %v5206_v1  ;;  %6673 = vrot.lane.b32.xlu0 %v8245_v31, %s8530_s14  ;;  %v13980_v1 = vld [vmem:[#allocation41_spill] sm:$0xff] }
 0x5b8   : > { %v5259_v36 = vsel %vm4920_vm9, %v5257_v51, %v12950_v60  ;;  %7019 = vrot.lane.b32.xlu1 %v8262_v58, %s8528_s12  ;;  %v8278_v60 = vcombine.low %v13975_v3, %v13975_v3  ;;  %v7504_v58 = vcombine.high %v13981_v32, %v13980_v1 }
 0x5b9   : > { %v5261_v24 = vsel %vm4923_vm7, %v5259_v36, %v12953_v54  ;;  %v5524_v28 = vpop.permute.xlu0 %5523  ;;  %v7470_v36 = vcombine.high %v13984_v59, %v13983_v14 }
 0x5ba   : > { %v5222_v38 = vpop.permute.xlu1 %5221  ;;  %v5263_v50 = vsel %vm4926_vm5, %v5261_v24, %v5218_v4  ;;  %v5575_v48 = vsel %vm4917_vm0, %v5573_v39, %v5524_v28  ;;  %v13976_v4 = vld [vmem:[#allocation26_spill] sm:$0xff] }
 0x5bb   : > { %v5265_v26 = vsel %vm4929_vm10, %v5263_v50, %v5222_v38  ;;  %v5577_v54 = vsel %vm4920_vm9, %v5575_v48, %v12965_v22  ;;  %7373 = vrot.lane.b32.xlu0 %v8285_v41, %s8519_s21  ;;  %v8270_v0 = vcombine.low %v13976_v4, %v13976_v4  ;;  %v7594_v22 = vpack.i.b16 %v7593_v44, %v7592_v43  ;;  %v13985_v24 = vld [vmem:[#allocation34_spill] sm:$0xff]  ;;  %v13986_v4 = vld [vmem:[#allocation65_spill] sm:$0xff] }
 0x5bc   : > { %v7725_v63 = vrot.slane %v5265_v26, 4  ;;  %7345 = vrot.lane.b32.xlu1 %v8278_v60, %s8519_s21  ;;  %v5579_v23 = vsel %vm4923_vm7, %v5577_v54, %v5532_v13  ;;  %v7587_v13 = vcombine.high %v12536_v5, %v13496_v35  ;;  %v8263_v28 = vcombine.low %v13985_v24, %v13985_v24 }
 0x5bd   : > { %v5581_v53 = vsel %vm4926_vm5, %v5579_v23, %v5536_v7  ;;  %v13048_v45 = vpop.permute.xlu0 %5225  ;;  %v7485_v7 = vcombine.high %v12351_v46, %v13496_v35  ;;  %v8286_v56 = vcombine.low %v7594_v22, %v7594_v22  ;;  %v7518_v44 = vrot.slane %v7504_v58, %v8828_v61 }
 0x5be   : > { %v5540_v40 = vpop.permute.xlu1 %5539  ;;  %v13055_v15 = vsel %vm13978_vm13, %v4931_v9, %v7725_v63  ;;  %v7621_v51 = vpack.i.b16 %v7587_v13, %v7553_v34  ;;  %v7484_v3 = vrot.slane %v7470_v36, %v8828_v61  ;;  %v7572_v60 = vcombine.high %v12512_v29, %v12515_v6  ;;  %v13988_v6 = vld [vmem:[#allocation83_spill] sm:$0xff]  ;;  %vm14016_vm13 = vmmov %vm13992_vm2 }
 0x5bf   : > { %v5583_v30 = vsel %vm4929_vm10, %v5581_v53, %v5540_v40  ;;  %7051 = vrot.lane.b32.xlu0 %v8270_v0, %s8527_s10  ;;  %v7598_v11 = vshrl.u32 %v7485_v7, 16  ;;  %v7597_v41 = vpack.i.b16 %v7519_v21, %v7485_v7  ;;  %v7623_v26 = vshrl.u32 %v7587_v13, 16  ;;  %v13987_v0 = vld [vmem:[#allocation53_spill] sm:$0xff] }
 0x5c0   : > { %7667 = vrot.lane.b32.xlu1 %v8293_v47, %s8501_s17  ;;  %v13065_v31 = vsel %vm13979_vm3, %v5583_v30, %v7729_v57  ;;  %v8294_v50 = vcombine.low %v7621_v51, %v7621_v51  ;;  %v7603_v63 = vpack.i.b16 %v7518_v44, %v7484_v3  ;;  %v7605_v23 = vshrl.u32 %v7518_v44, 16  ;;  %vm14020_vm3 = vmmov %vm13992_vm2 }
 0x5c1   : > { %v13067_v33 = vpop.permute.xlu0 %5241  ;;  %v7600_v48 = vpack.i.b16 %v7599_v16, %v7598_v11  ;;  %v8287_v12 = vcombine.low %v7597_v41, %v7597_v41  ;;  %v7538_v19 = vcombine.high %v13987_v0, %v13986_v4  ;;  %v7622_v9 = vshrl.u32 %v7553_v34, 16  ;;  %v13989_v34 = vld [vmem:[#allocation13_spill] sm:$0xff] }
 0x5c2   : > { %v13071_v55 = vpop.permute.xlu1 %5237  ;;  %v7604_v53 = vshrl.u32 %v7484_v3, 16  ;;  %v7586_v22 = vrot.slane %v7572_v60, %v8828_v61  ;;  %v8264_v21 = vcombine.low %v13988_v6, %v13988_v6  ;;  %v8289_v47 = vcombine.low %v7603_v63, %v7603_v63 }
 0x5c3   : > { %7639 = vrot.lane.b32.xlu0 %v8286_v56, %s8501_s17  ;;  %v8288_v43 = vcombine.low %v7600_v48, %v7600_v48  ;;  %v7624_v57 = vpack.i.b16 %v7623_v26, %v7622_v9  ;;  %v7520_v30 = vcombine.high %v7518_v44, %v13496_v35  ;;  %v7552_v7 = vrot.slane %v7538_v19, %v8828_v61  ;;  %v13990_v56 = vld [vmem:[#allocation21_spill] sm:$0xff] }
 0x5c4   : > { %7055 = vrot.lane.b32.xlu1 %v8271_v17, %s8519_s21  ;;  %v7606_v13 = vpack.i.b16 %v7605_v23, %v7604_v53  ;;  %v13991_v1 = vpack.i.b16 %v13989_v34, %v13990_v56  ;;  %v7486_v58 = vcombine.high %v7484_v3, %v13496_v35  ;;  %v7629_v16 = vshrl.u32 %v7586_v22, 16 }
 0x5c5   : > { %v13079_v39 = vpop.permute.xlu0 %5245  ;;  %v8295_v17 = vcombine.low %v7624_v57, %v7624_v57  ;;  %v7627_v51 = vpack.i.b16 %v7586_v22, %v7552_v7  ;;  %v7611_v61 = vshrl.u32 %v7520_v30, 16  ;;  %v7628_v24 = vshrl.u32 %v7552_v7, 16  ;;  %v13997_v57 = vld [vmem:[#allocation29_spill] sm:$0xff] }
 0x5c6   : > { %v13084_v38 = vpop.permute.xlu1 %5555  ;;  %v4934_v32 = vsel %vm13992_vm2, %v13991_v1, %v12705_v49  ;;  %v8290_v59 = vcombine.low %v7606_v13, %v7606_v13  ;;  %v7609_v36 = vpack.i.b16 %v7520_v30, %v7486_v58  ;;  %v7588_v41 = vcombine.high %v7586_v22, %v13496_v35  ;;  %v7764_v1 = vld [vmem:[%s13311_s6] sm:$0xff]  ;;  %vm14021_vm2 = vmmov %vm14003_vm11 }
 0x5c7   : > { %7023 = vrot.lane.b32.xlu0 %v8263_v28, %s8527_s10  ;;  %v4936_v11 = vsel %vm1050_vm1, %v4934_v32, %v12712_v37  ;;  %v7610_v28 = vshrl.u32 %v7486_v58, 16  ;;  %v7630_v48 = vpack.i.b16 %v7629_v16, %v7628_v24  ;;  %v7554_v37 = vcombine.high %v7552_v7, %v13496_v35  ;;  %v14001_v7 = vld [vmem:[#allocation67_spill] sm:$0xff]  ;;  %v14002_v16 = vld [vmem:[#allocation20_spill] sm:$0xff] }
 0x5c8   : > { %7671 = vrot.lane.b32.xlu1 %v8294_v50, %s8495_s11  ;;  %v4938_v49 = vsel %vm4917_vm0, %v4936_v11, %v12749_v18  ;;  %v8296_v50 = vcombine.low %v7627_v51, %v7627_v51  ;;  %v8291_v60 = vcombine.low %v7609_v36, %v7609_v36  ;;  %v13993_v18 = vld [vmem:[#allocation30_spill] sm:$0xff]  ;;  %v7635_v53 = vshrl.u32 %v7588_v41, 16 }
 0x5c9   : > { %v13091_v8 = vpop.permute.xlu0 %5543  ;;  %v4940_v26 = vsel %vm4920_vm9, %v4938_v49, %v12681_v25  ;;  %v7633_v4 = vpack.i.b16 %v7588_v41, %v7554_v37  ;;  %v8297_v9 = vcombine.low %v7630_v48, %v7630_v48  ;;  %v14006_v48 = vld [vmem:[#allocation18_spill] sm:$0xff] }
 0x5ca   : > { %v5230_v54 = vpop.permute.xlu1 %5229  ;;  %v4942_v35 = vsel %vm4923_vm7, %v4940_v26, %v12728_v52 }
 0x5cb   : > { %7643 = vrot.lane.b32.xlu0 %v8287_v12, %s8495_s11  ;;  %v7612_v12 = vpack.i.b16 %v7611_v61, %v7610_v28  ;;  %v8298_v52 = vcombine.low %v7633_v4, %v7633_v4  ;;  %v4944_v34 = vsel %vm4926_vm5, %v4942_v35, %v14001_v7 }
 0x5cc   : > { %7647 = vrot.lane.b32.xlu1 %v8288_v43, %s8530_s14  ;;  %v13994_v43 = vld [vmem:[#allocation82_spill] sm:$0xff] }
 0x5cd   : > { %v5548_v29 = vpop.permute.xlu0 %5547  ;;  %v13995_v63 = vpack.i.b16 %v13993_v18, %v13994_v43  ;;  %v8292_v6 = vcombine.low %v7612_v12, %v7612_v12 }
 0x5ce   : > { %v13100_v40 = vpop.permute.xlu1 %5559 }
 0x5cf   : > { %7027 = vrot.lane.b32.xlu0 %v8264_v21, %s8519_s21  ;;  %v5268_v23 = vsel %vm13996_vm15, %v13995_v63, %v13048_v45  ;;  %v7634_v45 = vshrl.u32 %v7554_v37, 16  ;;  %vm14023_vm15 = vmmov %vm14020_vm3 }
 0x5d0   : > { %7651 = vrot.lane.b32.xlu1 %v8289_v47, %s8529_s13  ;;  %v5270_v0 = vsel %vm1050_vm1, %v5268_v23, %v5230_v54  ;;  %v13998_v47 = vld [vmem:[#allocation88_spill] sm:$0xff] }
 0x5d1   : > { %v5564_v20 = vpop.permute.xlu0 %5563  ;;  %v13999_v54 = vpack.i.b16 %v13997_v57, %v13998_v47 }
 0x5d2   : > { %v5250_v14 = vpop.permute.xlu1 %5249 }
 0x5d3   : > { %7675 = vrot.lane.b32.xlu0 %v8295_v17, %s8530_s14  ;;  %v5586_v13 = vsel %vm14000_vm8, %v13999_v54, %v13091_v8  ;;  %v7636_v8 = vpack.i.b16 %v7635_v53, %v7634_v45  ;;  %vm14027_vm8 = vmmov %vm14020_vm3 }
 0x5d4   : > { %7655 = vrot.lane.b32.xlu1 %v8290_v59, %s8528_s12  ;;  %v4946_v59 = vsel %vm4929_vm10, %v4944_v34, %v14002_v16  ;;  %v14013_v34 = vld [vmem:[#allocation42_spill] sm:$0xff]  ;;  %v14018_v16 = vld [vmem:[#allocation25_spill] sm:$0xff] }
 0x5d5   : > { %v13119_v44 = vpop.permute.xlu0 %7333  ;;  %v8299_v11 = vcombine.low %v7636_v8, %v7636_v8 }
 0x5d6   : > { %v5568_v3 = vpop.permute.xlu1 %5567 }
 0x5d7   : > { %7679 = vrot.lane.b32.xlu0 %v8296_v50, %s8529_s13  ;;  %v14005_v50 = vld [vmem:[#allocation16_spill] sm:$0xff] }
 0x5d8   : > { %7659 = vrot.lane.b32.xlu1 %v8291_v60, %s8527_s10  ;;  %v14007_v60 = vpack.i.b16 %v14005_v50, %v14006_v48 }
 0x5d9   : > { %v5234_v19 = vpop.permute.xlu0 %5233 }
 0x5da   : > { %v7326_v25 = vpop.permute.xlu1 %7325  ;;  %v5272_v22 = vsel %vm4917_vm0, %v5270_v0, %v5234_v19  ;;  %v14009_v0 = vld [vmem:[#allocation43_spill] sm:$0xff]  ;;  %v14010_v19 = vld [vmem:[#allocation38_spill] sm:$0xff] }
 0x5db   : > { %v5274_v21 = vsel %vm4920_vm9, %v5272_v22, %v13071_v55  ;;  %7683 = vrot.lane.b32.xlu0 %v8297_v9, %s8528_s12  ;;  %v5588_v55 = vsel %vm1050_vm1, %v5586_v13, %v5548_v29  ;;  %v14011_v9 = vpack.i.b16 %v14009_v0, %v14010_v19 }
 0x5dc   : > { %v5276_v30 = vsel %vm4923_vm7, %v5274_v21, %v13067_v33  ;;  %7663 = vrot.lane.b32.xlu1 %v8292_v6, %s8519_s21 }
 0x5dd   : > { %v5552_v56 = vpop.permute.xlu0 %5551  ;;  %v5278_v32 = vsel %vm4926_vm5, %v5276_v30, %v13079_v39 }
 0x5de   : > { %v13154_v58 = vpop.permute.xlu1 %7361  ;;  %v5590_v33 = vsel %vm4917_vm0, %v5588_v55, %v5552_v56  ;;  %v5280_v17 = vsel %vm4929_vm10, %v5278_v32, %v5250_v14  ;;  %v7730_v14 = vrot.slane %v12958_v27, 4  ;;  %v14014_v55 = vld [vmem:[#allocation56_spill] sm:$0xff] }
 0x5df   : > { %v5592_v51 = vsel %vm4920_vm9, %v5590_v33, %v13084_v38  ;;  %7687 = vrot.lane.b32.xlu0 %v8298_v52, %s8527_s10  ;;  %v7726_v29 = vrot.slane %v5280_v17, 4  ;;  %v14015_v56 = vpack.i.b16 %v14013_v34, %v14014_v55 }
 0x5e0   : > { %v5594_v36 = vsel %vm4923_vm7, %v5592_v51, %v13100_v40  ;;  %7767 = vperm.xlu1 %8447, %v7764_v1  }
 0x5e1   : > { %v6650_v39 = vpop.permute.xlu0 %6649  ;;  %v7743_v61 = vsel %vm14003_vm11, %v4946_v59, %v7726_v29  ;;  %v5596_v24 = vsel %vm4926_vm5, %v5594_v36, %v5564_v20  ;;  %v14017_v29 = vld [vmem:[#allocation61_spill] sm:$0xff]  ;;  %vm14028_vm11 = vmmov %vm14021_vm2 }
 0x5e2   : > { %v7338_v49 = vpop.permute.xlu1 %7337  ;;  %7777 = vmatprep.subr.bf16.mxu0 %v7743_v61  ;;  %v5598_v38 = vsel %vm4929_vm10, %v5596_v24, %v5568_v3  ;;  %v14019_v59 = vpack.i.b16 %v14017_v29, %v14018_v16 }
 0x5e3   : > { %7691 = vrot.lane.b32.xlu0 %v8299_v11, %s8519_s21  ;;  %7778 = vmatpush1.bf16.msra.mxu0 %v13055_v15  ;;  %v7749_v28 = vsel %vm14004_vm12, %v5598_v38, %v7730_v14  ;;  %vm14032_vm12 = vmmov %vm14021_vm2 }
 0x5e4   : > { %7779 = vmatprep.subr.bf16.mxu0 %v7749_v28 }
 0x5e5   : > { %v7322_v40 = vpop.permute.xlu0 %7321 }
 0x5e6   : > { %v7342_v41 = vpop.permute.xlu1 %7341  ;;  %v7377_v20 = vsel %vm14008_vm14, %v14007_v60, %v7322_v40  ;;  %vm14037_vm14 = vmmov %vm14020_vm3 }
 0x5e7   : > { %7780 = vmatpush1.bf16.msra.mxu0 %v13065_v31  ;;  %v7379_v27 = vsel %vm1050_vm1, %v7377_v20, %v7326_v25 }
 0x5e9   : > { %v6332_v12 = vpop.permute.xlu0 %6331 }
 0x5ea   : > { %v6642_v3 = vpop.permute.xlu1 %6641 }
 0x5ed   : > { %v6638_v37 = vpop.permute.xlu0 %6637 }
 0x5ee   : > { %v7354_v26 = vpop.permute.xlu1 %7353  ;;  %v6693_v1 = vsel %vm14016_vm13, %v14015_v56, %v6638_v37  ;;  %vm14043_vm13 = vmmov %vm14020_vm3 }
 0x5ef   : > { %v6695_v8 = vsel %vm1050_vm1, %v6693_v1, %v6642_v3 }
 0x5f1   : > { %v6320_v18 = vpop.permute.xlu0 %6319 }
 0x5f2   : > { %v6336_v15 = vpop.permute.xlu1 %6335  ;;  %v6375_v36 = vsel %vm14020_vm3, %v14019_v59, %v6320_v18  ;;  %v14031_v59 = vld [vmem:[#allocation36_spill] sm:$0xff] }
 0x5f5   : > { %v6324_v43 = vpop.permute.xlu0 %6323 }
 0x5f6   : > { %v13178_v63 = vpop.permute.xlu1 %7365  ;;  %v6377_v11 = vsel %vm1050_vm1, %v6375_v36, %v6324_v43 }
 0x5f9   : > { %v7350_v23 = vpop.permute.xlu0 %7349 }
 0x5fa   : > { %v6678_v4 = vpop.permute.xlu1 %6677  ;;  %v7392_v53 = vsel %vm14012_vm6, %v14011_v9, %v7350_v23  ;;  %v14022_v23 = vpack.i.b16 %v12726_v42, %v12719_v2  ;;  %vm14041_vm6 = vmmov %vm14021_vm2 }
 0x5fb   : > { %v7394_v31 = vsel %vm1050_vm1, %v7392_v53, %v7354_v26 }
 0x5fd   : > { %v6654_v35 = vpop.permute.xlu0 %6653 }
 0x5fe   : > { %v6360_v25 = vpop.permute.xlu1 %6359 }
 0x601   : > { %v6658_v22 = vpop.permute.xlu0 %6657 }
 0x602   : > { %v6662_v6 = vpop.permute.xlu1 %6661 }
 0x605   : > { %v7330_v21 = vpop.permute.xlu0 %7329 }
 0x606   : > { %v6666_v45 = vpop.permute.xlu1 %6665  ;;  %v7381_v57 = vsel %vm4917_vm0, %v7379_v27, %v7330_v21 }
 0x607   : > { %v7383_v47 = vsel %vm4920_vm9, %v7381_v57, %v13119_v44 }
 0x608   : > { %v7385_v54 = vsel %vm4923_vm7, %v7383_v47, %v7338_v49 }
 0x609   : > { %v6340_v13 = vpop.permute.xlu0 %6339  ;;  %v13190_v30 = vsel %vm4926_vm5, %v7385_v54, %v7342_v41 }
 0x60a   : > { %v6670_v52 = vpop.permute.xlu1 %6669 }
 0x60d   : > { %v7370_v7 = vpop.permute.xlu0 %7369 }
 0x60e   : > { %v6352_v32 = vpop.permute.xlu1 %6351 }
 0x611   : > { %v6646_v33 = vpop.permute.xlu0 %6645 }
 0x612   : > { %v6682_v17 = vpop.permute.xlu1 %6681  ;;  %v6697_v44 = vsel %vm4917_vm0, %v6695_v8, %v6646_v33 }
 0x613   : > { %v6699_v51 = vsel %vm4920_vm9, %v6697_v44, %v6650_v39  ;;  %v14030_v44 = vld [vmem:[#allocation52_spill] sm:$0xff] }
 0x614   : > { %v6701_v61 = vsel %vm4923_vm7, %v6699_v51, %v6654_v35  ;;  %v14025_v35 = vld [vmem:[#allocation68_spill] sm:$0xff] }
 0x615   : > { %v6328_v24 = vpop.permute.xlu0 %6327  ;;  %v6703_v38 = vsel %vm4926_vm5, %v6701_v61, %v6658_v22 }
 0x616   : > { %v6686_v14 = vpop.permute.xlu1 %6685  ;;  %v6379_v49 = vsel %vm4917_vm0, %v6377_v11, %v6328_v24  ;;  %v6705_v48 = vsel %vm4929_vm10, %v6703_v38, %v6662_v6 }
 0x617   : > { %v6381_v28 = vsel %vm4920_vm9, %v6379_v49, %v6332_v12  ;;  %v7733_v3 = vrot.slane %v6705_v48, 4  ;;  %v14038_v48 = vld [vmem:[#allocation59_spill] sm:$0xff] }
 0x618   : > { %v6383_v50 = vsel %vm4923_vm7, %v6381_v28, %v6336_v15  ;;  %v14034_v28 = vld [vmem:[#allocation22_spill] sm:$0xff] }
 0x619   : > { %v7358_v40 = vpop.permute.xlu0 %7357  ;;  %v6385_v20 = vsel %vm4926_vm5, %v6383_v50, %v6340_v13 }
 0x61a   : > { %v6364_v41 = vpop.permute.xlu1 %6363  ;;  %v7396_v39 = vsel %vm4917_vm0, %v7394_v31, %v7358_v40  ;;  %v14024_v31 = vld [vmem:[#allocation71_spill] sm:$0xff]  ;;  %v14035_v40 = vld [vmem:[#allocation12_spill] sm:$0xff] }
 0x61b   : > { %v7398_v60 = vsel %vm4920_vm9, %v7396_v39, %v13154_v58  ;;  %v14026_v22 = vpack.i.b16 %v14024_v31, %v14025_v35 }
 0x61d   : > { %v6344_v27 = vpop.permute.xlu0 %6343  ;;  %v6708_v6 = vsel %vm14027_vm8, %v14026_v22, %v6666_v45  ;;  %v14042_v22 = vpack.i.b16 %v12347_v10, %v12351_v46 }
 0x61e   : > { %v6356_v37 = vpop.permute.xlu1 %6355  ;;  %v6387_v26 = vsel %vm4929_vm10, %v6385_v20, %v6344_v27  ;;  %v6710_v21 = vsel %vm1050_vm1, %v6708_v6, %v6670_v52  ;;  %v7400_v52 = vsel %vm4923_vm7, %v7398_v60, %v13178_v63  ;;  %v14039_v20 = vld [vmem:[#allocation85_spill] sm:$0xff] }
 0x61f   : > { %v7752_v12 = vsel %vm14021_vm2, %v6387_v26, %v7733_v3  ;;  %v7402_v51 = vsel %vm4926_vm5, %v7400_v52, %v7370_v7  ;;  %v14033_v7 = vld [vmem:[#allocation39_spill] sm:$0xff] }
 0x621   : > { %v6348_v18 = vpop.permute.xlu0 %6347 }
 0x622   : > { %v6690_v43 = vpop.permute.xlu1 %6689  ;;  %v6390_v15 = vsel %vm14023_vm15, %v14022_v23, %v6348_v18 }
 0x623   : > { %v6392_v0 = vsel %vm1050_vm1, %v6390_v15, %v6352_v32 }
 0x624   : > { %v6394_v58 = vsel %vm4917_vm0, %v6392_v0, %v6356_v37 }
 0x625   : > { %v6368_v19 = vpop.permute.xlu0 %6367  ;;  %v6396_v53 = vsel %vm4920_vm9, %v6394_v58, %v6360_v25 }
 0x626   : > { %v6372_v9 = vpop.permute.xlu1 %6371  ;;  %v6398_v2 = vsel %vm4923_vm7, %v6396_v53, %v6364_v41  ;;  %v14036_v41 = vpack.i.b16 %v14034_v28, %v14035_v40 }
 0x627   : > { %v6400_v34 = vsel %vm4926_vm5, %v6398_v2, %v6368_v19  ;;  %v14044_v2 = vpack.i.b16 %v12536_v5, %v12541_v62 }
 0x628   : > { %v6402_v32 = vsel %vm4929_vm10, %v6400_v34, %v6372_v9  ;;  %v7059_v39 = vsel %vm14037_vm14, %v14036_v41, %v14033_v7 }
 0x629   : > { %v6674_v57 = vpop.permute.xlu0 %6673  ;;  %v7061_v60 = vsel %vm1050_vm1, %v7059_v39, %v14038_v48 }
 0x62a   : > { %v7020_v42 = vpop.permute.xlu1 %7019  ;;  %v6712_v47 = vsel %vm4917_vm0, %v6710_v21, %v6674_v57  ;;  %v7063_v27 = vsel %vm4917_vm0, %v7061_v60, %v14039_v20 }
 0x62b   : > { %v6714_v54 = vsel %vm4920_vm9, %v6712_v47, %v6678_v4  ;;  %v14029_v4 = vld [vmem:[#allocation37_spill] sm:$0xff] }
 0x62c   : > { %v6716_v13 = vsel %vm4923_vm7, %v6714_v54, %v6682_v17  ;;  %v7080_v17 = vsel %vm4920_vm9, %v14030_v44, %v14029_v4 }
 0x62d   : > { %v6718_v25 = vsel %vm4926_vm5, %v6716_v13, %v6686_v14  ;;  %v7374_v55 = vpop.permute.xlu0 %7373  ;;  %v7082_v63 = vsel %vm4923_vm7, %v7080_v17, %v14031_v59 }
 0x62e   : > { %v7346_v56 = vpop.permute.xlu1 %7345  ;;  %v6720_v45 = vsel %vm4929_vm10, %v6718_v25, %v6690_v43  ;;  %v7404_v16 = vsel %vm4929_vm10, %v7402_v51, %v7374_v55 }
 0x62f   : > { %v7734_v1 = vrot.slane %v6720_v45, 4  ;;  %v7738_v61 = vrot.slane %v7404_v16, 4  ;;  %v7389_v37 = vsel %vm4929_vm10, %v13190_v30, %v7346_v56 }
 0x630   : > { %v7737_v23 = vrot.slane %v7389_v37, 4 }
 0x631   : > { %v7052_v8 = vpop.permute.xlu0 %7051  ;;  %v7755_v33 = vsel %vm14028_vm11, %v6402_v32, %v7734_v1 }
 0x632   : > { %v7668_v29 = vpop.permute.xlu1 %7667  ;;  %7781 = vmatprep.subr.bf16.mxu0 %v7755_v33  ;;  %v7084_v11 = vsel %vm4926_vm5, %v7082_v63, %v7052_v8  ;;  %v7763_v8 = vld [vmem:[%s13310_s5] sm:$0xf] }
 0x633   : > { %7782 = vmatpush1.bf16.msra.mxu0 %v7752_v12  ;;  %v14040_v12 = vld [vmem:[#allocation74_spill] sm:$0xff] }
 0x634   : > { %v7065_v18 = vsel %vm4920_vm9, %v7063_v27, %v14040_v12 }
 0x635   : > { %v7640_v36 = vpop.permute.xlu0 %7639  ;;  %v7067_v43 = vsel %vm4923_vm7, %v7065_v18, %v7020_v42  ;;  %v7710_v42 = vsel %vm14020_vm3, %v14044_v2, %v7668_v29 }
 0x636   : > { %v7056_v24 = vpop.permute.xlu1 %7055  ;;  %v7695_v6 = vsel %vm14043_vm13, %v14042_v22, %v7640_v36 }
 0x637   : > { %v7086_v14 = vsel %vm4929_vm10, %v7084_v11, %v7056_v24 }
 0x638   : > { %v7761_v49 = vsel %vm14032_vm12, %v7086_v14, %v7738_v61 }
 0x639   : > { %7783 = vmatprep.subr.bf16.mxu0 %v7761_v49  ;;  %v7024_v38 = vpop.permute.xlu0 %7023 }
 0x63a   : > { %v7672_v50 = vpop.permute.xlu1 %7671  ;;  %v7069_v15 = vsel %vm4926_vm5, %v7067_v43, %v7024_v38 }
 0x63b   : > { %v7712_v54 = vsel %vm1050_vm1, %v7710_v42, %v7672_v50 }
 0x63d   : > { %v7644_v3 = vpop.permute.xlu0 %7643 }
 0x63e   : > { %v7648_v26 = vpop.permute.xlu1 %7647  ;;  %v7697_v21 = vsel %vm1050_vm1, %v7695_v6, %v7644_v3  ;;  %vm14045_vm1 = vmmov %vm14021_vm2 }
 0x63f   : > { %v7699_v47 = vsel %vm4917_vm0, %v7697_v21, %v7648_v26  ;;  %vm14046_vm2 = vmmov %vm14045_vm1 }
 0x641   : > { %v7028_v0 = vpop.permute.xlu0 %7027 }
 0x642   : > { %v7652_v58 = vpop.permute.xlu1 %7651  ;;  %v7071_v19 = vsel %vm4929_vm10, %v7069_v15, %v7028_v0 }
 0x643   : > { %v7758_v9 = vsel %vm14041_vm6, %v7071_v19, %v7737_v23  ;;  %v7701_v13 = vsel %vm4920_vm9, %v7699_v47, %v7652_v58 }
 0x644   : > { %7784 = vmatpush1.bf16.msra.mxu0 %v7758_v9 }
 0x645   : > { %v7676_v53 = vpop.permute.xlu0 %7675 }
 0x646   : > { %v7656_v31 = vpop.permute.xlu1 %7655  ;;  %v7714_v46 = vsel %vm4917_vm0, %v7712_v54, %v7676_v53 }
 0x647   : > { %v7703_v10 = vsel %vm4923_vm7, %v7701_v13, %v7656_v31 }
 0x649   : > { %v7680_v35 = vpop.permute.xlu0 %7679 }
 0x64a   : > { %v7660_v30 = vpop.permute.xlu1 %7659  ;;  %v7716_v56 = vsel %vm4920_vm9, %v7714_v46, %v7680_v35 }
 0x64b   : > { %v7705_v55 = vsel %vm4926_vm5, %v7703_v10, %v7660_v30 }
 0x64d   : > { %v7684_v57 = vpop.permute.xlu0 %7683 }
 0x64e   : > { %v7664_v34 = vpop.permute.xlu1 %7663  ;;  %v7718_v62 = vsel %vm4923_vm7, %v7716_v56, %v7684_v57 }
 0x64f   : > { %v7707_v5 = vsel %vm4929_vm10, %v7705_v55, %v7664_v34 }
 0x650   : > { %v7773_v32 = vsel %vm14046_vm2, %v7707_v5, 0 }
 0x651   : > { %v7688_v25 = vpop.permute.xlu0 %7687 }
 0x652   : > { %v7720_v45 = vsel %vm4926_vm5, %v7718_v62, %v7688_v25 }
 0x655   : > { %v7692_v52 = vpop.permute.xlu0 %7691 }
 0x656   : > { %v7722_v1 = vsel %vm4929_vm10, %v7720_v45, %v7692_v52 }
 0x657   : > { %8300 = vmatprep.subr.msk.bf16.mxu0 %vm14045_vm1, %v7722_v1 }
 0x658   : > { %7786 = vmatpush1.bf16.msra.mxu0 %v7773_v32 }
 0x65b   : > { %8301 = vmatmul.mubr.msk.bf16.vlgmr.msra.gmra.mrb[0].mxu0 %vm1014_vm4, %v7763_v8 }
 0x65f   : > { %v7768_v33 = vpop.permute.xlu1 %7767 }
 0x72e   : > { %v7811_v4 = vpop.f32.mrb[0].mxu0 }
 0x72f   : > { %v7812_v44 = vadd.f32 %v7811_v4, %v7768_v33  ;;  %v7813_v17 = vpop.f32.mrb[1].mxu0 }
 0x730   : > { %v7814_v51 = vadd.f32 %v7813_v17, %v7768_v33  ;;  %v7815_v29 = vpop.f32.mrb[2].mxu0 }
 0x731   : > { %v7818_v16 = vmax.f32 %v7812_v44, 0.0  ;;  %v7816_v59 = vpop.f32.mrb[3].mxu0 }
 0x732   : > { %v7819_v63 = vmax.f32 %v7814_v51, 0.0 }
 0x733   : > { %7820 = vst [vmem:[%s488_s19] sm:$0xff] %v7818_v16 }
 0x734   : > { %7821 = vst [vmem:[%s488_s19 + $0x8] sm:$0xff] %v7819_v63 }
 0x735 PF: > { %s17_s2 = sadd.s32 1, %s8486_s2   ;;  %s14047_s24 = smov %s8482_s1 }
 0x736   : > { %p14_p6 = scmp.ge.s32.totalorder %s17_s2, 4   ;;  %s14048_s1 = smov %s14050_s25 }
 0x738   :  { %16 = sbr.rel (!%p14_p6) target bundleno = 2 (0x2), region = 186 }

</bundles_post_ra>
